<compile_context>
chip_gen: v6e
topology: v6e:2x2x1
jax: 0.10.0
libtpu: 0.0.40
codegen_flags: <defaults>
</compile_context>

<pallas_src>
import functools

import jax
import jax.numpy as jnp
from jax.experimental import pallas as pl
from jax.experimental.pallas import tpu as pltpu

LRELU_SLOPE = 0.2
BN_EPS = 1e-5
LANE = 128
MAX_TCO = 256           # Cout tile; also the parallel axis that feeds v7x's 2nd core


def _round_up(x, m):
    return (x + m - 1) // m * m


def _vmem_limit_bytes():
    """128 MiB chips (v5e/v6e) -> 64 MiB scoped budget, 64 MiB chips (v7x) -> 32 MiB."""
    try:
        cap = int(pltpu.get_tpu_info().vmem_capacity_bytes)
        return int(min(96 * 2 ** 20, max(32 * 2 ** 20, cap // 2)))
    except Exception:
        return 32 * 2 ** 20


VMEM_LIMIT = _vmem_limit_bytes()


def _cparams(sem):
    return pltpu.CompilerParams(dimension_semantics=sem, vmem_limit_bytes=VMEM_LIMIT)


# ----------------------------- Pallas kernels -------------------------------- #
def _conv_accum(z_ref, w_ref, *, oh, ow, c4):
    """Fused im2col + matmul for a 2x2/stride-1 conv over the space-to-depth slab.

    z_ref block: (1, oh+1, ow+1, c4) bf16  (one image's slab, resident in VMEM)
    w_ref block: (4*c4, tco)         bf16  (rows ordered (kih, kjh, hp, wp, ci))
    returns (oh*ow, tco) f32 accumulator.
    """
    acc = None
    for t, (kih, kjh) in enumerate(((0, 0), (0, 1), (1, 0), (1, 1))):
        p = z_ref[0, kih:kih + oh, kjh:kjh + ow, :].reshape(oh * ow, c4)
        part = jnp.dot(p, w_ref[t * c4:(t + 1) * c4, :],
                       preferred_element_type=jnp.float32)
        acc = part if acc is None else acc + part
    return acc


def _conv_act_kernel(z_ref, w_ref, b_ref, y_ref, *, oh, ow, c4, act):
    """conv (4x4, stride 2, pad 1) + bias + activation, one image x one Cout tile."""
    y = _conv_accum(z_ref, w_ref, oh=oh, ow=ow, c4=c4) + b_ref[...]
    if act == "leaky_relu":
        y = jnp.where(y >= 0, y, LRELU_SLOPE * y)
    elif act == "sigmoid":
        y = jax.nn.sigmoid(y)
    y_ref[0] = y.astype(y_ref.dtype)


def _conv_stats_kernel(z_ref, w_ref, y_ref, s_ref, *, oh, ow, c4):
    """conv (no bias: it cancels in the BN mean subtraction) + per-tile channel stats."""
    y = _conv_accum(z_ref, w_ref, oh=oh, ow=ow, c4=c4)
    y_ref[0] = y.astype(y_ref.dtype)
    s_ref[0, 0:1, :] = jnp.sum(y, axis=0, keepdims=True)
    s_ref[0, 1:2, :] = jnp.sum(y * y, axis=0, keepdims=True)


def _dense_act_kernel(p_ref, w_ref, b_ref, o_ref, *, act):
    y = jnp.dot(p_ref[...], w_ref[...], preferred_element_type=jnp.float32) + b_ref[...]
    if act == "leaky_relu":
        y = jnp.where(y >= 0, y, LRELU_SLOPE * y)
    elif act == "sigmoid":
        y = jax.nn.sigmoid(y)
    o_ref[...] = y.astype(o_ref.dtype)


# ----------------------------- kernel wrappers -------------------------------- #
def conv4x4s2(z, w2, bias=None, *, oh, ow, act=None, with_stats=False,
              out_dtype=jnp.bfloat16):
    """One 4x4/stride-2/pad-1 conv layer.

    z  : (N, oh+1, ow+1, 4*Cin) space-to-depth input slab (bf16).
    w2 : (16*Cin, Cpad) repacked weight, Cout padded to a 128-lane multiple (bf16).
    Grid = (Cout tiles, images); both axes independent ("parallel").
    """
    n, hh, wh, c4 = z.shape
    k16, cpad = w2.shape
    m = oh * ow
    tco = min(cpad, MAX_TCO)
    n_co = cpad // tco
    grid = (n_co, n)

    cost = pl.CostEstimate(
        flops=2 * n * m * k16 * cpad,
        transcendentals=n * m * cpad if act == "sigmoid" else 0,
        bytes_accessed=(z.size * 2 + w2.size * 2 + n * m * cpad * 2
                        + (n * 2 * cpad * 4 if with_stats else 0)),
    )

    in_specs = [
        # per-image slab; index ignores the inner image?no: it follows the image axis.
        pl.BlockSpec((1, hh, wh, c4), lambda j, i: (i, 0, 0, 0)),
        # weight tile streamed once per Cout tile (images are the inner grid axis).
        pl.BlockSpec((k16, tco), lambda j, i: (0, j)),
    ]
    args = [z, w2]
    if with_stats:
        kernel = functools.partial(_conv_stats_kernel, oh=oh, ow=ow, c4=c4)
        out_shape = (jax.ShapeDtypeStruct((n, m, cpad), out_dtype),
                     jax.ShapeDtypeStruct((n, 2, cpad), jnp.float32))
        out_specs = (pl.BlockSpec((1, m, tco), lambda j, i: (i, 0, j)),
                     pl.BlockSpec((1, 2, tco), lambda j, i: (i, 0, j)))
    else:
        kernel = functools.partial(_conv_act_kernel, oh=oh, ow=ow, c4=c4, act=act)
        in_specs.append(pl.BlockSpec((1, tco), lambda j, i: (0, j)))
        args.append(bias)
        out_shape = jax.ShapeDtypeStruct((n, m, cpad), out_dtype)
        out_specs = pl.BlockSpec((1, m, tco), lambda j, i: (i, 0, j))

    return pl.pallas_call(
        kernel,
        out_shape=out_shape,
        grid_spec=pltpu.PrefetchScalarGridSpec(
            num_scalar_prefetch=0, grid=grid,
            in_specs=in_specs, out_specs=out_specs),
        compiler_params=_cparams(("parallel", "parallel")),
        cost_estimate=cost,
    )(*args)


def dense_act(p, w2, bias, *, act, out_dtype):
    """conv5: 4x4 valid conv on a 4x4 map == dense matmul; whole K in one block."""
    n, k = p.shape
    cpad = w2.shape[1]
    tco = min(cpad, MAX_TCO)
    return pl.pallas_call(
        functools.partial(_dense_act_kernel, act=act),
        out_shape=jax.ShapeDtypeStruct((n, cpad), out_dtype),
        grid_spec=pltpu.PrefetchScalarGridSpec(
            num_scalar_prefetch=0, grid=(cpad // tco,),
            in_specs=[pl.BlockSpec((n, k), lambda j: (0, 0)),
                      pl.BlockSpec((k, tco), lambda j: (0, j)),
                      pl.BlockSpec((1, tco), lambda j: (0, j))],
            out_specs=pl.BlockSpec((n, tco), lambda j: (0, j))),
        compiler_params=_cparams(("parallel",)),
        cost_estimate=pl.CostEstimate(
            flops=2 * n * k * cpad,
            transcendentals=n * cpad if act == "sigmoid" else 0,
            bytes_accessed=p.size * 2 + w2.size * 2 + n * cpad * 4),
    )(p, w2, bias)


# ------------------------------- JAX glue ----------------------------------- #
def _space_to_depth_pad1(a):
    """Zero-pad H/W by 1 and fold the 2x2 stride phase into channels (bf16).

    (N, H, W, C) -> (N, H//2+1, W//2+1, 4*C), channel order (hp, wp, ci).  A 4x4 /
    stride-2 / pad-1 conv on `a` is exactly a 2x2/stride-1 conv on the result, so the
    Pallas kernel can build its im2col patches from unit-stride VMEM slices.  The
    previous BN scale/shift + LeakyReLU are folded into this same fused XLA pass.
    """
    n, h, w, c = a.shape
    xp = jnp.pad(a, ((0, 0), (1, 1), (1, 1), (0, 0)))
    z = xp.reshape(n, h // 2 + 1, 2, w // 2 + 1, 2, c)
    z = jnp.transpose(z, (0, 1, 3, 2, 4, 5)).reshape(n, h // 2 + 1, w // 2 + 1, 4 * c)
    return z.astype(jnp.bfloat16)


def _prep_w_s2d(w):
    """(Cout, Cin, 4, 4) -> (16*Cin, Cpad) bf16, rows ordered (kih, kjh, hp, wp, ci)."""
    co, ci = w.shape[0], w.shape[1]
    cpad = _round_up(max(co, LANE), LANE)
    w2 = jnp.transpose(w, (2, 3, 1, 0))                 # (ki, kj, ci, co)
    w2 = w2.reshape(2, 2, 2, 2, ci, co)                 # (kih, hp, kjh, wp, ci, co)
    w2 = jnp.transpose(w2, (0, 2, 1, 3, 4, 5)).reshape(16 * ci, co)
    return jnp.pad(w2, ((0, 0), (0, cpad - co))).astype(jnp.bfloat16), cpad


def _prep_w_dense(w):
    """(Cout, Cin, kh, kw) -> (kh*kw*Cin, Cpad) bf16, rows ordered (kh, kw, ci)."""
    co, ci, kh, kw = w.shape
    cpad = _round_up(max(co, LANE), LANE)
    w2 = jnp.transpose(w, (2, 3, 1, 0)).reshape(kh * kw * ci, co)
    return jnp.pad(w2, ((0, 0), (0, cpad - co))).astype(jnp.bfloat16), cpad


def cnn_discriminator_forward(x_nchw, params):
    """Forward pass identical to CNNDiscriminator.forward (training-mode BatchNorm)."""
    x = jnp.transpose(x_nchw, (0, 2, 3, 1))             # NCHW -> NHWC
    n = x.shape[0]

    def stride2_layer(a, w, bias, with_stats):
        co = w.shape[0]
        oh, ow = a.shape[1] // 2, a.shape[2] // 2
        z = _space_to_depth_pad1(a)
        w2, cpad = _prep_w_s2d(w)
        if with_stats:
            y, stats = conv4x4s2(z, w2, oh=oh, ow=ow, with_stats=True)
            return y, stats, oh, ow, co
        bpad = jnp.pad(bias, (0, cpad - co)).reshape(1, cpad).astype(jnp.float32)
        y = conv4x4s2(z, w2, bpad, oh=oh, ow=ow, act="leaky_relu")
        return y[:, :, :co].reshape(n, oh, ow, co)

    # conv1: conv + bias + LeakyReLU (no BN) fully fused in one kernel.
    w, b, _, _ = params["conv1"]
    a = stride2_layer(x, w, b, with_stats=False)

    # conv2..conv4: conv + per-tile channel stats in one kernel; the BatchNorm
    # scale/shift + LeakyReLU are applied inside the next layer's s2d prep pass.
    for name in ("conv2", "conv3", "conv4"):
        w, _, gamma, beta = params[name]
        y, stats, oh, ow, co = stride2_layer(a, w, None, with_stats=True)
        m_total = n * oh * ow
        tot = jnp.sum(stats, axis=0)[:, :co]             # (2, co) f32
        mean = tot[0] / m_total
        # One-pass variance; clamp >= 0 against catastrophic cancellation.
        var = jnp.maximum(tot[1] / m_total - mean * mean, 0.0)
        scale = gamma * jax.lax.rsqrt(var + BN_EPS)
        shift = beta - mean * scale
        yn = y[:, :, :co].astype(jnp.float32) * scale + shift
        a = jnp.where(yn >= 0, yn, LRELU_SLOPE * yn).reshape(n, oh, ow, co)

    # conv5: 4x4 valid conv on the 4x4 map == dense matmul + bias + sigmoid.
    w, b, _, _ = params["conv5"]
    w2, cpad = _prep_w_dense(w)
    p = a.reshape(n, -1).astype(jnp.bfloat16)            # flatten (h, w, ci)
    bpad = jnp.pad(b, (0, cpad - w.shape[0])).reshape(1, cpad).astype(jnp.float32)
    out = dense_act(p, w2, bpad, act="sigmoid", out_dtype=jnp.float32)
    return out[:, :w.shape[0]].reshape(n, 1, 1, 1)       # (N, 1, 1, 1)


# --------------------------- parameter init --------------------------------- #
def init_params(key, d):
    """Synthetic init (the module's weight_init only touches nn.Linear -> no-op here)."""
    layer_io = {
        "conv1": (d, 1),
        "conv2": (2 * d, d),
        "conv3": (4 * d, 2 * d),
        "conv4": (8 * d, 4 * d),
        "conv5": (1, 8 * d),
    }
    params = {}
    for i, (name, (cout, cin)) in enumerate(layer_io.items()):
        kw = jax.random.fold_in(key, i)
        w = 0.02 * jax.random.normal(kw, (cout, cin, 4, 4), jnp.float32)
        b = jnp.zeros((cout,), jnp.float32)
        gamma = jnp.ones((cout,), jnp.float32)
        beta = jnp.zeros((cout,), jnp.float32)
        params[name] = (w, b, gamma, beta)
    return params


# --------------------------- pure-JAX reference ------------------------------ #
def reference_forward(x_nchw, params):
    def conv(x, w, b, stride, pad):
        y = jax.lax.conv_general_dilated(
            x, w, (stride, stride), [(pad, pad), (pad, pad)],
            dimension_numbers=("NCHW", "OIHW", "NCHW"),
            preferred_element_type=jnp.float32)
        return y + b[None, :, None, None]

    def bn(y, g, be):
        mean = jnp.mean(y, axis=(0, 2, 3), keepdims=True)
        var = jnp.mean(jnp.square(y - mean), axis=(0, 2, 3), keepdims=True)
        yn = (y - mean) * jax.lax.rsqrt(var + BN_EPS)
        return yn * g[None, :, None, None] + be[None, :, None, None]

    def lrelu(y):
        return jnp.where(y >= 0, y, LRELU_SLOPE * y)

    w, b, _, _ = params["conv1"]
    x = lrelu(conv(x_nchw, w, b, 2, 1))
    for name in ("conv2", "conv3", "conv4"):
        w, b, g, be = params[name]
        x = lrelu(bn(conv(x, w, b, 2, 1), g, be))
    w, b, _, _ = params["conv5"]
    return jax.nn.sigmoid(conv(x, w, b, 1, 0))


# ------------------------------------ main ----------------------------------- #
if __name__ == "__main__":
    key = jax.random.PRNGKey(0)
    d = 8  # shrunk from the module's default d=128 so the example stays small/fast
    params = init_params(jax.random.fold_in(key, 100), d)

    # DCGAN discriminator expects 64x64 single-channel images (so conv5 sees 4x4).
    x = jax.random.normal(key, (2, 1, 64, 64), jnp.float32)

    fwd = jax.jit(lambda inp: cnn_discriminator_forward(inp, params))
    out = jax.block_until_ready(fwd(x))

    assert out.shape == (2, 1, 1, 1), out.shape
    ref = jax.block_until_ready(reference_forward(x, params))
    assert jnp.allclose(out, ref, atol=5e-2, rtol=5e-2), (out, ref)

    print("KERNEL_OK")
</pallas_src>

<mosaic_0001>
module attributes {stable_mosaic.version = 11 : i64} {
  func.func @_conv_act_kernel(%arg0: i32, %arg1: i32, %arg2: memref<1x33x33x4xbf16, #tpu.memory_space<vmem>>, %arg3: memref<16x128xbf16, #tpu.memory_space<vmem>>, %arg4: memref<1x128xf32, #tpu.memory_space<vmem>>, %arg5: memref<1x1024x128xbf16, #tpu.memory_space<vmem>>) attributes {dimension_semantics = [#tpu.dimension_semantics<parallel>, #tpu.dimension_semantics<parallel>], iteration_bounds = array<i64: 1, 2>, scalar_prefetch = 0 : i64, scratch_operands = 0 : i64, tpu.core_type = #tpu.core_type<tc>, window_params = [{transform_indices = @transform_0, window_bounds = array<i64: 1, 33, 33, 4>}, {transform_indices = @transform_1, window_bounds = array<i64: 16, 128>}, {transform_indices = @transform_2, window_bounds = array<i64: 1, 128>}, {transform_indices = @transform_3, window_bounds = array<i64: 1, 1024, 128>}]} {
    %c0 = arith.constant 0 : index
    %c0_0 = arith.constant 0 : index
    %c0_1 = arith.constant 0 : index
    %c0_2 = arith.constant 0 : index
    %0 = vector.load %arg2[%c0, %c0_0, %c0_1, %c0_2] : memref<1x33x33x4xbf16, #tpu.memory_space<vmem>>, vector<1x32x32x4xbf16>
    %1 = vector.shape_cast %0 : vector<1x32x32x4xbf16> to vector<32x32x4xbf16>
    %2 = vector.shape_cast %1 : vector<32x32x4xbf16> to vector<1024x4xbf16>
    %c0_3 = arith.constant 0 : index
    %c0_4 = arith.constant 0 : index
    %3 = vector.load %arg3[%c0_3, %c0_4] : memref<16x128xbf16, #tpu.memory_space<vmem>>, vector<4x128xbf16>
    %cst = arith.constant dense<0.000000e+00> : vector<1024x128xf32>
    %4 = tpu.matmul %2, %3, %cst {dimension_numbers = #tpu.dot_dimension_numbers<[1], [0], [0], [1], [0, 0, 1, 1], [], []>} : vector<1024x4xbf16>, vector<4x128xbf16>, vector<1024x128xf32> -> vector<1024x128xf32>
    %c0_5 = arith.constant 0 : index
    %c0_6 = arith.constant 0 : index
    %c1 = arith.constant 1 : index
    %c0_7 = arith.constant 0 : index
    %5 = vector.load %arg2[%c0_5, %c0_6, %c1, %c0_7] : memref<1x33x33x4xbf16, #tpu.memory_space<vmem>>, vector<1x32x32x4xbf16>
    %6 = vector.shape_cast %5 : vector<1x32x32x4xbf16> to vector<32x32x4xbf16>
    %7 = vector.shape_cast %6 : vector<32x32x4xbf16> to vector<1024x4xbf16>
    %c4 = arith.constant 4 : index
    %c0_8 = arith.constant 0 : index
    %8 = vector.load %arg3[%c4, %c0_8] : memref<16x128xbf16, #tpu.memory_space<vmem>>, vector<4x128xbf16>
    %cst_9 = arith.constant dense<0.000000e+00> : vector<1024x128xf32>
    %9 = tpu.matmul %7, %8, %cst_9 {dimension_numbers = #tpu.dot_dimension_numbers<[1], [0], [0], [1], [0, 0, 1, 1], [], []>} : vector<1024x4xbf16>, vector<4x128xbf16>, vector<1024x128xf32> -> vector<1024x128xf32>
    %10 = arith.addf %4, %9 : vector<1024x128xf32>
    %c0_10 = arith.constant 0 : index
    %c1_11 = arith.constant 1 : index
    %c0_12 = arith.constant 0 : index
    %c0_13 = arith.constant 0 : index
    %11 = vector.load %arg2[%c0_10, %c1_11, %c0_12, %c0_13] : memref<1x33x33x4xbf16, #tpu.memory_space<vmem>>, vector<1x32x32x4xbf16>
    %12 = vector.shape_cast %11 : vector<1x32x32x4xbf16> to vector<32x32x4xbf16>
    %13 = vector.shape_cast %12 : vector<32x32x4xbf16> to vector<1024x4xbf16>
    %c8 = arith.constant 8 : index
    %c0_14 = arith.constant 0 : index
    %14 = vector.load %arg3[%c8, %c0_14] : memref<16x128xbf16, #tpu.memory_space<vmem>>, vector<4x128xbf16>
    %cst_15 = arith.constant dense<0.000000e+00> : vector<1024x128xf32>
    %15 = tpu.matmul %13, %14, %cst_15 {dimension_numbers = #tpu.dot_dimension_numbers<[1], [0], [0], [1], [0, 0, 1, 1], [], []>} : vector<1024x4xbf16>, vector<4x128xbf16>, vector<1024x128xf32> -> vector<1024x128xf32>
    %16 = arith.addf %10, %15 : vector<1024x128xf32>
    %c0_16 = arith.constant 0 : index
    %c1_17 = arith.constant 1 : index
    %c1_18 = arith.constant 1 : index
    %c0_19 = arith.constant 0 : index
    %17 = vector.load %arg2[%c0_16, %c1_17, %c1_18, %c0_19] : memref<1x33x33x4xbf16, #tpu.memory_space<vmem>>, vector<1x32x32x4xbf16>
    %18 = vector.shape_cast %17 : vector<1x32x32x4xbf16> to vector<32x32x4xbf16>
    %19 = vector.shape_cast %18 : vector<32x32x4xbf16> to vector<1024x4xbf16>
    %c12 = arith.constant 12 : index
    %c0_20 = arith.constant 0 : index
    %20 = vector.load %arg3[%c12, %c0_20] : memref<16x128xbf16, #tpu.memory_space<vmem>>, vector<4x128xbf16>
    %cst_21 = arith.constant dense<0.000000e+00> : vector<1024x128xf32>
    %21 = tpu.matmul %19, %20, %cst_21 {dimension_numbers = #tpu.dot_dimension_numbers<[1], [0], [0], [1], [0, 0, 1, 1], [], []>} : vector<1024x4xbf16>, vector<4x128xbf16>, vector<1024x128xf32> -> vector<1024x128xf32>
    %22 = arith.addf %16, %21 : vector<1024x128xf32>
    %c0_22 = arith.constant 0 : index
    %c0_23 = arith.constant 0 : index
    %23 = vector.load %arg4[%c0_22, %c0_23] : memref<1x128xf32, #tpu.memory_space<vmem>>, vector<1x128xf32>
    %24 = vector.broadcast %23 : vector<1x128xf32> to vector<1024x128xf32>
    %25 = arith.addf %22, %24 : vector<1024x128xf32>
    %cst_24 = arith.constant 0.000000e+00 : f32
    %26 = vector.broadcast %cst_24 : f32 to vector<1024x128xf32>
    %27 = arith.cmpf oge, %25, %26 : vector<1024x128xf32>
    %cst_25 = arith.constant 2.000000e-01 : f32
    %28 = vector.broadcast %cst_25 : f32 to vector<1024x128xf32>
    %29 = arith.mulf %28, %25 : vector<1024x128xf32>
    %30 = arith.select %27, %25, %29 : vector<1024x128xi1>, vector<1024x128xf32>
    %31 = arith.truncf %30 : vector<1024x128xf32> to vector<1024x128xbf16>
    %c0_26 = arith.constant 0 : index
    %c0_27 = arith.constant 0 : index
    %c0_28 = arith.constant 0 : index
    %32 = vector.load %arg5[%c0_26, %c0_27, %c0_28] : memref<1x1024x128xbf16, #tpu.memory_space<vmem>>, vector<1x1024x128xbf16>
    %33 = vector.shape_cast %32 : vector<1x1024x128xbf16> to vector<1024x128xbf16>
    %34 = vector.shape_cast %31 : vector<1024x128xbf16> to vector<1x1024x128xbf16>
    tpu.vector_store %arg5[%c0_26, %c0_27, %c0_28], %34 {strides = array<i32>} : memref<1x1024x128xbf16, #tpu.memory_space<vmem>>, vector<1x1024x128xbf16>,
    return
  }
  func.func @transform_0(%arg0: i32, %arg1: i32) -> (i32, i32, i32, i32) {
    %c0_i32 = arith.constant 0 : i32
    %c0_i32_0 = arith.constant 0 : i32
    %c0_i32_1 = arith.constant 0 : i32
    %c0_i32_2 = arith.constant 0 : i32
    return %arg1, %c0_i32, %c0_i32_0, %c0_i32_1 : i32, i32, i32, i32
  }
  func.func @transform_1(%arg0: i32, %arg1: i32) -> (i32, i32) {
    %c0_i32 = arith.constant 0 : i32
    %c0_i32_0 = arith.constant 0 : i32
    return %c0_i32, %arg0 : i32, i32
  }
  func.func @transform_2(%arg0: i32, %arg1: i32) -> (i32, i32) {
    %c0_i32 = arith.constant 0 : i32
    %c0_i32_0 = arith.constant 0 : i32
    return %c0_i32, %arg0 : i32, i32
  }
  func.func @transform_3(%arg0: i32, %arg1: i32) -> (i32, i32, i32) {
    %c0_i32 = arith.constant 0 : i32
    %c0_i32_0 = arith.constant 0 : i32
    return %arg1, %c0_i32, %arg0 : i32, i32, i32
  }
}

module attributes {stable_mosaic.version = 11 : i64} {
  func.func @_conv_stats_kernel(%arg0: i32, %arg1: i32, %arg2: memref<1x17x17x32xbf16, #tpu.memory_space<vmem>>, %arg3: memref<128x128xbf16, #tpu.memory_space<vmem>>, %arg4: memref<1x256x128xbf16, #tpu.memory_space<vmem>>, %arg5: memref<1x2x128xf32, #tpu.memory_space<vmem>>) attributes {dimension_semantics = [#tpu.dimension_semantics<parallel>, #tpu.dimension_semantics<parallel>], iteration_bounds = array<i64: 1, 2>, scalar_prefetch = 0 : i64, scratch_operands = 0 : i64, tpu.core_type = #tpu.core_type<tc>, window_params = [{transform_indices = @transform_0, window_bounds = array<i64: 1, 17, 17, 32>}, {transform_indices = @transform_1, window_bounds = array<i64: 128, 128>}, {transform_indices = @transform_2, window_bounds = array<i64: 1, 256, 128>}, {transform_indices = @transform_3, window_bounds = array<i64: 1, 2, 128>}]} {
    %c0 = arith.constant 0 : index
    %c0_0 = arith.constant 0 : index
    %c0_1 = arith.constant 0 : index
    %c0_2 = arith.constant 0 : index
    %0 = vector.load %arg2[%c0, %c0_0, %c0_1, %c0_2] : memref<1x17x17x32xbf16, #tpu.memory_space<vmem>>, vector<1x16x16x32xbf16>
    %1 = vector.shape_cast %0 : vector<1x16x16x32xbf16> to vector<16x16x32xbf16>
    %2 = vector.shape_cast %1 : vector<16x16x32xbf16> to vector<256x32xbf16>
    %c0_3 = arith.constant 0 : index
    %c0_4 = arith.constant 0 : index
    %3 = vector.load %arg3[%c0_3, %c0_4] : memref<128x128xbf16, #tpu.memory_space<vmem>>, vector<32x128xbf16>
    %cst = arith.constant dense<0.000000e+00> : vector<256x128xf32>
    %4 = tpu.matmul %2, %3, %cst {dimension_numbers = #tpu.dot_dimension_numbers<[1], [0], [0], [1], [0, 0, 1, 1], [], []>} : vector<256x32xbf16>, vector<32x128xbf16>, vector<256x128xf32> -> vector<256x128xf32>
    %c0_5 = arith.constant 0 : index
    %c0_6 = arith.constant 0 : index
    %c1 = arith.constant 1 : index
    %c0_7 = arith.constant 0 : index
    %5 = vector.load %arg2[%c0_5, %c0_6, %c1, %c0_7] : memref<1x17x17x32xbf16, #tpu.memory_space<vmem>>, vector<1x16x16x32xbf16>
    %6 = vector.shape_cast %5 : vector<1x16x16x32xbf16> to vector<16x16x32xbf16>
    %7 = vector.shape_cast %6 : vector<16x16x32xbf16> to vector<256x32xbf16>
    %c32 = arith.constant 32 : index
    %c0_8 = arith.constant 0 : index
    %8 = vector.load %arg3[%c32, %c0_8] : memref<128x128xbf16, #tpu.memory_space<vmem>>, vector<32x128xbf16>
    %cst_9 = arith.constant dense<0.000000e+00> : vector<256x128xf32>
    %9 = tpu.matmul %7, %8, %cst_9 {dimension_numbers = #tpu.dot_dimension_numbers<[1], [0], [0], [1], [0, 0, 1, 1], [], []>} : vector<256x32xbf16>, vector<32x128xbf16>, vector<256x128xf32> -> vector<256x128xf32>
    %10 = arith.addf %4, %9 : vector<256x128xf32>
    %c0_10 = arith.constant 0 : index
    %c1_11 = arith.constant 1 : index
    %c0_12 = arith.constant 0 : index
    %c0_13 = arith.constant 0 : index
    %11 = vector.load %arg2[%c0_10, %c1_11, %c0_12, %c0_13] : memref<1x17x17x32xbf16, #tpu.memory_space<vmem>>, vector<1x16x16x32xbf16>
    %12 = vector.shape_cast %11 : vector<1x16x16x32xbf16> to vector<16x16x32xbf16>
    %13 = vector.shape_cast %12 : vector<16x16x32xbf16> to vector<256x32xbf16>
    %c64 = arith.constant 64 : index
    %c0_14 = arith.constant 0 : index
    %14 = vector.load %arg3[%c64, %c0_14] : memref<128x128xbf16, #tpu.memory_space<vmem>>, vector<32x128xbf16>
    %cst_15 = arith.constant dense<0.000000e+00> : vector<256x128xf32>
    %15 = tpu.matmul %13, %14, %cst_15 {dimension_numbers = #tpu.dot_dimension_numbers<[1], [0], [0], [1], [0, 0, 1, 1], [], []>} : vector<256x32xbf16>, vector<32x128xbf16>, vector<256x128xf32> -> vector<256x128xf32>
    %16 = arith.addf %10, %15 : vector<256x128xf32>
    %c0_16 = arith.constant 0 : index
    %c1_17 = arith.constant 1 : index
    %c1_18 = arith.constant 1 : index
    %c0_19 = arith.constant 0 : index
    %17 = vector.load %arg2[%c0_16, %c1_17, %c1_18, %c0_19] : memref<1x17x17x32xbf16, #tpu.memory_space<vmem>>, vector<1x16x16x32xbf16>
    %18 = vector.shape_cast %17 : vector<1x16x16x32xbf16> to vector<16x16x32xbf16>
    %19 = vector.shape_cast %18 : vector<16x16x32xbf16> to vector<256x32xbf16>
    %c96 = arith.constant 96 : index
    %c0_20 = arith.constant 0 : index
    %20 = vector.load %arg3[%c96, %c0_20] : memref<128x128xbf16, #tpu.memory_space<vmem>>, vector<32x128xbf16>
    %cst_21 = arith.constant dense<0.000000e+00> : vector<256x128xf32>
    %21 = tpu.matmul %19, %20, %cst_21 {dimension_numbers = #tpu.dot_dimension_numbers<[1], [0], [0], [1], [0, 0, 1, 1], [], []>} : vector<256x32xbf16>, vector<32x128xbf16>, vector<256x128xf32> -> vector<256x128xf32>
    %22 = arith.addf %16, %21 : vector<256x128xf32>
    %23 = arith.truncf %22 : vector<256x128xf32> to vector<256x128xbf16>
    %c0_22 = arith.constant 0 : index
    %c0_23 = arith.constant 0 : index
    %c0_24 = arith.constant 0 : index
    %24 = vector.load %arg4[%c0_22, %c0_23, %c0_24] : memref<1x256x128xbf16, #tpu.memory_space<vmem>>, vector<1x256x128xbf16>
    %25 = vector.shape_cast %24 : vector<1x256x128xbf16> to vector<256x128xbf16>
    %26 = vector.shape_cast %23 : vector<256x128xbf16> to vector<1x256x128xbf16>
    tpu.vector_store %arg4[%c0_22, %c0_23, %c0_24], %26 {strides = array<i32>} : memref<1x256x128xbf16, #tpu.memory_space<vmem>>, vector<1x256x128xbf16>,
    %cst_25 = arith.constant dense<0.000000e+00> : vector<128xf32>
    %27 = vector.multi_reduction <add>, %22, %cst_25 [0] : vector<256x128xf32> to vector<128xf32>
    %28 = vector.shape_cast %27 : vector<128xf32> to vector<1x128xf32>
    %c0_26 = arith.constant 0 : index
    %c0_27 = arith.constant 0 : index
    %c0_28 = arith.constant 0 : index
    %29 = vector.load %arg5[%c0_26, %c0_27, %c0_28] : memref<1x2x128xf32, #tpu.memory_space<vmem>>, vector<1x1x128xf32>
    %30 = vector.shape_cast %29 : vector<1x1x128xf32> to vector<1x128xf32>
    %31 = vector.shape_cast %28 : vector<1x128xf32> to vector<1x1x128xf32>
    tpu.vector_store %arg5[%c0_26, %c0_27, %c0_28], %31 {strides = array<i32>} : memref<1x2x128xf32, #tpu.memory_space<vmem>>, vector<1x1x128xf32>,
    %32 = arith.mulf %22, %22 : vector<256x128xf32>
    %cst_29 = arith.constant dense<0.000000e+00> : vector<128xf32>
    %33 = vector.multi_reduction <add>, %32, %cst_29 [0] : vector<256x128xf32> to vector<128xf32>
    %34 = vector.shape_cast %33 : vector<128xf32> to vector<1x128xf32>
    %c0_30 = arith.constant 0 : index
    %c1_31 = arith.constant 1 : index
    %c0_32 = arith.constant 0 : index
    %35 = vector.load %arg5[%c0_30, %c1_31, %c0_32] : memref<1x2x128xf32, #tpu.memory_space<vmem>>, vector<1x1x128xf32>
    %36 = vector.shape_cast %35 : vector<1x1x128xf32> to vector<1x128xf32>
    %37 = vector.shape_cast %34 : vector<1x128xf32> to vector<1x1x128xf32>
    tpu.vector_store %arg5[%c0_30, %c1_31, %c0_32], %37 {strides = array<i32>} : memref<1x2x128xf32, #tpu.memory_space<vmem>>, vector<1x1x128xf32>,
    return
  }
  func.func @transform_0(%arg0: i32, %arg1: i32) -> (i32, i32, i32, i32) {
    %c0_i32 = arith.constant 0 : i32
    %c0_i32_0 = arith.constant 0 : i32
    %c0_i32_1 = arith.constant 0 : i32
    %c0_i32_2 = arith.constant 0 : i32
    return %arg1, %c0_i32, %c0_i32_0, %c0_i32_1 : i32, i32, i32, i32
  }
  func.func @transform_1(%arg0: i32, %arg1: i32) -> (i32, i32) {
    %c0_i32 = arith.constant 0 : i32
    %c0_i32_0 = arith.constant 0 : i32
    return %c0_i32, %arg0 : i32, i32
  }
  func.func @transform_2(%arg0: i32, %arg1: i32) -> (i32, i32, i32) {
    %c0_i32 = arith.constant 0 : i32
    %c0_i32_0 = arith.constant 0 : i32
    return %arg1, %c0_i32, %arg0 : i32, i32, i32
  }
  func.func @transform_3(%arg0: i32, %arg1: i32) -> (i32, i32, i32) {
    %c0_i32 = arith.constant 0 : i32
    %c0_i32_0 = arith.constant 0 : i32
    return %arg1, %c0_i32, %arg0 : i32, i32, i32
  }
}

module attributes {stable_mosaic.version = 11 : i64} {
  func.func @_conv_stats_kernel(%arg0: i32, %arg1: i32, %arg2: memref<1x9x9x64xbf16, #tpu.memory_space<vmem>>, %arg3: memref<256x128xbf16, #tpu.memory_space<vmem>>, %arg4: memref<1x64x128xbf16, #tpu.memory_space<vmem>>, %arg5: memref<1x2x128xf32, #tpu.memory_space<vmem>>) attributes {dimension_semantics = [#tpu.dimension_semantics<parallel>, #tpu.dimension_semantics<parallel>], iteration_bounds = array<i64: 1, 2>, scalar_prefetch = 0 : i64, scratch_operands = 0 : i64, tpu.core_type = #tpu.core_type<tc>, window_params = [{transform_indices = @transform_0, window_bounds = array<i64: 1, 9, 9, 64>}, {transform_indices = @transform_1, window_bounds = array<i64: 256, 128>}, {transform_indices = @transform_2, window_bounds = array<i64: 1, 64, 128>}, {transform_indices = @transform_3, window_bounds = array<i64: 1, 2, 128>}]} {
    %c0 = arith.constant 0 : index
    %c0_0 = arith.constant 0 : index
    %c0_1 = arith.constant 0 : index
    %c0_2 = arith.constant 0 : index
    %0 = vector.load %arg2[%c0, %c0_0, %c0_1, %c0_2] : memref<1x9x9x64xbf16, #tpu.memory_space<vmem>>, vector<1x8x8x64xbf16>
    %1 = vector.shape_cast %0 : vector<1x8x8x64xbf16> to vector<8x8x64xbf16>
    %2 = vector.shape_cast %1 : vector<8x8x64xbf16> to vector<64x64xbf16>
    %c0_3 = arith.constant 0 : index
    %c0_4 = arith.constant 0 : index
    %3 = vector.load %arg3[%c0_3, %c0_4] : memref<256x128xbf16, #tpu.memory_space<vmem>>, vector<64x128xbf16>
    %cst = arith.constant dense<0.000000e+00> : vector<64x128xf32>
    %4 = tpu.matmul %2, %3, %cst {dimension_numbers = #tpu.dot_dimension_numbers<[1], [0], [0], [1], [0, 0, 1, 1], [], []>} : vector<64x64xbf16>, vector<64x128xbf16>, vector<64x128xf32> -> vector<64x128xf32>
    %c0_5 = arith.constant 0 : index
    %c0_6 = arith.constant 0 : index
    %c1 = arith.constant 1 : index
    %c0_7 = arith.constant 0 : index
    %5 = vector.load %arg2[%c0_5, %c0_6, %c1, %c0_7] : memref<1x9x9x64xbf16, #tpu.memory_space<vmem>>, vector<1x8x8x64xbf16>
    %6 = vector.shape_cast %5 : vector<1x8x8x64xbf16> to vector<8x8x64xbf16>
    %7 = vector.shape_cast %6 : vector<8x8x64xbf16> to vector<64x64xbf16>
    %c64 = arith.constant 64 : index
    %c0_8 = arith.constant 0 : index
    %8 = vector.load %arg3[%c64, %c0_8] : memref<256x128xbf16, #tpu.memory_space<vmem>>, vector<64x128xbf16>
    %cst_9 = arith.constant dense<0.000000e+00> : vector<64x128xf32>
    %9 = tpu.matmul %7, %8, %cst_9 {dimension_numbers = #tpu.dot_dimension_numbers<[1], [0], [0], [1], [0, 0, 1, 1], [], []>} : vector<64x64xbf16>, vector<64x128xbf16>, vector<64x128xf32> -> vector<64x128xf32>
    %10 = arith.addf %4, %9 : vector<64x128xf32>
    %c0_10 = arith.constant 0 : index
    %c1_11 = arith.constant 1 : index
    %c0_12 = arith.constant 0 : index
    %c0_13 = arith.constant 0 : index
    %11 = vector.load %arg2[%c0_10, %c1_11, %c0_12, %c0_13] : memref<1x9x9x64xbf16, #tpu.memory_space<vmem>>, vector<1x8x8x64xbf16>
    %12 = vector.shape_cast %11 : vector<1x8x8x64xbf16> to vector<8x8x64xbf16>
    %13 = vector.shape_cast %12 : vector<8x8x64xbf16> to vector<64x64xbf16>
    %c128 = arith.constant 128 : index
    %c0_14 = arith.constant 0 : index
    %14 = vector.load %arg3[%c128, %c0_14] : memref<256x128xbf16, #tpu.memory_space<vmem>>, vector<64x128xbf16>
    %cst_15 = arith.constant dense<0.000000e+00> : vector<64x128xf32>
    %15 = tpu.matmul %13, %14, %cst_15 {dimension_numbers = #tpu.dot_dimension_numbers<[1], [0], [0], [1], [0, 0, 1, 1], [], []>} : vector<64x64xbf16>, vector<64x128xbf16>, vector<64x128xf32> -> vector<64x128xf32>
    %16 = arith.addf %10, %15 : vector<64x128xf32>
    %c0_16 = arith.constant 0 : index
    %c1_17 = arith.constant 1 : index
    %c1_18 = arith.constant 1 : index
    %c0_19 = arith.constant 0 : index
    %17 = vector.load %arg2[%c0_16, %c1_17, %c1_18, %c0_19] : memref<1x9x9x64xbf16, #tpu.memory_space<vmem>>, vector<1x8x8x64xbf16>
    %18 = vector.shape_cast %17 : vector<1x8x8x64xbf16> to vector<8x8x64xbf16>
    %19 = vector.shape_cast %18 : vector<8x8x64xbf16> to vector<64x64xbf16>
    %c192 = arith.constant 192 : index
    %c0_20 = arith.constant 0 : index
    %20 = vector.load %arg3[%c192, %c0_20] : memref<256x128xbf16, #tpu.memory_space<vmem>>, vector<64x128xbf16>
    %cst_21 = arith.constant dense<0.000000e+00> : vector<64x128xf32>
    %21 = tpu.matmul %19, %20, %cst_21 {dimension_numbers = #tpu.dot_dimension_numbers<[1], [0], [0], [1], [0, 0, 1, 1], [], []>} : vector<64x64xbf16>, vector<64x128xbf16>, vector<64x128xf32> -> vector<64x128xf32>
    %22 = arith.addf %16, %21 : vector<64x128xf32>
    %23 = arith.truncf %22 : vector<64x128xf32> to vector<64x128xbf16>
    %c0_22 = arith.constant 0 : index
    %c0_23 = arith.constant 0 : index
    %c0_24 = arith.constant 0 : index
    %24 = vector.load %arg4[%c0_22, %c0_23, %c0_24] : memref<1x64x128xbf16, #tpu.memory_space<vmem>>, vector<1x64x128xbf16>
    %25 = vector.shape_cast %24 : vector<1x64x128xbf16> to vector<64x128xbf16>
    %26 = vector.shape_cast %23 : vector<64x128xbf16> to vector<1x64x128xbf16>
    tpu.vector_store %arg4[%c0_22, %c0_23, %c0_24], %26 {strides = array<i32>} : memref<1x64x128xbf16, #tpu.memory_space<vmem>>, vector<1x64x128xbf16>,
    %cst_25 = arith.constant dense<0.000000e+00> : vector<128xf32>
    %27 = vector.multi_reduction <add>, %22, %cst_25 [0] : vector<64x128xf32> to vector<128xf32>
    %28 = vector.shape_cast %27 : vector<128xf32> to vector<1x128xf32>
    %c0_26 = arith.constant 0 : index
    %c0_27 = arith.constant 0 : index
    %c0_28 = arith.constant 0 : index
    %29 = vector.load %arg5[%c0_26, %c0_27, %c0_28] : memref<1x2x128xf32, #tpu.memory_space<vmem>>, vector<1x1x128xf32>
    %30 = vector.shape_cast %29 : vector<1x1x128xf32> to vector<1x128xf32>
    %31 = vector.shape_cast %28 : vector<1x128xf32> to vector<1x1x128xf32>
    tpu.vector_store %arg5[%c0_26, %c0_27, %c0_28], %31 {strides = array<i32>} : memref<1x2x128xf32, #tpu.memory_space<vmem>>, vector<1x1x128xf32>,
    %32 = arith.mulf %22, %22 : vector<64x128xf32>
    %cst_29 = arith.constant dense<0.000000e+00> : vector<128xf32>
    %33 = vector.multi_reduction <add>, %32, %cst_29 [0] : vector<64x128xf32> to vector<128xf32>
    %34 = vector.shape_cast %33 : vector<128xf32> to vector<1x128xf32>
    %c0_30 = arith.constant 0 : index
    %c1_31 = arith.constant 1 : index
    %c0_32 = arith.constant 0 : index
    %35 = vector.load %arg5[%c0_30, %c1_31, %c0_32] : memref<1x2x128xf32, #tpu.memory_space<vmem>>, vector<1x1x128xf32>
    %36 = vector.shape_cast %35 : vector<1x1x128xf32> to vector<1x128xf32>
    %37 = vector.shape_cast %34 : vector<1x128xf32> to vector<1x1x128xf32>
    tpu.vector_store %arg5[%c0_30, %c1_31, %c0_32], %37 {strides = array<i32>} : memref<1x2x128xf32, #tpu.memory_space<vmem>>, vector<1x1x128xf32>,
    return
  }
  func.func @transform_0(%arg0: i32, %arg1: i32) -> (i32, i32, i32, i32) {
    %c0_i32 = arith.constant 0 : i32
    %c0_i32_0 = arith.constant 0 : i32
    %c0_i32_1 = arith.constant 0 : i32
    %c0_i32_2 = arith.constant 0 : i32
    return %arg1, %c0_i32, %c0_i32_0, %c0_i32_1 : i32, i32, i32, i32
  }
  func.func @transform_1(%arg0: i32, %arg1: i32) -> (i32, i32) {
    %c0_i32 = arith.constant 0 : i32
    %c0_i32_0 = arith.constant 0 : i32
    return %c0_i32, %arg0 : i32, i32
  }
  func.func @transform_2(%arg0: i32, %arg1: i32) -> (i32, i32, i32) {
    %c0_i32 = arith.constant 0 : i32
    %c0_i32_0 = arith.constant 0 : i32
    return %arg1, %c0_i32, %arg0 : i32, i32, i32
  }
  func.func @transform_3(%arg0: i32, %arg1: i32) -> (i32, i32, i32) {
    %c0_i32 = arith.constant 0 : i32
    %c0_i32_0 = arith.constant 0 : i32
    return %arg1, %c0_i32, %arg0 : i32, i32, i32
  }
}

module attributes {stable_mosaic.version = 11 : i64} {
  func.func @_conv_stats_kernel(%arg0: i32, %arg1: i32, %arg2: memref<1x5x5x128xbf16, #tpu.memory_space<vmem>>, %arg3: memref<512x128xbf16, #tpu.memory_space<vmem>>, %arg4: memref<1x16x128xbf16, #tpu.memory_space<vmem>>, %arg5: memref<1x2x128xf32, #tpu.memory_space<vmem>>) attributes {dimension_semantics = [#tpu.dimension_semantics<parallel>, #tpu.dimension_semantics<parallel>], iteration_bounds = array<i64: 1, 2>, scalar_prefetch = 0 : i64, scratch_operands = 0 : i64, tpu.core_type = #tpu.core_type<tc>, window_params = [{transform_indices = @transform_0, window_bounds = array<i64: 1, 5, 5, 128>}, {transform_indices = @transform_1, window_bounds = array<i64: 512, 128>}, {transform_indices = @transform_2, window_bounds = array<i64: 1, 16, 128>}, {transform_indices = @transform_3, window_bounds = array<i64: 1, 2, 128>}]} {
    %c0 = arith.constant 0 : index
    %c0_0 = arith.constant 0 : index
    %c0_1 = arith.constant 0 : index
    %c0_2 = arith.constant 0 : index
    %0 = vector.load %arg2[%c0, %c0_0, %c0_1, %c0_2] : memref<1x5x5x128xbf16, #tpu.memory_space<vmem>>, vector<1x4x4x128xbf16>
    %1 = vector.shape_cast %0 : vector<1x4x4x128xbf16> to vector<4x4x128xbf16>
    %2 = vector.shape_cast %1 : vector<4x4x128xbf16> to vector<16x128xbf16>
    %c0_3 = arith.constant 0 : index
    %c0_4 = arith.constant 0 : index
    %3 = vector.load %arg3[%c0_3, %c0_4] : memref<512x128xbf16, #tpu.memory_space<vmem>>, vector<128x128xbf16>
    %cst = arith.constant dense<0.000000e+00> : vector<16x128xf32>
    %4 = tpu.matmul %2, %3, %cst {dimension_numbers = #tpu.dot_dimension_numbers<[1], [0], [0], [1], [0, 0, 1, 1], [], []>} : vector<16x128xbf16>, vector<128x128xbf16>, vector<16x128xf32> -> vector<16x128xf32>
    %c0_5 = arith.constant 0 : index
    %c0_6 = arith.constant 0 : index
    %c1 = arith.constant 1 : index
    %c0_7 = arith.constant 0 : index
    %5 = vector.load %arg2[%c0_5, %c0_6, %c1, %c0_7] : memref<1x5x5x128xbf16, #tpu.memory_space<vmem>>, vector<1x4x4x128xbf16>
    %6 = vector.shape_cast %5 : vector<1x4x4x128xbf16> to vector<4x4x128xbf16>
    %7 = vector.shape_cast %6 : vector<4x4x128xbf16> to vector<16x128xbf16>
    %c128 = arith.constant 128 : index
    %c0_8 = arith.constant 0 : index
    %8 = vector.load %arg3[%c128, %c0_8] : memref<512x128xbf16, #tpu.memory_space<vmem>>, vector<128x128xbf16>
    %cst_9 = arith.constant dense<0.000000e+00> : vector<16x128xf32>
    %9 = tpu.matmul %7, %8, %cst_9 {dimension_numbers = #tpu.dot_dimension_numbers<[1], [0], [0], [1], [0, 0, 1, 1], [], []>} : vector<16x128xbf16>, vector<128x128xbf16>, vector<16x128xf32> -> vector<16x128xf32>
    %10 = arith.addf %4, %9 : vector<16x128xf32>
    %c0_10 = arith.constant 0 : index
    %c1_11 = arith.constant 1 : index
    %c0_12 = arith.constant 0 : index
    %c0_13 = arith.constant 0 : index
    %11 = vector.load %arg2[%c0_10, %c1_11, %c0_12, %c0_13] : memref<1x5x5x128xbf16, #tpu.memory_space<vmem>>, vector<1x4x4x128xbf16>
    %12 = vector.shape_cast %11 : vector<1x4x4x128xbf16> to vector<4x4x128xbf16>
    %13 = vector.shape_cast %12 : vector<4x4x128xbf16> to vector<16x128xbf16>
    %c256 = arith.constant 256 : index
    %c0_14 = arith.constant 0 : index
    %14 = vector.load %arg3[%c256, %c0_14] : memref<512x128xbf16, #tpu.memory_space<vmem>>, vector<128x128xbf16>
    %cst_15 = arith.constant dense<0.000000e+00> : vector<16x128xf32>
    %15 = tpu.matmul %13, %14, %cst_15 {dimension_numbers = #tpu.dot_dimension_numbers<[1], [0], [0], [1], [0, 0, 1, 1], [], []>} : vector<16x128xbf16>, vector<128x128xbf16>, vector<16x128xf32> -> vector<16x128xf32>
    %16 = arith.addf %10, %15 : vector<16x128xf32>
    %c0_16 = arith.constant 0 : index
    %c1_17 = arith.constant 1 : index
    %c1_18 = arith.constant 1 : index
    %c0_19 = arith.constant 0 : index
    %17 = vector.load %arg2[%c0_16, %c1_17, %c1_18, %c0_19] : memref<1x5x5x128xbf16, #tpu.memory_space<vmem>>, vector<1x4x4x128xbf16>
    %18 = vector.shape_cast %17 : vector<1x4x4x128xbf16> to vector<4x4x128xbf16>
    %19 = vector.shape_cast %18 : vector<4x4x128xbf16> to vector<16x128xbf16>
    %c384 = arith.constant 384 : index
    %c0_20 = arith.constant 0 : index
    %20 = vector.load %arg3[%c384, %c0_20] : memref<512x128xbf16, #tpu.memory_space<vmem>>, vector<128x128xbf16>
    %cst_21 = arith.constant dense<0.000000e+00> : vector<16x128xf32>
    %21 = tpu.matmul %19, %20, %cst_21 {dimension_numbers = #tpu.dot_dimension_numbers<[1], [0], [0], [1], [0, 0, 1, 1], [], []>} : vector<16x128xbf16>, vector<128x128xbf16>, vector<16x128xf32> -> vector<16x128xf32>
    %22 = arith.addf %16, %21 : vector<16x128xf32>
    %23 = arith.truncf %22 : vector<16x128xf32> to vector<16x128xbf16>
    %c0_22 = arith.constant 0 : index
    %c0_23 = arith.constant 0 : index
    %c0_24 = arith.constant 0 : index
    %24 = vector.load %arg4[%c0_22, %c0_23, %c0_24] : memref<1x16x128xbf16, #tpu.memory_space<vmem>>, vector<1x16x128xbf16>
    %25 = vector.shape_cast %24 : vector<1x16x128xbf16> to vector<16x128xbf16>
    %26 = vector.shape_cast %23 : vector<16x128xbf16> to vector<1x16x128xbf16>
    tpu.vector_store %arg4[%c0_22, %c0_23, %c0_24], %26 {strides = array<i32>} : memref<1x16x128xbf16, #tpu.memory_space<vmem>>, vector<1x16x128xbf16>,
    %cst_25 = arith.constant dense<0.000000e+00> : vector<128xf32>
    %27 = vector.multi_reduction <add>, %22, %cst_25 [0] : vector<16x128xf32> to vector<128xf32>
    %28 = vector.shape_cast %27 : vector<128xf32> to vector<1x128xf32>
    %c0_26 = arith.constant 0 : index
    %c0_27 = arith.constant 0 : index
    %c0_28 = arith.constant 0 : index
    %29 = vector.load %arg5[%c0_26, %c0_27, %c0_28] : memref<1x2x128xf32, #tpu.memory_space<vmem>>, vector<1x1x128xf32>
    %30 = vector.shape_cast %29 : vector<1x1x128xf32> to vector<1x128xf32>
    %31 = vector.shape_cast %28 : vector<1x128xf32> to vector<1x1x128xf32>
    tpu.vector_store %arg5[%c0_26, %c0_27, %c0_28], %31 {strides = array<i32>} : memref<1x2x128xf32, #tpu.memory_space<vmem>>, vector<1x1x128xf32>,
    %32 = arith.mulf %22, %22 : vector<16x128xf32>
    %cst_29 = arith.constant dense<0.000000e+00> : vector<128xf32>
    %33 = vector.multi_reduction <add>, %32, %cst_29 [0] : vector<16x128xf32> to vector<128xf32>
    %34 = vector.shape_cast %33 : vector<128xf32> to vector<1x128xf32>
    %c0_30 = arith.constant 0 : index
    %c1_31 = arith.constant 1 : index
    %c0_32 = arith.constant 0 : index
    %35 = vector.load %arg5[%c0_30, %c1_31, %c0_32] : memref<1x2x128xf32, #tpu.memory_space<vmem>>, vector<1x1x128xf32>
    %36 = vector.shape_cast %35 : vector<1x1x128xf32> to vector<1x128xf32>
    %37 = vector.shape_cast %34 : vector<1x128xf32> to vector<1x1x128xf32>
    tpu.vector_store %arg5[%c0_30, %c1_31, %c0_32], %37 {strides = array<i32>} : memref<1x2x128xf32, #tpu.memory_space<vmem>>, vector<1x1x128xf32>,
    return
  }
  func.func @transform_0(%arg0: i32, %arg1: i32) -> (i32, i32, i32, i32) {
    %c0_i32 = arith.constant 0 : i32
    %c0_i32_0 = arith.constant 0 : i32
    %c0_i32_1 = arith.constant 0 : i32
    %c0_i32_2 = arith.constant 0 : i32
    return %arg1, %c0_i32, %c0_i32_0, %c0_i32_1 : i32, i32, i32, i32
  }
  func.func @transform_1(%arg0: i32, %arg1: i32) -> (i32, i32) {
    %c0_i32 = arith.constant 0 : i32
    %c0_i32_0 = arith.constant 0 : i32
    return %c0_i32, %arg0 : i32, i32
  }
  func.func @transform_2(%arg0: i32, %arg1: i32) -> (i32, i32, i32) {
    %c0_i32 = arith.constant 0 : i32
    %c0_i32_0 = arith.constant 0 : i32
    return %arg1, %c0_i32, %arg0 : i32, i32, i32
  }
  func.func @transform_3(%arg0: i32, %arg1: i32) -> (i32, i32, i32) {
    %c0_i32 = arith.constant 0 : i32
    %c0_i32_0 = arith.constant 0 : i32
    return %arg1, %c0_i32, %arg0 : i32, i32, i32
  }
}

module attributes {stable_mosaic.version = 11 : i64} {
  func.func @_dense_act_kernel(%arg0: i32, %arg1: memref<2x1024xbf16, #tpu.memory_space<vmem>>, %arg2: memref<1024x128xbf16, #tpu.memory_space<vmem>>, %arg3: memref<1x128xf32, #tpu.memory_space<vmem>>, %arg4: memref<2x128xf32, #tpu.memory_space<vmem>>) attributes {dimension_semantics = [#tpu.dimension_semantics<parallel>], iteration_bounds = array<i64: 1>, scalar_prefetch = 0 : i64, scratch_operands = 0 : i64, tpu.core_type = #tpu.core_type<tc>, window_params = [{pipeline_mode = #tpu.pipeline_mode<synchronous>, transform_indices = @transform_0, window_bounds = array<i64: 2, 1024>}, {transform_indices = @transform_1, window_bounds = array<i64: 1024, 128>}, {transform_indices = @transform_2, window_bounds = array<i64: 1, 128>}, {transform_indices = @transform_3, window_bounds = array<i64: 2, 128>}]} {
    %c0 = arith.constant 0 : index
    %c0_0 = arith.constant 0 : index
    %0 = vector.load %arg1[%c0, %c0_0] : memref<2x1024xbf16, #tpu.memory_space<vmem>>, vector<2x1024xbf16>
    %c0_1 = arith.constant 0 : index
    %c0_2 = arith.constant 0 : index
    %1 = vector.load %arg2[%c0_1, %c0_2] : memref<1024x128xbf16, #tpu.memory_space<vmem>>, vector<1024x128xbf16>
    %cst = arith.constant dense<0.000000e+00> : vector<2x128xf32>
    %2 = tpu.matmul %0, %1, %cst {dimension_numbers = #tpu.dot_dimension_numbers<[1], [0], [0], [1], [0, 0, 1, 1], [], []>} : vector<2x1024xbf16>, vector<1024x128xbf16>, vector<2x128xf32> -> vector<2x128xf32>
    %c0_3 = arith.constant 0 : index
    %c0_4 = arith.constant 0 : index
    %3 = vector.load %arg3[%c0_3, %c0_4] : memref<1x128xf32, #tpu.memory_space<vmem>>, vector<1x128xf32>
    %4 = vector.broadcast %3 : vector<1x128xf32> to vector<2x128xf32>
    %5 = arith.addf %2, %4 : vector<2x128xf32>
    %6 = arith.negf %5 : vector<2x128xf32>
    %7 = math.exp %6 : vector<2x128xf32>
    %cst_5 = arith.constant 1.000000e+00 : f32
    %8 = vector.broadcast %cst_5 : f32 to vector<2x128xf32>
    %9 = arith.addf %8, %7 : vector<2x128xf32>
    %10 = arith.divf %8, %9 : vector<2x128xf32>
    %c0_6 = arith.constant 0 : index
    %c0_7 = arith.constant 0 : index
    %11 = vector.load %arg4[%c0_6, %c0_7] : memref<2x128xf32, #tpu.memory_space<vmem>>, vector<2x128xf32>
    tpu.vector_store %arg4[%c0_6, %c0_7], %10 {strides = array<i32>} : memref<2x128xf32, #tpu.memory_space<vmem>>, vector<2x128xf32>,
    return
  }
  func.func @transform_0(%arg0: i32) -> (i32, i32) {
    %c0_i32 = arith.constant 0 : i32
    %c0_i32_0 = arith.constant 0 : i32
    %c0_i32_1 = arith.constant 0 : i32
    return %c0_i32, %c0_i32_0 : i32, i32
  }
  func.func @transform_1(%arg0: i32) -> (i32, i32) {
    %c0_i32 = arith.constant 0 : i32
    %c0_i32_0 = arith.constant 0 : i32
    return %c0_i32, %arg0 : i32, i32
  }
  func.func @transform_2(%arg0: i32) -> (i32, i32) {
    %c0_i32 = arith.constant 0 : i32
    %c0_i32_0 = arith.constant 0 : i32
    return %c0_i32, %arg0 : i32, i32
  }
  func.func @transform_3(%arg0: i32) -> (i32, i32) {
    %c0_i32 = arith.constant 0 : i32
    %c0_i32_0 = arith.constant 0 : i32
    return %c0_i32, %arg0 : i32, i32
  }
}

</mosaic_0001>

<bundles_post_ra>
// kernel: _lambda_.5
= control target key start
LH: loop header
LB: loop body
LE: loop exit
PB: predicated region body
PF: predicated region fallthrough
CT: control target
= control target key end

     0   :  { %s11449_s12 = smov 0   ;;  %s11451_s13 = smov 0   ;;  %s14564_s0 = inlined_call_operand.vmem [shape: bf16[2,33,33,4], index: 0, kind: input, shape index: {}]   ;;  %s14565_s1 = inlined_call_operand.vmem [shape: bf16[16,128], index: 1, kind: input, shape index: {}]   ;;  %s14566_s2 = inlined_call_operand.vmem [shape: f32[1,128], index: 2, kind: input, shape index: {}]   ;;  %s14567_s3 = inlined_call_operand.vmem [shape: bf16[2,1024,128], index: 3, kind: output, shape index: {}]  }
   0x1   :  { %s11453_s14 = smov 0  }
   0x2 LB: > { %s22_s15 = sadd.s32 1, %s11423_s13  ;;  %p9015_p0 = scmp.ge.s32.totalorder %s11427_s14, 1  ;;  %s11427_s14 = sphi %s11453_s14, %s13_s14   ;;  %s11423_s13 = sphi %s11451_s13, %s14849_s13   ;;  %s11419_s12 = sphi %s11449_s12, %s14848_s12  }
   0x3   : > { %p23_p1 = scmp.ge.s32.totalorder %s22_s15, 2  ;;  %p168_p2 = scmp.lt.s32.totalorder %s11427_s14, 3 }
   0x5   : > { %s14851_s15 = smov (%p23_p1, %s22_s15), 0  ;;  %p169_p3 = pnand %p9015_p0, %p168_p2 }
   0x7   : > { %172 = sbr.rel (%p169_p3) target bundleno = 837 (0x345), region = 32 }
   0xc   : > { %v351_v0 = vld [vmem:[%s14565_s1] sm:$0x3]  ;;  %vm2185_vm0 = vcmask 1041408   ;;  %p202_p4 = scmp.lt.s32.totalorder %s11419_s12, 1  ;;  %v3923_v4 = vld [vmem:[%s14565_s1 + $0x4] sm:$0x3] }
   0xd   : > { %11245 = vmatprep.subr.msk.bf16.mxu1 %vm2185_vm0, %v351_v0  ;;  %v3247_v1 = vsel %vm2185_vm0, %v351_v0, 0  ;;  %v11273_v2 = vld [vmem:[%s14565_s1] ss:$0 sps:$4 sm:$0xcc]   ;;  %vm1992_vm1 = vcmask 31744   ;;  %v11492_v7 = vsel %vm2185_vm0, %v3923_v4, 0 }
   0xe   : > { %10855 = vmatpush3.bf16.msra.mxu1 %v3247_v1  ;;  %s14853_s12 = smov (!%p202_p4, %s11419_s12), 1  ;;  %v1991_v3 = vrot.slane %v11273_v2, 2  ;;  %v11276_v5 = vld [vmem:[%s14565_s1 + $0x4] ss:$0 sps:$4 sm:$0xcc]  }
   0xf   : > { %s11248_s22 = smul.u32 660, %s14853_s12  ;;  %vm384_vm2 = vsmask.f32 3328  ;;  %vm385_vm3 = vsmask.f32 7440  ;;  %v6876_v8 = vrot.slane %v11276_v5, 2 }
  0x10   : > { %11244 = vmatprep.subr.msk.bf16.mxu0 %vm2185_vm0, %v1991_v3  ;;  %v2187_v6 = vsel %vm2185_vm0, %v1991_v3, 0  ;;  %vm11508_vm4 = vmor %vm384_vm2, %vm385_vm3  ;;  %s9952_s30 = sshll.u32 %s14853_s12, 9 }
  0x11   : > { %s11489_s27 = scalar_lea.vmem %s14564_s0, %s11248_s22  ;;  %10725 = vmatpush3.bf16.msra.mxu0 %v2187_v6  ;;  %11247 = vmatprep.subr.msk.bf16.mxu1 %vm2185_vm0, %v6876_v8  ;;  %v7070_v34 = vsel %vm2185_vm0, %v6876_v8, 0  ;;  %s13566_s6 = scalar_lea.vmem %s14567_s3, %s9952_s30 }
  0x12   : > { %v223_v9 = vld [vmem:[%s11489_s27] sm:$0xf]  ;;  %v224_v10 = vld [vmem:[%s11489_s27 + $0x4] sm:$0xf]  ;;  %v225_v11 = vld [vmem:[%s11489_s27 + $0x8] sm:$0xf]  ;;  %11246 = vmatprep.subr.msk.bf16.mxu0 %vm2185_vm0, %v3923_v4 }
  0x13   : > { %v388_v12 = vshrl.u32 %v223_v9, 16  ;;  %v391_v13 = vshll.u32 %v223_v9, 16  ;;  %v397_v14 = vshll.u32 %v224_v10, 16  ;;  %v401_v15 = vshrl.u32 %v224_v10, 16  ;;  %v226_v16 = vld [vmem:[%s11489_s27 + $0xc] sm:$0xf] }
  0x14   : > { %v9148_v17 = vcombine.low %v223_v9, %v224_v10  ;;  %v417_v18 = vshll.u32 %v226_v16, 16  ;;  %v421_v19 = vshrl.u32 %v226_v16, 16  ;;  %v9149_v20 = vcombine.low %v225_v11, %v226_v16  ;;  %v352_v21 = vld [vmem:[%s11489_s27 + $0x10] sm:$0x1]  ;;  %v227_v26 = vld [vmem:[%s11489_s27 + $0x14] sm:$0xf] }
  0x15   : > { %v390_v22 = vrot.slane %v388_v12, 4  ;;  %v393_v23 = vrot.slane %v391_v13, 5  ;;  %v399_v24 = vrot.slane %v397_v14, 5  ;;  %v403_v25 = vrot.slane %v401_v15, 4  ;;  %v228_v35 = vld [vmem:[%s11489_s27 + $0x18] sm:$0xf] }
  0x16   : > { %10856 = vmatprep.mubr.msk.bf16.mxu1 %vm1992_vm1, %v9148_v17  ;;  %v419_v27 = vrot.slane %v417_v18, 5  ;;  %v423_v28 = vrot.slane %v421_v19, 4  ;;  %v407_v29 = vshll.u32 %v225_v11, 16  ;;  %v411_v30 = vshrl.u32 %v225_v11, 16  ;;  %v229_v49 = vld [vmem:[%s11489_s27 + $0x1c] sm:$0xf] }
  0x17   : > { %10857 = vmatmul.mubr.msk.bf16.vlgmr.msra.gmra.mxu1 %vm1992_vm1, %v9149_v20  ;;  %v394_v31 = vor.u32 %v393_v23, %v390_v22  ;;  %v404_v32 = vor.u32 %v403_v25, %v399_v24  ;;  %v427_v33 = vshll.u32 %v352_v21, 16  ;;  %v432_v40 = vshrl.u32 %v227_v26, 16  ;;  %v230_v54 = vld [vmem:[%s11489_s27 + $0x20] sm:$0xf]  ;;  %v353_v63 = vld [vmem:[%s11489_s27 + $0x24] sm:$0x1] }
  0x18   : > { %v409_v37 = vrot.slane %v407_v29, 5  ;;  %v413_v38 = vrot.slane %v411_v30, 4  ;;  %v424_v39 = vor.u32 %v423_v28, %v419_v27  ;;  %11115 = vmatpush3.bf16.msra.mxu1 %v7070_v34  ;;  %v435_v44 = vshll.u32 %v227_v26, 16  ;;  %v231_v4 = vld [vmem:[%s11489_s27 + $0x28] sm:$0xf] }
  0x19   : > { %v395_v41 = vrot.slane %v394_v31, 4  ;;  %v405_v42 = vrot.slane %v404_v32, 4  ;;  %v429_v43 = vrot.slane %v427_v33, 5  ;;  %v434_v47 = vrot.slane %v432_v40, 4  ;;  %v232_v10 = vld [vmem:[%s11489_s27 + $0x2c] sm:$0xf] }
  0x1a   : > { %v414_v45 = vor.u32 %v413_v38, %v409_v37  ;;  %v425_v46 = vrot.slane %v424_v39, 4  ;;  %v441_v48 = vshll.u32 %v228_v35, 16  ;;  %v437_v52 = vrot.slane %v435_v44, 5  ;;  %v233_v23 = vld [vmem:[%s11489_s27 + $0x30] sm:$0xf] }
  0x1b   : > { %v400_v50 = vsel %vm11508_vm4, %v395_v41, %v399_v24  ;;  %v410_v51 = vsel %vm11508_vm4, %v405_v42, %v409_v37  ;;  %v445_v53 = vshrl.u32 %v228_v35, 16  ;;  %v9150_v60 = vcombine.low %v227_v26, %v228_v35  ;;  %v234_v28 = vld [vmem:[%s11489_s27 + $0x34] sm:$0xf]  ;;  %v354_v37 = vld [vmem:[%s11489_s27 + $0x38] sm:$0x1] }
  0x1c   : > { %v415_v55 = vrot.slane %v414_v45, 4  ;;  %v9019_v56 = vcombine.low %v400_v50, %v410_v51  ;;  %v430_v57 = vsel %vm11508_vm4, %v425_v46, %v429_v43  ;;  %v443_v58 = vrot.slane %v441_v48, 5  ;;  %v235_v42 = vld [vmem:[%s11489_s27 + $0x3c] sm:$0xf] }
  0x1d   : > { %v447_v59 = vrot.slane %v445_v53, 4  ;;  %v451_v61 = vshll.u32 %v229_v49, 16  ;;  %v455_v62 = vshrl.u32 %v229_v49, 16  ;;  %v461_v1 = vshll.u32 %v230_v54, 16  ;;  %10860 = vmatprep.mubr.msk.bf16.mxu1 %vm1992_vm1, %v9150_v60  ;;  %v237_v60 = vld [vmem:[%s11489_s27 + $0x44] sm:$0xf] }
  0x1e   : > { %10726 = vmatprep.mubr.msk.bf16.mxu0 %vm1992_vm1, %v9019_v56  ;;  %v420_v0 = vsel %vm11508_vm4, %v415_v55, %v419_v27  ;;  %v465_v2 = vshrl.u32 %v230_v54, 16  ;;  %v9151_v3 = vcombine.low %v229_v49, %v230_v54  ;;  %v438_v9 = vor.u32 %v437_v52, %v434_v47  ;;  %v236_v47 = vld [vmem:[%s11489_s27 + $0x40] sm:$0xf] }
  0x1f   : > { %v9020_v5 = vcombine.low %v420_v0, %v430_v57  ;;  %v453_v6 = vrot.slane %v451_v61, 5  ;;  %v457_v8 = vrot.slane %v455_v62, 4  ;;  %v463_v11 = vrot.slane %v461_v1, 5  ;;  %v238_v1 = vld [vmem:[%s11489_s27 + $0x48] sm:$0xf] }
  0x20   : > { %v467_v12 = vrot.slane %v465_v2, 4  ;;  %10861 = vmatmul.mubr.msk.bf16.gmra.mxu1 %vm1992_vm1, %v9151_v3  ;;  %v448_v13 = vor.u32 %v447_v59, %v443_v58  ;;  %v471_v14 = vshll.u32 %v353_v63, 16  ;;  %v439_v15 = vrot.slane %v438_v9, 4 }
  0x21   : > { %10727 = vmatmul.mubr.msk.bf16.vlgmr.msra.gmra.mxu0 %vm1992_vm1, %v9020_v5  ;;  %v458_v16 = vor.u32 %v457_v8, %v453_v6  ;;  %v476_v17 = vshrl.u32 %v231_v4, 16  ;;  %v479_v18 = vshll.u32 %v231_v4, 16  ;;  %v485_v22 = vshll.u32 %v232_v10, 16 }
  0x22   : > { %10985 = vmatpush3.bf16.msra.mxu0 %v11492_v7  ;;  %v449_v19 = vrot.slane %v448_v13, 4  ;;  %v468_v20 = vor.u32 %v467_v12, %v463_v11  ;;  %v473_v21 = vrot.slane %v471_v14, 5  ;;  %v444_v24 = vsel %vm11508_vm4, %v439_v15, %v443_v58  ;;  %v355_v15 = vld [vmem:[%s11489_s27 + $0x4c] sm:$0x1] }
  0x23   : > { %v459_v25 = vrot.slane %v458_v16, 4  ;;  %v478_v26 = vrot.slane %v476_v17, 4  ;;  %v481_v27 = vrot.slane %v479_v18, 5  ;;  %v487_v31 = vrot.slane %v485_v22, 5 }
  0x24   : > { %v454_v29 = vsel %vm11508_vm4, %v449_v19, %v453_v6  ;;  %v469_v30 = vrot.slane %v468_v20, 4  ;;  %v489_v7 = vshrl.u32 %v232_v10, 16  ;;  %v9152_v34 = vcombine.low %v231_v4, %v232_v10  ;;  %v239_v20 = vld [vmem:[%s11489_s27 + $0x50] sm:$0xf] }
  0x25   : > { %v9021_v32 = vcombine.low %v444_v24, %v454_v29  ;;  %v464_v33 = vsel %vm11508_vm4, %v459_v25, %v463_v11  ;;  %v495_v35 = vshll.u32 %v233_v23, 16  ;;  %v499_v40 = vshrl.u32 %v233_v23, 16 }
  0x26   : > { %v474_v38 = vsel %vm11508_vm4, %v469_v30, %v473_v21  ;;  %v491_v39 = vrot.slane %v489_v7, 4  ;;  %v505_v41 = vshll.u32 %v234_v28, 16  ;;  %10864 = vmatprep.mubr.msk.bf16.mxu1 %vm1992_vm1, %v9152_v34  ;;  %v509_v45 = vshrl.u32 %v234_v28, 16  ;;  %v240_v21 = vld [vmem:[%s11489_s27 + $0x54] sm:$0xf] }
  0x27   : > { %10730 = vmatprep.mubr.msk.bf16.mxu0 %vm1992_vm1, %v9021_v32  ;;  %v9022_v43 = vcombine.low %v464_v33, %v474_v38  ;;  %v497_v44 = vrot.slane %v495_v35, 5  ;;  %v9153_v46 = vcombine.low %v233_v23, %v234_v28  ;;  %v501_v48 = vrot.slane %v499_v40, 4  ;;  %v241_v38 = vld [vmem:[%s11489_s27 + $0x58] sm:$0xf] }
  0x28   : > { %v507_v49 = vrot.slane %v505_v41, 5  ;;  %v482_v50 = vor.u32 %v481_v27, %v478_v26  ;;  %v492_v51 = vor.u32 %v491_v39, %v487_v31  ;;  %v511_v52 = vrot.slane %v509_v45, 4 }
  0x29   : > { %10731 = vmatmul.mubr.msk.bf16.gmra.mxu0 %vm1992_vm1, %v9022_v43  ;;  %10865 = vmatmul.mubr.msk.bf16.gmra.mxu1 %vm1992_vm1, %v9153_v46  ;;  %v515_v53 = vshll.u32 %v354_v37, 16  ;;  %v520_v54 = vshrl.u32 %v235_v42, 16  ;;  %v523_v55 = vshll.u32 %v235_v42, 16  ;;  %v502_v58 = vor.u32 %v501_v48, %v497_v44  ;;  %v242_v43 = vld [vmem:[%s11489_s27 + $0x5c] sm:$0xf] }
  0x2a   : > { %v483_v56 = vrot.slane %v482_v50, 4  ;;  %v493_v57 = vrot.slane %v492_v51, 4  ;;  %v529_v59 = vshll.u32 %v236_v47, 16  ;;  %v512_v61 = vor.u32 %v511_v52, %v507_v49  ;;  %v356_v52 = vld [vmem:[%s11489_s27 + $0x60] sm:$0x1] }
  0x2b   : > { %v517_v62 = vrot.slane %v515_v53, 5  ;;  %v522_v63 = vrot.slane %v520_v54, 4  ;;  %v525_v0 = vrot.slane %v523_v55, 5  ;;  %v503_v4 = vrot.slane %v502_v58, 4 }
  0x2c   : > { %v488_v2 = vsel %vm11508_vm4, %v483_v56, %v487_v31  ;;  %v498_v3 = vsel %vm11508_vm4, %v493_v57, %v497_v44  ;;  %v531_v5 = vrot.slane %v529_v59, 5  ;;  %v513_v8 = vrot.slane %v512_v61, 4  ;;  %v243_v57 = vld [vmem:[%s11489_s27 + $0x64] sm:$0xf] }
  0x2d   : > { %v9023_v6 = vcombine.low %v488_v2, %v498_v3  ;;  %v533_v9 = vshrl.u32 %v236_v47, 16  ;;  %v9154_v10 = vcombine.low %v235_v42, %v236_v47  ;;  %v508_v11 = vsel %vm11508_vm4, %v503_v4, %v507_v49 }
  0x2e   : > { %v539_v12 = vshll.u32 %v237_v60, 16  ;;  %v543_v13 = vshrl.u32 %v237_v60, 16  ;;  %v549_v14 = vshll.u32 %v238_v1, 16  ;;  %v518_v16 = vsel %vm11508_vm4, %v513_v8, %v517_v62  ;;  %v244_v62 = vld [vmem:[%s11489_s27 + $0x68] sm:$0xf] }
  0x2f   : > { %10734 = vmatprep.mubr.msk.bf16.mxu0 %vm1992_vm1, %v9023_v6  ;;  %v535_v17 = vrot.slane %v533_v9, 4  ;;  %10868 = vmatprep.mubr.msk.bf16.mxu1 %vm1992_vm1, %v9154_v10  ;;  %v553_v18 = vshrl.u32 %v238_v1, 16  ;;  %v9155_v19 = vcombine.low %v237_v60, %v238_v1  ;;  %v9024_v22 = vcombine.low %v508_v11, %v518_v16 }
  0x30   : > { %v541_v23 = vrot.slane %v539_v12, 5  ;;  %v545_v24 = vrot.slane %v543_v13, 4  ;;  %v551_v25 = vrot.slane %v549_v14, 5  ;;  %v526_v27 = vor.u32 %v525_v0, %v522_v63  ;;  %v245_v12 = vld [vmem:[%s11489_s27 + $0x6c] sm:$0xf] }
  0x31   : > { %v555_v26 = vrot.slane %v553_v18, 4  ;;  %10869 = vmatmul.mubr.msk.bf16.gmra.mxu1 %vm1992_vm1, %v9155_v19  ;;  %v536_v28 = vor.u32 %v535_v17, %v531_v5  ;;  %v559_v29 = vshll.u32 %v355_v15, 16  ;;  %10735 = vmatmul.mubr.msk.bf16.gmra.mxu0 %vm1992_vm1, %v9024_v22  ;;  %v564_v31 = vshrl.u32 %v239_v20, 16  ;;  %v246_v17 = vld [vmem:[%s11489_s27 + $0x70] sm:$0xf] }
  0x32   : > { %v546_v30 = vor.u32 %v545_v24, %v541_v23  ;;  %v567_v7 = vshll.u32 %v239_v20, 16  ;;  %v573_v32 = vshll.u32 %v240_v21, 16  ;;  %v527_v33 = vrot.slane %v526_v27, 4 }
  0x33   : > { %v537_v34 = vrot.slane %v536_v28, 4  ;;  %v556_v35 = vor.u32 %v555_v26, %v551_v25  ;;  %v561_v37 = vrot.slane %v559_v29, 5  ;;  %v566_v40 = vrot.slane %v564_v31, 4 }
  0x34   : > { %v547_v39 = vrot.slane %v546_v30, 4  ;;  %v569_v41 = vrot.slane %v567_v7, 5  ;;  %v575_v42 = vrot.slane %v573_v32, 5  ;;  %v532_v44 = vsel %vm11508_vm4, %v527_v33, %v531_v5  ;;  %v357_v30 = vld [vmem:[%s11489_s27 + $0x74] sm:$0x1] }
  0x35   : > { %v542_v45 = vsel %vm11508_vm4, %v537_v34, %v541_v23  ;;  %v557_v46 = vrot.slane %v556_v35, 4  ;;  %v577_v47 = vshrl.u32 %v240_v21, 16  ;;  %v9156_v50 = vcombine.low %v239_v20, %v240_v21  ;;  %v247_v34 = vld [vmem:[%s11489_s27 + $0x78] sm:$0xf]  ;;  %v248_v35 = vld [vmem:[%s11489_s27 + $0x7c] sm:$0xf] }
  0x36   : > { %v9025_v48 = vcombine.low %v532_v44, %v542_v45  ;;  %v552_v49 = vsel %vm11508_vm4, %v547_v39, %v551_v25  ;;  %v583_v51 = vshll.u32 %v241_v38, 16  ;;  %v587_v55 = vshrl.u32 %v241_v38, 16 }
  0x37   : > { %v562_v53 = vsel %vm11508_vm4, %v557_v46, %v561_v37  ;;  %v579_v54 = vrot.slane %v577_v47, 4  ;;  %v593_v56 = vshll.u32 %v242_v43, 16  ;;  %10872 = vmatprep.mubr.msk.bf16.mxu1 %vm1992_vm1, %v9156_v50  ;;  %v597_v60 = vshrl.u32 %v242_v43, 16 }
  0x38   : > { %10738 = vmatprep.mubr.msk.bf16.mxu0 %vm1992_vm1, %v9025_v48  ;;  %v9026_v58 = vcombine.low %v552_v49, %v562_v53  ;;  %v585_v59 = vrot.slane %v583_v51, 5  ;;  %v9157_v61 = vcombine.low %v241_v38, %v242_v43  ;;  %v589_v63 = vrot.slane %v587_v55, 4  ;;  %v249_v53 = vld [vmem:[%s11489_s27 + $0x80] sm:$0xf] }
  0x39   : > { %v595_v0 = vrot.slane %v593_v56, 5  ;;  %v570_v1 = vor.u32 %v569_v41, %v566_v40  ;;  %v580_v2 = vor.u32 %v579_v54, %v575_v42  ;;  %v599_v3 = vrot.slane %v597_v60, 4 }
  0x3a   : > { %10739 = vmatmul.mubr.msk.bf16.gmra.mxu0 %vm1992_vm1, %v9026_v58  ;;  %10873 = vmatmul.mubr.msk.bf16.gmra.mxu1 %vm1992_vm1, %v9157_v61  ;;  %v603_v4 = vshll.u32 %v356_v52, 16  ;;  %v608_v5 = vshrl.u32 %v243_v57, 16  ;;  %v611_v6 = vshll.u32 %v243_v57, 16  ;;  %v590_v10 = vor.u32 %v589_v63, %v585_v59  ;;  %v250_v58 = vld [vmem:[%s11489_s27 + $0x84] sm:$0xf] }
  0x3b   : > { %v571_v8 = vrot.slane %v570_v1, 4  ;;  %v581_v9 = vrot.slane %v580_v2, 4  ;;  %v617_v11 = vshll.u32 %v244_v62, 16  ;;  %v600_v13 = vor.u32 %v599_v3, %v595_v0  ;;  %v358_v3 = vld [vmem:[%s11489_s27 + $0x88] sm:$0x1] }
  0x3c   : > { %v605_v14 = vrot.slane %v603_v4, 5  ;;  %v610_v15 = vrot.slane %v608_v5, 4  ;;  %v613_v16 = vrot.slane %v611_v6, 5  ;;  %v591_v20 = vrot.slane %v590_v10, 4 }
  0x3d   : > { %v576_v18 = vsel %vm11508_vm4, %v571_v8, %v575_v42  ;;  %v586_v19 = vsel %vm11508_vm4, %v581_v9, %v585_v59  ;;  %v619_v21 = vrot.slane %v617_v11, 5  ;;  %v601_v23 = vrot.slane %v600_v13, 4  ;;  %v251_v9 = vld [vmem:[%s11489_s27 + $0x8c] sm:$0xf] }
  0x3e   : > { %v9027_v22 = vcombine.low %v576_v18, %v586_v19  ;;  %v621_v24 = vshrl.u32 %v244_v62, 16  ;;  %v9158_v25 = vcombine.low %v243_v57, %v244_v62  ;;  %v596_v26 = vsel %vm11508_vm4, %v591_v20, %v595_v0 }
  0x3f   : > { %v627_v27 = vshll.u32 %v245_v12, 16  ;;  %v631_v28 = vshrl.u32 %v245_v12, 16  ;;  %v637_v29 = vshll.u32 %v246_v17, 16  ;;  %v606_v31 = vsel %vm11508_vm4, %v601_v23, %v605_v14  ;;  %v252_v14 = vld [vmem:[%s11489_s27 + $0x90] sm:$0xf] }
  0x40   : > { %10742 = vmatprep.mubr.msk.bf16.mxu0 %vm1992_vm1, %v9027_v22  ;;  %v623_v7 = vrot.slane %v621_v24, 4  ;;  %10876 = vmatprep.mubr.msk.bf16.mxu1 %vm1992_vm1, %v9158_v25  ;;  %v641_v32 = vshrl.u32 %v246_v17, 16  ;;  %v9159_v33 = vcombine.low %v245_v12, %v246_v17  ;;  %v9028_v37 = vcombine.low %v596_v26, %v606_v31 }
  0x41   : > { %v629_v38 = vrot.slane %v627_v27, 5  ;;  %v633_v39 = vrot.slane %v631_v28, 4  ;;  %v639_v40 = vrot.slane %v637_v29, 5  ;;  %v614_v42 = vor.u32 %v613_v16, %v610_v15  ;;  %v253_v27 = vld [vmem:[%s11489_s27 + $0x94] sm:$0xf] }
  0x42   : > { %v643_v41 = vrot.slane %v641_v32, 4  ;;  %10877 = vmatmul.mubr.msk.bf16.gmra.mxu1 %vm1992_vm1, %v9159_v33  ;;  %v624_v43 = vor.u32 %v623_v7, %v619_v21  ;;  %v647_v44 = vshll.u32 %v357_v30, 16  ;;  %10743 = vmatmul.mubr.msk.bf16.gmra.mxu0 %vm1992_vm1, %v9028_v37  ;;  %v652_v46 = vshrl.u32 %v247_v34, 16  ;;  %v254_v7 = vld [vmem:[%s11489_s27 + $0x98] sm:$0xf] }
  0x43   : > { %v634_v45 = vor.u32 %v633_v39, %v629_v38  ;;  %v655_v47 = vshll.u32 %v247_v34, 16  ;;  %v661_v48 = vshll.u32 %v248_v35, 16  ;;  %v615_v49 = vrot.slane %v614_v42, 4 }
  0x44   : > { %v625_v50 = vrot.slane %v624_v43, 4  ;;  %v644_v51 = vor.u32 %v643_v41, %v639_v40  ;;  %v649_v52 = vrot.slane %v647_v44, 5  ;;  %v654_v55 = vrot.slane %v652_v46, 4 }
  0x45   : > { %v635_v54 = vrot.slane %v634_v45, 4  ;;  %v657_v56 = vrot.slane %v655_v47, 5  ;;  %v663_v57 = vrot.slane %v661_v48, 5  ;;  %v620_v59 = vsel %vm11508_vm4, %v615_v49, %v619_v21  ;;  %v359_v45 = vld [vmem:[%s11489_s27 + $0x9c] sm:$0x1] }
  0x46   : > { %v630_v60 = vsel %vm11508_vm4, %v625_v50, %v629_v38  ;;  %v645_v61 = vrot.slane %v644_v51, 4  ;;  %v665_v62 = vshrl.u32 %v248_v35, 16  ;;  %v9160_v1 = vcombine.low %v247_v34, %v248_v35  ;;  %v255_v50 = vld [vmem:[%s11489_s27 + $0xa0] sm:$0xf]  ;;  %v256_v51 = vld [vmem:[%s11489_s27 + $0xa4] sm:$0xf] }
  0x47   : > { %v9029_v63 = vcombine.low %v620_v59, %v630_v60  ;;  %v640_v0 = vsel %vm11508_vm4, %v635_v54, %v639_v40  ;;  %v671_v2 = vshll.u32 %v249_v53, 16  ;;  %v675_v6 = vshrl.u32 %v249_v53, 16 }
  0x48   : > { %v650_v4 = vsel %vm11508_vm4, %v645_v61, %v649_v52  ;;  %v667_v5 = vrot.slane %v665_v62, 4  ;;  %v681_v8 = vshll.u32 %v250_v58, 16  ;;  %10880 = vmatprep.mubr.msk.bf16.mxu1 %vm1992_vm1, %v9160_v1  ;;  %v685_v12 = vshrl.u32 %v250_v58, 16 }
  0x49   : > { %10746 = vmatprep.mubr.msk.bf16.mxu0 %vm1992_vm1, %v9029_v63  ;;  %v9030_v10 = vcombine.low %v640_v0, %v650_v4  ;;  %v673_v11 = vrot.slane %v671_v2, 5  ;;  %v9161_v13 = vcombine.low %v249_v53, %v250_v58  ;;  %v677_v15 = vrot.slane %v675_v6, 4  ;;  %v257_v4 = vld [vmem:[%s11489_s27 + $0xa8] sm:$0xf] }
  0x4a   : > { %v683_v16 = vrot.slane %v681_v8, 5  ;;  %v658_v17 = vor.u32 %v657_v56, %v654_v55  ;;  %v668_v18 = vor.u32 %v667_v5, %v663_v57  ;;  %v687_v19 = vrot.slane %v685_v12, 4 }
  0x4b   : > { %10747 = vmatmul.mubr.msk.bf16.gmra.mxu0 %vm1992_vm1, %v9030_v10  ;;  %10881 = vmatmul.mubr.msk.bf16.gmra.mxu1 %vm1992_vm1, %v9161_v13  ;;  %v691_v20 = vshll.u32 %v358_v3, 16  ;;  %v696_v21 = vshrl.u32 %v251_v9, 16  ;;  %v699_v22 = vshll.u32 %v251_v9, 16  ;;  %v678_v25 = vor.u32 %v677_v15, %v673_v11  ;;  %v258_v10 = vld [vmem:[%s11489_s27 + $0xac] sm:$0xf] }
  0x4c   : > { %v659_v23 = vrot.slane %v658_v17, 4  ;;  %v669_v24 = vrot.slane %v668_v18, 4  ;;  %v705_v26 = vshll.u32 %v252_v14, 16  ;;  %v688_v28 = vor.u32 %v687_v19, %v683_v16  ;;  %v360_v19 = vld [vmem:[%s11489_s27 + $0xb0] sm:$0x1] }
  0x4d   : > { %v693_v29 = vrot.slane %v691_v20, 5  ;;  %v698_v30 = vrot.slane %v696_v21, 4  ;;  %v701_v31 = vrot.slane %v699_v22, 5  ;;  %v679_v34 = vrot.slane %v678_v25, 4 }
  0x4e   : > { %v664_v32 = vsel %vm11508_vm4, %v659_v23, %v663_v57  ;;  %v674_v33 = vsel %vm11508_vm4, %v669_v24, %v673_v11  ;;  %v707_v35 = vrot.slane %v705_v26, 5  ;;  %v689_v38 = vrot.slane %v688_v28, 4  ;;  %v259_v24 = vld [vmem:[%s11489_s27 + $0xb4] sm:$0xf] }
  0x4f   : > { %v9031_v37 = vcombine.low %v664_v32, %v674_v33  ;;  %v709_v39 = vshrl.u32 %v252_v14, 16  ;;  %v9162_v40 = vcombine.low %v251_v9, %v252_v14  ;;  %v684_v41 = vsel %vm11508_vm4, %v679_v34, %v683_v16 }
  0x50   : > { %v715_v42 = vshll.u32 %v253_v27, 16  ;;  %v719_v43 = vshrl.u32 %v253_v27, 16  ;;  %v725_v44 = vshll.u32 %v254_v7, 16  ;;  %v694_v46 = vsel %vm11508_vm4, %v689_v38, %v693_v29  ;;  %v260_v29 = vld [vmem:[%s11489_s27 + $0xb8] sm:$0xf] }
  0x51   : > { %10750 = vmatprep.mubr.msk.bf16.mxu0 %vm1992_vm1, %v9031_v37  ;;  %v711_v47 = vrot.slane %v709_v39, 4  ;;  %10884 = vmatprep.mubr.msk.bf16.mxu1 %vm1992_vm1, %v9162_v40  ;;  %v729_v48 = vshrl.u32 %v254_v7, 16  ;;  %v9163_v49 = vcombine.low %v253_v27, %v254_v7  ;;  %v9032_v52 = vcombine.low %v684_v41, %v694_v46 }
  0x52   : > { %v717_v53 = vrot.slane %v715_v42, 5  ;;  %v721_v54 = vrot.slane %v719_v43, 4  ;;  %v727_v55 = vrot.slane %v725_v44, 5  ;;  %v702_v57 = vor.u32 %v701_v31, %v698_v30  ;;  %v261_v42 = vld [vmem:[%s11489_s27 + $0xbc] sm:$0xf] }
  0x53   : > { %v731_v56 = vrot.slane %v729_v48, 4  ;;  %10885 = vmatmul.mubr.msk.bf16.gmra.mxu1 %vm1992_vm1, %v9163_v49  ;;  %v712_v58 = vor.u32 %v711_v47, %v707_v35  ;;  %v735_v59 = vshll.u32 %v359_v45, 16  ;;  %10751 = vmatmul.mubr.msk.bf16.gmra.mxu0 %vm1992_vm1, %v9032_v52  ;;  %v740_v61 = vshrl.u32 %v255_v50, 16  ;;  %v262_v47 = vld [vmem:[%s11489_s27 + $0xc0] sm:$0xf] }
  0x54   : > { %v722_v60 = vor.u32 %v721_v54, %v717_v53  ;;  %v743_v62 = vshll.u32 %v255_v50, 16  ;;  %v749_v63 = vshll.u32 %v256_v51, 16  ;;  %v703_v0 = vrot.slane %v702_v57, 4 }
  0x55   : > { %v713_v1 = vrot.slane %v712_v58, 4  ;;  %v732_v2 = vor.u32 %v731_v56, %v727_v55  ;;  %v737_v3 = vrot.slane %v735_v59, 5  ;;  %v742_v6 = vrot.slane %v740_v61, 4 }
  0x56   : > { %v723_v5 = vrot.slane %v722_v60, 4  ;;  %v745_v8 = vrot.slane %v743_v62, 5  ;;  %v751_v9 = vrot.slane %v749_v63, 5  ;;  %v708_v11 = vsel %vm11508_vm4, %v703_v0, %v707_v35  ;;  %v361_v60 = vld [vmem:[%s11489_s27 + $0xc4] sm:$0x1] }
  0x57   : > { %v718_v12 = vsel %vm11508_vm4, %v713_v1, %v717_v53  ;;  %v733_v13 = vrot.slane %v732_v2, 4  ;;  %v753_v14 = vshrl.u32 %v256_v51, 16  ;;  %v9164_v17 = vcombine.low %v255_v50, %v256_v51  ;;  %v263_v1 = vld [vmem:[%s11489_s27 + $0xc8] sm:$0xf]  ;;  %v264_v2 = vld [vmem:[%s11489_s27 + $0xcc] sm:$0xf] }
  0x58   : > { %v9033_v15 = vcombine.low %v708_v11, %v718_v12  ;;  %v728_v16 = vsel %vm11508_vm4, %v723_v5, %v727_v55  ;;  %v759_v18 = vshll.u32 %v257_v4, 16  ;;  %v763_v22 = vshrl.u32 %v257_v4, 16 }
  0x59   : > { %v738_v20 = vsel %vm11508_vm4, %v733_v13, %v737_v3  ;;  %v755_v21 = vrot.slane %v753_v14, 4  ;;  %v769_v23 = vshll.u32 %v258_v10, 16  ;;  %10888 = vmatprep.mubr.msk.bf16.mxu1 %vm1992_vm1, %v9164_v17  ;;  %v773_v27 = vshrl.u32 %v258_v10, 16 }
  0x5a   : > { %10754 = vmatprep.mubr.msk.bf16.mxu0 %vm1992_vm1, %v9033_v15  ;;  %v9034_v25 = vcombine.low %v728_v16, %v738_v20  ;;  %v761_v26 = vrot.slane %v759_v18, 5  ;;  %v9165_v28 = vcombine.low %v257_v4, %v258_v10  ;;  %v765_v30 = vrot.slane %v763_v22, 4  ;;  %v265_v20 = vld [vmem:[%s11489_s27 + $0xd0] sm:$0xf] }
  0x5b   : > { %v771_v31 = vrot.slane %v769_v23, 5  ;;  %v746_v7 = vor.u32 %v745_v8, %v742_v6  ;;  %v756_v32 = vor.u32 %v755_v21, %v751_v9  ;;  %v775_v33 = vrot.slane %v773_v27, 4 }
  0x5c   : > { %10755 = vmatmul.mubr.msk.bf16.gmra.mxu0 %vm1992_vm1, %v9034_v25  ;;  %10889 = vmatmul.mubr.msk.bf16.gmra.mxu1 %vm1992_vm1, %v9165_v28  ;;  %v779_v34 = vshll.u32 %v360_v19, 16  ;;  %v784_v35 = vshrl.u32 %v259_v24, 16  ;;  %v787_v37 = vshll.u32 %v259_v24, 16  ;;  %v766_v40 = vor.u32 %v765_v30, %v761_v26  ;;  %v266_v25 = vld [vmem:[%s11489_s27 + $0xd4] sm:$0xf] }
  0x5d   : > { %v747_v38 = vrot.slane %v746_v7, 4  ;;  %v757_v39 = vrot.slane %v756_v32, 4  ;;  %v793_v41 = vshll.u32 %v260_v29, 16  ;;  %v776_v43 = vor.u32 %v775_v33, %v771_v31  ;;  %v362_v30 = vld [vmem:[%s11489_s27 + $0xd8] sm:$0x1] }
  0x5e   : > { %v781_v44 = vrot.slane %v779_v34, 5  ;;  %v786_v45 = vrot.slane %v784_v35, 4  ;;  %v789_v46 = vrot.slane %v787_v37, 5  ;;  %v767_v50 = vrot.slane %v766_v40, 4  ;;  %v267_v34 = vld [vmem:[%s11489_s27 + $0xdc] sm:$0xf] }
  0x5f   : > { %v752_v48 = vsel %vm11508_vm4, %v747_v38, %v751_v9  ;;  %v762_v49 = vsel %vm11508_vm4, %v757_v39, %v761_v26  ;;  %v795_v51 = vrot.slane %v793_v41, 5  ;;  %v777_v53 = vrot.slane %v776_v43, 4  ;;  %v268_v35 = vld [vmem:[%s11489_s27 + $0xe0] sm:$0xf] }
  0x60   : > { %v9035_v52 = vcombine.low %v752_v48, %v762_v49  ;;  %v797_v54 = vshrl.u32 %v260_v29, 16  ;;  %v9166_v55 = vcombine.low %v259_v24, %v260_v29  ;;  %v772_v56 = vsel %vm11508_vm4, %v767_v50, %v771_v31 }
  0x61   : > { %v803_v57 = vshll.u32 %v261_v42, 16  ;;  %v807_v58 = vshrl.u32 %v261_v42, 16  ;;  %v813_v59 = vshll.u32 %v262_v47, 16  ;;  %v782_v61 = vsel %vm11508_vm4, %v777_v53, %v781_v44  ;;  %v269_v53 = vld [vmem:[%s11489_s27 + $0xe4] sm:$0xf] }
  0x62   : > { %10758 = vmatprep.mubr.msk.bf16.mxu0 %vm1992_vm1, %v9035_v52  ;;  %v799_v62 = vrot.slane %v797_v54, 4  ;;  %10892 = vmatprep.mubr.msk.bf16.mxu1 %vm1992_vm1, %v9166_v55  ;;  %v817_v63 = vshrl.u32 %v262_v47, 16  ;;  %v9167_v0 = vcombine.low %v261_v42, %v262_v47  ;;  %v9036_v3 = vcombine.low %v772_v56, %v782_v61 }
  0x63   : > { %v805_v4 = vrot.slane %v803_v57, 5  ;;  %v809_v5 = vrot.slane %v807_v58, 4  ;;  %v815_v6 = vrot.slane %v813_v59, 5  ;;  %v790_v9 = vor.u32 %v789_v46, %v786_v45  ;;  %v270_v58 = vld [vmem:[%s11489_s27 + $0xe8] sm:$0xf] }
  0x64   : > { %v819_v8 = vrot.slane %v817_v63, 4  ;;  %10893 = vmatmul.mubr.msk.bf16.gmra.mxu1 %vm1992_vm1, %v9167_v0  ;;  %v800_v10 = vor.u32 %v799_v62, %v795_v51  ;;  %v823_v11 = vshll.u32 %v361_v60, 16  ;;  %10759 = vmatmul.mubr.msk.bf16.gmra.mxu0 %vm1992_vm1, %v9036_v3  ;;  %v828_v13 = vshrl.u32 %v263_v1, 16 }
  0x65   : > { %v810_v12 = vor.u32 %v809_v5, %v805_v4  ;;  %v831_v14 = vshll.u32 %v263_v1, 16  ;;  %v837_v15 = vshll.u32 %v264_v2, 16  ;;  %v791_v16 = vrot.slane %v790_v9, 4 }
  0x66   : > { %v801_v17 = vrot.slane %v800_v10, 4  ;;  %v820_v18 = vor.u32 %v819_v8, %v815_v6  ;;  %v825_v19 = vrot.slane %v823_v11, 5  ;;  %v830_v22 = vrot.slane %v828_v13, 4  ;;  %v363_v8 = vld [vmem:[%s11489_s27 + $0xec] sm:$0x1] }
  0x67   : > { %v811_v21 = vrot.slane %v810_v12, 4  ;;  %v833_v23 = vrot.slane %v831_v14, 5  ;;  %v839_v24 = vrot.slane %v837_v15, 5  ;;  %v796_v26 = vsel %vm11508_vm4, %v791_v16, %v795_v51  ;;  %v271_v13 = vld [vmem:[%s11489_s27 + $0xf0] sm:$0xf] }
  0x68   : > { %v806_v27 = vsel %vm11508_vm4, %v801_v17, %v805_v4  ;;  %v821_v28 = vrot.slane %v820_v18, 4  ;;  %v841_v29 = vshrl.u32 %v264_v2, 16  ;;  %v9168_v32 = vcombine.low %v263_v1, %v264_v2  ;;  %v272_v18 = vld [vmem:[%s11489_s27 + $0xf4] sm:$0xf] }
  0x69   : > { %v9037_v31 = vcombine.low %v796_v26, %v806_v27  ;;  %v816_v7 = vsel %vm11508_vm4, %v811_v21, %v815_v6  ;;  %v847_v33 = vshll.u32 %v265_v20, 16  ;;  %v851_v39 = vshrl.u32 %v265_v20, 16  ;;  %v273_v27 = vld [vmem:[%s11489_s27 + $0xf8] sm:$0xf] }
  0x6a   : > { %v826_v37 = vsel %vm11508_vm4, %v821_v28, %v825_v19  ;;  %v843_v38 = vrot.slane %v841_v29, 4  ;;  %v857_v40 = vshll.u32 %v266_v25, 16  ;;  %10896 = vmatprep.mubr.msk.bf16.mxu1 %vm1992_vm1, %v9168_v32  ;;  %v861_v43 = vshrl.u32 %v266_v25, 16 }
  0x6b   : > { %10762 = vmatprep.mubr.msk.bf16.mxu0 %vm1992_vm1, %v9037_v31  ;;  %v9038_v41 = vcombine.low %v816_v7, %v826_v37  ;;  %v849_v42 = vrot.slane %v847_v33, 5  ;;  %v9169_v44 = vcombine.low %v265_v20, %v266_v25  ;;  %v853_v45 = vrot.slane %v851_v39, 4 }
  0x6c   : > { %v859_v46 = vrot.slane %v857_v40, 5  ;;  %v834_v47 = vor.u32 %v833_v23, %v830_v22  ;;  %v844_v48 = vor.u32 %v843_v38, %v839_v24  ;;  %v863_v49 = vrot.slane %v861_v43, 4  ;;  %v274_v40 = vld [vmem:[%s11489_s27 + $0xfc] sm:$0xf] }
  0x6d   : > { %10763 = vmatmul.mubr.msk.bf16.gmra.mxu0 %vm1992_vm1, %v9038_v41  ;;  %10897 = vmatmul.mubr.msk.bf16.gmra.mxu1 %vm1992_vm1, %v9169_v44  ;;  %v867_v50 = vshll.u32 %v362_v30, 16  ;;  %v872_v51 = vshrl.u32 %v267_v34, 16  ;;  %v875_v52 = vshll.u32 %v267_v34, 16  ;;  %v854_v56 = vor.u32 %v853_v45, %v849_v42  ;;  %v364_v45 = vld [vmem:[%s11489_s27 + $0x100] sm:$0x1] }
  0x6e   : > { %v835_v54 = vrot.slane %v834_v47, 4  ;;  %v845_v55 = vrot.slane %v844_v48, 4  ;;  %v881_v57 = vshll.u32 %v268_v35, 16  ;;  %v864_v59 = vor.u32 %v863_v49, %v859_v46 }
  0x6f   : > { %v869_v60 = vrot.slane %v867_v50, 5  ;;  %v874_v61 = vrot.slane %v872_v51, 4  ;;  %v877_v62 = vrot.slane %v875_v52, 5  ;;  %v855_v1 = vrot.slane %v854_v56, 4 }
  0x70   : > { %v840_v63 = vsel %vm11508_vm4, %v835_v54, %v839_v24  ;;  %v850_v0 = vsel %vm11508_vm4, %v845_v55, %v849_v42  ;;  %v883_v2 = vrot.slane %v881_v57, 5  ;;  %v865_v4 = vrot.slane %v864_v59, 4  ;;  %v275_v54 = vld [vmem:[%s11489_s27 + $0x104] sm:$0xf]  ;;  %v276_v59 = vld [vmem:[%s11489_s27 + $0x108] sm:$0xf] }
  0x71   : > { %v9039_v3 = vcombine.low %v840_v63, %v850_v0  ;;  %v885_v5 = vshrl.u32 %v268_v35, 16  ;;  %v9170_v6 = vcombine.low %v267_v34, %v268_v35  ;;  %v860_v9 = vsel %vm11508_vm4, %v855_v1, %v859_v46 }
  0x72   : > { %v891_v10 = vshll.u32 %v269_v53, 16  ;;  %v895_v11 = vshrl.u32 %v269_v53, 16  ;;  %v901_v12 = vshll.u32 %v270_v58, 16  ;;  %v870_v14 = vsel %vm11508_vm4, %v865_v4, %v869_v60  ;;  %v277_v4 = vld [vmem:[%s11489_s27 + $0x10c] sm:$0xf] }
  0x73   : > { %10766 = vmatprep.mubr.msk.bf16.mxu0 %vm1992_vm1, %v9039_v3  ;;  %v887_v15 = vrot.slane %v885_v5, 4  ;;  %10900 = vmatprep.mubr.msk.bf16.mxu1 %vm1992_vm1, %v9170_v6  ;;  %v905_v16 = vshrl.u32 %v270_v58, 16  ;;  %v9171_v17 = vcombine.low %v269_v53, %v270_v58  ;;  %v9040_v19 = vcombine.low %v860_v9, %v870_v14  ;;  %v278_v5 = vld [vmem:[%s11489_s27 + $0x110] sm:$0xf] }
  0x74   : > { %v893_v20 = vrot.slane %v891_v10, 5  ;;  %v897_v21 = vrot.slane %v895_v11, 4  ;;  %v903_v22 = vrot.slane %v901_v12, 5  ;;  %v878_v24 = vor.u32 %v877_v62, %v874_v61 }
  0x75   : > { %v907_v23 = vrot.slane %v905_v16, 4  ;;  %10901 = vmatmul.mubr.msk.bf16.gmra.mxu1 %vm1992_vm1, %v9171_v17  ;;  %v888_v25 = vor.u32 %v887_v15, %v883_v2  ;;  %v911_v26 = vshll.u32 %v363_v8, 16  ;;  %10767 = vmatmul.mubr.msk.bf16.gmra.mxu0 %vm1992_vm1, %v9040_v19  ;;  %v916_v29 = vshrl.u32 %v271_v13, 16  ;;  %v365_v19 = vld [vmem:[%s11489_s27 + $0x114] sm:$0x1] }
  0x76   : > { %v898_v28 = vor.u32 %v897_v21, %v893_v20  ;;  %v919_v30 = vshll.u32 %v271_v13, 16  ;;  %v925_v31 = vshll.u32 %v272_v18, 16  ;;  %v879_v7 = vrot.slane %v878_v24, 4 }
  0x77   : > { %v889_v32 = vrot.slane %v888_v25, 4  ;;  %v908_v33 = vor.u32 %v907_v23, %v903_v22  ;;  %v913_v34 = vrot.slane %v911_v26, 5  ;;  %v918_v37 = vrot.slane %v916_v29, 4 }
  0x78   : > { %v899_v35 = vrot.slane %v898_v28, 4  ;;  %v921_v38 = vrot.slane %v919_v30, 5  ;;  %v927_v39 = vrot.slane %v925_v31, 5  ;;  %v884_v41 = vsel %vm11508_vm4, %v879_v7, %v883_v2  ;;  %v279_v7 = vld [vmem:[%s11489_s27 + $0x118] sm:$0xf] }
  0x79   : > { %v894_v42 = vsel %vm11508_vm4, %v889_v32, %v893_v20  ;;  %v909_v43 = vrot.slane %v908_v33, 4  ;;  %v929_v44 = vshrl.u32 %v272_v18, 16  ;;  %v9172_v48 = vcombine.low %v271_v13, %v272_v18  ;;  %v280_v32 = vld [vmem:[%s11489_s27 + $0x11c] sm:$0xf] }
  0x7a   : > { %v9041_v46 = vcombine.low %v884_v41, %v894_v42  ;;  %v904_v47 = vsel %vm11508_vm4, %v899_v35, %v903_v22  ;;  %v935_v49 = vshll.u32 %v273_v27, 16  ;;  %v939_v52 = vshrl.u32 %v273_v27, 16  ;;  %v281_v42 = vld [vmem:[%s11489_s27 + $0x120] sm:$0xf] }
  0x7b   : > { %v914_v50 = vsel %vm11508_vm4, %v909_v43, %v913_v34  ;;  %v931_v51 = vrot.slane %v929_v44, 4  ;;  %v945_v53 = vshll.u32 %v274_v40, 16  ;;  %10904 = vmatprep.mubr.msk.bf16.mxu1 %vm1992_vm1, %v9172_v48  ;;  %v949_v57 = vshrl.u32 %v274_v40, 16 }
  0x7c   : > { %10770 = vmatprep.mubr.msk.bf16.mxu0 %vm1992_vm1, %v9041_v46  ;;  %v9042_v55 = vcombine.low %v904_v47, %v914_v50  ;;  %v937_v56 = vrot.slane %v935_v49, 5  ;;  %v9173_v58 = vcombine.low %v273_v27, %v274_v40  ;;  %v941_v60 = vrot.slane %v939_v52, 4  ;;  %v282_v47 = vld [vmem:[%s11489_s27 + $0x124] sm:$0xf] }
  0x7d   : > { %v947_v61 = vrot.slane %v945_v53, 5  ;;  %v922_v62 = vor.u32 %v921_v38, %v918_v37  ;;  %v932_v63 = vor.u32 %v931_v51, %v927_v39  ;;  %v951_v0 = vrot.slane %v949_v57, 4 }
  0x7e   : > { %10771 = vmatmul.mubr.msk.bf16.gmra.mxu0 %vm1992_vm1, %v9042_v55  ;;  %10905 = vmatmul.mubr.msk.bf16.gmra.mxu1 %vm1992_vm1, %v9173_v58  ;;  %v955_v1 = vshll.u32 %v364_v45, 16  ;;  %v960_v2 = vshrl.u32 %v275_v54, 16  ;;  %v963_v3 = vshll.u32 %v275_v54, 16  ;;  %v942_v9 = vor.u32 %v941_v60, %v937_v56  ;;  %v366_v60 = vld [vmem:[%s11489_s27 + $0x128] sm:$0x1] }
  0x7f   : > { %v923_v6 = vrot.slane %v922_v62, 4  ;;  %v933_v8 = vrot.slane %v932_v63, 4  ;;  %v969_v10 = vshll.u32 %v276_v59, 16  ;;  %v952_v11 = vor.u32 %v951_v0, %v947_v61 }
  0x80   : > { %v957_v12 = vrot.slane %v955_v1, 5  ;;  %v962_v13 = vrot.slane %v960_v2, 4  ;;  %v965_v14 = vrot.slane %v963_v3, 5  ;;  %v943_v17 = vrot.slane %v942_v9, 4  ;;  %v284_v2 = vld [vmem:[%s11489_s27 + $0x130] sm:$0xf] }
  0x81   : > { %v928_v15 = vsel %vm11508_vm4, %v923_v6, %v927_v39  ;;  %v938_v16 = vsel %vm11508_vm4, %v933_v8, %v937_v56  ;;  %v971_v18 = vrot.slane %v969_v10, 5  ;;  %v953_v21 = vrot.slane %v952_v11, 4 }
  0x82   : > { %v9043_v20 = vcombine.low %v928_v15, %v938_v16  ;;  %v973_v22 = vshrl.u32 %v276_v59, 16  ;;  %v9174_v23 = vcombine.low %v275_v54, %v276_v59  ;;  %v948_v24 = vsel %vm11508_vm4, %v943_v17, %v947_v61  ;;  %v283_v61 = vld [vmem:[%s11489_s27 + $0x12c] sm:$0xf] }
  0x83   : > { %v979_v25 = vshll.u32 %v277_v4, 16  ;;  %v983_v26 = vshrl.u32 %v277_v4, 16  ;;  %v989_v27 = vshll.u32 %v278_v5, 16  ;;  %v958_v28 = vsel %vm11508_vm4, %v953_v21, %v957_v12 }
  0x84   : > { %10774 = vmatprep.mubr.msk.bf16.mxu0 %vm1992_vm1, %v9043_v20  ;;  %v975_v29 = vrot.slane %v973_v22, 4  ;;  %10908 = vmatprep.mubr.msk.bf16.mxu1 %vm1992_vm1, %v9174_v23  ;;  %v993_v30 = vshrl.u32 %v278_v5, 16  ;;  %v9175_v31 = vcombine.low %v277_v4, %v278_v5  ;;  %v9044_v33 = vcombine.low %v948_v24, %v958_v28  ;;  %v285_v20 = vld [vmem:[%s11489_s27 + $0x134] sm:$0xf] }
  0x85   : > { %v981_v34 = vrot.slane %v979_v25, 5  ;;  %v985_v35 = vrot.slane %v983_v26, 4  ;;  %v991_v37 = vrot.slane %v989_v27, 5  ;;  %v966_v39 = vor.u32 %v965_v14, %v962_v13  ;;  %v286_v25 = vld [vmem:[%s11489_s27 + $0x138] sm:$0xf] }
  0x86   : > { %v995_v38 = vrot.slane %v993_v30, 4  ;;  %10909 = vmatmul.mubr.msk.bf16.gmra.mxu1 %vm1992_vm1, %v9175_v31  ;;  %v976_v40 = vor.u32 %v975_v29, %v971_v18  ;;  %v999_v41 = vshll.u32 %v365_v19, 16  ;;  %10775 = vmatmul.mubr.msk.bf16.gmra.mxu0 %vm1992_vm1, %v9044_v33  ;;  %v1004_v44 = vshrl.u32 %v279_v7, 16  ;;  %v367_v33 = vld [vmem:[%s11489_s27 + $0x13c] sm:$0x1] }
  0x87   : > { %v986_v43 = vor.u32 %v985_v35, %v981_v34  ;;  %v1007_v45 = vshll.u32 %v279_v7, 16  ;;  %v1013_v46 = vshll.u32 %v280_v32, 16  ;;  %v967_v48 = vrot.slane %v966_v39, 4  ;;  %v287_v39 = vld [vmem:[%s11489_s27 + $0x140] sm:$0xf] }
  0x88   : > { %v977_v49 = vrot.slane %v976_v40, 4  ;;  %v996_v50 = vor.u32 %v995_v38, %v991_v37  ;;  %v1001_v51 = vrot.slane %v999_v41, 5  ;;  %v1006_v53 = vrot.slane %v1004_v44, 4 }
  0x89   : > { %v987_v52 = vrot.slane %v986_v43, 4  ;;  %v1009_v54 = vrot.slane %v1007_v45, 5  ;;  %v1015_v55 = vrot.slane %v1013_v46, 5  ;;  %v972_v56 = vsel %vm11508_vm4, %v967_v48, %v971_v18  ;;  %v288_v48 = vld [vmem:[%s11489_s27 + $0x144] sm:$0xf] }
  0x8a   : > { %v982_v57 = vsel %vm11508_vm4, %v977_v49, %v981_v34  ;;  %v997_v58 = vrot.slane %v996_v50, 4  ;;  %v1017_v59 = vshrl.u32 %v280_v32, 16  ;;  %v9176_v0 = vcombine.low %v279_v7, %v280_v32 }
  0x8b   : > { %v9045_v62 = vcombine.low %v972_v56, %v982_v57  ;;  %v992_v63 = vsel %vm11508_vm4, %v987_v52, %v991_v37  ;;  %v1023_v1 = vshll.u32 %v281_v42, 16  ;;  %v1027_v5 = vshrl.u32 %v281_v42, 16 }
  0x8c   : > { %v1002_v3 = vsel %vm11508_vm4, %v997_v58, %v1001_v51  ;;  %v1019_v4 = vrot.slane %v1017_v59, 4  ;;  %v1033_v6 = vshll.u32 %v282_v47, 16  ;;  %10912 = vmatprep.mubr.msk.bf16.mxu1 %vm1992_vm1, %v9176_v0  ;;  %v1037_v10 = vshrl.u32 %v282_v47, 16 }
  0x8d   : > { %10778 = vmatprep.mubr.msk.bf16.mxu0 %vm1992_vm1, %v9045_v62  ;;  %v9046_v8 = vcombine.low %v992_v63, %v1002_v3  ;;  %v1025_v9 = vrot.slane %v1023_v1, 5  ;;  %v9177_v11 = vcombine.low %v281_v42, %v282_v47  ;;  %v1029_v12 = vrot.slane %v1027_v5, 4  ;;  %v289_v1 = vld [vmem:[%s11489_s27 + $0x148] sm:$0xf] }
  0x8e   : > { %v1035_v13 = vrot.slane %v1033_v6, 5  ;;  %v1010_v14 = vor.u32 %v1009_v54, %v1006_v53  ;;  %v1020_v15 = vor.u32 %v1019_v4, %v1015_v55  ;;  %v1039_v16 = vrot.slane %v1037_v10, 4  ;;  %v290_v6 = vld [vmem:[%s11489_s27 + $0x14c] sm:$0xf] }
  0x8f   : > { %10779 = vmatmul.mubr.msk.bf16.gmra.mxu0 %vm1992_vm1, %v9046_v8  ;;  %10913 = vmatmul.mubr.msk.bf16.gmra.mxu1 %vm1992_vm1, %v9177_v11  ;;  %v1043_v17 = vshll.u32 %v366_v60, 16  ;;  %v1048_v18 = vshrl.u32 %v283_v61, 16  ;;  %v1051_v19 = vshll.u32 %v283_v61, 16  ;;  %v1030_v23 = vor.u32 %v1029_v12, %v1025_v9  ;;  %v368_v12 = vld [vmem:[%s11489_s27 + $0x150] sm:$0x1] }
  0x90   : > { %v1011_v21 = vrot.slane %v1010_v14, 4  ;;  %v1021_v22 = vrot.slane %v1020_v15, 4  ;;  %v1057_v24 = vshll.u32 %v284_v2, 16  ;;  %v1040_v26 = vor.u32 %v1039_v16, %v1035_v13 }
  0x91   : > { %v1045_v27 = vrot.slane %v1043_v17, 5  ;;  %v1050_v28 = vrot.slane %v1048_v18, 4  ;;  %v1053_v29 = vrot.slane %v1051_v19, 5  ;;  %v1031_v7 = vrot.slane %v1030_v23, 4  ;;  %v292_v18 = vld [vmem:[%s11489_s27 + $0x158] sm:$0xf] }
  0x92   : > { %v1016_v30 = vsel %vm11508_vm4, %v1011_v21, %v1015_v55  ;;  %v1026_v31 = vsel %vm11508_vm4, %v1021_v22, %v1025_v9  ;;  %v1059_v32 = vrot.slane %v1057_v24, 5  ;;  %v1041_v35 = vrot.slane %v1040_v26, 4 }
  0x93   : > { %v9047_v34 = vcombine.low %v1016_v30, %v1026_v31  ;;  %v1061_v37 = vshrl.u32 %v284_v2, 16  ;;  %v9178_v38 = vcombine.low %v283_v61, %v284_v2  ;;  %v1036_v40 = vsel %vm11508_vm4, %v1031_v7, %v1035_v13  ;;  %v291_v13 = vld [vmem:[%s11489_s27 + $0x154] sm:$0xf] }
  0x94   : > { %v1067_v41 = vshll.u32 %v285_v20, 16  ;;  %v1071_v42 = vshrl.u32 %v285_v20, 16  ;;  %v1077_v43 = vshll.u32 %v286_v25, 16  ;;  %v1046_v44 = vsel %vm11508_vm4, %v1041_v35, %v1045_v27 }
  0x95   : > { %10782 = vmatprep.mubr.msk.bf16.mxu0 %vm1992_vm1, %v9047_v34  ;;  %v1063_v45 = vrot.slane %v1061_v37, 4  ;;  %10916 = vmatprep.mubr.msk.bf16.mxu1 %vm1992_vm1, %v9178_v38  ;;  %v1081_v46 = vshrl.u32 %v286_v25, 16  ;;  %v9179_v47 = vcombine.low %v285_v20, %v286_v25  ;;  %v9048_v49 = vcombine.low %v1036_v40, %v1046_v44  ;;  %v293_v34 = vld [vmem:[%s11489_s27 + $0x15c] sm:$0xf]  ;;  %v294_v44 = vld [vmem:[%s11489_s27 + $0x160] sm:$0xf] }
  0x96   : > { %v1069_v50 = vrot.slane %v1067_v41, 5  ;;  %v1073_v51 = vrot.slane %v1071_v42, 4  ;;  %v1079_v52 = vrot.slane %v1077_v43, 5  ;;  %v1054_v54 = vor.u32 %v1053_v29, %v1050_v28 }
  0x97   : > { %v1083_v53 = vrot.slane %v1081_v46, 4  ;;  %10917 = vmatmul.mubr.msk.bf16.gmra.mxu1 %vm1992_vm1, %v9179_v47  ;;  %v1064_v55 = vor.u32 %v1063_v45, %v1059_v32  ;;  %v1087_v56 = vshll.u32 %v367_v33, 16  ;;  %10783 = vmatmul.mubr.msk.bf16.gmra.mxu0 %vm1992_vm1, %v9048_v49  ;;  %v1092_v58 = vshrl.u32 %v287_v39, 16  ;;  %v369_v49 = vld [vmem:[%s11489_s27 + $0x164] sm:$0x1] }
  0x98   : > { %v1074_v57 = vor.u32 %v1073_v51, %v1069_v50  ;;  %v1095_v59 = vshll.u32 %v287_v39, 16  ;;  %v1101_v60 = vshll.u32 %v288_v48, 16  ;;  %v1055_v61 = vrot.slane %v1054_v54, 4  ;;  %v295_v54 = vld [vmem:[%s11489_s27 + $0x168] sm:$0xf] }
  0x99   : > { %v1065_v62 = vrot.slane %v1064_v55, 4  ;;  %v1084_v63 = vor.u32 %v1083_v53, %v1079_v52  ;;  %v1089_v0 = vrot.slane %v1087_v56, 5  ;;  %v1094_v3 = vrot.slane %v1092_v58, 4  ;;  %v296_v55 = vld [vmem:[%s11489_s27 + $0x16c] sm:$0xf] }
  0x9a   : > { %v1075_v2 = vrot.slane %v1074_v57, 4  ;;  %v1097_v4 = vrot.slane %v1095_v59, 5  ;;  %v1103_v5 = vrot.slane %v1101_v60, 5  ;;  %v1060_v8 = vsel %vm11508_vm4, %v1055_v61, %v1059_v32 }
  0x9b   : > { %v1070_v9 = vsel %vm11508_vm4, %v1065_v62, %v1069_v50  ;;  %v1085_v10 = vrot.slane %v1084_v63, 4  ;;  %v1105_v11 = vshrl.u32 %v288_v48, 16  ;;  %v9180_v16 = vcombine.low %v287_v39, %v288_v48 }
  0x9c   : > { %v9049_v14 = vcombine.low %v1060_v8, %v1070_v9  ;;  %v1080_v15 = vsel %vm11508_vm4, %v1075_v2, %v1079_v52  ;;  %v1111_v17 = vshll.u32 %v289_v1, 16  ;;  %v1115_v21 = vshrl.u32 %v289_v1, 16 }
  0x9d   : > { %v1090_v19 = vsel %vm11508_vm4, %v1085_v10, %v1089_v0  ;;  %v1107_v20 = vrot.slane %v1105_v11, 4  ;;  %v1121_v22 = vshll.u32 %v290_v6, 16  ;;  %10920 = vmatprep.mubr.msk.bf16.mxu1 %vm1992_vm1, %v9180_v16  ;;  %v1125_v25 = vshrl.u32 %v290_v6, 16 }
  0x9e   : > { %10786 = vmatprep.mubr.msk.bf16.mxu0 %vm1992_vm1, %v9049_v14  ;;  %v9050_v23 = vcombine.low %v1080_v15, %v1090_v19  ;;  %v1113_v24 = vrot.slane %v1111_v17, 5  ;;  %v9181_v26 = vcombine.low %v289_v1, %v290_v6  ;;  %v1117_v27 = vrot.slane %v1115_v21, 4  ;;  %v297_v17 = vld [vmem:[%s11489_s27 + $0x170] sm:$0xf] }
  0x9f   : > { %v1123_v28 = vrot.slane %v1121_v22, 5  ;;  %v1098_v29 = vor.u32 %v1097_v4, %v1094_v3  ;;  %v1108_v30 = vor.u32 %v1107_v20, %v1103_v5  ;;  %v1127_v31 = vrot.slane %v1125_v25, 4  ;;  %v298_v22 = vld [vmem:[%s11489_s27 + $0x174] sm:$0xf] }
  0xa0   : > { %10787 = vmatmul.mubr.msk.bf16.gmra.mxu0 %vm1992_vm1, %v9050_v23  ;;  %10921 = vmatmul.mubr.msk.bf16.gmra.mxu1 %vm1992_vm1, %v9181_v26  ;;  %v1131_v7 = vshll.u32 %v368_v12, 16  ;;  %v1136_v32 = vshrl.u32 %v291_v13, 16  ;;  %v1139_v33 = vshll.u32 %v291_v13, 16  ;;  %v1118_v38 = vor.u32 %v1117_v27, %v1113_v24  ;;  %v370_v27 = vld [vmem:[%s11489_s27 + $0x178] sm:$0x1] }
  0xa1   : > { %v1099_v35 = vrot.slane %v1098_v29, 4  ;;  %v1109_v37 = vrot.slane %v1108_v30, 4  ;;  %v1145_v39 = vshll.u32 %v292_v18, 16  ;;  %v1128_v40 = vor.u32 %v1127_v31, %v1123_v28 }
  0xa2   : > { %v1133_v41 = vrot.slane %v1131_v7, 5  ;;  %v1138_v42 = vrot.slane %v1136_v32, 4  ;;  %v1141_v43 = vrot.slane %v1139_v33, 5  ;;  %v1119_v47 = vrot.slane %v1118_v38, 4  ;;  %v300_v32 = vld [vmem:[%s11489_s27 + $0x180] sm:$0xf] }
  0xa3   : > { %v1104_v45 = vsel %vm11508_vm4, %v1099_v35, %v1103_v5  ;;  %v1114_v46 = vsel %vm11508_vm4, %v1109_v37, %v1113_v24  ;;  %v1147_v48 = vrot.slane %v1145_v39, 5  ;;  %v1129_v51 = vrot.slane %v1128_v40, 4 }
  0xa4   : > { %v9051_v50 = vcombine.low %v1104_v45, %v1114_v46  ;;  %v1149_v52 = vshrl.u32 %v292_v18, 16  ;;  %v9182_v53 = vcombine.low %v291_v13, %v292_v18  ;;  %v1124_v56 = vsel %vm11508_vm4, %v1119_v47, %v1123_v28  ;;  %v299_v28 = vld [vmem:[%s11489_s27 + $0x17c] sm:$0xf] }
  0xa5   : > { %v1155_v57 = vshll.u32 %v293_v34, 16  ;;  %v1159_v58 = vshrl.u32 %v293_v34, 16  ;;  %v1165_v59 = vshll.u32 %v294_v44, 16  ;;  %v1134_v60 = vsel %vm11508_vm4, %v1129_v51, %v1133_v41 }
  0xa6   : > { %10790 = vmatprep.mubr.msk.bf16.mxu0 %vm1992_vm1, %v9051_v50  ;;  %v1151_v61 = vrot.slane %v1149_v52, 4  ;;  %10924 = vmatprep.mubr.msk.bf16.mxu1 %vm1992_vm1, %v9182_v53  ;;  %v1169_v62 = vshrl.u32 %v294_v44, 16  ;;  %v9183_v63 = vcombine.low %v293_v34, %v294_v44  ;;  %v9052_v0 = vcombine.low %v1124_v56, %v1134_v60  ;;  %v301_v50 = vld [vmem:[%s11489_s27 + $0x184] sm:$0xf] }
  0xa7   : > { %v1157_v1 = vrot.slane %v1155_v57, 5  ;;  %v1161_v2 = vrot.slane %v1159_v58, 4  ;;  %v1167_v3 = vrot.slane %v1165_v59, 5  ;;  %v1142_v5 = vor.u32 %v1141_v43, %v1138_v42  ;;  %v302_v59 = vld [vmem:[%s11489_s27 + $0x188] sm:$0xf] }
  0xa8   : > { %v1171_v4 = vrot.slane %v1169_v62, 4  ;;  %10925 = vmatmul.mubr.msk.bf16.gmra.mxu1 %vm1992_vm1, %v9183_v63  ;;  %v1152_v6 = vor.u32 %v1151_v61, %v1147_v48  ;;  %v1175_v8 = vshll.u32 %v369_v49, 16  ;;  %10791 = vmatmul.mubr.msk.bf16.gmra.mxu0 %vm1992_vm1, %v9052_v0  ;;  %v1180_v10 = vshrl.u32 %v295_v54, 16  ;;  %v371_v0 = vld [vmem:[%s11489_s27 + $0x18c] sm:$0x1] }
  0xa9   : > { %v1162_v9 = vor.u32 %v1161_v2, %v1157_v1  ;;  %v1183_v11 = vshll.u32 %v295_v54, 16  ;;  %v1189_v12 = vshll.u32 %v296_v55, 16  ;;  %v1143_v13 = vrot.slane %v1142_v5, 4  ;;  %v303_v5 = vld [vmem:[%s11489_s27 + $0x190] sm:$0xf] }
  0xaa   : > { %v1153_v14 = vrot.slane %v1152_v6, 4  ;;  %v1172_v15 = vor.u32 %v1171_v4, %v1167_v3  ;;  %v1177_v16 = vrot.slane %v1175_v8, 5  ;;  %v1182_v19 = vrot.slane %v1180_v10, 4  ;;  %v304_v6 = vld [vmem:[%s11489_s27 + $0x194] sm:$0xf] }
  0xab   : > { %v1163_v18 = vrot.slane %v1162_v9, 4  ;;  %v1185_v20 = vrot.slane %v1183_v11, 5  ;;  %v1191_v21 = vrot.slane %v1189_v12, 5  ;;  %v1148_v23 = vsel %vm11508_vm4, %v1143_v13, %v1147_v48 }
  0xac   : > { %v1158_v24 = vsel %vm11508_vm4, %v1153_v14, %v1157_v1  ;;  %v1173_v25 = vrot.slane %v1172_v15, 4  ;;  %v1193_v26 = vshrl.u32 %v296_v55, 16  ;;  %v9184_v31 = vcombine.low %v295_v54, %v296_v55 }
  0xad   : > { %v9053_v29 = vcombine.low %v1148_v23, %v1158_v24  ;;  %v1168_v30 = vsel %vm11508_vm4, %v1163_v18, %v1167_v3  ;;  %v1199_v7 = vshll.u32 %v297_v17, 16  ;;  %v1203_v35 = vshrl.u32 %v297_v17, 16  ;;  %v305_v24 = vld [vmem:[%s11489_s27 + $0x198] sm:$0xf] }
  0xae   : > { %v1178_v33 = vsel %vm11508_vm4, %v1173_v25, %v1177_v16  ;;  %v1195_v34 = vrot.slane %v1193_v26, 4  ;;  %v1209_v37 = vshll.u32 %v298_v22, 16  ;;  %10928 = vmatprep.mubr.msk.bf16.mxu1 %vm1992_vm1, %v9184_v31  ;;  %v1213_v40 = vshrl.u32 %v298_v22, 16 }
  0xaf   : > { %10794 = vmatprep.mubr.msk.bf16.mxu0 %vm1992_vm1, %v9053_v29  ;;  %v9054_v38 = vcombine.low %v1168_v30, %v1178_v33  ;;  %v1201_v39 = vrot.slane %v1199_v7, 5  ;;  %v9185_v41 = vcombine.low %v297_v17, %v298_v22  ;;  %v1205_v42 = vrot.slane %v1203_v35, 4  ;;  %v306_v29 = vld [vmem:[%s11489_s27 + $0x19c] sm:$0xf] }
  0xb0   : > { %v1211_v43 = vrot.slane %v1209_v37, 5  ;;  %v1186_v44 = vor.u32 %v1185_v20, %v1182_v19  ;;  %v1196_v45 = vor.u32 %v1195_v34, %v1191_v21  ;;  %v1215_v46 = vrot.slane %v1213_v40, 4 }
  0xb1   : > { %10795 = vmatmul.mubr.msk.bf16.gmra.mxu0 %vm1992_vm1, %v9054_v38  ;;  %10929 = vmatmul.mubr.msk.bf16.gmra.mxu1 %vm1992_vm1, %v9185_v41  ;;  %v1219_v47 = vshll.u32 %v370_v27, 16  ;;  %v1224_v48 = vshrl.u32 %v299_v28, 16  ;;  %v1227_v49 = vshll.u32 %v299_v28, 16  ;;  %v1206_v53 = vor.u32 %v1205_v42, %v1201_v39  ;;  %v372_v42 = vld [vmem:[%s11489_s27 + $0x1a0] sm:$0x1] }
  0xb2   : > { %v1187_v51 = vrot.slane %v1186_v44, 4  ;;  %v1197_v52 = vrot.slane %v1196_v45, 4  ;;  %v1233_v54 = vshll.u32 %v300_v32, 16  ;;  %v1216_v55 = vor.u32 %v1215_v46, %v1211_v43 }
  0xb3   : > { %v1221_v56 = vrot.slane %v1219_v47, 5  ;;  %v1226_v57 = vrot.slane %v1224_v48, 4  ;;  %v1229_v58 = vrot.slane %v1227_v49, 5  ;;  %v1207_v62 = vrot.slane %v1206_v53, 4  ;;  %v307_v47 = vld [vmem:[%s11489_s27 + $0x1a4] sm:$0xf] }
  0xb4   : > { %v1192_v60 = vsel %vm11508_vm4, %v1187_v51, %v1191_v21  ;;  %v1202_v61 = vsel %vm11508_vm4, %v1197_v52, %v1201_v39  ;;  %v1235_v63 = vrot.slane %v1233_v54, 5  ;;  %v1217_v2 = vrot.slane %v1216_v55, 4  ;;  %v308_v48 = vld [vmem:[%s11489_s27 + $0x1a8] sm:$0xf] }
  0xb5   : > { %v9055_v1 = vcombine.low %v1192_v60, %v1202_v61  ;;  %v1237_v3 = vshrl.u32 %v300_v32, 16  ;;  %v9186_v4 = vcombine.low %v299_v28, %v300_v32  ;;  %v1212_v8 = vsel %vm11508_vm4, %v1207_v62, %v1211_v43 }
  0xb6   : > { %v1243_v9 = vshll.u32 %v301_v50, 16  ;;  %v1247_v10 = vshrl.u32 %v301_v50, 16  ;;  %v1253_v11 = vshll.u32 %v302_v59, 16  ;;  %v1222_v12 = vsel %vm11508_vm4, %v1217_v2, %v1221_v56 }
  0xb7   : > { %10798 = vmatprep.mubr.msk.bf16.mxu0 %vm1992_vm1, %v9055_v1  ;;  %v1239_v13 = vrot.slane %v1237_v3, 4  ;;  %10932 = vmatprep.mubr.msk.bf16.mxu1 %vm1992_vm1, %v9186_v4  ;;  %v1257_v14 = vshrl.u32 %v302_v59, 16  ;;  %v9187_v15 = vcombine.low %v301_v50, %v302_v59  ;;  %v9056_v16 = vcombine.low %v1212_v8, %v1222_v12  ;;  %v309_v1 = vld [vmem:[%s11489_s27 + $0x1ac] sm:$0xf] }
  0xb8   : > { %v1245_v17 = vrot.slane %v1243_v9, 5  ;;  %v1249_v18 = vrot.slane %v1247_v10, 4  ;;  %v1255_v19 = vrot.slane %v1253_v11, 5  ;;  %v1230_v21 = vor.u32 %v1229_v58, %v1226_v57 }
  0xb9   : > { %v1259_v20 = vrot.slane %v1257_v14, 4  ;;  %10933 = vmatmul.mubr.msk.bf16.gmra.mxu1 %vm1992_vm1, %v9187_v15  ;;  %v1240_v22 = vor.u32 %v1239_v13, %v1235_v63  ;;  %v1263_v23 = vshll.u32 %v371_v0, 16  ;;  %10799 = vmatmul.mubr.msk.bf16.gmra.mxu0 %vm1992_vm1, %v9056_v16  ;;  %v1268_v26 = vshrl.u32 %v303_v5, 16 }
  0xba   : > { %v1250_v25 = vor.u32 %v1249_v18, %v1245_v17  ;;  %v1271_v27 = vshll.u32 %v303_v5, 16  ;;  %v1277_v28 = vshll.u32 %v304_v6, 16  ;;  %v1231_v30 = vrot.slane %v1230_v21, 4 }
  0xbb   : > { %v1241_v31 = vrot.slane %v1240_v22, 4  ;;  %v1260_v7 = vor.u32 %v1259_v20, %v1255_v19  ;;  %v1265_v32 = vrot.slane %v1263_v23, 5  ;;  %v1270_v34 = vrot.slane %v1268_v26, 4  ;;  %v373_v20 = vld [vmem:[%s11489_s27 + $0x1b4] sm:$0x1] }
  0xbc   : > { %v1251_v33 = vrot.slane %v1250_v25, 4  ;;  %v1273_v35 = vrot.slane %v1271_v27, 5  ;;  %v1279_v37 = vrot.slane %v1277_v28, 5  ;;  %v1236_v38 = vsel %vm11508_vm4, %v1231_v30, %v1235_v63  ;;  %v311_v25 = vld [vmem:[%s11489_s27 + $0x1b8] sm:$0xf] }
  0xbd   : > { %v1246_v39 = vsel %vm11508_vm4, %v1241_v31, %v1245_v17  ;;  %v1261_v40 = vrot.slane %v1260_v7, 4  ;;  %v1281_v41 = vshrl.u32 %v304_v6, 16  ;;  %v9188_v45 = vcombine.low %v303_v5, %v304_v6  ;;  %v310_v6 = vld [vmem:[%s11489_s27 + $0x1b0] sm:$0xf]  ;;  %v312_v30 = vld [vmem:[%s11489_s27 + $0x1bc] sm:$0xf] }
  0xbe   : > { %v9057_v43 = vcombine.low %v1236_v38, %v1246_v39  ;;  %v1256_v44 = vsel %vm11508_vm4, %v1251_v33, %v1255_v19  ;;  %v1287_v46 = vshll.u32 %v305_v24, 16  ;;  %v1291_v51 = vshrl.u32 %v305_v24, 16 }
  0xbf   : > { %v1266_v49 = vsel %vm11508_vm4, %v1261_v40, %v1265_v32  ;;  %v1283_v50 = vrot.slane %v1281_v41, 4  ;;  %v1297_v52 = vshll.u32 %v306_v29, 16  ;;  %10936 = vmatprep.mubr.msk.bf16.mxu1 %vm1992_vm1, %v9188_v45  ;;  %v1301_v55 = vshrl.u32 %v306_v29, 16 }
  0xc0   : > { %10802 = vmatprep.mubr.msk.bf16.mxu0 %vm1992_vm1, %v9057_v43  ;;  %v9058_v53 = vcombine.low %v1256_v44, %v1266_v49  ;;  %v1289_v54 = vrot.slane %v1287_v46, 5  ;;  %v9189_v56 = vcombine.low %v305_v24, %v306_v29  ;;  %v1293_v57 = vrot.slane %v1291_v51, 4  ;;  %v313_v43 = vld [vmem:[%s11489_s27 + $0x1c0] sm:$0xf] }
  0xc1   : > { %v1299_v58 = vrot.slane %v1297_v52, 5  ;;  %v1274_v59 = vor.u32 %v1273_v35, %v1270_v34  ;;  %v1284_v60 = vor.u32 %v1283_v50, %v1279_v37  ;;  %v1303_v61 = vrot.slane %v1301_v55, 4 }
  0xc2   : > { %10803 = vmatmul.mubr.msk.bf16.gmra.mxu0 %vm1992_vm1, %v9058_v53  ;;  %10937 = vmatmul.mubr.msk.bf16.gmra.mxu1 %vm1992_vm1, %v9189_v56  ;;  %v1307_v62 = vshll.u32 %v372_v42, 16  ;;  %v1312_v63 = vshrl.u32 %v307_v47, 16  ;;  %v1315_v0 = vshll.u32 %v307_v47, 16  ;;  %v1294_v4 = vor.u32 %v1293_v57, %v1289_v54 }
  0xc3   : > { %v1275_v2 = vrot.slane %v1274_v59, 4  ;;  %v1285_v3 = vrot.slane %v1284_v60, 4  ;;  %v1321_v5 = vshll.u32 %v308_v48, 16  ;;  %v1304_v8 = vor.u32 %v1303_v61, %v1299_v58  ;;  %v374_v61 = vld [vmem:[%s11489_s27 + $0x1c8] sm:$0x1] }
  0xc4   : > { %v1309_v9 = vrot.slane %v1307_v62, 5  ;;  %v1314_v10 = vrot.slane %v1312_v63, 4  ;;  %v1317_v11 = vrot.slane %v1315_v0, 5  ;;  %v1295_v14 = vrot.slane %v1294_v4, 4 }
  0xc5   : > { %v1280_v12 = vsel %vm11508_vm4, %v1275_v2, %v1279_v37  ;;  %v1290_v13 = vsel %vm11508_vm4, %v1285_v3, %v1289_v54  ;;  %v1323_v15 = vrot.slane %v1321_v5, 5  ;;  %v1305_v17 = vrot.slane %v1304_v8, 4  ;;  %v315_v2 = vld [vmem:[%s11489_s27 + $0x1cc] sm:$0xf]  ;;  %v316_v8 = vld [vmem:[%s11489_s27 + $0x1d0] sm:$0xf] }
  0xc6   : > { %v9059_v16 = vcombine.low %v1280_v12, %v1290_v13  ;;  %v1325_v18 = vshrl.u32 %v308_v48, 16  ;;  %v9190_v19 = vcombine.low %v307_v47, %v308_v48  ;;  %v1300_v21 = vsel %vm11508_vm4, %v1295_v14, %v1299_v58  ;;  %v314_v48 = vld [vmem:[%s11489_s27 + $0x1c4] sm:$0xf] }
  0xc7   : > { %v1331_v22 = vshll.u32 %v309_v1, 16  ;;  %v1335_v23 = vshrl.u32 %v309_v1, 16  ;;  %v1341_v24 = vshll.u32 %v310_v6, 16  ;;  %v1310_v26 = vsel %vm11508_vm4, %v1305_v17, %v1309_v9 }
  0xc8   : > { %10806 = vmatprep.mubr.msk.bf16.mxu0 %vm1992_vm1, %v9059_v16  ;;  %v1327_v27 = vrot.slane %v1325_v18, 4  ;;  %10940 = vmatprep.mubr.msk.bf16.mxu1 %vm1992_vm1, %v9190_v19  ;;  %v1345_v28 = vshrl.u32 %v310_v6, 16  ;;  %v9191_v29 = vcombine.low %v309_v1, %v310_v6  ;;  %v9060_v31 = vcombine.low %v1300_v21, %v1310_v26  ;;  %v317_v21 = vld [vmem:[%s11489_s27 + $0x1d4] sm:$0xf]  ;;  %v318_v26 = vld [vmem:[%s11489_s27 + $0x1d8] sm:$0xf] }
  0xc9   : > { %v1333_v7 = vrot.slane %v1331_v22, 5  ;;  %v1337_v32 = vrot.slane %v1335_v23, 4  ;;  %v1343_v33 = vrot.slane %v1341_v24, 5  ;;  %v1318_v35 = vor.u32 %v1317_v11, %v1314_v10 }
  0xca   : > { %v1347_v34 = vrot.slane %v1345_v28, 4  ;;  %10941 = vmatmul.mubr.msk.bf16.gmra.mxu1 %vm1992_vm1, %v9191_v29  ;;  %v1328_v37 = vor.u32 %v1327_v27, %v1323_v15  ;;  %v1351_v38 = vshll.u32 %v373_v20, 16  ;;  %10807 = vmatmul.mubr.msk.bf16.gmra.mxu0 %vm1992_vm1, %v9060_v31  ;;  %v1356_v40 = vshrl.u32 %v311_v25, 16 }
  0xcb   : > { %v1338_v39 = vor.u32 %v1337_v32, %v1333_v7  ;;  %v1359_v41 = vshll.u32 %v311_v25, 16  ;;  %v1365_v42 = vshll.u32 %v312_v30, 16  ;;  %v1319_v44 = vrot.slane %v1318_v35, 4 }
  0xcc   : > { %v1329_v45 = vrot.slane %v1328_v37, 4  ;;  %v1348_v46 = vor.u32 %v1347_v34, %v1343_v33  ;;  %v1353_v47 = vrot.slane %v1351_v38, 5  ;;  %v1358_v50 = vrot.slane %v1356_v40, 4  ;;  %v375_v40 = vld [vmem:[%s11489_s27 + $0x1dc] sm:$0x1] }
  0xcd   : > { %v1339_v49 = vrot.slane %v1338_v39, 4  ;;  %v1361_v51 = vrot.slane %v1359_v41, 5  ;;  %v1367_v52 = vrot.slane %v1365_v42, 5  ;;  %v1324_v53 = vsel %vm11508_vm4, %v1319_v44, %v1323_v15 }
  0xce   : > { %v1334_v54 = vsel %vm11508_vm4, %v1329_v45, %v1333_v7  ;;  %v1349_v55 = vrot.slane %v1348_v46, 4  ;;  %v1369_v56 = vshrl.u32 %v312_v30, 16  ;;  %v9192_v59 = vcombine.low %v311_v25, %v312_v30  ;;  %v319_v45 = vld [vmem:[%s11489_s27 + $0x1e0] sm:$0xf]  ;;  %v320_v46 = vld [vmem:[%s11489_s27 + $0x1e4] sm:$0xf] }
  0xcf   : > { %v9061_v57 = vcombine.low %v1324_v53, %v1334_v54  ;;  %v1344_v58 = vsel %vm11508_vm4, %v1339_v49, %v1343_v33  ;;  %v1375_v60 = vshll.u32 %v313_v43, 16  ;;  %v1379_v0 = vshrl.u32 %v313_v43, 16 }
  0xd0   : > { %v1354_v62 = vsel %vm11508_vm4, %v1349_v55, %v1353_v47  ;;  %v1371_v63 = vrot.slane %v1369_v56, 4  ;;  %v1385_v1 = vshll.u32 %v314_v48, 16  ;;  %10944 = vmatprep.mubr.msk.bf16.mxu1 %vm1992_vm1, %v9192_v59  ;;  %v1389_v5 = vshrl.u32 %v314_v48, 16 }
  0xd1   : > { %10810 = vmatprep.mubr.msk.bf16.mxu0 %vm1992_vm1, %v9061_v57  ;;  %v9062_v3 = vcombine.low %v1344_v58, %v1354_v62  ;;  %v1377_v4 = vrot.slane %v1375_v60, 5  ;;  %v9193_v6 = vcombine.low %v313_v43, %v314_v48  ;;  %v1381_v9 = vrot.slane %v1379_v0, 4 }
  0xd2   : > { %v1387_v10 = vrot.slane %v1385_v1, 5  ;;  %v1362_v11 = vor.u32 %v1361_v51, %v1358_v50  ;;  %v1372_v12 = vor.u32 %v1371_v63, %v1367_v52  ;;  %v1391_v13 = vrot.slane %v1389_v5, 4  ;;  %v321_v1 = vld [vmem:[%s11489_s27 + $0x1e8] sm:$0xf] }
  0xd3   : > { %10811 = vmatmul.mubr.msk.bf16.gmra.mxu0 %vm1992_vm1, %v9062_v3  ;;  %10945 = vmatmul.mubr.msk.bf16.gmra.mxu1 %vm1992_vm1, %v9193_v6  ;;  %v1395_v14 = vshll.u32 %v374_v61, 16  ;;  %v1400_v15 = vshrl.u32 %v315_v2, 16  ;;  %v1403_v16 = vshll.u32 %v315_v2, 16  ;;  %v1382_v19 = vor.u32 %v1381_v9, %v1377_v4 }
  0xd4   : > { %v1363_v17 = vrot.slane %v1362_v11, 4  ;;  %v1373_v18 = vrot.slane %v1372_v12, 4  ;;  %v1409_v20 = vshll.u32 %v316_v8, 16  ;;  %v1392_v22 = vor.u32 %v1391_v13, %v1387_v10 }
  0xd5   : > { %v1397_v23 = vrot.slane %v1395_v14, 5  ;;  %v1402_v24 = vrot.slane %v1400_v15, 4  ;;  %v1405_v25 = vrot.slane %v1403_v16, 5  ;;  %v1383_v29 = vrot.slane %v1382_v19, 4 }
  0xd6   : > { %v1368_v27 = vsel %vm11508_vm4, %v1363_v17, %v1367_v52  ;;  %v1378_v28 = vsel %vm11508_vm4, %v1373_v18, %v1377_v4  ;;  %v1411_v30 = vrot.slane %v1409_v20, 5  ;;  %v1393_v7 = vrot.slane %v1392_v22, 4 }
  0xd7   : > { %v9063_v31 = vcombine.low %v1368_v27, %v1378_v28  ;;  %v1413_v32 = vshrl.u32 %v316_v8, 16  ;;  %v9194_v33 = vcombine.low %v315_v2, %v316_v8  ;;  %v11893_v34 = vpop.f32.mrf.mxu1  ;;  %v1388_v35 = vsel %vm11508_vm4, %v1383_v29, %v1387_v10  ;;  %v322_v8 = vld [vmem:[%s11489_s27 + $0x1ec] sm:$0xf]  ;;  %v323_v28 = vld [vmem:[%s11489_s27 + $0x1f4] sm:$0xf] }
  0xd8   : > { %v1419_v37 = vshll.u32 %v317_v21, 16  ;;  %v1423_v38 = vshrl.u32 %v317_v21, 16  ;;  %v1429_v39 = vshll.u32 %v318_v26, 16  ;;  %v1398_v41 = vsel %vm11508_vm4, %v1393_v7, %v1397_v23  ;;  %v376_v23 = vld [vmem:[%s11489_s27 + $0x1f0] sm:$0x1] }
  0xd9   : > { %10814 = vmatprep.mubr.msk.bf16.mxu0 %vm1992_vm1, %v9063_v31  ;;  %v1415_v42 = vrot.slane %v1413_v32, 4  ;;  %10948 = vmatprep.mubr.msk.bf16.mxu1 %vm1992_vm1, %v9194_v33  ;;  %v1433_v43 = vshrl.u32 %v318_v26, 16  ;;  %v9195_v44 = vcombine.low %v317_v21, %v318_v26  ;;  %v3283_v47 = vpop.f32.mrf.mxu1  ;;  %v9064_v48 = vcombine.low %v1388_v35, %v1398_v41  ;;  %v324_v35 = vld [vmem:[%s11489_s27 + $0x1f8] sm:$0xf] }
  0xda   : > { %v1421_v49 = vrot.slane %v1419_v37, 5  ;;  %v1425_v50 = vrot.slane %v1423_v38, 4  ;;  %v1431_v51 = vrot.slane %v1429_v39, 5  ;;  %v1406_v53 = vor.u32 %v1405_v25, %v1402_v24 }
  0xdb   : > { %v1435_v52 = vrot.slane %v1433_v43, 4  ;;  %10949 = vmatmul.mubr.msk.bf16.gmra.mxu1 %vm1992_vm1, %v9195_v44  ;;  %v1416_v54 = vor.u32 %v1415_v42, %v1411_v30  ;;  %v1439_v55 = vshll.u32 %v375_v40, 16  ;;  %v11905_v56 = vpop.f32.mrf.mxu1  ;;  %10815 = vmatmul.mubr.msk.bf16.gmra.mxu0 %vm1992_vm1, %v9064_v48  ;;  %v1444_v58 = vshrl.u32 %v319_v45, 16 }
  0xdc   : > { %v1426_v57 = vor.u32 %v1425_v50, %v1421_v49  ;;  %v1447_v59 = vshll.u32 %v319_v45, 16  ;;  %v1453_v60 = vshll.u32 %v320_v46, 16  ;;  %v1407_v61 = vrot.slane %v1406_v53, 4 }
  0xdd   : > { %v1417_v62 = vrot.slane %v1416_v54, 4  ;;  %v1436_v63 = vor.u32 %v1435_v52, %v1431_v51  ;;  %v1441_v0 = vrot.slane %v1439_v55, 5  ;;  %v11909_v2 = vpop.f32.mrf.mxu1  ;;  %v1446_v4 = vrot.slane %v1444_v58, 4  ;;  %v325_v52 = vld [vmem:[%s11489_s27 + $0x1fc] sm:$0xf] }
  0xde   : > { %v1427_v3 = vrot.slane %v1426_v57, 4  ;;  %v1449_v5 = vrot.slane %v1447_v59, 5  ;;  %v1455_v6 = vrot.slane %v1453_v60, 5  ;;  %v1412_v9 = vsel %vm11508_vm4, %v1407_v61, %v1411_v30  ;;  %v326_v57 = vld [vmem:[%s11489_s27 + $0x200] sm:$0xf] }
  0xdf   : > { %v1422_v10 = vsel %vm11508_vm4, %v1417_v62, %v1421_v49  ;;  %v1437_v11 = vrot.slane %v1436_v63, 4  ;;  %v1457_v12 = vshrl.u32 %v320_v46, 16  ;;  %v9196_v15 = vcombine.low %v319_v45, %v320_v46 }
  0xe0   : > { %v9065_v13 = vcombine.low %v1412_v9, %v1422_v10  ;;  %v1432_v14 = vsel %vm11508_vm4, %v1427_v3, %v1431_v51  ;;  %v1463_v16 = vshll.u32 %v321_v1, 16  ;;  %v11918_v17 = vpop.f32.mrf.mxu1  ;;  %v1467_v20 = vshrl.u32 %v321_v1, 16 }
  0xe1   : > { %v1442_v18 = vsel %vm11508_vm4, %v1437_v11, %v1441_v0  ;;  %v1459_v19 = vrot.slane %v1457_v12, 4  ;;  %v1473_v21 = vshll.u32 %v322_v8, 16  ;;  %v10728_v22 = vpop.f32.mrf.mxu0  ;;  %10952 = vmatprep.mubr.msk.bf16.mxu1 %vm1992_vm1, %v9196_v15  ;;  %v1477_v26 = vshrl.u32 %v322_v8, 16 }
  0xe2   : > { %10818 = vmatprep.mubr.msk.bf16.mxu0 %vm1992_vm1, %v9065_v13  ;;  %v9066_v24 = vcombine.low %v1432_v14, %v1442_v18  ;;  %v1465_v25 = vrot.slane %v1463_v16, 5  ;;  %v9197_v27 = vcombine.low %v321_v1, %v322_v8  ;;  %v11926_v29 = vpop.f32.mrf.mxu1  ;;  %v1469_v30 = vrot.slane %v1467_v20, 4  ;;  %v327_v16 = vld [vmem:[%s11489_s27 + $0x208] sm:$0xf] }
  0xe3   : > { %v1475_v31 = vrot.slane %v1473_v21, 5  ;;  %v1450_v7 = vor.u32 %v1449_v5, %v1446_v4  ;;  %v1460_v32 = vor.u32 %v1459_v19, %v1455_v6  ;;  %v2223_v33 = vpop.f32.mrf.mxu0  ;;  %v1479_v37 = vrot.slane %v1477_v26, 4 }
  0xe4   : > { %10819 = vmatmul.mubr.msk.bf16.gmra.mxu0 %vm1992_vm1, %v9066_v24  ;;  %10953 = vmatmul.mubr.msk.bf16.gmra.mxu1 %vm1992_vm1, %v9197_v27  ;;  %v11932_v38 = vadd.f32 %v11893_v34, %v10728_v22  ;;  %v1483_v39 = vshll.u32 %v376_v23, 16  ;;  %v11934_v40 = vadd.f32 %v3283_v47, %v2223_v33  ;;  %v11936_v41 = vpop.f32.mrf.mxu1  ;;  %v1470_v44 = vor.u32 %v1469_v30, %v1465_v25  ;;  %v328_v23 = vld [vmem:[%s11489_s27 + $0x20c] sm:$0xf] }
  0xe5   : > { %v1451_v42 = vrot.slane %v1450_v7, 4  ;;  %v1461_v43 = vrot.slane %v1460_v32, 4  ;;  %v1488_v45 = vshrl.u32 %v323_v28, 16  ;;  %v10729_v46 = vpop.f32.mrf.mxu0  ;;  %v1480_v48 = vor.u32 %v1479_v37, %v1475_v31 }
  0xe6   : > { %v1485_v49 = vrot.slane %v1483_v39, 5  ;;  %v1491_v50 = vshll.u32 %v323_v28, 16  ;;  %v1497_v51 = vshll.u32 %v324_v35, 16  ;;  %v11939_v53 = vpop.f32.mrf.mxu1  ;;  %v1471_v54 = vrot.slane %v1470_v44, 4 }
  0xe7   : > { %v1456_v34 = vsel %vm11508_vm4, %v1451_v42, %v1455_v6  ;;  %v1466_v47 = vsel %vm11508_vm4, %v1461_v43, %v1465_v25  ;;  %v1490_v55 = vrot.slane %v1488_v45, 4  ;;  %v2226_v58 = vpop.f32.mrf.mxu0  ;;  %v1481_v60 = vrot.slane %v1480_v48, 4  ;;  %v329_v42 = vld [vmem:[%s11489_s27 + $0x210] sm:$0xf] }
  0xe8   : > { %v9067_v59 = vcombine.low %v1456_v34, %v1466_v47  ;;  %v1493_v61 = vrot.slane %v1491_v50, 5  ;;  %v1499_v62 = vrot.slane %v1497_v51, 5  ;;  %v1476_v63 = vsel %vm11508_vm4, %v1471_v54, %v1475_v31 }
  0xe9   : > { %v1501_v0 = vshrl.u32 %v324_v35, 16  ;;  %v9198_v1 = vcombine.low %v323_v28, %v324_v35  ;;  %v11949_v3 = vadd.f32 %v11905_v56, %v10729_v46  ;;  %v10732_v4 = vpop.f32.mrf.mxu0  ;;  %v11951_v5 = vpop.f32.mrf.mxu1  ;;  %v1486_v6 = vsel %vm11508_vm4, %v1481_v60, %v1485_v49  ;;  %v377_v56 = vld [vmem:[%s11489_s27 + $0x204] sm:$0x1]  ;;  %v330_v49 = vld [vmem:[%s11489_s27 + $0x214] sm:$0xf] }
  0xea   : > { %10822 = vmatprep.mubr.msk.bf16.mxu0 %vm1992_vm1, %v9067_v59  ;;  %v1507_v8 = vshll.u32 %v325_v52, 16  ;;  %v1511_v9 = vshrl.u32 %v325_v52, 16  ;;  %v1517_v10 = vshll.u32 %v326_v57, 16  ;;  %v9068_v11 = vcombine.low %v1476_v63, %v1486_v6  ;;  %v378_v63 = vld [vmem:[%s11489_s27 + $0x218] sm:$0x1] }
  0xeb   : > { %v1503_v12 = vrot.slane %v1501_v0, 4  ;;  %10956 = vmatprep.mubr.msk.bf16.mxu1 %vm1992_vm1, %v9198_v1  ;;  %v1521_v13 = vshrl.u32 %v326_v57, 16  ;;  %v9199_v14 = vcombine.low %v325_v52, %v326_v57  ;;  %v2239_v15 = vpop.f32.mrf.mxu0  ;;  %v11959_v18 = vpop.f32.mrf.mxu1  ;;  %v11962_v22 = vadd.f32 %v11909_v2, %v2226_v58 }
  0xec   : > { %v1509_v19 = vrot.slane %v1507_v8, 5  ;;  %v1513_v20 = vrot.slane %v1511_v9, 4  ;;  %v1519_v21 = vrot.slane %v1517_v10, 5  ;;  %10823 = vmatmul.mubr.msk.bf16.gmra.mxu0 %vm1992_vm1, %v9068_v11  ;;  %v1494_v25 = vor.u32 %v1493_v61, %v1490_v55  ;;  %v331_v10 = vld [vmem:[%s11489_s27 + $0x21c] sm:$0xf] }
  0xed   : > { %v1523_v24 = vrot.slane %v1521_v13, 4  ;;  %10957 = vmatmul.mubr.msk.bf16.gmra.mxu1 %vm1992_vm1, %v9199_v14  ;;  %v1504_v26 = vor.u32 %v1503_v12, %v1499_v62  ;;  %v11968_v27 = vadd.f32 %v11918_v17, %v10732_v4  ;;  %v10733_v28 = vpop.f32.mrf.mxu0  ;;  %v11970_v30 = vpop.f32.mrf.mxu1  ;;  %v1527_v7 = vshll.u32 %v377_v56, 16  ;;  %v332_v14 = vld [vmem:[%s11489_s27 + $0x220] sm:$0xf] }
  0xee   : > { %v1514_v31 = vor.u32 %v1513_v20, %v1509_v19  ;;  %v11973_v2 = vadd.f32 %v11926_v29, %v2239_v15  ;;  %v1532_v32 = vshrl.u32 %v327_v16, 16  ;;  %v1495_v33 = vrot.slane %v1494_v25, 4 }
  0xef   : > { %v1505_v35 = vrot.slane %v1504_v26, 4  ;;  %v1524_v37 = vor.u32 %v1523_v24, %v1519_v21  ;;  %v1535_v39 = vshll.u32 %v327_v16, 16  ;;  %v2242_v43 = vpop.f32.mrf.mxu0  ;;  %v11976_v44 = vpop.f32.mrf.mxu1  ;;  %v1529_v45 = vrot.slane %v1527_v7, 5 }
  0xf0   : > { %v1515_v17 = vrot.slane %v1514_v31, 4  ;;  %v1534_v46 = vrot.slane %v1532_v32, 4  ;;  %v1541_v48 = vshll.u32 %v328_v23, 16  ;;  %v1500_v50 = vsel %vm11508_vm4, %v1495_v33, %v1499_v62 }
  0xf1   : > { %v1510_v29 = vsel %vm11508_vm4, %v1505_v35, %v1509_v19  ;;  %v1525_v51 = vrot.slane %v1524_v37, 4  ;;  %v1537_v52 = vrot.slane %v1535_v39, 5  ;;  %v11983_v34 = vpop.f32.mrf.mxu1  ;;  %v1545_v57 = vshrl.u32 %v328_v23, 16  ;;  %v10736_v58 = vpop.f32.mrf.mxu0 }
  0xf2   : > { %v9069_v47 = vcombine.low %v1500_v50, %v1510_v29  ;;  %v1520_v54 = vsel %vm11508_vm4, %v1515_v17, %v1519_v21  ;;  %v1543_v55 = vrot.slane %v1541_v48, 5  ;;  %v9200_v60 = vcombine.low %v327_v16, %v328_v23 }
  0xf3   : > { %v1530_v59 = vsel %vm11508_vm4, %v1525_v51, %v1529_v45  ;;  %v11990_v61 = vadd.f32 %v11936_v41, %v10733_v28  ;;  %v1551_v62 = vshll.u32 %v329_v42, 16  ;;  %v11993_v0 = vpop.f32.mrf.mxu1  ;;  %v1547_v4 = vrot.slane %v1545_v57, 4  ;;  %v2255_v9 = vpop.f32.mrf.mxu0  ;;  %v333_v45 = vld [vmem:[%s11489_s27 + $0x224] sm:$0xf] }
  0xf4   : > { %10826 = vmatprep.mubr.msk.bf16.mxu0 %vm1992_vm1, %v9069_v47  ;;  %v9070_v1 = vcombine.low %v1520_v54, %v1530_v59  ;;  %v1555_v6 = vshrl.u32 %v329_v42, 16  ;;  %v1561_v8 = vshll.u32 %v330_v49, 16  ;;  %10960 = vmatprep.mubr.msk.bf16.mxu1 %vm1992_vm1, %v9200_v60  ;;  %v1565_v12 = vshrl.u32 %v330_v49, 16 }
  0xf5   : > { %v1553_v11 = vrot.slane %v1551_v62, 5  ;;  %v9201_v13 = vcombine.low %v329_v42, %v330_v49  ;;  %v11999_v41 = vadd.f32 %v11939_v53, %v2242_v43  ;;  %v12002_v56 = vpop.f32.mrf.mxu1  ;;  %v1538_v19 = vor.u32 %v1537_v52, %v1534_v46  ;;  %v10737_v21 = vpop.f32.mrf.mxu0  ;;  %v334_v46 = vld [vmem:[%s11489_s27 + $0x228] sm:$0xf] }
  0xf6   : > { %10827 = vmatmul.mubr.msk.bf16.gmra.mxu0 %vm1992_vm1, %v9070_v1  ;;  %v1557_v15 = vrot.slane %v1555_v6, 4  ;;  %v1563_v16 = vrot.slane %v1561_v8, 5  ;;  %v1548_v20 = vor.u32 %v1547_v4, %v1543_v55  ;;  %v1567_v23 = vrot.slane %v1565_v12, 4 }
  0xf7   : > { %10961 = vmatmul.mubr.msk.bf16.gmra.mxu1 %vm1992_vm1, %v9201_v13  ;;  %v12007_v24 = vadd.f32 %v11951_v5, %v10736_v58  ;;  %v1571_v25 = vshll.u32 %v378_v63, 16  ;;  %v12010_v53 = vadd.f32 %v11959_v18, %v2255_v9  ;;  %v12012_v26 = vpop.f32.mrf.mxu1  ;;  %v1539_v28 = vrot.slane %v1538_v19, 4  ;;  %v2258_v33 = vpop.f32.mrf.mxu0 }
  0xf8   : > { %v1549_v31 = vrot.slane %v1548_v20, 4  ;;  %v1558_v7 = vor.u32 %v1557_v15, %v1553_v11  ;;  %v1576_v32 = vshrl.u32 %v331_v10, 16  ;;  %v1568_v35 = vor.u32 %v1567_v23, %v1563_v16 }
  0xf9   : > { %v1573_v37 = vrot.slane %v1571_v25, 5  ;;  %v1579_v39 = vshll.u32 %v331_v10, 16  ;;  %v1585_v42 = vshll.u32 %v332_v14, 16  ;;  %v1544_v5 = vsel %vm11508_vm4, %v1539_v28, %v1543_v55  ;;  %v336_v25 = vld [vmem:[%s11489_s27 + $0x234] sm:$0xf] }
  0xfa   : > { %v1554_v43 = vsel %vm11508_vm4, %v1549_v31, %v1553_v11  ;;  %v1559_v18 = vrot.slane %v1558_v7, 4  ;;  %v1578_v17 = vrot.slane %v1576_v32, 4  ;;  %v10740_v48 = vpop.f32.mrf.mxu0  ;;  %v12020_v49 = vpop.f32.mrf.mxu1  ;;  %v1569_v29 = vrot.slane %v1568_v35, 4 }
  0xfb   : > { %v9071_v50 = vcombine.low %v1544_v5, %v1554_v43  ;;  %v1581_v51 = vrot.slane %v1579_v39, 5  ;;  %v1587_v52 = vrot.slane %v1585_v42, 5  ;;  %v1589_v54 = vshrl.u32 %v332_v14, 16 }
  0xfc   : > { %v1564_v47 = vsel %vm11508_vm4, %v1559_v18, %v1563_v16  ;;  %v9202_v55 = vcombine.low %v331_v10, %v332_v14  ;;  %v12025_v57 = vadd.f32 %v11970_v30, %v10737_v21  ;;  %v2271_v58 = vpop.f32.mrf.mxu0  ;;  %v12027_v59 = vpop.f32.mrf.mxu1  ;;  %v1574_v60 = vsel %vm11508_vm4, %v1569_v29, %v1573_v37  ;;  %v379_v30 = vld [vmem:[%s11489_s27 + $0x22c] sm:$0x1]  ;;  %v335_v10 = vld [vmem:[%s11489_s27 + $0x230] sm:$0xf] }
  0xfd   : > { %10830 = vmatprep.mubr.msk.bf16.mxu0 %vm1992_vm1, %v9071_v50  ;;  %v1595_v62 = vshll.u32 %v333_v45, 16  ;;  %v1599_v63 = vshrl.u32 %v333_v45, 16  ;;  %v1605_v1 = vshll.u32 %v334_v46, 16  ;;  %v9072_v4 = vcombine.low %v1564_v47, %v1574_v60 }
  0xfe   : > { %v1591_v6 = vrot.slane %v1589_v54, 4  ;;  %10964 = vmatprep.mubr.msk.bf16.mxu1 %vm1992_vm1, %v9202_v55  ;;  %v1609_v8 = vshrl.u32 %v334_v46, 16  ;;  %v9203_v9 = vcombine.low %v333_v45, %v334_v46  ;;  %v10741_v11 = vpop.f32.mrf.mxu0  ;;  %v12035_v12 = vpop.f32.mrf.mxu1  ;;  %v12038_v16 = vadd.f32 %v11976_v44, %v2258_v33  ;;  %v337_v45 = vld [vmem:[%s11489_s27 + $0x238] sm:$0xf] }
  0xff   : > { %v1597_v13 = vrot.slane %v1595_v62, 5  ;;  %v1601_v14 = vrot.slane %v1599_v63, 4  ;;  %v1607_v15 = vrot.slane %v1605_v1, 5  ;;  %10831 = vmatmul.mubr.msk.bf16.gmra.mxu0 %vm1992_vm1, %v9072_v4  ;;  %v1582_v20 = vor.u32 %v1581_v51, %v1578_v17  ;;  %v338_v51 = vld [vmem:[%s11489_s27 + $0x23c] sm:$0xf] }
 0x100   : > { %v1611_v19 = vrot.slane %v1609_v8, 4  ;;  %10965 = vmatmul.mubr.msk.bf16.gmra.mxu1 %vm1992_vm1, %v9203_v9  ;;  %v1592_v21 = vor.u32 %v1591_v6, %v1587_v52  ;;  %v12043_v23 = vadd.f32 %v11983_v34, %v10740_v48  ;;  %v2274_v28 = vpop.f32.mrf.mxu0  ;;  %v12046_v31 = vpop.f32.mrf.mxu1  ;;  %v1615_v32 = vshll.u32 %v379_v30, 16 }
 0x101   : > { %v1602_v7 = vor.u32 %v1601_v14, %v1597_v13  ;;  %v12049_v44 = vadd.f32 %v11993_v0, %v2271_v58  ;;  %v1620_v33 = vshrl.u32 %v335_v10, 16  ;;  %v1583_v35 = vrot.slane %v1582_v20, 4  ;;  %v380_v14 = vld [vmem:[%s11489_s27 + $0x240] sm:$0x1]  ;;  %v339_v20 = vld [vmem:[%s11489_s27 + $0x244] sm:$0xf] }
 0x102   : > { %v1593_v37 = vrot.slane %v1592_v21, 4  ;;  %v1612_v39 = vor.u32 %v1611_v19, %v1607_v15  ;;  %v1623_v42 = vshll.u32 %v335_v10, 16  ;;  %v12051_v5 = vpop.f32.mrf.mxu1  ;;  %v1617_v43 = vrot.slane %v1615_v32, 5  ;;  %v10744_v46 = vpop.f32.mrf.mxu0 }
 0x103   : > { %v1603_v34 = vrot.slane %v1602_v7, 4  ;;  %v1622_v18 = vrot.slane %v1620_v33, 4  ;;  %v1629_v17 = vshll.u32 %v336_v25, 16  ;;  %v1588_v48 = vsel %vm11508_vm4, %v1583_v35, %v1587_v52 }
 0x104   : > { %v1598_v0 = vsel %vm11508_vm4, %v1593_v37, %v1597_v13  ;;  %v1613_v50 = vrot.slane %v1612_v39, 4  ;;  %v1625_v29 = vrot.slane %v1623_v42, 5  ;;  %v12059_v47 = vpop.f32.mrf.mxu1  ;;  %v1633_v60 = vshrl.u32 %v336_v25, 16  ;;  %v2287_v62 = vpop.f32.mrf.mxu0  ;;  %v340_v42 = vld [vmem:[%s11489_s27 + $0x248] sm:$0xf] }
 0x105   : > { %v9073_v54 = vcombine.low %v1588_v48, %v1598_v0  ;;  %v1608_v55 = vsel %vm11508_vm4, %v1603_v34, %v1607_v15  ;;  %v1631_v58 = vrot.slane %v1629_v17, 5  ;;  %v9204_v52 = vcombine.low %v335_v10, %v336_v25 }
 0x106   : > { %v1618_v63 = vsel %vm11508_vm4, %v1613_v50, %v1617_v43  ;;  %v12066_v1 = vadd.f32 %v12002_v56, %v10741_v11  ;;  %v1643_v4 = vshrl.u32 %v337_v45, 16  ;;  %v12068_v6 = vpop.f32.mrf.mxu1  ;;  %v1635_v9 = vrot.slane %v1633_v60, 4  ;;  %v10745_v15 = vpop.f32.mrf.mxu0 }
 0x107   : > { %10834 = vmatprep.mubr.msk.bf16.mxu0 %vm1992_vm1, %v9073_v54  ;;  %v9074_v8 = vcombine.low %v1608_v55, %v1618_v63  ;;  %v1649_v30 = vshll.u32 %v338_v51, 16  ;;  %v1653_v13 = vshrl.u32 %v338_v51, 16  ;;  %10968 = vmatprep.mubr.msk.bf16.mxu1 %vm1992_vm1, %v9204_v52  ;;  %v9205_v19 = vcombine.low %v337_v45, %v338_v51  ;;  %v342_v63 = vld [vmem:[%s11489_s27 + $0x250] sm:$0xf] }
 0x108   : > { %v12074_v10 = vadd.f32 %v12012_v26, %v2274_v28  ;;  %v1626_v56 = vor.u32 %v1625_v29, %v1622_v18  ;;  %v1639_v11 = vshll.u32 %v337_v45, 16  ;;  %v12077_v21 = vpop.f32.mrf.mxu1  ;;  %v1636_v32 = vor.u32 %v1635_v9, %v1631_v58  ;;  %v2290_v35 = vpop.f32.mrf.mxu0 }
 0x109   : > { %10835 = vmatmul.mubr.msk.bf16.gmra.mxu0 %vm1992_vm1, %v9074_v8  ;;  %v1651_v25 = vrot.slane %v1649_v30, 5  ;;  %v1655_v7 = vrot.slane %v1653_v13, 4  ;;  %v1645_v33 = vrot.slane %v1643_v4, 4  ;;  %10969 = vmatmul.mubr.msk.bf16.gmra.mxu1 %vm1992_vm1, %v9205_v19  ;;  %v12082_v26 = vadd.f32 %v12020_v49, %v10744_v46  ;;  %v341_v49 = vld [vmem:[%s11489_s27 + $0x24c] sm:$0xf] }
 0x10a   : > { %14570 = vst [vmem:[#allocation2_spill] sm:$0xff] %v12074_v10  ;;  %v1627_v37 = vrot.slane %v1626_v56, 4  ;;  %v1641_v39 = vrot.slane %v1639_v11, 5  ;;  %v1659_v28 = vshll.u32 %v380_v14, 16  ;;  %v1637_v34 = vrot.slane %v1636_v32, 4 }
 0x10b   : > { %14571 = vst [vmem:[#allocation3_spill] sm:$0xff] %v12082_v26  ;;  %v1656_v43 = vor.u32 %v1655_v7, %v1651_v25  ;;  %v12086_v18 = vadd.f32 %v12027_v59, %v2287_v62  ;;  %v1664_v17 = vshrl.u32 %v339_v20, 16  ;;  %v10748_v45 = vpop.f32.mrf.mxu0  ;;  %v12088_v48 = vpop.f32.mrf.mxu1  ;;  %v1667_v51 = vshll.u32 %v339_v20, 16 }
 0x10c   : > { %v1632_v0 = vsel %vm11508_vm4, %v1627_v37, %v1631_v58  ;;  %v1646_v50 = vor.u32 %v1645_v33, %v1641_v39  ;;  %v1661_v29 = vrot.slane %v1659_v28, 5  ;;  %v1642_v46 = vsel %vm11508_vm4, %v1637_v34, %v1641_v39  ;;  %v381_v37 = vld [vmem:[%s11489_s27 + $0x254] sm:$0x1] }
 0x10d   : > { %14572 = vst [vmem:[#allocation4_spill] sm:$0xff] %v12086_v18  ;;  %v1657_v54 = vrot.slane %v1656_v43, 4  ;;  %v1666_v55 = vrot.slane %v1664_v17, 4  ;;  %v1673_v60 = vshll.u32 %v340_v42, 16  ;;  %v2303_v59 = vpop.f32.mrf.mxu0  ;;  %v12096_v62 = vpop.f32.mrf.mxu1  ;;  %v9075_v4 = vcombine.low %v1632_v0, %v1642_v46  ;;  %v343_v0 = vld [vmem:[%s11489_s27 + $0x258] sm:$0xf] }
 0x10e   : > { %v1647_v52 = vrot.slane %v1646_v50, 4  ;;  %v1669_v8 = vrot.slane %v1667_v51, 5  ;;  %v1677_v9 = vshrl.u32 %v340_v42, 16  ;;  %v9206_v13 = vcombine.low %v339_v20, %v340_v42 }
 0x10f   : > { %v1662_v58 = vsel %vm11508_vm4, %v1657_v54, %v1661_v29  ;;  %v1675_v30 = vrot.slane %v1673_v60, 5  ;;  %v12101_v14 = vadd.f32 %v12035_v12, %v10745_v15  ;;  %v10749_v19 = vpop.f32.mrf.mxu0  ;;  %v12103_v56 = vpop.f32.mrf.mxu1  ;;  %10838 = vmatprep.mubr.msk.bf16.mxu0 %vm1992_vm1, %v9075_v4  ;;  %v1687_v32 = vshrl.u32 %v341_v49, 16 }
 0x110   : > { %v1652_v11 = vsel %vm11508_vm4, %v1647_v52, %v1651_v25  ;;  %v1679_v7 = vrot.slane %v1677_v9, 4  ;;  %v1693_v33 = vshll.u32 %v342_v63, 16  ;;  %10972 = vmatprep.mubr.msk.bf16.mxu1 %vm1992_vm1, %v9206_v13  ;;  %v1697_v20 = vshrl.u32 %v342_v63, 16 }
 0x111   : > { %14573 = vst [vmem:[#allocation5_spill] sm:$0xff] %v12101_v14  ;;  %v9076_v39 = vcombine.low %v1652_v11, %v1662_v58  ;;  %v9207_v12 = vcombine.low %v341_v49, %v342_v63  ;;  %v12111_v15 = vadd.f32 %v12046_v31, %v2290_v35  ;;  %v2306_v28 = vpop.f32.mrf.mxu0  ;;  %v12113_v42 = vpop.f32.mrf.mxu1  ;;  %v1670_v43 = vor.u32 %v1669_v8, %v1666_v55  ;;  %v344_v31 = vld [vmem:[%s11489_s27 + $0x25c] sm:$0xf] }
 0x112   : > { %v1695_v34 = vrot.slane %v1693_v33, 5  ;;  %v1680_v25 = vor.u32 %v1679_v7, %v1675_v30  ;;  %v1683_v17 = vshll.u32 %v341_v49, 16  ;;  %v1699_v50 = vrot.slane %v1697_v20, 4  ;;  %v345_v7 = vld [vmem:[%s11489_s27 + $0x260] sm:$0xf] }
 0x113   : > { %14574 = vst [vmem:[#allocation6_spill] sm:$0xff] %v12111_v15  ;;  %10839 = vmatmul.mubr.msk.bf16.gmra.mxu0 %vm1992_vm1, %v9076_v39  ;;  %10973 = vmatmul.mubr.msk.bf16.gmra.mxu1 %vm1992_vm1, %v9207_v12  ;;  %v1689_v29 = vrot.slane %v1687_v32, 4  ;;  %v12119_v51 = vadd.f32 %v12051_v5, %v10748_v45  ;;  %v1703_v46 = vshll.u32 %v381_v37, 16  ;;  %v12122_v35 = vpop.f32.mrf.mxu1  ;;  %v1671_v54 = vrot.slane %v1670_v43, 4  ;;  %v10752_v63 = vpop.f32.mrf.mxu0  ;;  %v346_v32 = vld [vmem:[%s11489_s27 + $0x264] sm:$0xf] }
 0x114   : > { %v1681_v55 = vrot.slane %v1680_v25, 4  ;;  %v1685_v60 = vrot.slane %v1683_v17, 5  ;;  %v12125_v49 = vadd.f32 %v12059_v47, %v2303_v59  ;;  %v1700_v52 = vor.u32 %v1699_v50, %v1695_v34 }
 0x115   : > { %14575 = vst [vmem:[#allocation7_spill] sm:$0xff] %v12119_v51  ;;  %v1705_v4 = vrot.slane %v1703_v46, 5  ;;  %v1708_v8 = vshrl.u32 %v343_v0, 16  ;;  %v1711_v9 = vshll.u32 %v343_v0, 16  ;;  %v12127_v58 = vpop.f32.mrf.mxu1  ;;  %v1676_v5 = vsel %vm11508_vm4, %v1671_v54, %v1675_v30  ;;  %v2319_v33 = vpop.f32.mrf.mxu0 }
 0x116   : > { %14576 = vst [vmem:[#allocation8_spill] sm:$0xff] %v12125_v49  ;;  %v1686_v45 = vsel %vm11508_vm4, %v1681_v55, %v1685_v60  ;;  %v1690_v13 = vor.u32 %v1689_v29, %v1685_v60  ;;  %v1717_v11 = vshll.u32 %v344_v31, 16  ;;  %v1701_v59 = vrot.slane %v1700_v52, 4 }
 0x117   : > { %v9077_v47 = vcombine.low %v1676_v5, %v1686_v45  ;;  %v1710_v37 = vrot.slane %v1708_v8, 4  ;;  %v1713_v39 = vrot.slane %v1711_v9, 5  ;;  %v12135_v20 = vpop.f32.mrf.mxu1  ;;  %v1721_v25 = vshrl.u32 %v344_v31, 16  ;;  %v10753_v30 = vpop.f32.mrf.mxu0  ;;  %v382_v8 = vld [vmem:[%s11489_s27 + $0x268] sm:$0x1] }
 0x118   : > { %v1691_v12 = vrot.slane %v1690_v13, 4  ;;  %v1719_v43 = vrot.slane %v1717_v11, 5  ;;  %v9208_v17 = vcombine.low %v343_v0, %v344_v31  ;;  %v1706_v50 = vsel %vm11508_vm4, %v1701_v59, %v1705_v4  ;;  %v347_v45 = vld [vmem:[%s11489_s27 + $0x26c] sm:$0xf]  ;;  %v348_v59 = vld [vmem:[%s11489_s27 + $0x270] sm:$0xf] }
 0x119   : > { %10842 = vmatprep.mubr.msk.bf16.mxu0 %vm1992_vm1, %v9077_v47  ;;  %v12141_v29 = vadd.f32 %v12068_v6, %v10749_v19  ;;  %v1731_v46 = vshrl.u32 %v345_v7, 16  ;;  %v1737_v54 = vshll.u32 %v346_v32, 16  ;;  %v12143_v55 = vpop.f32.mrf.mxu1  ;;  %v1723_v52 = vrot.slane %v1721_v25, 4  ;;  %v2322_v9 = vpop.f32.mrf.mxu0 }
 0x11a   : > { %v1696_v60 = vsel %vm11508_vm4, %v1691_v12, %v1695_v34  ;;  %10976 = vmatprep.mubr.msk.bf16.mxu1 %vm1992_vm1, %v9208_v17  ;;  %v1741_v0 = vshrl.u32 %v346_v32, 16  ;;  %v9209_v31 = vcombine.low %v345_v7, %v346_v32  ;;  %v12150_v6 = vadd.f32 %v12077_v21, %v2306_v28 }
 0x11b   : > { %14577 = vst [vmem:[#allocation9_spill] sm:$0xff] %v12141_v29  ;;  %v9078_v4 = vcombine.low %v1696_v60, %v1706_v50  ;;  %v1739_v5 = vrot.slane %v1737_v54, 5  ;;  %v1714_v19 = vor.u32 %v1713_v39, %v1710_v37  ;;  %v1724_v11 = vor.u32 %v1723_v52, %v1719_v43 }
 0x11c   : > { %14578 = vst [vmem:[#allocation10_spill] sm:$0xff] %v12150_v6  ;;  %v1743_v13 = vrot.slane %v1741_v0, 4  ;;  %10977 = vmatmul.mubr.msk.bf16.gmra.mxu1 %vm1992_vm1, %v9209_v31  ;;  %v1727_v34 = vshll.u32 %v345_v7, 16  ;;  %v1733_v47 = vrot.slane %v1731_v46, 4  ;;  %v10756_v12 = vpop.f32.mrf.mxu0  ;;  %v12155_v25 = vpop.f32.mrf.mxu1  ;;  %v12159_v17 = vadd.f32 %v12088_v48, %v10752_v63 }
 0x11d   : > { %10843 = vmatmul.mubr.msk.bf16.gmra.mxu0 %vm1992_vm1, %v9078_v4  ;;  %v1715_v32 = vrot.slane %v1714_v19, 4  ;;  %v1747_v21 = vshll.u32 %v382_v8, 16  ;;  %v12162_v28 = vadd.f32 %v12096_v62, %v2319_v33  ;;  %v1725_v37 = vrot.slane %v1724_v11, 4  ;;  %v349_v8 = vld [vmem:[%s11489_s27 + $0x274] sm:$0xf] }
 0x11e   : > { %14579 = vst [vmem:[#allocation11_spill] sm:$0xff] %v12159_v17  ;;  %v1729_v39 = vrot.slane %v1727_v34, 5  ;;  %v1744_v7 = vor.u32 %v1743_v13, %v1739_v5  ;;  %v1752_v50 = vshrl.u32 %v347_v45, 16  ;;  %v2335_v46 = vpop.f32.mrf.mxu0  ;;  %v12164_v54 = vpop.f32.mrf.mxu1  ;;  %v1755_v0 = vshll.u32 %v347_v45, 16  ;;  %v350_v4 = vld [vmem:[%s11489_s27 + $0x278] sm:$0xf] }
 0x11f   : > { %14580 = vst [vmem:[#allocation12_spill] sm:$0xff] %v12162_v28  ;;  %v1720_v60 = vsel %vm11508_vm4, %v1715_v32, %v1719_v43  ;;  %v1749_v52 = vrot.slane %v1747_v21, 5  ;;  %v1761_v48 = vshll.u32 %v348_v59, 16  ;;  %v1765_v17 = vshrl.u32 %v348_v59, 16 }
 0x120   : > { %v1730_v63 = vsel %vm11508_vm4, %v1725_v37, %v1729_v39  ;;  %v1734_v31 = vor.u32 %v1733_v47, %v1729_v39  ;;  %v1745_v62 = vrot.slane %v1744_v7, 4  ;;  %v1754_v33 = vrot.slane %v1752_v50, 4  ;;  %v12172_v19 = vpop.f32.mrf.mxu0  ;;  %v12174_v13 = vpop.f32.mrf.mxu1 }
 0x121   : > { %v9079_v11 = vcombine.low %v1720_v60, %v1730_v63  ;;  %v1757_v34 = vrot.slane %v1755_v0, 5  ;;  %v1763_v28 = vrot.slane %v1761_v48, 5  ;;  %v9210_v21 = vcombine.low %v347_v45, %v348_v59  ;;  %v383_v59 = vld [vmem:[%s11489_s27 + $0x27c] sm:$0x1] }
 0x122   : > { %v1735_v43 = vrot.slane %v1734_v31, 4  ;;  %v1750_v32 = vsel %vm11508_vm4, %v1745_v62, %v1749_v52  ;;  %v12179_v47 = vadd.f32 %v12103_v56, %v10753_v30  ;;  %v12181_v37 = vpop.f32.mrf.mxu0  ;;  %v12183_v39 = vpop.f32.mrf.mxu1  ;;  %v1767_v7 = vrot.slane %v1765_v17, 4 }
 0x123   : > { %10846 = vmatprep.mubr.msk.bf16.mxu0 %vm1992_vm1, %v9079_v11  ;;  %v1775_v50 = vshrl.u32 %v349_v8, 16  ;;  %v1781_v60 = vshll.u32 %v350_v4, 16  ;;  %v1785_v0 = vshrl.u32 %v350_v4, 16  ;;  %10980 = vmatprep.mubr.msk.bf16.mxu1 %vm1992_vm1, %v9210_v21  ;;  %v9211_v45 = vcombine.low %v349_v8, %v350_v4  ;;  %v9532_v11 = vld [vmem:[%s11489_s27 + $0x14] sm:$0xf] }
 0x124   : > { %14581 = vst [vmem:[#allocation13_spill] sm:$0xff] %v12179_v47  ;;  %v1740_v48 = vsel %vm11508_vm4, %v1735_v43, %v1739_v5  ;;  %v12190_v56 = vadd.f32 %v12113_v42, %v2322_v9  ;;  %v1758_v30 = vor.u32 %v1757_v34, %v1754_v33  ;;  %v12193_v52 = vpop.f32.mrf.mxu1  ;;  %v1768_v62 = vor.u32 %v1767_v7, %v1763_v28  ;;  %v12196_v47 = vpop.f32.mrf.mxu0  ;;  %v9533_v42 = vld [vmem:[%s11489_s27 + $0x18] sm:$0xf] }
 0x125   : > { %v9080_v63 = vcombine.low %v1740_v48, %v1750_v32  ;;  %v1783_v31 = vrot.slane %v1781_v60, 5  ;;  %v1787_v17 = vrot.slane %v1785_v0, 4  ;;  %10981 = vmatmul.mubr.msk.bf16.gmra.mxu1 %vm1992_vm1, %v9211_v45  ;;  %v1771_v43 = vshll.u32 %v349_v8, 16 }
 0x126   : > { %14582 = vst [vmem:[#allocation14_spill] sm:$0xff] %v12190_v56  ;;  %v1759_v5 = vrot.slane %v1758_v30, 4  ;;  %v1777_v4 = vrot.slane %v1775_v50, 4  ;;  %v12200_v21 = vadd.f32 %v12122_v35, %v10756_v12  ;;  %v12203_v9 = vpop.f32.mrf.mxu1  ;;  %v1769_v33 = vrot.slane %v1768_v62, 4  ;;  %v12209_v60 = vpop.f32.mrf.mxu0  ;;  %v9534_v30 = vld [vmem:[%s11489_s27 + $0x1c] sm:$0xf] }
 0x127   : > { %10847 = vmatmul.mubr.msk.bf16.gmra.mxu0 %vm1992_vm1, %v9080_v63  ;;  %v1788_v34 = vor.u32 %v1787_v17, %v1783_v31  ;;  %v1791_v32 = vshll.u32 %v383_v59, 16  ;;  %v12207_v7 = vadd.f32 %v12127_v58, %v2335_v46  ;;  %v1773_v12 = vrot.slane %v1771_v43, 5  ;;  %v9535_v62 = vld [vmem:[%s11489_s27 + $0x20] sm:$0xf] }
 0x128   : > { %14583 = vst [vmem:[#allocation15_spill] sm:$0xff] %v12200_v21  ;;  %v1764_v35 = vsel %vm11508_vm4, %v1759_v5, %v1763_v28  ;;  %v5273_v8 = vshrl.u32 %v9532_v11, 16  ;;  %v5276_v50 = vshll.u32 %v9532_v11, 16  ;;  %v12213_v0 = vpop.f32.mrf.mxu1  ;;  %v5282_v63 = vshll.u32 %v9533_v42, 16  ;;  %v12216_v17 = vpop.f32.mrf.mxu0 }
 0x129   : > { %14584 = vst [vmem:[#allocation16_spill] sm:$0xff] %v12207_v7  ;;  %v1789_v48 = vrot.slane %v1788_v34, 4  ;;  %v1793_v45 = vrot.slane %v1791_v32, 5  ;;  %v5286_v59 = vshrl.u32 %v9533_v42, 16  ;;  %v1774_v58 = vsel %vm11508_vm4, %v1769_v33, %v1773_v12  ;;  %v9536_v7 = vld [vmem:[%s11489_s27 + $0x24] sm:$0x1] }
 0x12a   : > { %v1778_v46 = vor.u32 %v1777_v4, %v1773_v12  ;;  %v5275_v21 = vrot.slane %v5273_v8, 4  ;;  %v5278_v28 = vrot.slane %v5276_v50, 5  ;;  %v12222_v5 = vpop.f32.mrf.mxu1  ;;  %v9081_v11 = vcombine.low %v1764_v35, %v1774_v58  ;;  %v12226_v56 = vpop.f32.mrf.mxu0 }
 0x12b   : > { %v1794_v43 = vsel %vm11508_vm4, %v1789_v48, %v1793_v45  ;;  %v5284_v34 = vrot.slane %v5282_v63, 5  ;;  %v5288_v32 = vrot.slane %v5286_v59, 4  ;;  %v5292_v29 = vshll.u32 %v9534_v30, 16  ;;  %v11339_v59 = vld [vmem:[%s11489_s27 + $0x14] sm:$0xff]  }
 0x12c   : > { %v1779_v42 = vrot.slane %v1778_v46, 4  ;;  %v5279_v6 = vor.u32 %v5278_v28, %v5275_v21  ;;  %v5296_v33 = vshrl.u32 %v9534_v30, 16  ;;  %10850 = vmatprep.mubr.msk.bf16.mxu0 %vm1992_vm1, %v9081_v11  ;;  %v5302_v12 = vshll.u32 %v9535_v62, 16 }
 0x12d   : > { %v5289_v4 = vor.u32 %v5288_v32, %v5284_v34  ;;  %v5306_v8 = vshrl.u32 %v9535_v62, 16  ;;  %v5312_v50 = vshll.u32 %v9536_v7, 16  ;;  %v12229_v35 = vpop.f32.mrf.mxu0  ;;  %v12231_v58 = vpop.f32.mrf.mxu1  ;;  %v5294_v63 = vrot.slane %v5292_v29, 5  ;;  %v9537_v32 = vld [vmem:[%s11489_s27 + $0x28] sm:$0xf] }
 0x12e   : > { %v1784_v48 = vsel %vm11508_vm4, %v1779_v42, %v1783_v31  ;;  %v5280_v45 = vrot.slane %v5279_v6, 4  ;;  %v5298_v21 = vrot.slane %v5296_v33, 4  ;;  %v5304_v28 = vrot.slane %v5302_v12, 5  ;;  %v9538_v6 = vld [vmem:[%s11489_s27 + $0x2c] sm:$0xf] }
 0x12f   : > { %v9082_v30 = vcombine.low %v1784_v48, %v1794_v43  ;;  %v5290_v46 = vrot.slane %v5289_v4, 4  ;;  %v5308_v11 = vrot.slane %v5306_v8, 4  ;;  %v12237_v62 = vpop.f32.mrf.mxu0  ;;  %v12239_v7 = vpop.f32.mrf.mxu1  ;;  %v5314_v31 = vrot.slane %v5312_v50, 5  ;;  %v9539_v4 = vld [vmem:[%s11489_s27 + $0x30] sm:$0xf] }
 0x130   : > { %v5285_v49 = vsel %vm11508_vm4, %v5280_v45, %v5284_v34  ;;  %v5299_v51 = vor.u32 %v5298_v21, %v5294_v63  ;;  %v12245_v29 = vadd.f32 %v12135_v20, %v12172_v19  ;;  %v12253_v33 = vadd.f32 %v12143_v55, %v12181_v37 }
 0x131   : > { %10851 = vmatmul.mubr.msk.bf16.gmra.mxu0 %vm1992_vm1, %v9082_v30  ;;  %v5295_v43 = vsel %vm11508_vm4, %v5290_v46, %v5294_v63  ;;  %v5309_v42 = vor.u32 %v5308_v11, %v5304_v28  ;;  %v12257_v34 = vadd.f32 %v12155_v25, %v12196_v47  ;;  %v12260_v12 = vpop.f32.mrf.mxu0  ;;  %v12262_v20 = vpop.f32.mrf.mxu1  ;;  %v12267_v50 = vadd.f32 %v12164_v54, %v12209_v60  ;;  %v9540_v60 = vld [vmem:[%s11489_s27 + $0x34] sm:$0xf]  ;;  %v11340_v30 = vld [vmem:[%s11489_s27 + $0x1c] sm:$0xff]  }
 0x132   : > { %14585 = vst [vmem:[#allocation17_spill] sm:$0xff] %v12245_v29  ;;  %14586 = vst [vmem:[#allocation18_spill] sm:$0xff] %v12253_v33  ;;  %v5300_v19 = vrot.slane %v5299_v51, 4  ;;  %v9692_v8 = vcombine.low %v5285_v49, %v5295_v43  ;;  %10986 = vmatprep.mubr.msk.bf16.mxu0 %vm1992_vm1, %v11339_v59  ;;  %v5317_v55 = vshrl.u32 %v9537_v32, 16  ;;  %v5320_v48 = vshll.u32 %v9537_v32, 16 }
 0x133   : > { %14587 = vst [vmem:[#allocation19_spill] sm:$0xff] %v12257_v34  ;;  %14588 = vst [vmem:[#allocation20_spill] sm:$0xff] %v12267_v50  ;;  %v5310_v37 = vrot.slane %v5309_v42, 4  ;;  %v5326_v25 = vshll.u32 %v9538_v6, 16  ;;  %v5330_v47 = vshrl.u32 %v9538_v6, 16  ;;  %v12269_v45 = vpop.f32.mrf.mxu0  ;;  %v12271_v63 = vpop.f32.mrf.mxu1  ;;  %v5336_v21 = vshll.u32 %v9539_v4, 16 }
 0x134   : > { %v5305_v51 = vsel %vm11508_vm4, %v5300_v19, %v5304_v28  ;;  %11116 = vmatprep.mubr.msk.bf16.mxu1 %vm1992_vm1, %v9692_v8  ;;  %v5319_v49 = vrot.slane %v5317_v55, 4  ;;  %v5340_v54 = vshrl.u32 %v9539_v4, 16  ;;  %v5322_v46 = vrot.slane %v5320_v48, 5  ;;  %v9541_v6 = vld [vmem:[%s11489_s27 + $0x38] sm:$0x1]  ;;  %v11341_v4 = vld [vmem:[%s11489_s27 + $0x28] sm:$0xff]  }
 0x135   : > { %v5315_v59 = vsel %vm11508_vm4, %v5310_v37, %v5314_v31  ;;  %v5328_v11 = vrot.slane %v5326_v25, 5  ;;  %v5332_v32 = vrot.slane %v5330_v47, 4  ;;  %v12281_v43 = vpop.f32.mrf.mxu1  ;;  %v5338_v28 = vrot.slane %v5336_v21, 5  ;;  %v12288_v55 = vpop.f32.mrf.mxu0  ;;  %v9542_v25 = vld [vmem:[%s11489_s27 + $0x3c] sm:$0xf] }
 0x136   : > { %v9693_v42 = vcombine.low %v5305_v51, %v5315_v59  ;;  %v5342_v19 = vrot.slane %v5340_v54, 4  ;;  %v12285_v8 = vadd.f32 %v12174_v13, %v12216_v17  ;;  %v5323_v50 = vor.u32 %v5322_v46, %v5319_v49 }
 0x137   : > { %v5333_v31 = vor.u32 %v5332_v32, %v5328_v11  ;;  %v5346_v37 = vshll.u32 %v9540_v60, 16  ;;  %v5350_v48 = vshrl.u32 %v9540_v60, 16  ;;  %v12291_v47 = vpop.f32.mrf.mxu1  ;;  %v5356_v21 = vshll.u32 %v9541_v6, 16  ;;  %v2383_v49 = vpop.f32.mrf.mxu0  ;;  %v9543_v32 = vld [vmem:[%s11489_s27 + $0x40] sm:$0xf] }
 0x138   : > { %14589 = vst [vmem:[#allocation21_spill] sm:$0xff] %v12285_v8  ;;  %11117 = vmatmul.mubr.msk.bf16.vlgmr.msra.gmra.mxu1 %vm1992_vm1, %v9693_v42  ;;  %v5343_v51 = vor.u32 %v5342_v19, %v5338_v28  ;;  %v12296_v13 = vadd.f32 %v12183_v39, %v12226_v56  ;;  %v12300_v17 = vadd.f32 %v12193_v52, %v12229_v35  ;;  %v5324_v54 = vrot.slane %v5323_v50, 4  ;;  %v9544_v56 = vld [vmem:[%s11489_s27 + $0x44] sm:$0xf] }
 0x139   : > { %10987 = vmatmul.mubr.msk.bf16.vlgmr.msra.gmra.mxu0 %vm1992_vm1, %v11340_v30  ;;  %v5334_v60 = vrot.slane %v5333_v31, 4  ;;  %v5348_v59 = vrot.slane %v5346_v37, 5  ;;  %v5352_v46 = vrot.slane %v5350_v48, 4  ;;  %v12304_v42 = vpop.f32.mrf.mxu1  ;;  %v5358_v19 = vrot.slane %v5356_v21, 5  ;;  %v12312_v35 = vpop.f32.mrf.mxu0  ;;  %v9545_v48 = vld [vmem:[%s11489_s27 + $0x48] sm:$0xf] }
 0x13a   : > { %14590 = vst [vmem:[#allocation22_spill] sm:$0xff] %v12296_v13  ;;  %14591 = vst [vmem:[#allocation23_spill] sm:$0xff] %v12300_v17  ;;  %v5344_v6 = vrot.slane %v5343_v51, 4  ;;  %10990 = vmatprep.mubr.msk.bf16.mxu0 %vm1992_vm1, %v11341_v4  ;;  %v12309_v39 = vadd.f32 %v12203_v9, %v12237_v62  ;;  %v5361_v52 = vshrl.u32 %v9542_v25, 16  ;;  %v5329_v50 = vsel %vm11508_vm4, %v5324_v54, %v5328_v11  ;;  %v11342_v11 = vld [vmem:[%s11489_s27 + $0x30] sm:$0xff]  }
 0x13b   : > { %v5339_v30 = vsel %vm11508_vm4, %v5334_v60, %v5338_v28  ;;  %v5353_v31 = vor.u32 %v5352_v46, %v5348_v59  ;;  %v5364_v37 = vshll.u32 %v9542_v25, 16  ;;  %v12319_v4 = vpop.f32.mrf.mxu1  ;;  %v5370_v21 = vshll.u32 %v9543_v32, 16 }
 0x13c   : > { %14592 = vst [vmem:[#allocation24_spill] sm:$0xff] %v12309_v39  ;;  %v9694_v51 = vcombine.low %v5329_v50, %v5339_v30  ;;  %v5349_v9 = vsel %vm11508_vm4, %v5344_v6, %v5348_v59  ;;  %v5363_v62 = vrot.slane %v5361_v52, 4  ;;  %v12323_v39 = vpop.f32.mrf.mxu0  ;;  %v5374_v13 = vshrl.u32 %v9543_v32, 16  ;;  %v9546_v50 = vld [vmem:[%s11489_s27 + $0x4c] sm:$0x1]  ;;  %v11343_v6 = vld [vmem:[%s11489_s27 + $0x3c] sm:$0xff]  }
 0x13d   : > { %v5354_v17 = vrot.slane %v5353_v31, 4  ;;  %v5366_v54 = vrot.slane %v5364_v37, 5  ;;  %v5380_v28 = vshll.u32 %v9544_v56, 16  ;;  %v5372_v25 = vrot.slane %v5370_v21, 5 }
 0x13e   : > { %11120 = vmatprep.mubr.msk.bf16.mxu1 %vm1992_vm1, %v9694_v51  ;;  %v5384_v60 = vshrl.u32 %v9544_v56, 16  ;;  %v12329_v46 = vadd.f32 %v12213_v0, %v12260_v12  ;;  %v5390_v59 = vshll.u32 %v9545_v48, 16  ;;  %v12333_v52 = vpop.f32.mrf.mxu0  ;;  %v12335_v30 = vpop.f32.mrf.mxu1  ;;  %v5376_v37 = vrot.slane %v5374_v13, 4  ;;  %v9547_v0 = vld [vmem:[%s11489_s27 + $0x50] sm:$0xf] }
 0x13f   : > { %v5359_v32 = vsel %vm11508_vm4, %v5354_v17, %v5358_v19  ;;  %v5367_v31 = vor.u32 %v5366_v54, %v5363_v62  ;;  %v5382_v51 = vrot.slane %v5380_v28, 5  ;;  %v5394_v34 = vshrl.u32 %v9545_v48, 16  ;;  %v9548_v13 = vld [vmem:[%s11489_s27 + $0x54] sm:$0xf] }
 0x140   : > { %14593 = vst [vmem:[#allocation25_spill] sm:$0xff] %v12329_v46  ;;  %v9695_v21 = vcombine.low %v5349_v9, %v5359_v32  ;;  %v5386_v56 = vrot.slane %v5384_v60, 4  ;;  %v5392_v8 = vrot.slane %v5390_v59, 5  ;;  %v12340_v12 = vpop.f32.mrf.mxu0  ;;  %v12342_v46 = vpop.f32.mrf.mxu1  ;;  %v5377_v29 = vor.u32 %v5376_v37, %v5372_v25  ;;  %v11344_v32 = vld [vmem:[%s11489_s27 + $0x44] sm:$0xff]  }
 0x141   : > { %10991 = vmatmul.mubr.msk.bf16.gmra.mxu0 %vm1992_vm1, %v11342_v11  ;;  %v5368_v33 = vrot.slane %v5367_v31, 4  ;;  %v5400_v15 = vshll.u32 %v9546_v50, 16  ;;  %v12347_v17 = vadd.f32 %v12222_v5, %v12269_v45  ;;  %v5396_v48 = vrot.slane %v5394_v34, 4  ;;  %v9549_v11 = vld [vmem:[%s11489_s27 + $0x58] sm:$0xf] }
 0x142   : > { %11121 = vmatmul.mubr.msk.bf16.gmra.mxu1 %vm1992_vm1, %v9695_v21  ;;  %v5387_v19 = vor.u32 %v5386_v56, %v5382_v51  ;;  %10994 = vmatprep.mubr.msk.bf16.mxu0 %vm1992_vm1, %v11343_v6  ;;  %v12354_v9 = vadd.f32 %v12231_v58, %v12288_v55  ;;  %v12357_v62 = vadd.f32 %v12239_v7, %v2383_v49  ;;  %v12360_v54 = vpop.f32.mrf.mxu0  ;;  %v12362_v5 = vpop.f32.mrf.mxu1  ;;  %v5378_v34 = vrot.slane %v5377_v29, 4  ;;  %v9550_v29 = vld [vmem:[%s11489_s27 + $0x5c] sm:$0xf] }
 0x143   : > { %14594 = vst [vmem:[#allocation26_spill] sm:$0xff] %v12347_v17  ;;  %v5373_v45 = vsel %vm11508_vm4, %v5368_v33, %v5372_v25  ;;  %v5402_v28 = vrot.slane %v5400_v15, 5  ;;  %v5405_v60 = vshrl.u32 %v9547_v0, 16  ;;  %v5397_v58 = vor.u32 %v5396_v48, %v5392_v8 }
 0x144   : > { %14595 = vst [vmem:[#allocation27_spill] sm:$0xff] %v12354_v9  ;;  %14596 = vst [vmem:[#allocation28_spill] sm:$0xff] %v12357_v62  ;;  %v5388_v50 = vrot.slane %v5387_v19, 4  ;;  %v5408_v55 = vshll.u32 %v9547_v0, 16  ;;  %v5414_v59 = vshll.u32 %v9548_v13, 16  ;;  %v12366_v6 = vpop.f32.mrf.mxu0  ;;  %v12368_v7 = vpop.f32.mrf.mxu1  ;;  %v5383_v49 = vsel %vm11508_vm4, %v5378_v34, %v5382_v51  ;;  %v11345_v0 = vld [vmem:[%s11489_s27 + $0x50] sm:$0xff]  }
 0x145   : > { %v5407_v31 = vrot.slane %v5405_v60, 4  ;;  %v5418_v37 = vshrl.u32 %v9548_v13, 16  ;;  %v5424_v33 = vshll.u32 %v9549_v11, 16  ;;  %v9696_v15 = vcombine.low %v5373_v45, %v5383_v49  ;;  %v9551_v34 = vld [vmem:[%s11489_s27 + $0x60] sm:$0x1] }
 0x146   : > { %v5393_v25 = vsel %vm11508_vm4, %v5388_v50, %v5392_v8  ;;  %v5398_v21 = vrot.slane %v5397_v58, 4  ;;  %v5410_v56 = vrot.slane %v5408_v55, 5  ;;  %v12377_v19 = vpop.f32.mrf.mxu1  ;;  %v5416_v48 = vrot.slane %v5414_v59, 5  ;;  %v12380_v17 = vpop.f32.mrf.mxu0  ;;  %v9552_v49 = vld [vmem:[%s11489_s27 + $0x64] sm:$0xf] }
 0x147   : > { %v5420_v62 = vrot.slane %v5418_v37, 4  ;;  %v5426_v9 = vrot.slane %v5424_v33, 5  ;;  %v5428_v51 = vshrl.u32 %v9549_v11, 16  ;;  %11124 = vmatprep.mubr.msk.bf16.mxu1 %vm1992_vm1, %v9696_v15  ;;  %v12387_v8 = vadd.f32 %v12262_v20, %v12312_v35 }
 0x148   : > { %v5403_v13 = vsel %vm11508_vm4, %v5398_v21, %v5402_v28  ;;  %v5411_v45 = vor.u32 %v5410_v56, %v5407_v31  ;;  %v5434_v60 = vshll.u32 %v9550_v29, 16  ;;  %v12389_v50 = vpop.f32.mrf.mxu1  ;;  %v5438_v59 = vshrl.u32 %v9550_v29, 16  ;;  %v12393_v37 = vpop.f32.mrf.mxu0 }
 0x149   : > { %14597 = vst [vmem:[#allocation29_spill] sm:$0xff] %v12387_v8  ;;  %v9697_v58 = vcombine.low %v5393_v25, %v5403_v13  ;;  %10995 = vmatmul.mubr.msk.bf16.gmra.mxu0 %vm1992_vm1, %v11344_v32  ;;  %v5421_v11 = vor.u32 %v5420_v62, %v5416_v48  ;;  %v5430_v55 = vrot.slane %v5428_v51, 4  ;;  %v5444_v31 = vshll.u32 %v9551_v34, 16  ;;  %v9553_v25 = vld [vmem:[%s11489_s27 + $0x68] sm:$0xf] }
 0x14a   : > { %v5412_v33 = vrot.slane %v5411_v45, 4  ;;  %v5436_v28 = vrot.slane %v5434_v60, 5  ;;  %v12397_v20 = vadd.f32 %v12271_v63, %v12323_v39  ;;  %10998 = vmatprep.mubr.msk.bf16.mxu0 %vm1992_vm1, %v11345_v0  ;;  %v12400_v35 = vpop.f32.mrf.mxu1  ;;  %v5440_v29 = vrot.slane %v5438_v59, 4  ;;  %v12408_v21 = vpop.f32.mrf.mxu0  ;;  %v9554_v0 = vld [vmem:[%s11489_s27 + $0x6c] sm:$0xf]  ;;  %v11346_v45 = vld [vmem:[%s11489_s27 + $0x58] sm:$0xff]  }
 0x14b   : > { %11125 = vmatmul.mubr.msk.bf16.gmra.mxu1 %vm1992_vm1, %v9697_v58  ;;  %v5422_v62 = vrot.slane %v5421_v11, 4  ;;  %v5431_v32 = vor.u32 %v5430_v55, %v5426_v9  ;;  %v12405_v15 = vadd.f32 %v12281_v43, %v12333_v52  ;;  %v5446_v39 = vrot.slane %v5444_v31, 5 }
 0x14c   : > { %14598 = vst [vmem:[#allocation30_spill] sm:$0xff] %v12397_v20  ;;  %v5417_v63 = vsel %vm11508_vm4, %v5412_v33, %v5416_v48  ;;  %v12414_v56 = vadd.f32 %v12291_v47, %v12340_v12  ;;  %v5449_v51 = vshrl.u32 %v9552_v49, 16  ;;  %v12417_v34 = vpop.f32.mrf.mxu1  ;;  %v5441_v13 = vor.u32 %v5440_v29, %v5436_v28  ;;  %v12422_v58 = vpop.f32.mrf.mxu0  ;;  %v9555_v47 = vld [vmem:[%s11489_s27 + $0x70] sm:$0xf]  ;;  %v11347_v12 = vld [vmem:[%s11489_s27 + $0x64] sm:$0xff]  }
 0x14d   : > { %14599 = vst [vmem:[#allocation31_spill] sm:$0xff] %v12405_v15  ;;  %v5427_v43 = vsel %vm11508_vm4, %v5422_v62, %v5426_v9  ;;  %v5432_v52 = vrot.slane %v5431_v32, 4  ;;  %v5452_v60 = vshll.u32 %v9552_v49, 16  ;;  %v5458_v55 = vshll.u32 %v9553_v25, 16 }
 0x14e   : > { %14600 = vst [vmem:[#allocation32_spill] sm:$0xff] %v12414_v56  ;;  %v9698_v48 = vcombine.low %v5417_v63, %v5427_v43  ;;  %v5451_v11 = vrot.slane %v5449_v51, 4  ;;  %v5462_v59 = vshrl.u32 %v9553_v25, 16  ;;  %v5442_v31 = vrot.slane %v5441_v13, 4  ;;  %v9556_v63 = vld [vmem:[%s11489_s27 + $0x74] sm:$0x1] }
 0x14f   : > { %v5437_v33 = vsel %vm11508_vm4, %v5432_v52, %v5436_v28  ;;  %v5454_v56 = vrot.slane %v5452_v60, 5  ;;  %v5468_v15 = vshll.u32 %v9554_v0, 16  ;;  %v12428_v9 = vpop.f32.mrf.mxu0  ;;  %v12430_v62 = vpop.f32.mrf.mxu1  ;;  %v5460_v49 = vrot.slane %v5458_v55, 5 }
 0x150   : > { %11128 = vmatprep.mubr.msk.bf16.mxu1 %vm1992_vm1, %v9698_v48  ;;  %v5464_v32 = vrot.slane %v5462_v59, 4  ;;  %v5472_v29 = vshrl.u32 %v9554_v0, 16  ;;  %v12435_v25 = vadd.f32 %v12304_v42, %v12360_v54  ;;  %v5447_v28 = vsel %vm11508_vm4, %v5442_v31, %v5446_v39  ;;  %v9557_v42 = vld [vmem:[%s11489_s27 + $0x78] sm:$0xf] }
 0x151   : > { %10999 = vmatmul.mubr.msk.bf16.gmra.mxu0 %vm1992_vm1, %v11346_v45  ;;  %v5455_v51 = vor.u32 %v5454_v56, %v5451_v11  ;;  %v5470_v43 = vrot.slane %v5468_v15, 5  ;;  %v5478_v52 = vshll.u32 %v9555_v47, 16  ;;  %v12441_v13 = vpop.f32.mrf.mxu0  ;;  %v12443_v60 = vpop.f32.mrf.mxu1  ;;  %v9699_v48 = vcombine.low %v5437_v33, %v5447_v28  ;;  %v9559_v28 = vld [vmem:[%s11489_s27 + $0x80] sm:$0xf] }
 0x152   : > { %14601 = vst [vmem:[#allocation33_spill] sm:$0xff] %v12435_v25  ;;  %v5465_v55 = vor.u32 %v5464_v32, %v5460_v49  ;;  %v5474_v0 = vrot.slane %v5472_v29, 4  ;;  %v5482_v59 = vshrl.u32 %v9555_v47, 16  ;;  %11002 = vmatprep.mubr.msk.bf16.mxu0 %vm1992_vm1, %v11347_v12  ;;  %v5488_v45 = vshll.u32 %v9556_v63, 16  ;;  %v9558_v32 = vld [vmem:[%s11489_s27 + $0x7c] sm:$0xf] }
 0x153   : > { %v5456_v54 = vrot.slane %v5455_v51, 4  ;;  %v5480_v39 = vrot.slane %v5478_v52, 5  ;;  %v12449_v15 = vadd.f32 %v12319_v4, %v12366_v6  ;;  %v12451_v56 = vpop.f32.mrf.mxu0  ;;  %v12453_v11 = vpop.f32.mrf.mxu1  ;;  %11129 = vmatmul.mubr.msk.bf16.gmra.mxu1 %vm1992_vm1, %v9699_v48  ;;  %v12458_v31 = vadd.f32 %v12335_v30, %v12380_v17  ;;  %v11348_v6 = vld [vmem:[%s11489_s27 + $0x6c] sm:$0xff]  }
 0x154   : > { %v5466_v33 = vrot.slane %v5465_v55, 4  ;;  %v5475_v47 = vor.u32 %v5474_v0, %v5470_v43  ;;  %v5484_v12 = vrot.slane %v5482_v59, 4  ;;  %v5490_v4 = vrot.slane %v5488_v45, 5 }
 0x155   : > { %14602 = vst [vmem:[#allocation34_spill] sm:$0xff] %v12449_v15  ;;  %14603 = vst [vmem:[#allocation35_spill] sm:$0xff] %v12458_v31  ;;  %v5461_v29 = vsel %vm11508_vm4, %v5456_v54, %v5460_v49  ;;  %v12466_v63 = vadd.f32 %v12342_v46, %v12393_v37  ;;  %v5493_v51 = vshrl.u32 %v9557_v42, 16  ;;  %v12469_v52 = vpop.f32.mrf.mxu0  ;;  %v12471_v48 = vpop.f32.mrf.mxu1  ;;  %v5496_v0 = vshll.u32 %v9557_v42, 16  ;;  %v11349_v49 = vld [vmem:[%s11489_s27 + $0x78] sm:$0xff]  }
 0x156   : > { %v5471_v30 = vsel %vm11508_vm4, %v5466_v33, %v5470_v43  ;;  %v5476_v17 = vrot.slane %v5475_v47, 4  ;;  %v5485_v55 = vor.u32 %v5484_v12, %v5480_v39  ;;  %v5502_v45 = vshll.u32 %v9558_v32, 16  ;;  %v9560_v46 = vld [vmem:[%s11489_s27 + $0x84] sm:$0xf]  ;;  %v9561_v12 = vld [vmem:[%s11489_s27 + $0x88] sm:$0x1] }
 0x157   : > { %14604 = vst [vmem:[#allocation36_spill] sm:$0xff] %v12466_v63  ;;  %v9700_v59 = vcombine.low %v5461_v29, %v5471_v30  ;;  %v5495_v54 = vrot.slane %v5493_v51, 4  ;;  %v5506_v31 = vshrl.u32 %v9558_v32, 16  ;;  %v12477_v37 = vpop.f32.mrf.mxu1  ;;  %v5498_v25 = vrot.slane %v5496_v0, 5  ;;  %v12481_v8 = vpop.f32.mrf.mxu0 }
 0x158   : > { %v5481_v63 = vsel %vm11508_vm4, %v5476_v17, %v5480_v39  ;;  %v5486_v15 = vrot.slane %v5485_v55, 4  ;;  %v5512_v20 = vshll.u32 %v9559_v28, 16  ;;  %v5504_v43 = vrot.slane %v5502_v45, 5  ;;  %v11350_v45 = vld [vmem:[%s11489_s27 + $0x80] sm:$0xff]  }
 0x159   : > { %11132 = vmatprep.mubr.msk.bf16.mxu1 %vm1992_vm1, %v9700_v59  ;;  %11003 = vmatmul.mubr.msk.bf16.gmra.mxu0 %vm1992_vm1, %v11348_v6  ;;  %v5508_v42 = vrot.slane %v5506_v31, 4  ;;  %v5516_v33 = vshrl.u32 %v9559_v28, 16  ;;  %v12487_v47 = vadd.f32 %v12362_v5, %v12408_v21  ;;  %v12490_v32 = vpop.f32.mrf.mxu1  ;;  %v5499_v29 = vor.u32 %v5498_v25, %v5495_v54  ;;  %v12495_v6 = vpop.f32.mrf.mxu0  ;;  %v9562_v21 = vld [vmem:[%s11489_s27 + $0x8c] sm:$0xf] }
 0x15a   : > { %v5491_v39 = vsel %vm11508_vm4, %v5486_v15, %v5490_v4  ;;  %v5514_v51 = vrot.slane %v5512_v20, 5  ;;  %v5522_v30 = vshll.u32 %v9560_v46, 16  ;;  %11006 = vmatprep.mubr.msk.bf16.mxu0 %vm1992_vm1, %v11349_v49  ;;  %v5526_v5 = vshrl.u32 %v9560_v46, 16  ;;  %v9563_v46 = vld [vmem:[%s11489_s27 + $0x90] sm:$0xf] }
 0x15b   : > { %14605 = vst [vmem:[#allocation37_spill] sm:$0xff] %v12487_v47  ;;  %v9701_v17 = vcombine.low %v5481_v63, %v5491_v39  ;;  %v5509_v31 = vor.u32 %v5508_v42, %v5504_v43  ;;  %v5518_v28 = vrot.slane %v5516_v33, 4  ;;  %v12498_v55 = vpop.f32.mrf.mxu1  ;;  %v5500_v0 = vrot.slane %v5499_v29, 4  ;;  %v12504_v25 = vpop.f32.mrf.mxu0  ;;  %v11351_v29 = vld [vmem:[%s11489_s27 + $0x8c] sm:$0xff]  }
 0x15c   : > { %v5524_v59 = vrot.slane %v5522_v30, 5  ;;  %v5532_v15 = vshll.u32 %v9561_v12, 16  ;;  %v12502_v20 = vadd.f32 %v12368_v7, %v12422_v58  ;;  %v5528_v49 = vrot.slane %v5526_v5, 4  ;;  %v9564_v12 = vld [vmem:[%s11489_s27 + $0x94] sm:$0xf] }
 0x15d   : > { %11133 = vmatmul.mubr.msk.bf16.gmra.mxu1 %vm1992_vm1, %v9701_v17  ;;  %v5510_v4 = vrot.slane %v5509_v31, 4  ;;  %v5519_v63 = vor.u32 %v5518_v28, %v5514_v51  ;;  %v12509_v54 = vadd.f32 %v12377_v19, %v12428_v9  ;;  %v12513_v42 = vpop.f32.mrf.mxu1  ;;  %v5505_v7 = vsel %vm11508_vm4, %v5500_v0, %v5504_v43  ;;  %v12523_v30 = vpop.f32.mrf.mxu0 }
 0x15e   : > { %14606 = vst [vmem:[#allocation38_spill] sm:$0xff] %v12502_v20  ;;  %v5534_v58 = vrot.slane %v5532_v15, 5  ;;  %v12519_v33 = vadd.f32 %v12389_v50, %v12441_v13  ;;  %v5537_v39 = vshrl.u32 %v9562_v21, 16  ;;  %v5529_v17 = vor.u32 %v5528_v49, %v5524_v59  ;;  %v9565_v15 = vld [vmem:[%s11489_s27 + $0x98] sm:$0xf] }
 0x15f   : > { %14607 = vst [vmem:[#allocation39_spill] sm:$0xff] %v12509_v54  ;;  %v5515_v19 = vsel %vm11508_vm4, %v5510_v4, %v5514_v51  ;;  %v5520_v9 = vrot.slane %v5519_v63, 4  ;;  %v5540_v31 = vshll.u32 %v9562_v21, 16  ;;  %v5546_v43 = vshll.u32 %v9563_v46, 16 }
 0x160   : > { %14608 = vst [vmem:[#allocation40_spill] sm:$0xff] %v12519_v33  ;;  %v9702_v28 = vcombine.low %v5505_v7, %v5515_v19  ;;  %v5539_v5 = vrot.slane %v5537_v39, 4  ;;  %v5550_v0 = vshrl.u32 %v9563_v46, 16  ;;  %v12528_v54 = vpop.f32.mrf.mxu0  ;;  %v12530_v50 = vpop.f32.mrf.mxu1  ;;  %v5530_v33 = vrot.slane %v5529_v17, 4  ;;  %v9566_v7 = vld [vmem:[%s11489_s27 + $0x9c] sm:$0x1] }
 0x161   : > { %v5525_v13 = vsel %vm11508_vm4, %v5520_v9, %v5524_v59  ;;  %11007 = vmatmul.mubr.msk.bf16.gmra.mxu0 %vm1992_vm1, %v11350_v45  ;;  %v5542_v51 = vrot.slane %v5540_v31, 5  ;;  %v5556_v4 = vshll.u32 %v9564_v12, 16  ;;  %v5548_v21 = vrot.slane %v5546_v43, 5 }
 0x162   : > { %11136 = vmatprep.mubr.msk.bf16.mxu1 %vm1992_vm1, %v9702_v28  ;;  %v5552_v63 = vrot.slane %v5550_v0, 4  ;;  %v5560_v49 = vshrl.u32 %v9564_v12, 16  ;;  %v12538_v46 = vadd.f32 %v12400_v35, %v12451_v56  ;;  %11010 = vmatprep.mubr.msk.bf16.mxu0 %vm1992_vm1, %v11351_v29  ;;  %v12542_v39 = vpop.f32.mrf.mxu0  ;;  %v12544_v59 = vpop.f32.mrf.mxu1  ;;  %v5535_v45 = vsel %vm11508_vm4, %v5530_v33, %v5534_v58  ;;  %v9567_v56 = vld [vmem:[%s11489_s27 + $0xa0] sm:$0xf]  ;;  %v11352_v33 = vld [vmem:[%s11489_s27 + $0x94] sm:$0xff]  }
 0x163   : > { %v5543_v19 = vor.u32 %v5542_v51, %v5539_v5  ;;  %v5558_v9 = vrot.slane %v5556_v4, 5  ;;  %v5566_v17 = vshll.u32 %v9565_v15, 16  ;;  %v9703_v31 = vcombine.low %v5525_v13, %v5535_v45  ;;  %v9568_v4 = vld [vmem:[%s11489_s27 + $0xa4] sm:$0xf] }
 0x164   : > { %14609 = vst [vmem:[#allocation41_spill] sm:$0xff] %v12538_v46  ;;  %v5553_v12 = vor.u32 %v5552_v63, %v5548_v21  ;;  %v5562_v28 = vrot.slane %v5560_v49, 4  ;;  %v5570_v35 = vshrl.u32 %v9565_v15, 16  ;;  %v12549_v43 = vpop.f32.mrf.mxu0  ;;  %v12551_v29 = vpop.f32.mrf.mxu1  ;;  %v5576_v20 = vshll.u32 %v9566_v7, 16  ;;  %v11353_v63 = vld [vmem:[%s11489_s27 + $0xa0] sm:$0xff]  }
 0x165   : > { %v5544_v0 = vrot.slane %v5543_v19, 4  ;;  %v5568_v46 = vrot.slane %v5566_v17, 5  ;;  %v12555_v58 = vadd.f32 %v12417_v34, %v12469_v52  ;;  %11137 = vmatmul.mubr.msk.bf16.gmra.mxu1 %vm1992_vm1, %v9703_v31  ;;  %v12561_v15 = vadd.f32 %v12430_v62, %v12481_v8  ;;  %v9569_v19 = vld [vmem:[%s11489_s27 + $0xa8] sm:$0xf] }
 0x166   : > { %v5554_v5 = vrot.slane %v5553_v12, 4  ;;  %v5563_v13 = vor.u32 %v5562_v28, %v5558_v9  ;;  %v5572_v51 = vrot.slane %v5570_v35, 4  ;;  %v12565_v49 = vpop.f32.mrf.mxu0  ;;  %v12567_v45 = vpop.f32.mrf.mxu1  ;;  %v5578_v52 = vrot.slane %v5576_v20, 5 }
 0x167   : > { %14610 = vst [vmem:[#allocation42_spill] sm:$0xff] %v12555_v58  ;;  %14611 = vst [vmem:[#allocation43_spill] sm:$0xff] %v12561_v15  ;;  %v5549_v34 = vsel %vm11508_vm4, %v5544_v0, %v5548_v21  ;;  %v12573_v7 = vadd.f32 %v12443_v60, %v12495_v6  ;;  %v5581_v17 = vshrl.u32 %v9567_v56, 16  ;;  %v5584_v12 = vshll.u32 %v9567_v56, 16  ;;  %v9570_v0 = vld [vmem:[%s11489_s27 + $0xac] sm:$0xf] }
 0x168   : > { %v5559_v8 = vsel %vm11508_vm4, %v5554_v5, %v5558_v9  ;;  %v5564_v62 = vrot.slane %v5563_v13, 4  ;;  %v5573_v31 = vor.u32 %v5572_v51, %v5568_v46  ;;  %v12578_v28 = vpop.f32.mrf.mxu1  ;;  %v5590_v20 = vshll.u32 %v9568_v4, 16  ;;  %v12582_v60 = vpop.f32.mrf.mxu0 }
 0x169   : > { %14612 = vst [vmem:[#allocation44_spill] sm:$0xff] %v12573_v7  ;;  %v9704_v35 = vcombine.low %v5549_v34, %v5559_v8  ;;  %11011 = vmatmul.mubr.msk.bf16.gmra.mxu0 %vm1992_vm1, %v11352_v33  ;;  %v5583_v15 = vrot.slane %v5581_v17, 4  ;;  %v5594_v21 = vshrl.u32 %v9568_v4, 16  ;;  %v5586_v9 = vrot.slane %v5584_v12, 5  ;;  %v9571_v34 = vld [vmem:[%s11489_s27 + $0xb0] sm:$0x1] }
 0x16a   : > { %v5569_v6 = vsel %vm11508_vm4, %v5564_v62, %v5568_v46  ;;  %v5574_v7 = vrot.slane %v5573_v31, 4  ;;  %v5600_v5 = vshll.u32 %v9569_v19, 16  ;;  %11014 = vmatprep.mubr.msk.bf16.mxu0 %vm1992_vm1, %v11353_v63  ;;  %v12587_v56 = vpop.f32.mrf.mxu1  ;;  %v5592_v33 = vrot.slane %v5590_v20, 5  ;;  %v12595_v46 = vpop.f32.mrf.mxu0 }
 0x16b   : > { %11140 = vmatprep.mubr.msk.bf16.mxu1 %vm1992_vm1, %v9704_v35  ;;  %v5596_v13 = vrot.slane %v5594_v21, 4  ;;  %v5604_v51 = vshrl.u32 %v9569_v19, 16  ;;  %v12592_v4 = vadd.f32 %v12453_v11, %v12504_v25  ;;  %v5587_v63 = vor.u32 %v5586_v9, %v5583_v15  ;;  %v11354_v21 = vld [vmem:[%s11489_s27 + $0xa8] sm:$0xff]   ;;  %v9572_v11 = vld [vmem:[%s11489_s27 + $0xb4] sm:$0xf] }
 0x16c   : > { %v5579_v17 = vsel %vm11508_vm4, %v5574_v7, %v5578_v52  ;;  %v5602_v8 = vrot.slane %v5600_v5, 5  ;;  %v5610_v62 = vshll.u32 %v9570_v0, 16  ;;  %v12599_v31 = vpop.f32.mrf.mxu1  ;;  %v5614_v19 = vshrl.u32 %v9570_v0, 16  ;;  %v12603_v25 = vpop.f32.mrf.mxu0  ;;  %v11355_v52 = vld [vmem:[%s11489_s27 + $0xb4] sm:$0xff]  }
 0x16d   : > { %14613 = vst [vmem:[#allocation45_spill] sm:$0xff] %v12592_v4  ;;  %v9705_v12 = vcombine.low %v5569_v6, %v5579_v17  ;;  %v5597_v35 = vor.u32 %v5596_v13, %v5592_v33  ;;  %v5606_v20 = vrot.slane %v5604_v51, 4  ;;  %v5588_v4 = vrot.slane %v5587_v63, 4  ;;  %v9573_v13 = vld [vmem:[%s11489_s27 + $0xb8] sm:$0xf] }
 0x16e   : > { %v5612_v58 = vrot.slane %v5610_v62, 5  ;;  %v5620_v47 = vshll.u32 %v9571_v34, 16  ;;  %v12607_v15 = vadd.f32 %v12471_v48, %v12523_v30  ;;  %v12610_v7 = vpop.f32.mrf.mxu1  ;;  %v5616_v0 = vrot.slane %v5614_v19, 4  ;;  %v12618_v51 = vpop.f32.mrf.mxu0  ;;  %v9574_v17 = vld [vmem:[%s11489_s27 + $0xbc] sm:$0xf] }
 0x16f   : > { %11141 = vmatmul.mubr.msk.bf16.gmra.mxu1 %vm1992_vm1, %v9705_v12  ;;  %v5598_v6 = vrot.slane %v5597_v35, 4  ;;  %v5607_v9 = vor.u32 %v5606_v20, %v5602_v8  ;;  %v12615_v5 = vadd.f32 %v12477_v37, %v12528_v54  ;;  %v5593_v34 = vsel %vm11508_vm4, %v5588_v4, %v5592_v33 }
 0x170   : > { %14614 = vst [vmem:[#allocation46_spill] sm:$0xff] %v12607_v15  ;;  %v5622_v48 = vrot.slane %v5620_v47, 5  ;;  %v12624_v30 = vadd.f32 %v12490_v32, %v12542_v39  ;;  %v5625_v63 = vshrl.u32 %v9572_v11, 16  ;;  %v5617_v37 = vor.u32 %v5616_v0, %v5612_v58  ;;  %v9575_v39 = vld [vmem:[%s11489_s27 + $0xc0] sm:$0xf] }
 0x171   : > { %14615 = vst [vmem:[#allocation47_spill] sm:$0xff] %v12615_v5  ;;  %v5603_v62 = vsel %vm11508_vm4, %v5598_v6, %v5602_v8  ;;  %v5608_v12 = vrot.slane %v5607_v9, 4  ;;  %11015 = vmatmul.mubr.msk.bf16.gmra.mxu0 %vm1992_vm1, %v11354_v21  ;;  %v5628_v54 = vshll.u32 %v9572_v11, 16  ;;  %v12630_v35 = vpop.f32.mrf.mxu0  ;;  %v12632_v20 = vpop.f32.mrf.mxu1  ;;  %v5634_v4 = vshll.u32 %v9573_v13, 16  ;;  %v9577_v15 = vld [vmem:[%s11489_s27 + $0xc8] sm:$0xf] }
 0x172   : > { %14616 = vst [vmem:[#allocation48_spill] sm:$0xff] %v12624_v30  ;;  %v9706_v33 = vcombine.low %v5593_v34, %v5603_v62  ;;  %v5627_v47 = vrot.slane %v5625_v63, 4  ;;  %v5638_v32 = vshrl.u32 %v9573_v13, 16  ;;  %11018 = vmatprep.mubr.msk.bf16.mxu0 %vm1992_vm1, %v11355_v52  ;;  %v5618_v19 = vrot.slane %v5617_v37, 4 }
 0x173   : > { %v5613_v8 = vsel %vm11508_vm4, %v5608_v12, %v5612_v58  ;;  %v5630_v6 = vrot.slane %v5628_v54, 5  ;;  %v5644_v21 = vshll.u32 %v9574_v17, 16  ;;  %v12638_v11 = vpop.f32.mrf.mxu0  ;;  %v12640_v9 = vpop.f32.mrf.mxu1  ;;  %v5636_v0 = vrot.slane %v5634_v4, 5  ;;  %v9576_v58 = vld [vmem:[%s11489_s27 + $0xc4] sm:$0x1]  ;;  %v11356_v54 = vld [vmem:[%s11489_s27 + $0xbc] sm:$0xff]  }
 0x174   : > { %11144 = vmatprep.mubr.msk.bf16.mxu1 %vm1992_vm1, %v9706_v33  ;;  %v5640_v34 = vrot.slane %v5638_v32, 4  ;;  %v5648_v13 = vshrl.u32 %v9574_v17, 16  ;;  %v12645_v52 = vadd.f32 %v12498_v55, %v12549_v43  ;;  %v5623_v63 = vsel %vm11508_vm4, %v5618_v19, %v5622_v48  ;;  %v11357_v55 = vld [vmem:[%s11489_s27 + $0xc8] sm:$0xff]  }
 0x175   : > { %v5631_v62 = vor.u32 %v5630_v6, %v5627_v47  ;;  %v5646_v12 = vrot.slane %v5644_v21, 5  ;;  %v5654_v37 = vshll.u32 %v9575_v39, 16  ;;  %v12651_v30 = vpop.f32.mrf.mxu0  ;;  %v12653_v33 = vpop.f32.mrf.mxu1  ;;  %v9707_v4 = vcombine.low %v5613_v8, %v5623_v63 }
 0x176   : > { %14617 = vst [vmem:[#allocation49_spill] sm:$0xff] %v12645_v52  ;;  %v5641_v32 = vor.u32 %v5640_v34, %v5636_v0  ;;  %v5650_v17 = vrot.slane %v5648_v13, 4  ;;  %v5658_v5 = vshrl.u32 %v9575_v39, 16  ;;  %v5664_v14 = vshll.u32 %v9576_v58, 16  ;;  %v9578_v34 = vld [vmem:[%s11489_s27 + $0xcc] sm:$0xf] }
 0x177   : > { %v5632_v43 = vrot.slane %v5631_v62, 4  ;;  %v5656_v52 = vrot.slane %v5654_v37, 5  ;;  %v12659_v48 = vadd.f32 %v12513_v42, %v12565_v49  ;;  %v12661_v47 = vpop.f32.mrf.mxu0  ;;  %v12663_v19 = vpop.f32.mrf.mxu1  ;;  %11145 = vmatmul.mubr.msk.bf16.gmra.mxu1 %vm1992_vm1, %v9707_v4  ;;  %v12668_v39 = vadd.f32 %v12530_v50, %v12582_v60  ;;  %v9579_v49 = vld [vmem:[%s11489_s27 + $0xd0] sm:$0xf]  ;;  %v9580_v4 = vld [vmem:[%s11489_s27 + $0xd4] sm:$0xf] }
 0x178   : > { %v5642_v8 = vrot.slane %v5641_v32, 4  ;;  %v5651_v6 = vor.u32 %v5650_v17, %v5646_v12  ;;  %v5660_v21 = vrot.slane %v5658_v5, 4  ;;  %v5666_v58 = vrot.slane %v5664_v14, 5 }
 0x179   : > { %14618 = vst [vmem:[#allocation50_spill] sm:$0xff] %v12659_v48  ;;  %14619 = vst [vmem:[#allocation51_spill] sm:$0xff] %v12668_v39  ;;  %v5637_v13 = vsel %vm11508_vm4, %v5632_v43, %v5636_v0  ;;  %11019 = vmatmul.mubr.msk.bf16.gmra.mxu0 %vm1992_vm1, %v11356_v54  ;;  %v12676_v42 = vadd.f32 %v12544_v59, %v12595_v46  ;;  %v5669_v63 = vshrl.u32 %v9577_v15, 16  ;;  %v12679_v62 = vpop.f32.mrf.mxu1  ;;  %v5672_v37 = vshll.u32 %v9577_v15, 16  ;;  %v12684_v14 = vpop.f32.mrf.mxu0 }
 0x17a   : > { %v5647_v50 = vsel %vm11508_vm4, %v5642_v8, %v5646_v12  ;;  %v5652_v60 = vrot.slane %v5651_v6, 4  ;;  %v5661_v5 = vor.u32 %v5660_v21, %v5656_v52  ;;  %11022 = vmatprep.mubr.msk.bf16.mxu0 %vm1992_vm1, %v11357_v55  ;;  %v5678_v59 = vshll.u32 %v9578_v34, 16 }
 0x17b   : > { %14620 = vst [vmem:[#allocation52_spill] sm:$0xff] %v12676_v42  ;;  %v9708_v0 = vcombine.low %v5637_v13, %v5647_v50  ;;  %v5671_v54 = vrot.slane %v5669_v63, 4  ;;  %v5682_v46 = vshrl.u32 %v9578_v34, 16  ;;  %v12687_v32 = vpop.f32.mrf.mxu1  ;;  %v5674_v43 = vrot.slane %v5672_v37, 5  ;;  %v12691_v8 = vpop.f32.mrf.mxu0  ;;  %v9581_v13 = vld [vmem:[%s11489_s27 + $0xd8] sm:$0x1] }
 0x17c   : > { %v5657_v17 = vsel %vm11508_vm4, %v5652_v60, %v5656_v52  ;;  %v5662_v12 = vrot.slane %v5661_v5, 4  ;;  %v5688_v15 = vshll.u32 %v9579_v49, 16  ;;  %v5680_v55 = vrot.slane %v5678_v59, 5  ;;  %v11358_v63 = vld [vmem:[%s11489_s27 + $0xd0] sm:$0xff]   ;;  %v11359_v42 = vld [vmem:[%s11489_s27 + $0xdc] sm:$0xff]  }
 0x17d   : > { %11148 = vmatprep.mubr.msk.bf16.mxu1 %vm1992_vm1, %v9708_v0  ;;  %v5684_v6 = vrot.slane %v5682_v46, 4  ;;  %v5692_v21 = vshrl.u32 %v9579_v49, 16  ;;  %v12696_v34 = vadd.f32 %v12551_v29, %v12603_v25  ;;  %v12700_v50 = vpop.f32.mrf.mxu1  ;;  %v5675_v60 = vor.u32 %v5674_v43, %v5671_v54  ;;  %v12705_v0 = vpop.f32.mrf.mxu0  ;;  %v9582_v29 = vld [vmem:[%s11489_s27 + $0xdc] sm:$0xf] }
 0x17e   : > { %v5667_v52 = vsel %vm11508_vm4, %v5662_v12, %v5666_v58  ;;  %v5690_v5 = vrot.slane %v5688_v15, 5  ;;  %v5698_v37 = vshll.u32 %v9580_v4, 16  ;;  %v5702_v39 = vshrl.u32 %v9580_v4, 16  ;;  %v9583_v15 = vld [vmem:[%s11489_s27 + $0xe0] sm:$0xf] }
 0x17f   : > { %14621 = vst [vmem:[#allocation53_spill] sm:$0xff] %v12696_v34  ;;  %v9709_v59 = vcombine.low %v5657_v17, %v5667_v52  ;;  %v5685_v46 = vor.u32 %v5684_v6, %v5680_v55  ;;  %v5694_v49 = vrot.slane %v5692_v21, 4  ;;  %v12708_v25 = vpop.f32.mrf.mxu1  ;;  %v5676_v34 = vrot.slane %v5675_v60, 4  ;;  %v12714_v54 = vpop.f32.mrf.mxu0  ;;  %v9584_v21 = vld [vmem:[%s11489_s27 + $0xe4] sm:$0xf] }
 0x180   : > { %v5700_v48 = vrot.slane %v5698_v37, 5  ;;  %v5708_v18 = vshll.u32 %v9581_v13, 16  ;;  %v12712_v58 = vadd.f32 %v12567_v45, %v12618_v51  ;;  %v5704_v43 = vrot.slane %v5702_v39, 4  ;;  %v9585_v60 = vld [vmem:[%s11489_s27 + $0xe8] sm:$0xf] }
 0x181   : > { %11149 = vmatmul.mubr.msk.bf16.gmra.mxu1 %vm1992_vm1, %v9709_v59  ;;  %v5686_v17 = vrot.slane %v5685_v46, 4  ;;  %v5695_v12 = vor.u32 %v5694_v49, %v5690_v5  ;;  %v12719_v4 = vadd.f32 %v12578_v28, %v12630_v35  ;;  %11023 = vmatmul.mubr.msk.bf16.gmra.mxu0 %vm1992_vm1, %v11358_v63  ;;  %v5681_v6 = vsel %vm11508_vm4, %v5676_v34, %v5680_v55 }
 0x182   : > { %14622 = vst [vmem:[#allocation54_spill] sm:$0xff] %v12712_v58  ;;  %v5710_v45 = vrot.slane %v5708_v18, 5  ;;  %v12727_v51 = vadd.f32 %v12587_v56, %v12638_v11  ;;  %v5713_v13 = vshrl.u32 %v9582_v29, 16  ;;  %11026 = vmatprep.mubr.msk.bf16.mxu0 %vm1992_vm1, %v11359_v42  ;;  %v12731_v39 = vpop.f32.mrf.mxu0  ;;  %v12733_v28 = vpop.f32.mrf.mxu1  ;;  %v5705_v55 = vor.u32 %v5704_v43, %v5700_v48 }
 0x183   : > { %14623 = vst [vmem:[#allocation55_spill] sm:$0xff] %v12719_v4  ;;  %v5691_v35 = vsel %vm11508_vm4, %v5686_v17, %v5690_v5  ;;  %v5696_v63 = vrot.slane %v5695_v12, 4  ;;  %v5716_v34 = vshll.u32 %v9582_v29, 16  ;;  %v5722_v56 = vshll.u32 %v9583_v15, 16  ;;  %v11360_v17 = vld [vmem:[%s11489_s27 + $0xe4] sm:$0xff]  }
 0x184   : > { %14624 = vst [vmem:[#allocation56_spill] sm:$0xff] %v12727_v51  ;;  %v9710_v18 = vcombine.low %v5681_v6, %v5691_v35  ;;  %v5715_v52 = vrot.slane %v5713_v13, 4  ;;  %v5726_v11 = vshrl.u32 %v9583_v15, 16  ;;  %v12738_v37 = vpop.f32.mrf.mxu0  ;;  %v12740_v42 = vpop.f32.mrf.mxu1  ;;  %v5706_v46 = vrot.slane %v5705_v55, 4  ;;  %v9586_v6 = vld [vmem:[%s11489_s27 + $0xec] sm:$0x1] }
 0x185   : > { %v5701_v59 = vsel %vm11508_vm4, %v5696_v63, %v5700_v48  ;;  %v5718_v49 = vrot.slane %v5716_v34, 5  ;;  %v5732_v5 = vshll.u32 %v9584_v21, 16  ;;  %v5724_v29 = vrot.slane %v5722_v56, 5  ;;  %v11361_v13 = vld [vmem:[%s11489_s27 + $0xf0] sm:$0xff]  }
 0x186   : > { %11152 = vmatprep.mubr.msk.bf16.mxu1 %vm1992_vm1, %v9710_v18  ;;  %v5728_v12 = vrot.slane %v5726_v11, 4  ;;  %v5736_v43 = vshrl.u32 %v9584_v21, 16  ;;  %v12748_v15 = vadd.f32 %v12599_v31, %v12651_v30  ;;  %v12752_v35 = vpop.f32.mrf.mxu0  ;;  %v12754_v51 = vpop.f32.mrf.mxu1  ;;  %v5711_v48 = vsel %vm11508_vm4, %v5706_v46, %v5710_v45  ;;  %v9587_v4 = vld [vmem:[%s11489_s27 + $0xf0] sm:$0xf] }
 0x187   : > { %v5719_v63 = vor.u32 %v5718_v49, %v5715_v52  ;;  %v5734_v55 = vrot.slane %v5732_v5, 5  ;;  %v5742_v34 = vshll.u32 %v9585_v60, 16  ;;  %v9711_v18 = vcombine.low %v5701_v59, %v5711_v48  ;;  %v9588_v49 = vld [vmem:[%s11489_s27 + $0xf4] sm:$0xf] }
 0x188   : > { %14625 = vst [vmem:[#allocation57_spill] sm:$0xff] %v12748_v15  ;;  %v5729_v56 = vor.u32 %v5728_v12, %v5724_v29  ;;  %v5738_v21 = vrot.slane %v5736_v43, 4  ;;  %v5746_v11 = vshrl.u32 %v9585_v60, 16  ;;  %v12759_v31 = vpop.f32.mrf.mxu0  ;;  %v12761_v30 = vpop.f32.mrf.mxu1  ;;  %v5752_v26 = vshll.u32 %v9586_v6, 16  ;;  %v9589_v12 = vld [vmem:[%s11489_s27 + $0xf8] sm:$0xf] }
 0x189   : > { %v5720_v15 = vrot.slane %v5719_v63, 4  ;;  %v5744_v58 = vrot.slane %v5742_v34, 5  ;;  %v12765_v45 = vadd.f32 %v12610_v7, %v12661_v47  ;;  %11027 = vmatmul.mubr.msk.bf16.gmra.mxu0 %vm1992_vm1, %v11360_v17  ;;  %11153 = vmatmul.mubr.msk.bf16.gmra.mxu1 %vm1992_vm1, %v9711_v18  ;;  %v12771_v46 = vadd.f32 %v12632_v20, %v12684_v14 }
 0x18a   : > { %v5730_v52 = vrot.slane %v5729_v56, 4  ;;  %v5739_v59 = vor.u32 %v5738_v21, %v5734_v55  ;;  %v5748_v60 = vrot.slane %v5746_v11, 4  ;;  %11030 = vmatprep.mubr.msk.bf16.mxu0 %vm1992_vm1, %v11361_v13  ;;  %v12775_v5 = vpop.f32.mrf.mxu1  ;;  %v5754_v47 = vrot.slane %v5752_v26, 5  ;;  %v12784_v6 = vpop.f32.mrf.mxu0 }
 0x18b   : > { %14626 = vst [vmem:[#allocation58_spill] sm:$0xff] %v12765_v45  ;;  %14627 = vst [vmem:[#allocation59_spill] sm:$0xff] %v12771_v46  ;;  %v5725_v7 = vsel %vm11508_vm4, %v5720_v15, %v5724_v29  ;;  %v12781_v17 = vadd.f32 %v12640_v9, %v12691_v8  ;;  %v5757_v43 = vshrl.u32 %v9587_v4, 16  ;;  %v5760_v48 = vshll.u32 %v9587_v4, 16  ;;  %v9590_v9 = vld [vmem:[%s11489_s27 + $0xfc] sm:$0xf] }
 0x18c   : > { %v5735_v20 = vsel %vm11508_vm4, %v5730_v52, %v5734_v55  ;;  %v5740_v14 = vrot.slane %v5739_v59, 4  ;;  %v5749_v13 = vor.u32 %v5748_v60, %v5744_v58  ;;  %v12788_v63 = vpop.f32.mrf.mxu1  ;;  %v5766_v26 = vshll.u32 %v9588_v49, 16  ;;  %v11362_v8 = vld [vmem:[%s11489_s27 + $0xf8] sm:$0xff]   ;;  %v12792_v18 = vpop.f32.mrf.mxu0  ;;  %v11363_v52 = vld [vmem:[%s11489_s27 + $0x104] sm:$0xff]  }
 0x18d   : > { %14628 = vst [vmem:[#allocation60_spill] sm:$0xff] %v12781_v17  ;;  %v9712_v29 = vcombine.low %v5725_v7, %v5735_v20  ;;  %v5759_v15 = vrot.slane %v5757_v43, 4  ;;  %v5770_v34 = vshrl.u32 %v9588_v49, 16  ;;  %v5762_v55 = vrot.slane %v5760_v48, 5  ;;  %v9591_v43 = vld [vmem:[%s11489_s27 + $0x100] sm:$0x1] }
 0x18e   : > { %v5745_v56 = vsel %vm11508_vm4, %v5740_v14, %v5744_v58  ;;  %v5750_v21 = vrot.slane %v5749_v13, 4  ;;  %v5776_v11 = vshll.u32 %v9589_v12, 16  ;;  %v12797_v59 = vpop.f32.mrf.mxu1  ;;  %v5768_v4 = vrot.slane %v5766_v26, 5  ;;  %v12805_v20 = vpop.f32.mrf.mxu0 }
 0x18f   : > { %11156 = vmatprep.mubr.msk.bf16.mxu1 %vm1992_vm1, %v9712_v29  ;;  %v5772_v60 = vrot.slane %v5770_v34, 4  ;;  %v5780_v7 = vshrl.u32 %v9589_v12, 16  ;;  %v12802_v49 = vadd.f32 %v12653_v33, %v12705_v0  ;;  %v5763_v14 = vor.u32 %v5762_v55, %v5759_v15  ;;  %v9592_v33 = vld [vmem:[%s11489_s27 + $0x104] sm:$0xf] }
 0x190   : > { %v5755_v58 = vsel %vm11508_vm4, %v5750_v21, %v5754_v47  ;;  %v5778_v13 = vrot.slane %v5776_v11, 5  ;;  %v5786_v48 = vshll.u32 %v9590_v9, 16  ;;  %v12809_v17 = vpop.f32.mrf.mxu1  ;;  %v5790_v12 = vshrl.u32 %v9590_v9, 16  ;;  %v12813_v0 = vpop.f32.mrf.mxu0  ;;  %v9593_v21 = vld [vmem:[%s11489_s27 + $0x108] sm:$0xf] }
 0x191   : > { %14629 = vst [vmem:[#allocation61_spill] sm:$0xff] %v12802_v49  ;;  %v9713_v29 = vcombine.low %v5745_v56, %v5755_v58  ;;  %v5773_v26 = vor.u32 %v5772_v60, %v5768_v4  ;;  %v5782_v34 = vrot.slane %v5780_v7, 4  ;;  %11031 = vmatmul.mubr.msk.bf16.gmra.mxu0 %vm1992_vm1, %v11362_v8  ;;  %v5764_v49 = vrot.slane %v5763_v14, 4  ;;  %v9594_v60 = vld [vmem:[%s11489_s27 + $0x10c] sm:$0xf] }
 0x192   : > { %v5788_v46 = vrot.slane %v5786_v48, 5  ;;  %v5796_v45 = vshll.u32 %v9591_v43, 16  ;;  %v12817_v47 = vadd.f32 %v12663_v19, %v12714_v54  ;;  %11034 = vmatprep.mubr.msk.bf16.mxu0 %vm1992_vm1, %v11363_v52  ;;  %v5792_v56 = vrot.slane %v5790_v12, 4  ;;  %v11364_v14 = vld [vmem:[%s11489_s27 + $0x10c] sm:$0xff]  }
 0x193   : > { %11157 = vmatmul.mubr.msk.bf16.gmra.mxu1 %vm1992_vm1, %v9713_v29  ;;  %v5774_v15 = vrot.slane %v5773_v26, 4  ;;  %v5783_v9 = vor.u32 %v5782_v34, %v5778_v13  ;;  %v12823_v8 = vadd.f32 %v12679_v62, %v12731_v39  ;;  %v12826_v55 = vpop.f32.mrf.mxu0  ;;  %v12828_v11 = vpop.f32.mrf.mxu1  ;;  %v5769_v19 = vsel %vm11508_vm4, %v5764_v49, %v5768_v4 }
 0x194   : > { %14630 = vst [vmem:[#allocation62_spill] sm:$0xff] %v12817_v47  ;;  %v5798_v54 = vrot.slane %v5796_v45, 5  ;;  %v12834_v52 = vadd.f32 %v12687_v32, %v12738_v37  ;;  %v5801_v7 = vshrl.u32 %v9592_v33, 16  ;;  %v5793_v43 = vor.u32 %v5792_v56, %v5788_v46  ;;  %v9595_v32 = vld [vmem:[%s11489_s27 + $0x110] sm:$0xf]  ;;  %v11365_v37 = vld [vmem:[%s11489_s27 + $0x118] sm:$0xff]  }
 0x195   : > { %14631 = vst [vmem:[#allocation63_spill] sm:$0xff] %v12823_v8  ;;  %v5779_v62 = vsel %vm11508_vm4, %v5774_v15, %v5778_v13  ;;  %v5784_v39 = vrot.slane %v5783_v9, 4  ;;  %v5804_v58 = vshll.u32 %v9592_v33, 16  ;;  %v12840_v48 = vpop.f32.mrf.mxu0  ;;  %v12842_v29 = vpop.f32.mrf.mxu1  ;;  %v5810_v49 = vshll.u32 %v9593_v21, 16 }
 0x196   : > { %14632 = vst [vmem:[#allocation64_spill] sm:$0xff] %v12834_v52  ;;  %v9714_v4 = vcombine.low %v5769_v19, %v5779_v62  ;;  %v5803_v45 = vrot.slane %v5801_v7, 4  ;;  %v5814_v26 = vshrl.u32 %v9593_v21, 16  ;;  %v5794_v12 = vrot.slane %v5793_v43, 4  ;;  %v9596_v62 = vld [vmem:[%s11489_s27 + $0x114] sm:$0x1] }
 0x197   : > { %v5789_v34 = vsel %vm11508_vm4, %v5784_v39, %v5788_v46  ;;  %v5806_v13 = vrot.slane %v5804_v58, 5  ;;  %v5820_v15 = vshll.u32 %v9594_v60, 16  ;;  %v12848_v9 = vpop.f32.mrf.mxu0  ;;  %v12850_v33 = vpop.f32.mrf.mxu1  ;;  %v5812_v56 = vrot.slane %v5810_v49, 5 }
 0x198   : > { %11160 = vmatprep.mubr.msk.bf16.mxu1 %vm1992_vm1, %v9714_v4  ;;  %v5816_v19 = vrot.slane %v5814_v26, 4  ;;  %v5824_v7 = vshrl.u32 %v9594_v60, 16  ;;  %v12855_v21 = vadd.f32 %v12700_v50, %v12752_v35  ;;  %v5799_v46 = vsel %vm11508_vm4, %v5794_v12, %v5798_v54  ;;  %v9597_v50 = vld [vmem:[%s11489_s27 + $0x118] sm:$0xf] }
 0x199   : > { %v5807_v39 = vor.u32 %v5806_v13, %v5803_v45  ;;  %v5822_v43 = vrot.slane %v5820_v15, 5  ;;  %v5830_v58 = vshll.u32 %v9595_v32, 16  ;;  %11035 = vmatmul.mubr.msk.bf16.gmra.mxu0 %vm1992_vm1, %v11364_v14  ;;  %v12861_v52 = vpop.f32.mrf.mxu0  ;;  %v12863_v4 = vpop.f32.mrf.mxu1  ;;  %v9715_v49 = vcombine.low %v5789_v34, %v5799_v46  ;;  %v9598_v15 = vld [vmem:[%s11489_s27 + $0x11c] sm:$0xf] }
 0x19a   : > { %14633 = vst [vmem:[#allocation65_spill] sm:$0xff] %v12855_v21  ;;  %v5817_v60 = vor.u32 %v5816_v19, %v5812_v56  ;;  %v5826_v26 = vrot.slane %v5824_v7, 4  ;;  %v5834_v8 = vshrl.u32 %v9595_v32, 16  ;;  %11038 = vmatprep.mubr.msk.bf16.mxu0 %vm1992_vm1, %v11365_v37  ;;  %v5840_v45 = vshll.u32 %v9596_v62, 16  ;;  %v9599_v62 = vld [vmem:[%s11489_s27 + $0x120] sm:$0xf] }
 0x19b   : > { %v5808_v35 = vrot.slane %v5807_v39, 4  ;;  %v5832_v54 = vrot.slane %v5830_v58, 5  ;;  %v12869_v14 = vadd.f32 %v12708_v25, %v12759_v31  ;;  %v12871_v12 = vpop.f32.mrf.mxu1  ;;  %11161 = vmatmul.mubr.msk.bf16.gmra.mxu1 %vm1992_vm1, %v9715_v49  ;;  %v12876_v37 = vadd.f32 %v12733_v28, %v12784_v6  ;;  %v12879_v19 = vpop.f32.mrf.mxu0  ;;  %v11366_v39 = vld [vmem:[%s11489_s27 + $0x120] sm:$0xff]  }
 0x19c   : > { %v5818_v34 = vrot.slane %v5817_v60, 4  ;;  %v5827_v13 = vor.u32 %v5826_v26, %v5822_v43  ;;  %v5836_v32 = vrot.slane %v5834_v8, 4  ;;  %v5842_v25 = vrot.slane %v5840_v45, 5  ;;  %v11367_v60 = vld [vmem:[%s11489_s27 + $0x12c] sm:$0xff]  }
 0x19d   : > { %14634 = vst [vmem:[#allocation66_spill] sm:$0xff] %v12869_v14  ;;  %14635 = vst [vmem:[#allocation67_spill] sm:$0xff] %v12876_v37  ;;  %v5813_v7 = vsel %vm11508_vm4, %v5808_v35, %v5812_v56  ;;  %v12885_v31 = vadd.f32 %v12740_v42, %v12792_v18  ;;  %v5845_v46 = vshrl.u32 %v9597_v50, 16  ;;  %v12889_v8 = vpop.f32.mrf.mxu1  ;;  %v5848_v49 = vshll.u32 %v9597_v50, 16  ;;  %v12894_v26 = vpop.f32.mrf.mxu0  ;;  %v9600_v18 = vld [vmem:[%s11489_s27 + $0x124] sm:$0xf] }
 0x19e   : > { %v5823_v28 = vsel %vm11508_vm4, %v5818_v34, %v5822_v43  ;;  %v5828_v6 = vrot.slane %v5827_v13, 4  ;;  %v5837_v58 = vor.u32 %v5836_v32, %v5832_v54  ;;  %v5854_v45 = vshll.u32 %v9598_v15, 16 }
 0x19f   : > { %14636 = vst [vmem:[#allocation68_spill] sm:$0xff] %v12885_v31  ;;  %v9716_v56 = vcombine.low %v5813_v7, %v5823_v28  ;;  %v5847_v35 = vrot.slane %v5845_v46, 4  ;;  %v5858_v42 = vshrl.u32 %v9598_v15, 16  ;;  %v12897_v31 = vpop.f32.mrf.mxu1  ;;  %v5850_v21 = vrot.slane %v5848_v49, 5  ;;  %v12901_v34 = vpop.f32.mrf.mxu0  ;;  %v9601_v7 = vld [vmem:[%s11489_s27 + $0x128] sm:$0x1] }
 0x1a0   : > { %v5833_v37 = vsel %vm11508_vm4, %v5828_v6, %v5832_v54  ;;  %v5838_v14 = vrot.slane %v5837_v58, 4  ;;  %v5864_v43 = vshll.u32 %v9599_v62, 16  ;;  %v5856_v50 = vrot.slane %v5854_v45, 5  ;;  %v9602_v45 = vld [vmem:[%s11489_s27 + $0x12c] sm:$0xf] }
 0x1a1   : > { %11164 = vmatprep.mubr.msk.bf16.mxu1 %vm1992_vm1, %v9716_v56  ;;  %v5860_v13 = vrot.slane %v5858_v42, 4  ;;  %v5868_v32 = vshrl.u32 %v9599_v62, 16  ;;  %v12906_v15 = vadd.f32 %v12754_v51, %v12805_v20  ;;  %11039 = vmatmul.mubr.msk.bf16.gmra.mxu0 %vm1992_vm1, %v11366_v39  ;;  %v12910_v46 = vpop.f32.mrf.mxu1  ;;  %v5851_v28 = vor.u32 %v5850_v21, %v5847_v35  ;;  %v12915_v49 = vpop.f32.mrf.mxu0 }
 0x1a2   : > { %v5843_v54 = vsel %vm11508_vm4, %v5838_v14, %v5842_v25  ;;  %v5866_v6 = vrot.slane %v5864_v43, 5  ;;  %v5874_v58 = vshll.u32 %v9600_v18, 16  ;;  %11042 = vmatprep.mubr.msk.bf16.mxu0 %vm1992_vm1, %v11367_v60  ;;  %v5878_v20 = vshrl.u32 %v9600_v18, 16  ;;  %v9603_v43 = vld [vmem:[%s11489_s27 + $0x130] sm:$0xf] }
 0x1a3   : > { %14637 = vst [vmem:[#allocation69_spill] sm:$0xff] %v12906_v15  ;;  %v9717_v62 = vcombine.low %v5833_v37, %v5843_v54  ;;  %v5861_v56 = vor.u32 %v5860_v13, %v5856_v50  ;;  %v5870_v51 = vrot.slane %v5868_v32, 4  ;;  %v5852_v39 = vrot.slane %v5851_v28, 4  ;;  %v11368_v13 = vld [vmem:[%s11489_s27 + $0x134] sm:$0xff]   ;;  %v11369_v28 = vld [vmem:[%s11489_s27 + $0x140] sm:$0xff]  }
 0x1a4   : > { %v5876_v42 = vrot.slane %v5874_v58, 5  ;;  %v5884_v15 = vshll.u32 %v9601_v7, 16  ;;  %v12920_v21 = vadd.f32 %v12761_v30, %v12813_v0  ;;  %v12922_v14 = vpop.f32.mrf.mxu0  ;;  %v12924_v25 = vpop.f32.mrf.mxu1  ;;  %v5880_v35 = vrot.slane %v5878_v20, 4  ;;  %v9604_v7 = vld [vmem:[%s11489_s27 + $0x134] sm:$0xf] }
 0x1a5   : > { %11165 = vmatmul.mubr.msk.bf16.gmra.mxu1 %vm1992_vm1, %v9717_v62  ;;  %v5862_v37 = vrot.slane %v5861_v56, 4  ;;  %v5871_v60 = vor.u32 %v5870_v51, %v5866_v6  ;;  %v12929_v18 = vadd.f32 %v12775_v5, %v12826_v55  ;;  %v5857_v32 = vsel %vm11508_vm4, %v5852_v39, %v5856_v50 }
 0x1a6   : > { %14638 = vst [vmem:[#allocation70_spill] sm:$0xff] %v12920_v21  ;;  %v5886_v30 = vrot.slane %v5884_v15, 5  ;;  %v12937_v0 = vadd.f32 %v12788_v63, %v12840_v48  ;;  %v5889_v54 = vshrl.u32 %v9602_v45, 16  ;;  %v12941_v58 = vpop.f32.mrf.mxu0  ;;  %v12943_v62 = vpop.f32.mrf.mxu1  ;;  %v5881_v56 = vor.u32 %v5880_v35, %v5876_v42  ;;  %v9605_v63 = vld [vmem:[%s11489_s27 + $0x138] sm:$0xf] }
 0x1a7   : > { %14639 = vst [vmem:[#allocation71_spill] sm:$0xff] %v12929_v18  ;;  %v5867_v5 = vsel %vm11508_vm4, %v5862_v37, %v5866_v6  ;;  %v5872_v55 = vrot.slane %v5871_v60, 4  ;;  %v5892_v51 = vshll.u32 %v9602_v45, 16  ;;  %v5898_v15 = vshll.u32 %v9603_v43, 16  ;;  %v9606_v35 = vld [vmem:[%s11489_s27 + $0x13c] sm:$0x1] }
 0x1a8   : > { %14640 = vst [vmem:[#allocation72_spill] sm:$0xff] %v12937_v0  ;;  %v9718_v50 = vcombine.low %v5857_v32, %v5867_v5  ;;  %v5891_v20 = vrot.slane %v5889_v54, 4  ;;  %v5902_v39 = vshrl.u32 %v9603_v43, 16  ;;  %v12948_v48 = vpop.f32.mrf.mxu0  ;;  %v12950_v0 = vpop.f32.mrf.mxu1  ;;  %v5882_v21 = vrot.slane %v5881_v56, 4 }
 0x1a9   : > { %v5877_v18 = vsel %vm11508_vm4, %v5872_v55, %v5876_v42  ;;  %v5894_v47 = vrot.slane %v5892_v51, 5  ;;  %v5908_v10 = vshll.u32 %v9604_v7, 16  ;;  %11043 = vmatmul.mubr.msk.bf16.gmra.mxu0 %vm1992_vm1, %v11368_v13  ;;  %v5900_v6 = vrot.slane %v5898_v15, 5 }
 0x1aa   : > { %11168 = vmatprep.mubr.msk.bf16.mxu1 %vm1992_vm1, %v9718_v50  ;;  %v5904_v45 = vrot.slane %v5902_v39, 4  ;;  %v5912_v37 = vshrl.u32 %v9604_v7, 16  ;;  %v12958_v60 = vadd.f32 %v12797_v59, %v12848_v9  ;;  %11046 = vmatprep.mubr.msk.bf16.mxu0 %vm1992_vm1, %v11369_v28  ;;  %v12962_v42 = vpop.f32.mrf.mxu0  ;;  %v12964_v43 = vpop.f32.mrf.mxu1  ;;  %v5887_v13 = vsel %vm11508_vm4, %v5882_v21, %v5886_v30  ;;  %v9607_v9 = vld [vmem:[%s11489_s27 + $0x140] sm:$0xf]  ;;  %v11370_v39 = vld [vmem:[%s11489_s27 + $0x148] sm:$0xff]  }
 0x1ab   : > { %v5895_v32 = vor.u32 %v5894_v47, %v5891_v20  ;;  %v5910_v54 = vrot.slane %v5908_v10, 5  ;;  %v5918_v5 = vshll.u32 %v9605_v63, 16  ;;  %v9719_v55 = vcombine.low %v5877_v18, %v5887_v13 }
 0x1ac   : > { %14641 = vst [vmem:[#allocation73_spill] sm:$0xff] %v12958_v60  ;;  %v5905_v7 = vor.u32 %v5904_v45, %v5900_v6  ;;  %v5914_v56 = vrot.slane %v5912_v37, 4  ;;  %v5922_v59 = vshrl.u32 %v9605_v63, 16  ;;  %v5928_v50 = vshll.u32 %v9606_v35, 16  ;;  %v12974_v21 = vpop.f32.mrf.mxu0  ;;  %v9608_v63 = vld [vmem:[%s11489_s27 + $0x144] sm:$0xf] }
 0x1ad   : > { %v5896_v51 = vrot.slane %v5895_v32, 4  ;;  %v5920_v28 = vrot.slane %v5918_v5, 5  ;;  %v12971_v15 = vadd.f32 %v12809_v17, %v12861_v52  ;;  %v12976_v10 = vpop.f32.mrf.mxu1  ;;  %11169 = vmatmul.mubr.msk.bf16.gmra.mxu1 %vm1992_vm1, %v9719_v55  ;;  %v12981_v20 = vadd.f32 %v12828_v11, %v12879_v19  ;;  %v11371_v45 = vld [vmem:[%s11489_s27 + $0x154] sm:$0xff]   ;;  %v9609_v35 = vld [vmem:[%s11489_s27 + $0x148] sm:$0xf] }
 0x1ae   : > { %v5906_v47 = vrot.slane %v5905_v7, 4  ;;  %v5915_v18 = vor.u32 %v5914_v56, %v5910_v54  ;;  %v5924_v30 = vrot.slane %v5922_v59, 4  ;;  %v5930_v52 = vrot.slane %v5928_v50, 5  ;;  %v12992_v32 = vpop.f32.mrf.mxu0  ;;  %v9610_v50 = vld [vmem:[%s11489_s27 + $0x14c] sm:$0xf] }
 0x1af   : > { %14642 = vst [vmem:[#allocation74_spill] sm:$0xff] %v12971_v15  ;;  %14643 = vst [vmem:[#allocation75_spill] sm:$0xff] %v12981_v20  ;;  %v5901_v17 = vsel %vm11508_vm4, %v5896_v51, %v5900_v6  ;;  %v12989_v37 = vadd.f32 %v12842_v29, %v12894_v26  ;;  %v5933_v13 = vshrl.u32 %v9607_v9, 16  ;;  %v12994_v5 = vpop.f32.mrf.mxu1  ;;  %v5936_v7 = vshll.u32 %v9607_v9, 16  ;;  %v11373_v60 = vld [vmem:[%s11489_s27 + $0x168] sm:$0xff]  }
 0x1b0   : > { %v5911_v11 = vsel %vm11508_vm4, %v5906_v47, %v5910_v54  ;;  %v5916_v19 = vrot.slane %v5915_v18, 4  ;;  %v5925_v55 = vor.u32 %v5924_v30, %v5920_v28  ;;  %v5942_v6 = vshll.u32 %v9608_v63, 16  ;;  %v13000_v29 = vpop.f32.mrf.mxu0 }
 0x1b1   : > { %14644 = vst [vmem:[#allocation76_spill] sm:$0xff] %v12989_v37  ;;  %v9720_v56 = vcombine.low %v5901_v17, %v5911_v11  ;;  %v5935_v59 = vrot.slane %v5933_v13, 4  ;;  %v5946_v51 = vshrl.u32 %v9608_v63, 16  ;;  %11047 = vmatmul.mubr.msk.bf16.gmra.mxu0 %vm1992_vm1, %v11370_v39  ;;  %v13002_v26 = vpop.f32.mrf.mxu1  ;;  %v5938_v54 = vrot.slane %v5936_v7, 5  ;;  %v9611_v63 = vld [vmem:[%s11489_s27 + $0x150] sm:$0x1] }
 0x1b2   : > { %v5921_v37 = vsel %vm11508_vm4, %v5916_v19, %v5920_v28  ;;  %v5926_v20 = vrot.slane %v5925_v55, 4  ;;  %v5952_v47 = vshll.u32 %v9609_v35, 16  ;;  %11050 = vmatprep.mubr.msk.bf16.mxu0 %vm1992_vm1, %v11371_v45  ;;  %v5944_v9 = vrot.slane %v5942_v6, 5  ;;  %v13013_v17 = vpop.f32.mrf.mxu0  ;;  %v9612_v6 = vld [vmem:[%s11489_s27 + $0x154] sm:$0xf] }
 0x1b3   : > { %11172 = vmatprep.mubr.msk.bf16.mxu1 %vm1992_vm1, %v9720_v56  ;;  %v5948_v18 = vrot.slane %v5946_v51, 4  ;;  %v5956_v30 = vshrl.u32 %v9609_v35, 16  ;;  %v13010_v39 = vadd.f32 %v12850_v33, %v12901_v34  ;;  %v13015_v28 = vpop.f32.mrf.mxu1  ;;  %v5939_v13 = vor.u32 %v5938_v54, %v5935_v59  ;;  %v11372_v33 = vld [vmem:[%s11489_s27 + $0x15c] sm:$0xff]   ;;  %v9613_v54 = vld [vmem:[%s11489_s27 + $0x158] sm:$0xf] }
 0x1b4   : > { %v5931_v45 = vsel %vm11508_vm4, %v5926_v20, %v5930_v52  ;;  %v5954_v11 = vrot.slane %v5952_v47, 5  ;;  %v5962_v19 = vshll.u32 %v9610_v50, 16  ;;  %v5966_v56 = vshrl.u32 %v9610_v50, 16 }
 0x1b5   : > { %14645 = vst [vmem:[#allocation77_spill] sm:$0xff] %v13010_v39  ;;  %v9721_v55 = vcombine.low %v5921_v37, %v5931_v45  ;;  %v5949_v7 = vor.u32 %v5948_v18, %v5944_v9  ;;  %v5958_v35 = vrot.slane %v5956_v30, 4  ;;  %v5940_v34 = vrot.slane %v5939_v13, 4  ;;  %v9614_v30 = vld [vmem:[%s11489_s27 + $0x15c] sm:$0xf] }
 0x1b6   : > { %v5964_v51 = vrot.slane %v5962_v19, 5  ;;  %v5972_v39 = vshll.u32 %v9611_v63, 16  ;;  %v13023_v15 = vadd.f32 %v12863_v4, %v12915_v49  ;;  %v13026_v20 = vpop.f32.mrf.mxu0  ;;  %v5968_v59 = vrot.slane %v5966_v56, 4 }
 0x1b7   : > { %11173 = vmatmul.mubr.msk.bf16.gmra.mxu1 %vm1992_vm1, %v9721_v55  ;;  %v5950_v52 = vrot.slane %v5949_v7, 4  ;;  %v5959_v37 = vor.u32 %v5958_v35, %v5954_v11  ;;  %v13031_v50 = vadd.f32 %v12871_v12, %v12922_v14  ;;  %v13034_v47 = vpop.f32.mrf.mxu1  ;;  %v5945_v18 = vsel %vm11508_vm4, %v5940_v34, %v5944_v9 }
 0x1b8   : > { %14646 = vst [vmem:[#allocation78_spill] sm:$0xff] %v13023_v15  ;;  %v5974_v4 = vrot.slane %v5972_v39, 5  ;;  %v13040_v49 = vadd.f32 %v12889_v8, %v12941_v58  ;;  %v5977_v63 = vshrl.u32 %v9612_v6, 16  ;;  %v13043_v45 = vpop.f32.mrf.mxu0  ;;  %v5969_v13 = vor.u32 %v5968_v59, %v5964_v51  ;;  %v9615_v58 = vld [vmem:[%s11489_s27 + $0x160] sm:$0xf] }
 0x1b9   : > { %14647 = vst [vmem:[#allocation79_spill] sm:$0xff] %v13031_v50  ;;  %v5955_v12 = vsel %vm11508_vm4, %v5950_v52, %v5954_v11  ;;  %v5960_v14 = vrot.slane %v5959_v37, 4  ;;  %v5980_v19 = vshll.u32 %v9612_v6, 16  ;;  %11051 = vmatmul.mubr.msk.bf16.gmra.mxu0 %vm1992_vm1, %v11372_v33  ;;  %v13048_v55 = vpop.f32.mrf.mxu1  ;;  %v5986_v7 = vshll.u32 %v9613_v54, 16 }
 0x1ba   : > { %14648 = vst [vmem:[#allocation80_spill] sm:$0xff] %v13040_v49  ;;  %v9722_v9 = vcombine.low %v5945_v18, %v5955_v12  ;;  %v5979_v39 = vrot.slane %v5977_v63, 4  ;;  %v5990_v8 = vshrl.u32 %v9613_v54, 16  ;;  %11054 = vmatprep.mubr.msk.bf16.mxu0 %vm1992_vm1, %v11373_v60  ;;  %v13052_v35 = vpop.f32.mrf.mxu0  ;;  %v5970_v56 = vrot.slane %v5969_v13, 4  ;;  %v9616_v54 = vld [vmem:[%s11489_s27 + $0x164] sm:$0x1] }
 0x1bb   : > { %v5965_v11 = vsel %vm11508_vm4, %v5960_v14, %v5964_v51  ;;  %v5982_v6 = vrot.slane %v5980_v19, 5  ;;  %v5996_v34 = vshll.u32 %v9614_v30, 16  ;;  %v13056_v33 = vpop.f32.mrf.mxu1  ;;  %v5988_v52 = vrot.slane %v5986_v7, 5  ;;  %v11374_v13 = vld [vmem:[%s11489_s27 + $0x170] sm:$0xff]   ;;  %v9617_v49 = vld [vmem:[%s11489_s27 + $0x168] sm:$0xf] }
 0x1bc   : > { %11176 = vmatprep.mubr.msk.bf16.mxu1 %vm1992_vm1, %v9722_v9  ;;  %v5992_v37 = vrot.slane %v5990_v8, 4  ;;  %v6000_v59 = vshrl.u32 %v9614_v30, 16  ;;  %v13061_v60 = vadd.f32 %v12897_v31, %v12948_v48  ;;  %v13064_v18 = vpop.f32.mrf.mxu0  ;;  %v5975_v51 = vsel %vm11508_vm4, %v5970_v56, %v5974_v4  ;;  %v11375_v31 = vld [vmem:[%s11489_s27 + $0x17c] sm:$0xff]  }
 0x1bd   : > { %v5983_v63 = vor.u32 %v5982_v6, %v5979_v39  ;;  %v5998_v12 = vrot.slane %v5996_v34, 5  ;;  %v6006_v14 = vshll.u32 %v9615_v58, 16  ;;  %v13069_v19 = vpop.f32.mrf.mxu1  ;;  %v9723_v9 = vcombine.low %v5965_v11, %v5975_v51 }
 0x1be   : > { %14649 = vst [vmem:[#allocation81_spill] sm:$0xff] %v13061_v60  ;;  %v5993_v7 = vor.u32 %v5992_v37, %v5988_v52  ;;  %v6002_v30 = vrot.slane %v6000_v59, 4  ;;  %v6010_v8 = vshrl.u32 %v9615_v58, 16  ;;  %v6016_v50 = vshll.u32 %v9616_v54, 16  ;;  %v9618_v58 = vld [vmem:[%s11489_s27 + $0x16c] sm:$0xf] }
 0x1bf   : > { %v5984_v48 = vrot.slane %v5983_v63, 4  ;;  %v6008_v60 = vrot.slane %v6006_v14, 5  ;;  %v13075_v4 = vadd.f32 %v12910_v46, %v12962_v42  ;;  %11177 = vmatmul.mubr.msk.bf16.gmra.mxu1 %vm1992_vm1, %v9723_v9  ;;  %v13080_v11 = vadd.f32 %v12924_v25, %v12974_v21  ;;  %v13083_v34 = vpop.f32.mrf.mxu0  ;;  %v9619_v42 = vld [vmem:[%s11489_s27 + $0x170] sm:$0xf] }
 0x1c0   : > { %v5994_v39 = vrot.slane %v5993_v7, 4  ;;  %v6003_v56 = vor.u32 %v6002_v30, %v5998_v12  ;;  %v6012_v6 = vrot.slane %v6010_v8, 4  ;;  %v13085_v37 = vpop.f32.mrf.mxu1  ;;  %v6018_v54 = vrot.slane %v6016_v50, 5  ;;  %v9620_v30 = vld [vmem:[%s11489_s27 + $0x174] sm:$0xf] }
 0x1c1   : > { %14650 = vst [vmem:[#allocation82_spill] sm:$0xff] %v13075_v4  ;;  %14651 = vst [vmem:[#allocation83_spill] sm:$0xff] %v13080_v11  ;;  %v5989_v59 = vsel %vm11508_vm4, %v5984_v48, %v5988_v52  ;;  %v13091_v46 = vadd.f32 %v12943_v62, %v12992_v32  ;;  %v6021_v51 = vshrl.u32 %v9617_v49, 16  ;;  %11055 = vmatmul.mubr.msk.bf16.gmra.mxu0 %vm1992_vm1, %v11374_v13  ;;  %v6024_v14 = vshll.u32 %v9617_v49, 16  ;;  %v13098_v9 = vpop.f32.mrf.mxu0 }
 0x1c2   : > { %v5999_v25 = vsel %vm11508_vm4, %v5994_v39, %v5998_v12  ;;  %v6004_v21 = vrot.slane %v6003_v56, 4  ;;  %v6013_v63 = vor.u32 %v6012_v6, %v6008_v60  ;;  %11058 = vmatprep.mubr.msk.bf16.mxu0 %vm1992_vm1, %v11375_v31  ;;  %v13100_v50 = vpop.f32.mrf.mxu1  ;;  %v6030_v32 = vshll.u32 %v9618_v58, 16 }
 0x1c3   : > { %14652 = vst [vmem:[#allocation84_spill] sm:$0xff] %v13091_v46  ;;  %v9724_v52 = vcombine.low %v5989_v59, %v5999_v25  ;;  %v6023_v62 = vrot.slane %v6021_v51, 4  ;;  %v6034_v7 = vshrl.u32 %v9618_v58, 16  ;;  %v6026_v8 = vrot.slane %v6024_v14, 5  ;;  %v13105_v48 = vpop.f32.mrf.mxu0  ;;  %v9621_v59 = vld [vmem:[%s11489_s27 + $0x178] sm:$0x1] }
 0x1c4   : > { %v6009_v13 = vsel %vm11508_vm4, %v6004_v21, %v6008_v60  ;;  %v6014_v12 = vrot.slane %v6013_v63, 4  ;;  %v6040_v49 = vshll.u32 %v9619_v42, 16  ;;  %v13107_v31 = vpop.f32.mrf.mxu1  ;;  %v6032_v39 = vrot.slane %v6030_v32, 5  ;;  %v11376_v60 = vld [vmem:[%s11489_s27 + $0x184] sm:$0xff]   ;;  %v11377_v46 = vld [vmem:[%s11489_s27 + $0x190] sm:$0xff]  }
 0x1c5   : > { %11180 = vmatprep.mubr.msk.bf16.mxu1 %vm1992_vm1, %v9724_v52  ;;  %v6036_v56 = vrot.slane %v6034_v7, 4  ;;  %v6044_v6 = vshrl.u32 %v9619_v42, 16  ;;  %v13112_v58 = vadd.f32 %v12950_v0, %v13000_v29  ;;  %v6027_v25 = vor.u32 %v6026_v8, %v6023_v62  ;;  %v13118_v14 = vpop.f32.mrf.mxu0  ;;  %v9622_v0 = vld [vmem:[%s11489_s27 + $0x17c] sm:$0xf] }
 0x1c6   : > { %v6019_v51 = vsel %vm11508_vm4, %v6014_v12, %v6018_v54  ;;  %v6042_v21 = vrot.slane %v6040_v49, 5  ;;  %v6050_v63 = vshll.u32 %v9620_v30, 16  ;;  %v13121_v52 = vpop.f32.mrf.mxu1  ;;  %v6054_v11 = vshrl.u32 %v9620_v30, 16  ;;  %v9623_v49 = vld [vmem:[%s11489_s27 + $0x180] sm:$0xf] }
 0x1c7   : > { %14653 = vst [vmem:[#allocation85_spill] sm:$0xff] %v13112_v58  ;;  %v9725_v32 = vcombine.low %v6009_v13, %v6019_v51  ;;  %v6037_v42 = vor.u32 %v6036_v56, %v6032_v39  ;;  %v6046_v7 = vrot.slane %v6044_v6, 4  ;;  %v6028_v29 = vrot.slane %v6027_v25, 4  ;;  %v9624_v6 = vld [vmem:[%s11489_s27 + $0x184] sm:$0xf] }
 0x1c8   : > { %v6052_v58 = vrot.slane %v6050_v63, 5  ;;  %v6060_v4 = vshll.u32 %v9621_v59, 16  ;;  %v13126_v54 = vadd.f32 %v12964_v43, %v13013_v17  ;;  %v6056_v8 = vrot.slane %v6054_v11, 4  ;;  %v9625_v63 = vld [vmem:[%s11489_s27 + $0x188] sm:$0xf] }
 0x1c9   : > { %11181 = vmatmul.mubr.msk.bf16.gmra.mxu1 %vm1992_vm1, %v9725_v32  ;;  %v6038_v62 = vrot.slane %v6037_v42, 4  ;;  %v6047_v12 = vor.u32 %v6046_v7, %v6042_v21  ;;  %v13131_v13 = vadd.f32 %v12976_v10, %v13026_v20  ;;  %11059 = vmatmul.mubr.msk.bf16.gmra.mxu0 %vm1992_vm1, %v11376_v60  ;;  %v13135_v30 = vpop.f32.mrf.mxu0  ;;  %v6033_v56 = vsel %vm11508_vm4, %v6028_v29, %v6032_v39  ;;  %v13145_v10 = vpop.f32.mrf.mxu1  ;;  %v11378_v29 = vld [vmem:[%s11489_s27 + $0x198] sm:$0xff]  }
 0x1ca   : > { %14654 = vst [vmem:[#allocation86_spill] sm:$0xff] %v13126_v54  ;;  %v6062_v43 = vrot.slane %v6060_v4, 5  ;;  %v13141_v17 = vadd.f32 %v12994_v5, %v13043_v45  ;;  %v6065_v11 = vshrl.u32 %v9622_v0, 16  ;;  %11062 = vmatprep.mubr.msk.bf16.mxu0 %vm1992_vm1, %v11377_v46  ;;  %v6057_v60 = vor.u32 %v6056_v8, %v6052_v58 }
 0x1cb   : > { %14655 = vst [vmem:[#allocation87_spill] sm:$0xff] %v13131_v13  ;;  %v6043_v20 = vsel %vm11508_vm4, %v6038_v62, %v6042_v21  ;;  %v6048_v59 = vrot.slane %v6047_v12, 4  ;;  %v6068_v51 = vshll.u32 %v9622_v0, 16  ;;  %v13149_v39 = vpop.f32.mrf.mxu0  ;;  %v6074_v5 = vshll.u32 %v9623_v49, 16  ;;  %v13152_v32 = vpop.f32.mrf.mxu1  ;;  %v9627_v13 = vld [vmem:[%s11489_s27 + $0x190] sm:$0xf] }
 0x1cc   : > { %14656 = vst [vmem:[#allocation88_spill] sm:$0xff] %v13141_v17  ;;  %v9726_v4 = vcombine.low %v6033_v56, %v6043_v20  ;;  %v6067_v25 = vrot.slane %v6065_v11, 4  ;;  %v6078_v45 = vshrl.u32 %v9623_v49, 16  ;;  %v6058_v42 = vrot.slane %v6057_v60, 4  ;;  %v9626_v56 = vld [vmem:[%s11489_s27 + $0x18c] sm:$0x1] }
 0x1cd   : > { %v6053_v46 = vsel %vm11508_vm4, %v6048_v59, %v6052_v58  ;;  %v6070_v7 = vrot.slane %v6068_v51, 5  ;;  %v6084_v21 = vshll.u32 %v9624_v6, 16  ;;  %v13157_v62 = vpop.f32.mrf.mxu0  ;;  %v6076_v0 = vrot.slane %v6074_v5, 5  ;;  %v11379_v11 = vld [vmem:[%s11489_s27 + $0x1a4] sm:$0xff]   ;;  %v13166_v20 = vpop.f32.mrf.mxu1 }
 0x1ce   : > { %11184 = vmatprep.mubr.msk.bf16.mxu1 %vm1992_vm1, %v9726_v4  ;;  %v6080_v12 = vrot.slane %v6078_v45, 4  ;;  %v6088_v8 = vshrl.u32 %v9624_v6, 16  ;;  %v13162_v49 = vadd.f32 %v13002_v26, %v13052_v35  ;;  %v6063_v58 = vsel %vm11508_vm4, %v6058_v42, %v6062_v43 }
 0x1cf   : > { %v6071_v59 = vor.u32 %v6070_v7, %v6067_v25  ;;  %v6086_v60 = vrot.slane %v6084_v21, 5  ;;  %v6094_v51 = vshll.u32 %v9625_v63, 16  ;;  %v13170_v17 = vpop.f32.mrf.mxu0  ;;  %v9727_v4 = vcombine.low %v6053_v46, %v6063_v58  ;;  %v13173_v26 = vpop.f32.mrf.mxu1  ;;  %v9628_v7 = vld [vmem:[%s11489_s27 + $0x194] sm:$0xf] }
 0x1d0   : > { %14657 = vst [vmem:[#allocation89_spill] sm:$0xff] %v13162_v49  ;;  %v6081_v5 = vor.u32 %v6080_v12, %v6076_v0  ;;  %v6090_v6 = vrot.slane %v6088_v8, 4  ;;  %v6098_v45 = vshrl.u32 %v9625_v63, 16  ;;  %v6104_v54 = vshll.u32 %v9626_v56, 16 }
 0x1d1   : > { %v6072_v35 = vrot.slane %v6071_v59, 4  ;;  %v6096_v49 = vrot.slane %v6094_v51, 5  ;;  %v13177_v43 = vadd.f32 %v13015_v28, %v13064_v18  ;;  %11063 = vmatmul.mubr.msk.bf16.gmra.mxu0 %vm1992_vm1, %v11378_v29  ;;  %11185 = vmatmul.mubr.msk.bf16.gmra.mxu1 %vm1992_vm1, %v9727_v4  ;;  %v13183_v63 = vadd.f32 %v13034_v47, %v13083_v34  ;;  %v9629_v29 = vld [vmem:[%s11489_s27 + $0x198] sm:$0xf] }
 0x1d2   : > { %v6082_v25 = vrot.slane %v6081_v5, 4  ;;  %v6091_v46 = vor.u32 %v6090_v6, %v6086_v60  ;;  %v6100_v42 = vrot.slane %v6098_v45, 4  ;;  %11066 = vmatprep.mubr.msk.bf16.mxu0 %vm1992_vm1, %v11379_v11  ;;  %v6106_v28 = vrot.slane %v6104_v54, 5 }
 0x1d3   : > { %14658 = vst [vmem:[#allocation90_spill] sm:$0xff] %v13177_v43  ;;  %14659 = vst [vmem:[#allocation91_spill] sm:$0xff] %v13183_v63  ;;  %v6077_v21 = vsel %vm11508_vm4, %v6072_v35, %v6076_v0  ;;  %v13191_v18 = vadd.f32 %v13048_v55, %v13098_v9  ;;  %v6109_v12 = vshrl.u32 %v9627_v13, 16  ;;  %v13194_v8 = vpop.f32.mrf.mxu0  ;;  %v13196_v56 = vpop.f32.mrf.mxu1  ;;  %v6112_v58 = vshll.u32 %v9627_v13, 16  ;;  %v9630_v55 = vld [vmem:[%s11489_s27 + $0x19c] sm:$0xf] }
 0x1d4   : > { %v6087_v47 = vsel %vm11508_vm4, %v6082_v25, %v6086_v60  ;;  %v6092_v34 = vrot.slane %v6091_v46, 4  ;;  %v6101_v11 = vor.u32 %v6100_v42, %v6096_v49  ;;  %v6118_v54 = vshll.u32 %v9628_v7, 16  ;;  %v11380_v9 = vld [vmem:[%s11489_s27 + $0x1ac] sm:$0xff]   ;;  %v11381_v25 = vld [vmem:[%s11489_s27 + $0x1b8] sm:$0xff]  }
 0x1d5   : > { %14660 = vst [vmem:[#allocation92_spill] sm:$0xff] %v13191_v18  ;;  %v9728_v0 = vcombine.low %v6077_v21, %v6087_v47  ;;  %v6111_v59 = vrot.slane %v6109_v12, 4  ;;  %v6122_v51 = vshrl.u32 %v9628_v7, 16  ;;  %v13202_v4 = vpop.f32.mrf.mxu0  ;;  %v13204_v5 = vpop.f32.mrf.mxu1  ;;  %v6114_v60 = vrot.slane %v6112_v58, 5  ;;  %v9631_v21 = vld [vmem:[%s11489_s27 + $0x1a0] sm:$0x1] }
 0x1d6   : > { %v6097_v6 = vsel %vm11508_vm4, %v6092_v34, %v6096_v49  ;;  %v6102_v45 = vrot.slane %v6101_v11, 4  ;;  %v6128_v35 = vshll.u32 %v9629_v29, 16  ;;  %v6120_v13 = vrot.slane %v6118_v54, 5 }
 0x1d7   : > { %11188 = vmatprep.mubr.msk.bf16.mxu1 %vm1992_vm1, %v9728_v0  ;;  %v6124_v46 = vrot.slane %v6122_v51, 4  ;;  %v6132_v42 = vshrl.u32 %v9629_v29, 16  ;;  %v13212_v7 = vadd.f32 %v13056_v33, %v13105_v48  ;;  %v13215_v12 = vpop.f32.mrf.mxu0  ;;  %v13217_v47 = vpop.f32.mrf.mxu1  ;;  %v6115_v34 = vor.u32 %v6114_v60, %v6111_v59  ;;  %v9632_v51 = vld [vmem:[%s11489_s27 + $0x1a4] sm:$0xf] }
 0x1d8   : > { %v6107_v49 = vsel %vm11508_vm4, %v6102_v45, %v6106_v28  ;;  %v6130_v11 = vrot.slane %v6128_v35, 5  ;;  %v6138_v58 = vshll.u32 %v9630_v55, 16  ;;  %v6142_v29 = vshrl.u32 %v9630_v55, 16  ;;  %v9633_v45 = vld [vmem:[%s11489_s27 + $0x1a8] sm:$0xf] }
 0x1d9   : > { %14661 = vst [vmem:[#allocation93_spill] sm:$0xff] %v13212_v7  ;;  %v9729_v0 = vcombine.low %v6097_v6, %v6107_v49  ;;  %v6125_v18 = vor.u32 %v6124_v46, %v6120_v13  ;;  %v6134_v54 = vrot.slane %v6132_v42, 4  ;;  %11067 = vmatmul.mubr.msk.bf16.gmra.mxu0 %vm1992_vm1, %v11380_v9  ;;  %v13223_v33 = vpop.f32.mrf.mxu0  ;;  %v13225_v48 = vpop.f32.mrf.mxu1  ;;  %v6116_v7 = vrot.slane %v6115_v34, 4 }
 0x1da   : > { %14662 = vst [vmem:[#allocation94_spill] sm:$0xff] %v13225_v48  ;;  %v6140_v63 = vrot.slane %v6138_v58, 5  ;;  %v6148_v43 = vshll.u32 %v9631_v21, 16  ;;  %v13229_v28 = vadd.f32 %v13069_v19, %v13118_v14  ;;  %11070 = vmatprep.mubr.msk.bf16.mxu0 %vm1992_vm1, %v11381_v25  ;;  %v6144_v9 = vrot.slane %v6142_v29, 4  ;;  %v9634_v14 = vld [vmem:[%s11489_s27 + $0x1ac] sm:$0xf] }
 0x1db   : > { %11189 = vmatmul.mubr.msk.bf16.gmra.mxu1 %vm1992_vm1, %v9729_v0  ;;  %v6126_v59 = vrot.slane %v6125_v18, 4  ;;  %v6135_v55 = vor.u32 %v6134_v54, %v6130_v11  ;;  %v13235_v6 = vadd.f32 %v13085_v37, %v13135_v30  ;;  %v6121_v60 = vsel %vm11508_vm4, %v6116_v7, %v6120_v13  ;;  %v11382_v13 = vld [vmem:[%s11489_s27 + $0x1c0] sm:$0xff]   ;;  %v11383_v58 = vld [vmem:[%s11489_s27 + $0x1cc] sm:$0xff]  }
 0x1dc   : > { %14663 = vst [vmem:[#allocation95_spill] sm:$0xff] %v13229_v28  ;;  %v6150_v35 = vrot.slane %v6148_v43, 5  ;;  %v13242_v19 = vadd.f32 %v13100_v50, %v13149_v39  ;;  %v6153_v18 = vshrl.u32 %v9632_v51, 16  ;;  %v13245_v25 = vpop.f32.mrf.mxu1  ;;  %v6145_v30 = vor.u32 %v6144_v9, %v6140_v63  ;;  %v9635_v39 = vld [vmem:[%s11489_s27 + $0x1b0] sm:$0xf] }
 0x1dd   : > { %14664 = vst [vmem:[#allocation96_spill] sm:$0xff] %v13235_v6  ;;  %v6131_v46 = vsel %vm11508_vm4, %v6126_v59, %v6130_v11  ;;  %v6136_v37 = vrot.slane %v6135_v55, 4  ;;  %v6156_v42 = vshll.u32 %v9632_v51, 16  ;;  %v13249_v21 = vpop.f32.mrf.mxu0  ;;  %v6162_v49 = vshll.u32 %v9633_v45, 16 }
 0x1de   : > { %14665 = vst [vmem:[#allocation97_spill] sm:$0xff] %v13242_v19  ;;  %v9730_v7 = vcombine.low %v6121_v60, %v6131_v46  ;;  %v6155_v43 = vrot.slane %v6153_v18, 4  ;;  %v6166_v50 = vshrl.u32 %v9633_v45, 16  ;;  %v13253_v34 = vpop.f32.mrf.mxu1  ;;  %v6146_v54 = vrot.slane %v6145_v30, 4  ;;  %v9636_v60 = vld [vmem:[%s11489_s27 + $0x1b4] sm:$0x1] }
 0x1df   : > { %v6141_v0 = vsel %vm11508_vm4, %v6136_v37, %v6140_v63  ;;  %v6158_v11 = vrot.slane %v6156_v42, 5  ;;  %v6172_v29 = vshll.u32 %v9634_v14, 16  ;;  %v13258_v59 = vpop.f32.mrf.mxu0  ;;  %v6164_v51 = vrot.slane %v6162_v49, 5 }
 0x1e0   : > { %11192 = vmatprep.mubr.msk.bf16.mxu1 %vm1992_vm1, %v9730_v7  ;;  %v6168_v55 = vrot.slane %v6166_v50, 4  ;;  %v6176_v9 = vshrl.u32 %v9634_v14, 16  ;;  %v13263_v45 = vadd.f32 %v13107_v31, %v13157_v62  ;;  %v13266_v18 = vpop.f32.mrf.mxu1  ;;  %v6151_v63 = vsel %vm11508_vm4, %v6146_v54, %v6150_v35  ;;  %v9637_v31 = vld [vmem:[%s11489_s27 + $0x1b8] sm:$0xf] }
 0x1e1   : > { %v6159_v46 = vor.u32 %v6158_v11, %v6155_v43  ;;  %v6174_v37 = vrot.slane %v6172_v29, 5  ;;  %v6182_v30 = vshll.u32 %v9635_v39, 16  ;;  %11071 = vmatmul.mubr.msk.bf16.gmra.mxu0 %vm1992_vm1, %v11382_v13  ;;  %v13271_v42 = vpop.f32.mrf.mxu0  ;;  %v9731_v7 = vcombine.low %v6141_v0, %v6151_v63  ;;  %v9638_v11 = vld [vmem:[%s11489_s27 + $0x1bc] sm:$0xf]  ;;  %v11384_v63 = vld [vmem:[%s11489_s27 + $0x1d4] sm:$0xff]  }
 0x1e2   : > { %14666 = vst [vmem:[#allocation98_spill] sm:$0xff] %v13263_v45  ;;  %v6169_v14 = vor.u32 %v6168_v55, %v6164_v51  ;;  %v6178_v49 = vrot.slane %v6176_v9, 4  ;;  %v6186_v50 = vshrl.u32 %v9635_v39, 16  ;;  %11074 = vmatprep.mubr.msk.bf16.mxu0 %vm1992_vm1, %v11383_v58  ;;  %v6192_v35 = vshll.u32 %v9636_v60, 16  ;;  %v13287_v29 = vpop.f32.mrf.mxu1  ;;  %v9639_v9 = vld [vmem:[%s11489_s27 + $0x1c0] sm:$0xf] }
 0x1e3   : > { %v6160_v62 = vrot.slane %v6159_v46, 4  ;;  %v6184_v48 = vrot.slane %v6182_v30, 5  ;;  %v13277_v43 = vadd.f32 %v13121_v52, %v13170_v17  ;;  %v13279_v13 = vpop.f32.mrf.mxu0  ;;  %11193 = vmatmul.mubr.msk.bf16.gmra.mxu1 %vm1992_vm1, %v9731_v7  ;;  %v13284_v58 = vadd.f32 %v13145_v10, %v13194_v8  ;;  %14670 = vst [vmem:[#allocation102_spill] sm:$0xff] %v13287_v29  ;;  %v11385_v7 = vld [vmem:[%s11489_s27 + $0x1e0] sm:$0xff]  }
 0x1e4   : > { %14668 = vst [vmem:[#allocation100_spill] sm:$0xff] %v13279_v13  ;;  %v6170_v0 = vrot.slane %v6169_v14, 4  ;;  %v6179_v54 = vor.u32 %v6178_v49, %v6174_v37  ;;  %v6188_v39 = vrot.slane %v6186_v50, 4  ;;  %v6194_v17 = vrot.slane %v6192_v35, 5 }
 0x1e5   : > { %14667 = vst [vmem:[#allocation99_spill] sm:$0xff] %v13277_v43  ;;  %14669 = vst [vmem:[#allocation101_spill] sm:$0xff] %v13284_v58  ;;  %v6165_v52 = vsel %vm11508_vm4, %v6160_v62, %v6164_v51  ;;  %v13293_v55 = vadd.f32 %v13152_v32, %v13202_v4  ;;  %v6197_v60 = vshrl.u32 %v9637_v31, 16  ;;  %v6200_v30 = vshll.u32 %v9637_v31, 16  ;;  %v9640_v62 = vld [vmem:[%s11489_s27 + $0x1c4] sm:$0xf] }
 0x1e6   : > { %v6175_v46 = vsel %vm11508_vm4, %v6170_v0, %v6174_v37  ;;  %v6180_v10 = vrot.slane %v6179_v54, 4  ;;  %v6189_v8 = vor.u32 %v6188_v39, %v6184_v48  ;;  %v6206_v50 = vshll.u32 %v9638_v11, 16  ;;  %v9641_v39 = vld [vmem:[%s11489_s27 + $0x1c8] sm:$0x1] }
 0x1e7   : > { %14671 = vst [vmem:[#allocation103_spill] sm:$0xff] %v13293_v55  ;;  %v9732_v14 = vcombine.low %v6165_v52, %v6175_v46  ;;  %v6199_v49 = vrot.slane %v6197_v60, 4  ;;  %v6210_v51 = vshrl.u32 %v9638_v11, 16  ;;  %v13301_v35 = vpop.f32.mrf.mxu0  ;;  %v6202_v29 = vrot.slane %v6200_v30, 5  ;;  %v13305_v55 = vpop.f32.mrf.mxu1 }
 0x1e8   : > { %v6185_v32 = vsel %vm11508_vm4, %v6180_v10, %v6184_v48  ;;  %v6190_v4 = vrot.slane %v6189_v8, 4  ;;  %v6216_v13 = vshll.u32 %v9639_v9, 16  ;;  %v6208_v37 = vrot.slane %v6206_v50, 5 }
 0x1e9   : > { %11196 = vmatprep.mubr.msk.bf16.mxu1 %vm1992_vm1, %v9732_v14  ;;  %v6212_v31 = vrot.slane %v6210_v51, 4  ;;  %v6220_v0 = vshrl.u32 %v9639_v9, 16  ;;  %v13310_v54 = vadd.f32 %v13166_v20, %v13215_v12  ;;  %11075 = vmatmul.mubr.msk.bf16.gmra.mxu0 %vm1992_vm1, %v11384_v63  ;;  %v13314_v11 = vpop.f32.mrf.mxu0  ;;  %v6203_v52 = vor.u32 %v6202_v29, %v6199_v49  ;;  %v9642_v12 = vld [vmem:[%s11489_s27 + $0x1cc] sm:$0xf]  ;;  %v13326_v29 = vpop.f32.mrf.mxu1 }
 0x1ea   : > { %v6195_v48 = vsel %vm11508_vm4, %v6190_v4, %v6194_v17  ;;  %v6218_v60 = vrot.slane %v6216_v13, 5  ;;  %v6226_v46 = vshll.u32 %v9640_v62, 16  ;;  %11078 = vmatprep.mubr.msk.bf16.mxu0 %vm1992_vm1, %v11385_v7  ;;  %v6230_v20 = vshrl.u32 %v9640_v62, 16  ;;  %v9643_v62 = vld [vmem:[%s11489_s27 + $0x1d0] sm:$0xf]  ;;  %v11386_v4 = vld [vmem:[%s11489_s27 + $0x1e8] sm:$0xff]  }
 0x1eb   : > { %14672 = vst [vmem:[#allocation104_spill] sm:$0xff] %v13310_v54  ;;  %v9733_v10 = vcombine.low %v6185_v32, %v6195_v48  ;;  %v6213_v9 = vor.u32 %v6212_v31, %v6208_v37  ;;  %v6222_v8 = vrot.slane %v6220_v0, 4  ;;  %v13320_v30 = vpop.f32.mrf.mxu0  ;;  %v6204_v63 = vrot.slane %v6203_v52, 4  ;;  %v9644_v0 = vld [vmem:[%s11489_s27 + $0x1d4] sm:$0xf] }
 0x1ec   : > { %v6228_v14 = vrot.slane %v6226_v46, 5  ;;  %v6236_v50 = vshll.u32 %v9641_v39, 16  ;;  %v13324_v13 = vadd.f32 %v13173_v26, %v13223_v33  ;;  %v6232_v49 = vrot.slane %v6230_v20, 4  ;;  %v11387_v48 = vld [vmem:[%s11489_s27 + $0x1f4] sm:$0xff]  }
 0x1ed   : > { %11197 = vmatmul.mubr.msk.bf16.gmra.mxu1 %vm1992_vm1, %v9733_v10  ;;  %v6214_v17 = vrot.slane %v6213_v9, 4  ;;  %v6223_v7 = vor.u32 %v6222_v8, %v6218_v60  ;;  %v13331_v51 = vadd.f32 %v13196_v56, %v13249_v21  ;;  %v13334_v32 = vpop.f32.mrf.mxu0  ;;  %v6209_v26 = vsel %vm11508_vm4, %v6204_v63, %v6208_v37  ;;  %v9645_v37 = vld [vmem:[%s11489_s27 + $0x1d8] sm:$0xf]  ;;  %v13348_v63 = vpop.f32.mrf.mxu1 }
 0x1ee   : > { %14673 = vst [vmem:[#allocation105_spill] sm:$0xff] %v13324_v13  ;;  %14675 = vst [vmem:[#allocation107_spill] sm:$0xff] %v13334_v32  ;;  %v6238_v33 = vrot.slane %v6236_v50, 5  ;;  %v13341_v31 = vadd.f32 %v13204_v5, %v13258_v59  ;;  %v6241_v39 = vshrl.u32 %v9642_v12, 16  ;;  %v6233_v52 = vor.u32 %v6232_v49, %v6228_v14  ;;  %v9646_v49 = vld [vmem:[%s11489_s27 + $0x1dc] sm:$0x1] }
 0x1ef   : > { %14674 = vst [vmem:[#allocation106_spill] sm:$0xff] %v13331_v51  ;;  %v6219_v56 = vsel %vm11508_vm4, %v6214_v17, %v6218_v60  ;;  %v6224_v21 = vrot.slane %v6223_v7, 4  ;;  %v6244_v46 = vshll.u32 %v9642_v12, 16  ;;  %v6250_v8 = vshll.u32 %v9643_v62, 16 }
 0x1f0   : > { %14676 = vst [vmem:[#allocation108_spill] sm:$0xff] %v13341_v31  ;;  %v9734_v10 = vcombine.low %v6209_v26, %v6219_v56  ;;  %v6243_v9 = vrot.slane %v6241_v39, 4  ;;  %v6254_v20 = vshrl.u32 %v9643_v62, 16  ;;  %v6234_v59 = vrot.slane %v6233_v52, 4 }
 0x1f1   : > { %v6229_v5 = vsel %vm11508_vm4, %v6224_v21, %v6228_v14  ;;  %v6246_v50 = vrot.slane %v6244_v46, 5  ;;  %v6260_v32 = vshll.u32 %v9644_v0, 16  ;;  %v13352_v31 = vpop.f32.mrf.mxu0  ;;  %11079 = vmatmul.mubr.msk.bf16.gmra.mxu0 %vm1992_vm1, %v11386_v4  ;;  %v6252_v60 = vrot.slane %v6250_v8, 5 }
 0x1f2   : > { %11200 = vmatprep.mubr.msk.bf16.mxu1 %vm1992_vm1, %v9734_v10  ;;  %v6256_v12 = vrot.slane %v6254_v20, 4  ;;  %v6264_v17 = vshrl.u32 %v9644_v0, 16  ;;  %v13358_v7 = vadd.f32 %v13217_v47, %v13271_v42  ;;  %11082 = vmatprep.mubr.msk.bf16.mxu0 %vm1992_vm1, %v11387_v48  ;;  %v6239_v14 = vsel %vm11508_vm4, %v6234_v59, %v6238_v33  ;;  %v9647_v47 = vld [vmem:[%s11489_s27 + $0x1e0] sm:$0xf]  ;;  %v13367_v42 = vpop.f32.mrf.mxu1  ;;  %v11389_v59 = vld [vmem:[%s11489_s27 + $0x208] sm:$0xff]  }
 0x1f3   : > { %v6247_v62 = vor.u32 %v6246_v50, %v6243_v9  ;;  %v6262_v26 = vrot.slane %v6260_v32, 5  ;;  %v6270_v4 = vshll.u32 %v9645_v37, 16  ;;  %v13364_v39 = vpop.f32.mrf.mxu0  ;;  %v9735_v56 = vcombine.low %v6229_v5, %v6239_v14  ;;  %14678 = vst [vmem:[#allocation110_spill] sm:$0xff] %v13367_v42  ;;  %v11388_v33 = vld [vmem:[%s11489_s27 + $0x1fc] sm:$0xff]  }
 0x1f4   : > { %14677 = vst [vmem:[#allocation109_spill] sm:$0xff] %v13358_v7  ;;  %v6257_v21 = vor.u32 %v6256_v12, %v6252_v60  ;;  %v6266_v0 = vrot.slane %v6264_v17, 4  ;;  %v6274_v52 = vshrl.u32 %v9645_v37, 16  ;;  %v6280_v10 = vshll.u32 %v9646_v49, 16  ;;  %v9648_v37 = vld [vmem:[%s11489_s27 + $0x1e4] sm:$0xf] }
 0x1f5   : > { %v6248_v48 = vrot.slane %v6247_v62, 4  ;;  %v6272_v46 = vrot.slane %v6270_v4, 5  ;;  %v13369_v8 = vpop.f32.mrf.mxu0  ;;  %11201 = vmatmul.mubr.msk.bf16.gmra.mxu1 %vm1992_vm1, %v9735_v56  ;;  %v13375_v5 = vadd.f32 %v13245_v25, %v13301_v35  ;;  %v13383_v17 = vadd.f32 %v13253_v34, %v13314_v11  ;;  %v9649_v49 = vld [vmem:[%s11489_s27 + $0x1e8] sm:$0xf] }
 0x1f6   : > { %v6258_v32 = vrot.slane %v6257_v21, 4  ;;  %v6267_v9 = vor.u32 %v6266_v0, %v6262_v26  ;;  %v6276_v20 = vrot.slane %v6274_v52, 4  ;;  %v6282_v12 = vrot.slane %v6280_v10, 5  ;;  %v9650_v10 = vld [vmem:[%s11489_s27 + $0x1ec] sm:$0xf] }
 0x1f7   : > { %14679 = vst [vmem:[#allocation111_spill] sm:$0xff] %v13375_v5  ;;  %v6253_v50 = vsel %vm11508_vm4, %v6248_v48, %v6252_v60  ;;  %14680 = vst [vmem:[#allocation112_spill] sm:$0xff] %v13383_v17  ;;  %v6285_v14 = vshrl.u32 %v9647_v47, 16  ;;  %v13386_v62 = vpop.f32.mrf.mxu0  ;;  %v6288_v56 = vshll.u32 %v9647_v47, 16  ;;  %v6294_v60 = vshll.u32 %v9648_v37, 16 }
 0x1f8   : > { %14681 = vst [vmem:[#allocation113_spill] sm:$0xff] %v13386_v62  ;;  %v6263_v4 = vsel %vm11508_vm4, %v6258_v32, %v6262_v26  ;;  %v6268_v25 = vrot.slane %v6267_v9, 4  ;;  %v6277_v35 = vor.u32 %v6276_v20, %v6272_v46  ;;  %v13390_v21 = vpop.f32.mrf.mxu1  ;;  %v6298_v48 = vshrl.u32 %v9648_v37, 16  ;;  %v9657_v5 = vld [vmem:[%s11489_s27 + $0x208] sm:$0xf] }
 0x1f9   : > { %v9736_v0 = vcombine.low %v6253_v50, %v6263_v4  ;;  %v6287_v52 = vrot.slane %v6285_v14, 4  ;;  %v13393_v34 = vpop.f32.mrf.mxu0  ;;  %11083 = vmatmul.mubr.msk.bf16.gmra.mxu0 %vm1992_vm1, %v11388_v33  ;;  %v6290_v26 = vrot.slane %v6288_v56, 5  ;;  %v6304_v32 = vshll.u32 %v9649_v49, 16  ;;  %v9651_v50 = vld [vmem:[%s11489_s27 + $0x1f0] sm:$0x1] }
 0x1fa   : > { %v6273_v11 = vsel %vm11508_vm4, %v6268_v25, %v6272_v46  ;;  %v6278_v42 = vrot.slane %v6277_v35, 4  ;;  %v13398_v9 = vpop.f32.mrf.mxu1  ;;  %11086 = vmatprep.mubr.msk.bf16.mxu0 %vm1992_vm1, %v11389_v59  ;;  %v6296_v47 = vrot.slane %v6294_v60, 5  ;;  %v6300_v20 = vrot.slane %v6298_v48, 4  ;;  %v9652_v48 = vld [vmem:[%s11489_s27 + $0x1f4] sm:$0xf] }
 0x1fb   : > { %11204 = vmatprep.mubr.msk.bf16.mxu1 %vm1992_vm1, %v9736_v0  ;;  %v6308_v37 = vshrl.u32 %v9649_v49, 16  ;;  %v13404_v33 = vadd.f32 %v13266_v18, %v13320_v30  ;;  %v13407_v46 = vpop.f32.mrf.mxu0  ;;  %v6291_v4 = vor.u32 %v6290_v26, %v6287_v52  ;;  %v6306_v59 = vrot.slane %v6304_v32, 5  ;;  %v11390_v30 = vld [vmem:[%s11489_s27 + $0x210] sm:$0xff]  }
 0x1fc   : > { %v6283_v14 = vsel %vm11508_vm4, %v6278_v42, %v6282_v12  ;;  %v6314_v25 = vshll.u32 %v9650_v10, 16  ;;  %v13411_v35 = vpop.f32.mrf.mxu1  ;;  %v6301_v0 = vor.u32 %v6300_v20, %v6296_v47  ;;  %v6318_v60 = vshrl.u32 %v9650_v10, 16  ;;  %v11391_v12 = vld [vmem:[%s11489_s27 + $0x21c] sm:$0xff]   ;;  %v9653_v10 = vld [vmem:[%s11489_s27 + $0x1f8] sm:$0xf] }
 0x1fd   : > { %14682 = vst [vmem:[#allocation114_spill] sm:$0xff] %v13404_v33  ;;  %v9737_v56 = vcombine.low %v6273_v11, %v6283_v14  ;;  %v6310_v49 = vrot.slane %v6308_v37, 4  ;;  %v13414_v18 = vpop.f32.mrf.mxu0  ;;  %v6292_v62 = vrot.slane %v6291_v4, 4  ;;  %v6324_v17 = vshll.u32 %v9651_v50, 16  ;;  %v9654_v4 = vld [vmem:[%s11489_s27 + $0x1fc] sm:$0xf] }
 0x1fe   : > { %v6316_v33 = vrot.slane %v6314_v25, 5  ;;  %v13417_v42 = vpop.f32.mrf.mxu1  ;;  %v6302_v52 = vrot.slane %v6301_v0, 4  ;;  %v6320_v11 = vrot.slane %v6318_v60, 4  ;;  %v13423_v32 = vadd.f32 %v13305_v55, %v13352_v31 }
 0x1ff   : > { %11205 = vmatmul.mubr.msk.bf16.gmra.mxu1 %vm1992_vm1, %v9737_v56  ;;  %v6311_v26 = vor.u32 %v6310_v49, %v6306_v59  ;;  %v13426_v20 = vpop.f32.mrf.mxu0  ;;  %v6297_v37 = vsel %vm11508_vm4, %v6292_v62, %v6296_v47  ;;  %v6326_v50 = vrot.slane %v6324_v17, 5  ;;  %v13432_v14 = vadd.f32 %v13326_v29, %v13364_v39  ;;  %v9655_v47 = vld [vmem:[%s11489_s27 + $0x200] sm:$0xf] }
 0x200   : > { %14683 = vst [vmem:[#allocation115_spill] sm:$0xff] %v13423_v32  ;;  %v6329_v25 = vshrl.u32 %v9652_v48, 16  ;;  %v6307_v56 = vsel %vm11508_vm4, %v6302_v52, %v6306_v59  ;;  %v6321_v55 = vor.u32 %v6320_v11, %v6316_v33  ;;  %v6332_v31 = vshll.u32 %v9652_v48, 16 }
 0x201   : > { %14684 = vst [vmem:[#allocation116_spill] sm:$0xff] %v13432_v14  ;;  %v6312_v0 = vrot.slane %v6311_v26, 4  ;;  %v13437_v49 = vpop.f32.mrf.mxu0  ;;  %11087 = vmatmul.mubr.msk.bf16.gmra.mxu0 %vm1992_vm1, %v11390_v30  ;;  %v9738_v60 = vcombine.low %v6297_v37, %v6307_v56  ;;  %v6338_v17 = vshll.u32 %v9653_v10, 16  ;;  %v6342_v62 = vshrl.u32 %v9653_v10, 16 }
 0x202   : > { %v6331_v32 = vrot.slane %v6329_v25, 4  ;;  %v13441_v29 = vpop.f32.mrf.mxu1  ;;  %11090 = vmatprep.mubr.msk.bf16.mxu0 %vm1992_vm1, %v11391_v12  ;;  %v6322_v59 = vrot.slane %v6321_v55, 4  ;;  %v6334_v48 = vrot.slane %v6332_v31, 5  ;;  %v6348_v52 = vshll.u32 %v9654_v4, 16  ;;  %v9656_v12 = vld [vmem:[%s11489_s27 + $0x204] sm:$0x1] }
 0x203   : > { %v6317_v39 = vsel %vm11508_vm4, %v6312_v0, %v6316_v33  ;;  %v13446_v26 = vpop.f32.mrf.mxu0  ;;  %11208 = vmatprep.mubr.msk.bf16.mxu1 %vm1992_vm1, %v9738_v60  ;;  %v6340_v30 = vrot.slane %v6338_v17, 5  ;;  %v6344_v11 = vrot.slane %v6342_v62, 4  ;;  %v6352_v10 = vshrl.u32 %v9654_v4, 16  ;;  %v11392_v60 = vld [vmem:[%s11489_s27 + $0x224] sm:$0xff]  }
 0x204   : > { %v13451_v37 = vadd.f32 %v13348_v63, %v13369_v8  ;;  %v13454_v25 = vpop.f32.mrf.mxu1  ;;  %v6327_v33 = vsel %vm11508_vm4, %v6322_v59, %v6326_v50  ;;  %v6335_v56 = vor.u32 %v6334_v48, %v6331_v32  ;;  %v6350_v0 = vrot.slane %v6348_v52, 5  ;;  %v11393_v63 = vld [vmem:[%s11489_s27 + $0x230] sm:$0xff]  }
 0x205   : > { %v6358_v55 = vshll.u32 %v9655_v47, 16  ;;  %v13458_v31 = vpop.f32.mrf.mxu0  ;;  %v9739_v17 = vcombine.low %v6317_v39, %v6327_v33  ;;  %v6345_v62 = vor.u32 %v6344_v11, %v6340_v30  ;;  %v6354_v4 = vrot.slane %v6352_v10, 4  ;;  %v13477_v11 = vld [vmem:[%s14566_s2] ss:$0 sm:$0xff] }
 0x206   : > { %14685 = vst [vmem:[#allocation117_spill] sm:$0xff] %v13451_v37  ;;  %v6362_v14 = vshrl.u32 %v9655_v47, 16  ;;  %v13462_v7 = vpop.f32.mrf.mxu1  ;;  %v6336_v8 = vrot.slane %v6335_v56, 4  ;;  %v6368_v51 = vshll.u32 %v9656_v12, 16  ;;  %v4986_v39 = vadd.f32 %v13393_v34, %v11932_v38  ;;  %v9658_v12 = vld [vmem:[%s11489_s27 + $0x20c] sm:$0xf] }
 0x207   : > { %v6360_v37 = vrot.slane %v6358_v55, 5  ;;  %v13465_v13 = vpop.f32.mrf.mxu0  ;;  %11209 = vmatmul.mubr.msk.bf16.gmra.mxu1 %vm1992_vm1, %v9739_v17  ;;  %v6346_v32 = vrot.slane %v6345_v62, 4  ;;  %v6355_v50 = vor.u32 %v6354_v4, %v6350_v0  ;;  %v4984_v10 = vadd.f32 %v13407_v46, %v11934_v40  ;;  %v9659_v56 = vld [vmem:[%s11489_s27 + $0x210] sm:$0xf] }
 0x208   : > { %v6364_v59 = vrot.slane %v6362_v14, 4  ;;  %v13470_v47 = vpop.f32.mrf.mxu1  ;;  %v6341_v48 = vsel %vm11508_vm4, %v6336_v8, %v6340_v30  ;;  %v6370_v52 = vrot.slane %v6368_v51, 5  ;;  %v6373_v33 = vshrl.u32 %v9657_v5, 16 }
 0x209   : > { %v13482_v14 = vpop.f32.mrf.mxu0  ;;  %11091 = vmatmul.mubr.msk.bf16.gmra.mxu0 %vm1992_vm1, %v11392_v60  ;;  %v6351_v38 = vsel %vm11508_vm4, %v6346_v32, %v6350_v0  ;;  %v6356_v34 = vrot.slane %v6355_v50, 4  ;;  %v7619_v51 = vadd.f32 %v13390_v21, %v4986_v39  ;;  %v7617_v40 = vadd.f32 %v13398_v9, %v4984_v10  ;;  %v9660_v50 = vld [vmem:[%s11489_s27 + $0x214] sm:$0xf] }
 0x20a   : > { %v6365_v30 = vor.u32 %v6364_v59, %v6360_v37  ;;  %11094 = vmatprep.mubr.msk.bf16.mxu0 %vm1992_vm1, %v11393_v63  ;;  %v9740_v55 = vcombine.low %v6341_v48, %v6351_v38  ;;  %v6375_v46 = vrot.slane %v6373_v33, 4  ;;  %v6376_v17 = vshll.u32 %v9657_v5, 16  ;;  %v11394_v48 = vld [vmem:[%s11489_s27 + $0x238] sm:$0xff]   ;;  %v11395_v38 = vld [vmem:[%s11489_s27 + $0x244] sm:$0xff]  }
 0x20b   : > { %v13491_v62 = vpop.f32.mrf.mxu1  ;;  %v13493_v60 = vpop.f32.mrf.mxu0  ;;  %v6361_v0 = vsel %vm11508_vm4, %v6356_v34, %v6360_v37  ;;  %v7754_v21 = vadd.f32 %v13477_v11, %v7619_v51  ;;  %v6382_v8 = vshll.u32 %v9658_v12, 16  ;;  %v7752_v63 = vadd.f32 %v13477_v11, %v7617_v40 }
 0x20c   : > { %v6366_v4 = vrot.slane %v6365_v30, 4  ;;  %11212 = vmatprep.mubr.msk.bf16.mxu1 %vm1992_vm1, %v9740_v55  ;;  %v6378_v9 = vrot.slane %v6376_v17, 5  ;;  %v6386_v32 = vshrl.u32 %v9658_v12, 16  ;;  %v6392_v5 = vshll.u32 %v9659_v56, 16  ;;  %v9661_v55 = vld [vmem:[%s11489_s27 + $0x218] sm:$0x1] }
 0x20d   : > { %v13501_v59 = vpop.f32.mrf.mxu1  ;;  %v13503_v39 = vpop.f32.mrf.mxu0  ;;  %vm7882_vm5 = vcmp.ge.f32.partialorder %v7754_v21, 0.0  ;;  %v8010_v10 = vmul.f32 0.2, %v7754_v21  ;;  %v6384_v33 = vrot.slane %v6382_v8, 5  ;;  %vm7880_vm6 = vcmp.ge.f32.partialorder %v7752_v63, 0.0 }
 0x20e   : > { %v6371_v37 = vsel %vm11508_vm4, %v6366_v4, %v6370_v52  ;;  %v8008_v30 = vmul.f32 0.2, %v7752_v63  ;;  %v6379_v51 = vor.u32 %v6378_v9, %v6375_v46  ;;  %v6388_v54 = vrot.slane %v6386_v32, 4 }
 0x20f   : > { %v9741_v34 = vcombine.low %v6361_v0, %v6371_v37  ;;  %v13510_v12 = vpop.f32.mrf.mxu1  ;;  %v13512_v40 = vpop.f32.mrf.mxu0  ;;  %v13514_v17 = vsel %vm7882_vm5, %v7754_v21, %v8010_v10  ;;  %v6394_v58 = vrot.slane %v6392_v5, 5  ;;  %v6396_v43 = vshrl.u32 %v9659_v56, 16  ;;  %v9662_v10 = vld [vmem:[%s11489_s27 + $0x21c] sm:$0xf] }
 0x210   : > { %v13517_v52 = vsel %vm7880_vm6, %v7752_v63, %v8008_v30  ;;  %v6380_v4 = vrot.slane %v6379_v51, 4  ;;  %v4987_v0 = vadd.f32 %v13414_v18, %v11949_v3  ;;  %v6402_v46 = vshll.u32 %v9660_v50, 16  ;;  %v11396_v51 = vld [vmem:[%s11489_s27 + $0x24c] sm:$0xff]  }
 0x211   : > { %11213 = vmatmul.mubr.msk.bf16.gmra.mxu1 %vm1992_vm1, %v9741_v34  ;;  %v13521_v8 = vpop.f32.mrf.mxu1  ;;  %v13523_v9 = vpop.f32.mrf.mxu0  ;;  %11095 = vmatmul.mubr.msk.bf16.gmra.mxu0 %vm1992_vm1, %v11394_v48  ;;  %v6389_v21 = vor.u32 %v6388_v54, %v6384_v33  ;;  %v6398_v32 = vrot.slane %v6396_v43, 4  ;;  %v6406_v5 = vshrl.u32 %v9660_v50, 16  ;;  %v6412_v56 = vshll.u32 %v9661_v55, 16 }
 0x212   : > { %11098 = vmatprep.mubr.msk.bf16.mxu0 %vm1992_vm1, %v11395_v38  ;;  %v6385_v63 = vsel %vm11508_vm4, %v6380_v4, %v6384_v33  ;;  %v7620_v37 = vadd.f32 %v13411_v35, %v4987_v0  ;;  %v6404_v3 = vrot.slane %v6402_v46, 5  ;;  %v4985_v18 = vadd.f32 %v13426_v20, %v11962_v22 }
 0x213   : > { %v13533_v34 = vpop.f32.mrf.mxu0  ;;  %v6390_v54 = vrot.slane %v6389_v21, 4  ;;  %v6399_v43 = vor.u32 %v6398_v32, %v6394_v58  ;;  %v6408_v50 = vrot.slane %v6406_v5, 4  ;;  %v6414_v48 = vrot.slane %v6412_v56, 5  ;;  %v13535_v38 = vpop.f32.mrf.mxu1 }
 0x214   : > { %v7755_v33 = vadd.f32 %v13477_v11, %v7620_v37  ;;  %v7618_v30 = vadd.f32 %v13417_v42, %v4985_v18  ;;  %v4990_v35 = vadd.f32 %v13437_v49, %v11968_v27  ;;  %v4988_v22 = vadd.f32 %v13446_v26, %v11973_v2  ;;  %v11397_v42 = vld [vmem:[%s11489_s27 + $0x258] sm:$0xff]   ;;  %v9663_v37 = vld [vmem:[%s11489_s27 + $0x220] sm:$0xf] }
 0x215   : > { %v13543_v20 = vpop.f32.mrf.mxu0  ;;  %v6395_v55 = vsel %vm11508_vm4, %v6390_v54, %v6394_v58  ;;  %v6400_v4 = vrot.slane %v6399_v43, 4  ;;  %v6409_v0 = vor.u32 %v6408_v50, %v6404_v3  ;;  %v6417_v46 = vshrl.u32 %v9662_v10, 16  ;;  %v13549_v21 = vpop.f32.mrf.mxu1 }
 0x216   : > { %v9742_v32 = vcombine.low %v6385_v63, %v6395_v55  ;;  %vm7883_vm7 = vcmp.ge.f32.partialorder %v7755_v33, 0.0  ;;  %v8011_v27 = vmul.f32 0.2, %v7755_v33  ;;  %v7753_v49 = vadd.f32 %v13477_v11, %v7618_v30  ;;  %v9664_v55 = vld [vmem:[%s11489_s27 + $0x224] sm:$0xf] }
 0x217   : > { %v13553_v2 = vpop.f32.mrf.mxu0  ;;  %v6405_v26 = vsel %vm11508_vm4, %v6400_v4, %v6404_v3  ;;  %v6410_v5 = vrot.slane %v6409_v0, 4  ;;  %v7623_v58 = vadd.f32 %v13441_v29, %v4990_v35  ;;  %v7621_v56 = vadd.f32 %v13454_v25, %v4988_v22  ;;  %v13560_v18 = vpop.f32.mrf.mxu1 }
 0x218   : > { %11216 = vmatprep.mubr.msk.bf16.mxu1 %vm1992_vm1, %v9742_v32  ;;  %v8139_v63 = vsel %vm7883_vm7, %v7755_v33, %v8011_v27  ;;  %vm7881_vm8 = vcmp.ge.f32.partialorder %v7753_v49, 0.0  ;;  %v8009_v54 = vmul.f32 0.2, %v7753_v49  ;;  %v6419_v3 = vrot.slane %v6417_v46, 4  ;;  %v9665_v46 = vld [vmem:[%s11489_s27 + $0x228] sm:$0xf] }
 0x219   : > { %v13568_v43 = vpop.f32.mrf.mxu0  ;;  %11099 = vmatmul.mubr.msk.bf16.gmra.mxu0 %vm1992_vm1, %v11396_v51  ;;  %v10089_v29 = vpack.c.bf16 %v8139_v63, %v13514_v17  ;;  %v6415_v25 = vsel %vm11508_vm4, %v6410_v5, %v6414_v48  ;;  %v7758_v50 = vadd.f32 %v13477_v11, %v7623_v58  ;;  %v7756_v30 = vadd.f32 %v13477_v11, %v7621_v56  ;;  %v13576_v35 = vpop.f32.mrf.mxu1  ;;  %v11398_v5 = vld [vmem:[%s11489_s27 + $0x260] sm:$0xff]  }
 0x21a   : > { %11102 = vmatprep.mubr.msk.bf16.mxu0 %vm1992_vm1, %v11397_v42  ;;  %v9743_v33 = vcombine.low %v6405_v26, %v6415_v25  ;;  %v8137_v22 = vsel %vm7881_vm8, %v7753_v49, %v8009_v54  ;;  %v6420_v4 = vshll.u32 %v9662_v10, 16  ;;  %v6426_v51 = vshll.u32 %v9663_v37, 16  ;;  %v9666_v54 = vld [vmem:[%s11489_s27 + $0x22c] sm:$0x1] }
 0x21b   : > { %v13580_v17 = vpop.f32.mrf.mxu0  ;;  %10401 = vst [vmem:[%s13566_s6 + $0x8] sm:$0xff] %v10089_v29   ;;  %v10084_v48 = vpack.c.bf16 %v8137_v22, %v13517_v52  ;;  %vm7886_vm9 = vcmp.ge.f32.partialorder %v7758_v50, 0.0  ;;  %v8014_v0 = vmul.f32 0.2, %v7758_v50  ;;  %vm7884_vm10 = vcmp.ge.f32.partialorder %v7756_v30, 0.0  ;;  %v11399_v29 = vld [vmem:[%s11489_s27 + $0x26c] sm:$0xff]  }
 0x21c   : > { %11217 = vmatmul.mubr.msk.bf16.gmra.mxu1 %vm1992_vm1, %v9743_v33  ;;  %v8012_v42 = vmul.f32 0.2, %v7756_v30  ;;  %v6422_v32 = vrot.slane %v6420_v4, 5  ;;  %v6428_v27 = vrot.slane %v6426_v51, 5  ;;  %v6430_v10 = vshrl.u32 %v9663_v37, 16 }
 0x21d   : > { %v13586_v49 = vpop.f32.mrf.mxu1  ;;  %v13588_v26 = vpop.f32.mrf.mxu0  ;;  %10085 = vst [vmem:[%s13566_s6] sm:$0xff] %v10084_v48   ;;  %v13592_v58 = vsel %vm7886_vm9, %v7758_v50, %v8014_v0  ;;  %v6436_v52 = vshll.u32 %v9664_v55, 16  ;;  %v6440_v56 = vshrl.u32 %v9664_v55, 16  ;;  %v4991_v63 = vadd.f32 %v13458_v31, %v11990_v61 }
 0x21e   : > { %v13599_v25 = vsel %vm7884_vm10, %v7756_v30, %v8012_v42  ;;  %v6423_v33 = vor.u32 %v6422_v32, %v6419_v3  ;;  %v6432_v37 = vrot.slane %v6430_v10, 4  ;;  %v6446_v22 = vshll.u32 %v9665_v46, 16 }
 0x21f   : > { %v13601_v4 = vpop.f32.mrf.mxu1  ;;  %v13603_v51 = vpop.f32.mrf.mxu0  ;;  %v6438_v48 = vrot.slane %v6436_v52, 5  ;;  %v6442_v50 = vrot.slane %v6440_v56, 4  ;;  %v7624_v0 = vadd.f32 %v13462_v7, %v4991_v63  ;;  %v6450_v55 = vshrl.u32 %v9665_v46, 16 }
 0x220   : > { %v6424_v45 = vrot.slane %v6423_v33, 4  ;;  %v6433_v19 = vor.u32 %v6432_v37, %v6428_v27  ;;  %v6448_v61 = vrot.slane %v6446_v22, 5  ;;  %v6456_v31 = vshll.u32 %v9666_v54, 16  ;;  %v11400_v37 = vld [vmem:[%s11489_s27 + $0x274] sm:$0xff]  }
 0x221   : > { %v13606_v6 = vpop.f32.mrf.mxu1  ;;  %v13608_v30 = vpop.f32.mrf.mxu0  ;;  %11103 = vmatmul.mubr.msk.bf16.gmra.mxu0 %vm1992_vm1, %v11398_v5  ;;  %v6443_v3 = vor.u32 %v6442_v50, %v6438_v48  ;;  %v7759_v42 = vadd.f32 %v13477_v11, %v7624_v0  ;;  %v6452_v32 = vrot.slane %v6450_v55, 4  ;;  %v4989_v10 = vadd.f32 %v13465_v13, %v11999_v41 }
 0x222   : > { %11106 = vmatprep.mubr.msk.bf16.mxu0 %vm1992_vm1, %v11399_v29  ;;  %v6429_v7 = vsel %vm11508_vm4, %v6424_v45, %v6428_v27  ;;  %v6434_v46 = vrot.slane %v6433_v19, 4  ;;  %v6458_v52 = vrot.slane %v6456_v31, 5  ;;  %v4994_v5 = vadd.f32 %v13482_v14, %v12007_v24  ;;  %v9667_v24 = vld [vmem:[%s11489_s27 + $0x230] sm:$0xf]  ;;  %v9668_v14 = vld [vmem:[%s11489_s27 + $0x234] sm:$0xf] }
 0x223   : > { %v13619_v56 = vpop.f32.mrf.mxu1  ;;  %v13621_v63 = vpop.f32.mrf.mxu0  ;;  %v6444_v54 = vrot.slane %v6443_v3, 4  ;;  %vm7887_vm11 = vcmp.ge.f32.partialorder %v7759_v42, 0.0  ;;  %v8015_v41 = vmul.f32 0.2, %v7759_v42  ;;  %v6453_v13 = vor.u32 %v6452_v32, %v6448_v61 }
 0x224   : > { %v6439_v29 = vsel %vm11508_vm4, %v6434_v46, %v6438_v48  ;;  %v7622_v45 = vadd.f32 %v13470_v47, %v4989_v10  ;;  %v7627_v19 = vadd.f32 %v13491_v62, %v4994_v5  ;;  %v4992_v27 = vadd.f32 %v13493_v60, %v12010_v53  ;;  %v11401_v47 = vld [vmem:[%s11489_s27 + $0x280] sm:$0xff]  }
 0x225   : > { %v13631_v33 = vpop.f32.mrf.mxu0  ;;  %v9744_v22 = vcombine.low %v6429_v7, %v6439_v29  ;;  %v8143_v50 = vsel %vm7887_vm11, %v7759_v42, %v8015_v41  ;;  %v6449_v0 = vsel %vm11508_vm4, %v6444_v54, %v6448_v61  ;;  %v6454_v48 = vrot.slane %v6453_v13, 4  ;;  %v13636_v55 = vpop.f32.mrf.mxu1  ;;  %v9669_v42 = vld [vmem:[%s11489_s27 + $0x238] sm:$0xf] }
 0x226   : > { %v10099_v62 = vpack.c.bf16 %v8143_v50, %v13592_v58  ;;  %v7757_v53 = vadd.f32 %v13477_v11, %v7622_v45  ;;  %v7762_v60 = vadd.f32 %v13477_v11, %v7627_v19  ;;  %v7625_v31 = vadd.f32 %v13501_v59, %v4992_v27 }
 0x227   : > { %v13643_v3 = vpop.f32.mrf.mxu0  ;;  %11220 = vmatprep.mubr.msk.bf16.mxu1 %vm1992_vm1, %v9744_v22  ;;  %v6459_v61 = vsel %vm11508_vm4, %v6454_v48, %v6458_v52  ;;  %v6461_v32 = vshrl.u32 %v9667_v24, 16  ;;  %v6464_v10 = vshll.u32 %v9667_v24, 16  ;;  %v6470_v7 = vshll.u32 %v9668_v14, 16  ;;  %v13649_v46 = vpop.f32.mrf.mxu1  ;;  %v9670_v22 = vld [vmem:[%s11489_s27 + $0x23c] sm:$0xf] }
 0x228   : > { %10403 = vst [vmem:[%s13566_s6 + $0x18] sm:$0xff] %v10099_v62   ;;  %v9745_v58 = vcombine.low %v6449_v0, %v6459_v61  ;;  %vm7885_vm12 = vcmp.ge.f32.partialorder %v7757_v53, 0.0  ;;  %v8013_v5 = vmul.f32 0.2, %v7757_v53  ;;  %vm7890_vm13 = vcmp.ge.f32.partialorder %v7762_v60, 0.0 }
 0x229   : > { %v13652_v59 = vpop.f32.mrf.mxu0  ;;  %11107 = vmatmul.mubr.msk.bf16.gmra.mxu0 %vm1992_vm1, %v11400_v37  ;;  %v8018_v54 = vmul.f32 0.2, %v7762_v60  ;;  %v7760_v41 = vadd.f32 %v13477_v11, %v7625_v31  ;;  %v6463_v52 = vrot.slane %v6461_v32, 4  ;;  %v6466_v13 = vrot.slane %v6464_v10, 5  ;;  %v13656_v29 = vpop.f32.mrf.mxu1  ;;  %v9671_v62 = vld [vmem:[%s11489_s27 + $0x240] sm:$0x1] }
 0x22a   : > { %11110 = vmatprep.mubr.msk.bf16.mxu0 %vm1992_vm1, %v11401_v47  ;;  %11221 = vmatmul.mubr.msk.bf16.gmra.mxu1 %vm1992_vm1, %v9745_v58  ;;  %v8141_v45 = vsel %vm7885_vm12, %v7757_v53, %v8013_v5  ;;  %v6472_v19 = vrot.slane %v6470_v7, 5  ;;  %v6474_v27 = vshrl.u32 %v9668_v14, 16  ;;  %v6480_v24 = vshll.u32 %v9669_v42, 16  ;;  %v11402_v10 = vld [vmem:[%s11489_s27 + $0x288] sm:$0xff]  }
 0x22b   : > { %v13661_v37 = vpop.f32.mrf.mxu0  ;;  %v10094_v50 = vpack.c.bf16 %v8141_v45, %v13599_v25  ;;  %v13665_v0 = vsel %vm7890_vm13, %v7762_v60, %v8018_v54  ;;  %vm7888_vm14 = vcmp.ge.f32.partialorder %v7760_v41, 0.0  ;;  %v8016_v48 = vmul.f32 0.2, %v7760_v41  ;;  %v13668_v47 = vpop.f32.mrf.mxu1 }
 0x22c   : > { %v6467_v31 = vor.u32 %v6466_v13, %v6463_v52  ;;  %v6476_v53 = vrot.slane %v6474_v27, 4  ;;  %v6482_v61 = vrot.slane %v6480_v24, 5  ;;  %v6484_v32 = vshrl.u32 %v9669_v42, 16 }
 0x22d   : > { %v13670_v14 = vpop.f32.mrf.mxu0  ;;  %10402 = vst [vmem:[%s13566_s6 + $0x10] sm:$0xff] %v10094_v50   ;;  %v13674_v7 = vsel %vm7888_vm14, %v7760_v41, %v8016_v48  ;;  %v4995_v25 = vadd.f32 %v13503_v39, %v12025_v57  ;;  %v6490_v60 = vshll.u32 %v9670_v22, 16  ;;  %v6494_v58 = vshrl.u32 %v9670_v22, 16  ;;  %v9672_v50 = vld [vmem:[%s11489_s27 + $0x244] sm:$0xf] }
 0x22e   : > { %v6468_v5 = vrot.slane %v6467_v31, 4  ;;  %v6477_v54 = vor.u32 %v6476_v53, %v6472_v19  ;;  %v6486_v45 = vrot.slane %v6484_v32, 4  ;;  %v6500_v28 = vshll.u32 %v9671_v62, 16 }
 0x22f   : > { %v13678_v52 = vpop.f32.mrf.mxu1  ;;  %v13680_v13 = vpop.f32.mrf.mxu0  ;;  %v7628_v42 = vadd.f32 %v13510_v12, %v4995_v25  ;;  %v6492_v27 = vrot.slane %v6490_v60, 5  ;;  %v6496_v24 = vrot.slane %v6494_v58, 4  ;;  %v4993_v41 = vadd.f32 %v13512_v40, %v12038_v16 }
 0x230   : > { %v6473_v57 = vsel %vm11508_vm4, %v6468_v5, %v6472_v19  ;;  %v6478_v39 = vrot.slane %v6477_v54, 4  ;;  %v6487_v22 = vor.u32 %v6486_v45, %v6482_v61  ;;  %v6502_v48 = vrot.slane %v6500_v28, 5 }
 0x231   : > { %v13688_v31 = vpop.f32.mrf.mxu1  ;;  %v13690_v62 = vpop.f32.mrf.mxu0  ;;  %11111 = vmatmul.mubr.msk.bf16.gmra.mxu0 %vm1992_vm1, %v11402_v10  ;;  %v7763_v12 = vadd.f32 %v13477_v11, %v7628_v42  ;;  %v6497_v53 = vor.u32 %v6496_v24, %v6492_v27  ;;  %v7626_v32 = vadd.f32 %v13521_v8, %v4993_v41  ;;  %v4998_v16 = vadd.f32 %v13523_v9, %v12043_v23  ;;  %v9674_v41 = vld [vmem:[%s11489_s27 + $0x24c] sm:$0xf] }
 0x232   : > { %v6483_v40 = vsel %vm11508_vm4, %v6478_v39, %v6482_v61  ;;  %v6488_v19 = vrot.slane %v6487_v22, 4  ;;  %v4996_v28 = vadd.f32 %v13533_v34, %v12049_v44  ;;  %v6505_v25 = vshrl.u32 %v9672_v50, 16  ;;  %v9673_v44 = vld [vmem:[%s11489_s27 + $0x248] sm:$0xf] }
 0x233   : > { %v13701_v60 = vpop.f32.mrf.mxu1  ;;  %v13703_v10 = vpop.f32.mrf.mxu0  ;;  %v9746_v58 = vcombine.low %v6473_v57, %v6483_v40  ;;  %vm7891_vm15 = vcmp.ge.f32.partialorder %v7763_v12, 0.0  ;;  %v8019_v8 = vmul.f32 0.2, %v7763_v12  ;;  %v6498_v5 = vrot.slane %v6497_v53, 4 }
 0x234   : > { %v6493_v23 = vsel %vm11508_vm4, %v6488_v19, %v6492_v27  ;;  %v7761_v9 = vadd.f32 %v13477_v11, %v7626_v32  ;;  %v7631_v61 = vadd.f32 %v13535_v38, %v4998_v16  ;;  %v7629_v54 = vadd.f32 %v13549_v21, %v4996_v28 }
 0x235   : > { %v13711_v34 = vpop.f32.mrf.mxu1  ;;  %v13713_v45 = vpop.f32.mrf.mxu0  ;;  %11224 = vmatprep.mubr.msk.bf16.mxu1 %vm1992_vm1, %v9746_v58  ;;  %v8147_v42 = vsel %vm7891_vm15, %v7763_v12, %v8019_v8  ;;  %v6503_v24 = vsel %vm11508_vm4, %v6498_v5, %v6502_v48  ;;  %v6507_v27 = vrot.slane %v6505_v25, 4  ;;  %v6508_v57 = vshll.u32 %v9672_v50, 16  ;;  %v9675_v8 = vld [vmem:[%s11489_s27 + $0x250] sm:$0xf] }
 0x236   : > { %v10109_v39 = vpack.c.bf16 %v8147_v42, %v13665_v0  ;;  %v9747_v38 = vcombine.low %v6493_v23, %v6503_v24  ;;  %vm7889_vm0 = vcmp.ge.f32.partialorder %v7761_v9, 0.0  ;;  %v8017_v21 = vmul.f32 0.2, %v7761_v9  ;;  %v9676_v24 = vld [vmem:[%s11489_s27 + $0x254] sm:$0x1] }
 0x237   : > { %v13720_v22 = vpop.f32.mrf.mxu0  ;;  %v7766_v53 = vadd.f32 %v13477_v11, %v7631_v61  ;;  %v7764_v32 = vadd.f32 %v13477_v11, %v7629_v54  ;;  %v6510_v16 = vrot.slane %v6508_v57, 5  ;;  %v6514_v12 = vshll.u32 %v9673_v44, 16  ;;  %v13724_v40 = vpop.f32.mrf.mxu1 }
 0x238   : > { %10405 = vst [vmem:[%s13566_s6 + $0x28] sm:$0xff] %v10109_v39   ;;  %11225 = vmatmul.mubr.msk.bf16.gmra.mxu1 %vm1992_vm1, %v9747_v38  ;;  %v8145_v50 = vsel %vm7889_vm0, %v7761_v9, %v8017_v21  ;;  %v6518_v0 = vshrl.u32 %v9673_v44, 16  ;;  %v6524_v48 = vshll.u32 %v9674_v41, 16  ;;  %v6528_v19 = vshrl.u32 %v9674_v41, 16 }
 0x239   : > { %v13728_v28 = vpop.f32.mrf.mxu0  ;;  %v10104_v25 = vpack.c.bf16 %v8145_v50, %v13674_v7  ;;  %vm7894_vm2 = vcmp.ge.f32.partialorder %v7766_v53, 0.0  ;;  %v8022_v58 = vmul.f32 0.2, %v7766_v53  ;;  %vm7892_vm3 = vcmp.ge.f32.partialorder %v7764_v32, 0.0  ;;  %v13732_v5 = vpop.f32.mrf.mxu1 }
 0x23a   : > { %v8020_v23 = vmul.f32 0.2, %v7764_v32  ;;  %v6511_v61 = vor.u32 %v6510_v16, %v6507_v27  ;;  %v6516_v54 = vrot.slane %v6514_v12, 5  ;;  %v6520_v42 = vrot.slane %v6518_v0, 4 }
 0x23b   : > { %v13735_v9 = vpop.f32.mrf.mxu0  ;;  %10404 = vst [vmem:[%s13566_s6 + $0x20] sm:$0xff] %v10104_v25   ;;  %v8150_v44 = vsel %vm7894_vm2, %v7766_v53, %v8022_v58  ;;  %v6526_v41 = vrot.slane %v6524_v48, 5  ;;  %v6530_v57 = vrot.slane %v6528_v19, 4  ;;  %v4999_v7 = vadd.f32 %v13543_v20, %v12066_v1  ;;  %v13740_v39 = vpop.f32.mrf.mxu1  ;;  %v14686_v19 = vld [vmem:[#allocation2_spill] sm:$0xff] }
 0x23c   : > { %v13742_v38 = vsel %vm7892_vm3, %v7764_v32, %v8020_v23  ;;  %v6512_v21 = vrot.slane %v6511_v61, 4  ;;  %v6521_v50 = vor.u32 %v6520_v42, %v6516_v54  ;;  %v6534_v15 = vshll.u32 %v9675_v8, 16 }
 0x23d   : > { %v13744_v27 = vpop.f32.mrf.mxu0  ;;  %v6531_v16 = vor.u32 %v6530_v57, %v6526_v41  ;;  %v7632_v12 = vadd.f32 %v13560_v18, %v4999_v7  ;;  %v6538_v0 = vshrl.u32 %v9675_v8, 16  ;;  %v6544_v53 = vshll.u32 %v9676_v24, 16  ;;  %v13747_v48 = vpop.f32.mrf.mxu1  ;;  %v14687_v57 = vld [vmem:[#allocation3_spill] sm:$0xff]  ;;  %v14688_v7 = vld [vmem:[#allocation4_spill] sm:$0xff] }
 0x23e   : > { %v6517_v1 = vsel %vm11508_vm4, %v6512_v21, %v6516_v54  ;;  %v6522_v20 = vrot.slane %v6521_v50, 4  ;;  %v6536_v32 = vrot.slane %v6534_v15, 5  ;;  %v4997_v25 = vadd.f32 %v13553_v2, %v14686_v19  ;;  %v9677_v21 = vld [vmem:[%s11489_s27 + $0x258] sm:$0xf]  ;;  %v9678_v2 = vld [vmem:[%s11489_s27 + $0x25c] sm:$0xf] }
 0x23f   : > { %v13753_v58 = vpop.f32.mrf.mxu0  ;;  %v6532_v23 = vrot.slane %v6531_v16, 4  ;;  %v7767_v61 = vadd.f32 %v13477_v11, %v7632_v12  ;;  %v6540_v18 = vrot.slane %v6538_v0, 4  ;;  %v6546_v8 = vrot.slane %v6544_v53, 5 }
 0x240   : > { %v6527_v42 = vsel %vm11508_vm4, %v6522_v20, %v6526_v41  ;;  %v7630_v24 = vadd.f32 %v13576_v35, %v4997_v25  ;;  %v5002_v54 = vadd.f32 %v13568_v43, %v14687_v57  ;;  %v5000_v15 = vadd.f32 %v13580_v17, %v14688_v7 }
 0x241   : > { %v13765_v50 = vpop.f32.mrf.mxu1  ;;  %v13767_v16 = vpop.f32.mrf.mxu0  ;;  %v9748_v12 = vcombine.low %v6517_v1, %v6527_v42  ;;  %vm7895_vm5 = vcmp.ge.f32.partialorder %v7767_v61, 0.0  ;;  %v8023_v0 = vmul.f32 0.2, %v7767_v61  ;;  %v6537_v41 = vsel %vm11508_vm4, %v6532_v23, %v6536_v32 }
 0x242   : > { %v6541_v53 = vor.u32 %v6540_v18, %v6536_v32  ;;  %v7765_v35 = vadd.f32 %v13477_v11, %v7630_v24  ;;  %v7635_v43 = vadd.f32 %v13586_v49, %v5002_v54  ;;  %v7633_v20 = vadd.f32 %v13601_v4, %v5000_v15 }
 0x243   : > { %v13774_v17 = vpop.f32.mrf.mxu1  ;;  %v13776_v19 = vpop.f32.mrf.mxu0  ;;  %11228 = vmatprep.mubr.msk.bf16.mxu1 %vm1992_vm1, %v9748_v12  ;;  %v8151_v1 = vsel %vm7895_vm5, %v7767_v61, %v8023_v0  ;;  %v6549_v25 = vshrl.u32 %v9677_v21, 16  ;;  %v6552_v42 = vshll.u32 %v9677_v21, 16  ;;  %v6558_v57 = vshll.u32 %v9678_v2, 16 }
 0x244   : > { %14689 = vst [vmem:[#allocation2_spill] sm:$0xff] %v13776_v19  ;;  %v10119_v23 = vpack.c.bf16 %v8151_v1, %v8150_v44  ;;  %v6542_v32 = vrot.slane %v6541_v53, 4  ;;  %vm7893_vm6 = vcmp.ge.f32.partialorder %v7765_v35, 0.0  ;;  %v8021_v18 = vmul.f32 0.2, %v7765_v35 }
 0x245   : > { %v13779_v24 = vpop.f32.mrf.mxu1  ;;  %v13781_v49 = vpop.f32.mrf.mxu0  ;;  %v7770_v4 = vadd.f32 %v13477_v11, %v7635_v43  ;;  %v7768_v54 = vadd.f32 %v13477_v11, %v7633_v20  ;;  %v6551_v7 = vrot.slane %v6549_v25, 4  ;;  %v6554_v15 = vrot.slane %v6552_v42, 5  ;;  %v9679_v44 = vld [vmem:[%s11489_s27 + $0x260] sm:$0xf]  ;;  %v9680_v25 = vld [vmem:[%s11489_s27 + $0x264] sm:$0xf] }
 0x246   : > { %14690 = vst [vmem:[#allocation3_spill] sm:$0xff] %v13781_v49  ;;  %10407 = vst [vmem:[%s13566_s6 + $0x38] sm:$0xff] %v10119_v23   ;;  %v6547_v61 = vsel %vm11508_vm4, %v6542_v32, %v6546_v8  ;;  %v8149_v21 = vsel %vm7893_vm6, %v7765_v35, %v8021_v18  ;;  %v6560_v12 = vrot.slane %v6558_v57, 5  ;;  %v6562_v0 = vshrl.u32 %v9678_v2, 16  ;;  %v14693_v18 = vld [vmem:[#allocation5_spill] sm:$0xff] }
 0x247   : > { %v13789_v53 = vpop.f32.mrf.mxu1  ;;  %v13791_v1 = vpop.f32.mrf.mxu0  ;;  %v9749_v49 = vcombine.low %v6537_v41, %v6547_v61  ;;  %v10114_v43 = vpack.c.bf16 %v8149_v21, %v13742_v38  ;;  %vm7898_vm7 = vcmp.ge.f32.partialorder %v7770_v4, 0.0  ;;  %v8026_v20 = vmul.f32 0.2, %v7770_v4  ;;  %v9681_v61 = vld [vmem:[%s11489_s27 + $0x268] sm:$0x1] }
 0x248   : > { %14691 = vst [vmem:[#allocation4_spill] sm:$0xff] %v13791_v1  ;;  %vm7896_vm8 = vcmp.ge.f32.partialorder %v7768_v54, 0.0  ;;  %v8024_v42 = vmul.f32 0.2, %v7768_v54  ;;  %v6555_v23 = vor.u32 %v6554_v15, %v6551_v7  ;;  %v6564_v8 = vrot.slane %v6562_v0, 4 }
 0x249   : > { %v13795_v35 = vpop.f32.mrf.mxu0  ;;  %11229 = vmatmul.mubr.msk.bf16.gmra.mxu1 %vm1992_vm1, %v9749_v49  ;;  %10406 = vst [vmem:[%s13566_s6 + $0x30] sm:$0xff] %v10114_v43   ;;  %v8154_v2 = vsel %vm7898_vm7, %v7770_v4, %v8026_v20  ;;  %v6568_v57 = vshll.u32 %v9679_v44, 16  ;;  %v6572_v32 = vshrl.u32 %v9679_v44, 16  ;;  %v5003_v41 = vadd.f32 %v13588_v26, %v14693_v18  ;;  %v13802_v38 = vpop.f32.mrf.mxu1 }
 0x24a   : > { %14692 = vst [vmem:[#allocation118_spill] sm:$0xff] %v13795_v35  ;;  %v13804_v21 = vsel %vm7896_vm8, %v7768_v54, %v8024_v42  ;;  %v6556_v1 = vrot.slane %v6555_v23, 4  ;;  %v6565_v19 = vor.u32 %v6564_v8, %v6560_v12  ;;  %v6578_v7 = vshll.u32 %v9680_v25, 16 }
 0x24b   : > { %v13806_v15 = vpop.f32.mrf.mxu0  ;;  %v6570_v0 = vrot.slane %v6568_v57, 5  ;;  %v6574_v35 = vrot.slane %v6572_v32, 4  ;;  %v7636_v49 = vadd.f32 %v13606_v6, %v5003_v41  ;;  %v6582_v4 = vshrl.u32 %v9680_v25, 16  ;;  %v13809_v44 = vpop.f32.mrf.mxu1  ;;  %v14696_v57 = vld [vmem:[#allocation6_spill] sm:$0xff] }
 0x24c   : > { %14694 = vst [vmem:[#allocation5_spill] sm:$0xff] %v13806_v15  ;;  %v6561_v26 = vsel %vm11508_vm4, %v6556_v1, %v6560_v12  ;;  %v6566_v43 = vrot.slane %v6565_v19, 4  ;;  %v6580_v20 = vrot.slane %v6578_v7, 5  ;;  %v6588_v54 = vshll.u32 %v9681_v61, 16  ;;  %v14697_v12 = vld [vmem:[#allocation7_spill] sm:$0xff]  ;;  %v14698_v1 = vld [vmem:[#allocation8_spill] sm:$0xff] }
 0x24d   : > { %v13813_v42 = vpop.f32.mrf.mxu0  ;;  %v6575_v23 = vor.u32 %v6574_v35, %v6570_v0  ;;  %v7771_v8 = vadd.f32 %v13477_v11, %v7636_v49  ;;  %v6584_v18 = vrot.slane %v6582_v4, 4  ;;  %v5001_v32 = vadd.f32 %v13603_v51, %v14696_v57  ;;  %v13818_v6 = vpop.f32.mrf.mxu1  ;;  %v9682_v35 = vld [vmem:[%s11489_s27 + $0x26c] sm:$0xf] }
 0x24e   : > { %14695 = vst [vmem:[#allocation119_spill] sm:$0xff] %v13813_v42  ;;  %v6571_v25 = vsel %vm11508_vm4, %v6566_v43, %v6570_v0  ;;  %v6590_v41 = vrot.slane %v6588_v54, 5  ;;  %v5006_v19 = vadd.f32 %v13608_v30, %v14697_v12  ;;  %v5004_v61 = vadd.f32 %v13621_v63, %v14698_v1  ;;  %v9683_v30 = vld [vmem:[%s11489_s27 + $0x270] sm:$0xf] }
 0x24f   : > { %v13827_v7 = vpop.f32.mrf.mxu0  ;;  %v6576_v49 = vrot.slane %v6575_v23, 4  ;;  %v9750_v4 = vcombine.low %v6561_v26, %v6571_v25  ;;  %vm7899_vm9 = vcmp.ge.f32.partialorder %v7771_v8, 0.0  ;;  %v8027_v51 = vmul.f32 0.2, %v7771_v8  ;;  %v13829_v57 = vpop.f32.mrf.mxu1 }
 0x250   : > { %v6585_v42 = vor.u32 %v6584_v18, %v6580_v20  ;;  %v7634_v15 = vadd.f32 %v13619_v56, %v5001_v32  ;;  %v7639_v0 = vadd.f32 %v13636_v55, %v5006_v19  ;;  %v7637_v43 = vadd.f32 %v13649_v46, %v5004_v61 }
 0x251   : > { %v13835_v54 = vpop.f32.mrf.mxu0  ;;  %11232 = vmatprep.mubr.msk.bf16.mxu1 %vm1992_vm1, %v9750_v4  ;;  %v8155_v63 = vsel %vm7899_vm9, %v7771_v8, %v8027_v51  ;;  %v6581_v26 = vsel %vm11508_vm4, %v6576_v49, %v6580_v20  ;;  %v6593_v23 = vshrl.u32 %v9682_v35, 16  ;;  %v6596_v25 = vshll.u32 %v9682_v35, 16 }
 0x252   : > { %14699 = vst [vmem:[#allocation6_spill] sm:$0xff] %v13835_v54  ;;  %v10129_v18 = vpack.c.bf16 %v8155_v63, %v8154_v2  ;;  %v6586_v12 = vrot.slane %v6585_v42, 4  ;;  %v7769_v56 = vadd.f32 %v13477_v11, %v7634_v15  ;;  %v7774_v55 = vadd.f32 %v13477_v11, %v7639_v0  ;;  %v9684_v15 = vld [vmem:[%s11489_s27 + $0x274] sm:$0xf]  ;;  %v14707_v54 = vld [vmem:[#allocation10_spill] sm:$0xff] }
 0x253   : > { %v13842_v46 = vpop.f32.mrf.mxu1  ;;  %v13844_v32 = vpop.f32.mrf.mxu0  ;;  %v7772_v19 = vadd.f32 %v13477_v11, %v7637_v43  ;;  %v6595_v1 = vrot.slane %v6593_v23, 4  ;;  %v6598_v8 = vrot.slane %v6596_v25, 5  ;;  %v6602_v61 = vshll.u32 %v9683_v30, 16  ;;  %v9685_v25 = vld [vmem:[%s11489_s27 + $0x278] sm:$0xf] }
 0x254   : > { %14700 = vst [vmem:[#allocation7_spill] sm:$0xff] %v13844_v32  ;;  %10409 = vst [vmem:[%s13566_s6 + $0x48] sm:$0xff] %v10129_v18   ;;  %v6591_v20 = vsel %vm11508_vm4, %v6586_v12, %v6590_v41  ;;  %vm7897_vm10 = vcmp.ge.f32.partialorder %v7769_v56, 0.0  ;;  %v8025_v2 = vmul.f32 0.2, %v7769_v56  ;;  %vm7902_vm11 = vcmp.ge.f32.partialorder %v7774_v55, 0.0 }
 0x255   : > { %v13851_v42 = vpop.f32.mrf.mxu1  ;;  %v13853_v35 = vpop.f32.mrf.mxu0  ;;  %v9751_v49 = vcombine.low %v6581_v26, %v6591_v20  ;;  %v8030_v4 = vmul.f32 0.2, %v7774_v55  ;;  %vm7900_vm12 = vcmp.ge.f32.partialorder %v7772_v19, 0.0  ;;  %v8028_v51 = vmul.f32 0.2, %v7772_v19 }
 0x256   : > { %14701 = vst [vmem:[#allocation8_spill] sm:$0xff] %v13853_v35  ;;  %v8153_v0 = vsel %vm7897_vm10, %v7769_v56, %v8025_v2  ;;  %v6599_v43 = vor.u32 %v6598_v8, %v6595_v1  ;;  %v6604_v63 = vrot.slane %v6602_v61, 5  ;;  %v6606_v23 = vshrl.u32 %v9683_v30, 16  ;;  %v9686_v41 = vld [vmem:[%s11489_s27 + $0x27c] sm:$0x1] }
 0x257   : > { %v13857_v18 = vpop.f32.mrf.mxu1  ;;  %v13859_v12 = vpop.f32.mrf.mxu0  ;;  %11233 = vmatmul.mubr.msk.bf16.gmra.mxu1 %vm1992_vm1, %v9751_v49  ;;  %v10124_v32 = vpack.c.bf16 %v8153_v0, %v13804_v21  ;;  %v13864_v26 = vsel %vm7902_vm11, %v7774_v55, %v8030_v4  ;;  %v13866_v20 = vsel %vm7900_vm12, %v7772_v19, %v8028_v51  ;;  %v6612_v56 = vshll.u32 %v9684_v15, 16  ;;  %v14703_v61 = vld [vmem:[#allocation9_spill] sm:$0xff] }
 0x258   : > { %14702 = vst [vmem:[#allocation120_spill] sm:$0xff] %v13859_v12  ;;  %v6600_v1 = vrot.slane %v6599_v43, 4  ;;  %v6608_v30 = vrot.slane %v6606_v23, 4  ;;  %v6616_v8 = vshrl.u32 %v9684_v15, 16  ;;  %v5007_v2 = vadd.f32 %v13631_v33, %v14703_v61  ;;  %v9687_v15 = vld [vmem:[%s11489_s27 + $0x280] sm:$0xf] }
 0x259   : > { %v13870_v35 = vpop.f32.mrf.mxu1  ;;  %v13872_v12 = vpop.f32.mrf.mxu0  ;;  %10408 = vst [vmem:[%s13566_s6 + $0x40] sm:$0xff] %v10124_v32   ;;  %v6614_v49 = vrot.slane %v6612_v56, 5  ;;  %v6622_v21 = vshll.u32 %v9685_v25, 16  ;;  %v6626_v0 = vshrl.u32 %v9685_v25, 16  ;;  %v6632_v55 = vshll.u32 %v9686_v41, 16 }
 0x25a   : > { %14704 = vst [vmem:[#allocation9_spill] sm:$0xff] %v13870_v35  ;;  %14705 = vst [vmem:[#allocation121_spill] sm:$0xff] %v13872_v12  ;;  %v6605_v19 = vsel %vm11508_vm4, %v6600_v1, %v6604_v63  ;;  %v6609_v4 = vor.u32 %v6608_v30, %v6604_v63  ;;  %v6618_v51 = vrot.slane %v6616_v8, 4  ;;  %v7640_v43 = vadd.f32 %v13656_v29, %v5007_v2  ;;  %v14708_v1 = vld [vmem:[#allocation11_spill] sm:$0xff]  ;;  %v14710_v2 = vld [vmem:[#allocation12_spill] sm:$0xff] }
 0x25b   : > { %v13879_v23 = vpop.f32.mrf.mxu0  ;;  %v6624_v33 = vrot.slane %v6622_v21, 5  ;;  %v6628_v61 = vrot.slane %v6626_v0, 4  ;;  %v6634_v35 = vrot.slane %v6632_v55, 5  ;;  %v5005_v32 = vadd.f32 %v13643_v3, %v14707_v54  ;;  %v13883_v56 = vpop.f32.mrf.mxu1 }
 0x25c   : > { %14706 = vst [vmem:[#allocation122_spill] sm:$0xff] %v13879_v23  ;;  %v6610_v25 = vrot.slane %v6609_v4, 4  ;;  %v6619_v41 = vor.u32 %v6618_v51, %v6614_v49  ;;  %v7775_v12 = vadd.f32 %v13477_v11, %v7640_v43  ;;  %v5010_v63 = vadd.f32 %v13652_v59, %v14708_v1 }
 0x25d   : > { %v13888_v30 = vpop.f32.mrf.mxu0  ;;  %v6629_v29 = vor.u32 %v6628_v61, %v6624_v33  ;;  %v7638_v8 = vadd.f32 %v13668_v47, %v5005_v32  ;;  %v5008_v21 = vadd.f32 %v13661_v37, %v14710_v2  ;;  %v6637_v0 = vshrl.u32 %v9687_v15, 16  ;;  %v13893_v3 = vpop.f32.mrf.mxu1 }
 0x25e   : > { %14709 = vst [vmem:[#allocation10_spill] sm:$0xff] %v13888_v30  ;;  %v6615_v54 = vsel %vm11508_vm4, %v6610_v25, %v6614_v49  ;;  %v6620_v55 = vrot.slane %v6619_v41, 4  ;;  %vm7903_vm13 = vcmp.ge.f32.partialorder %v7775_v12, 0.0  ;;  %v8031_v4 = vmul.f32 0.2, %v7775_v12 }
 0x25f   : > { %v13897_v59 = vpop.f32.mrf.mxu0  ;;  %v9752_v51 = vcombine.low %v6605_v19, %v6615_v54  ;;  %v6630_v43 = vrot.slane %v6629_v29, 4  ;;  %v7773_v47 = vadd.f32 %v13477_v11, %v7638_v8  ;;  %v7643_v61 = vadd.f32 %v13678_v52, %v5010_v63  ;;  %v13901_v37 = vpop.f32.mrf.mxu1  ;;  %v9688_v49 = vld [vmem:[%s11489_s27 + $0x284] sm:$0xf]  ;;  %v9689_v25 = vld [vmem:[%s11489_s27 + $0x288] sm:$0xf] }
 0x260   : > { %14711 = vst [vmem:[#allocation11_spill] sm:$0xff] %v13897_v59  ;;  %v8159_v32 = vsel %vm7903_vm13, %v7775_v12, %v8031_v4  ;;  %v6625_v1 = vsel %vm11508_vm4, %v6620_v55, %v6624_v33  ;;  %v7641_v2 = vadd.f32 %v13688_v31, %v5008_v21  ;;  %v6639_v41 = vrot.slane %v6637_v0, 4  ;;  %v13919_v31 = vld [vmem:[%s14566_s2] ss:$0 sm:$0xff]  ;;  %v9690_v55 = vld [vmem:[%s11489_s27 + $0x28c] sm:$0xf] }
 0x261   : > { %v13908_v30 = vpop.f32.mrf.mxu0  ;;  %11236 = vmatprep.mubr.msk.bf16.mxu1 %vm1992_vm1, %v9752_v51  ;;  %v10139_v11 = vpack.c.bf16 %v8159_v32, %v13864_v26  ;;  %v6635_v52 = vsel %vm11508_vm4, %v6630_v43, %v6634_v35  ;;  %vm7901_vm14 = vcmp.ge.f32.partialorder %v7773_v47, 0.0  ;;  %v8029_v12 = vmul.f32 0.2, %v7773_v47  ;;  %v13914_v19 = vpop.f32.mrf.mxu1  ;;  %v9691_v43 = vld [vmem:[%s11489_s27 + $0x290] sm:$0x1] }
 0x262   : > { %14712 = vst [vmem:[#allocation12_spill] sm:$0xff] %v13908_v30  ;;  %v9753_v33 = vcombine.low %v6625_v1, %v6635_v52  ;;  %v7778_v63 = vadd.f32 %v13919_v31, %v7643_v61  ;;  %v7776_v29 = vadd.f32 %v13919_v31, %v7641_v2  ;;  %v6640_v26 = vshll.u32 %v9687_v15, 16 }
 0x263   : > { %v13923_v8 = vpop.f32.mrf.mxu0  ;;  %10411 = vst [vmem:[%s13566_s6 + $0x58] sm:$0xff] %v10139_v11   ;;  %v8157_v35 = vsel %vm7901_vm14, %v7773_v47, %v8029_v12  ;;  %v6646_v21 = vshll.u32 %v9688_v49, 16  ;;  %v6650_v0 = vshrl.u32 %v9688_v49, 16  ;;  %v6656_v54 = vshll.u32 %v9689_v25, 16  ;;  %v14715_v12 = vld [vmem:[#allocation13_spill] sm:$0xff] }
 0x264   : > { %14713 = vst [vmem:[#allocation123_spill] sm:$0xff] %v13923_v8  ;;  %11237 = vmatmul.mubr.msk.bf16.gmra.mxu1 %vm1992_vm1, %v9753_v33  ;;  %v10134_v4 = vpack.c.bf16 %v8157_v35, %v13866_v20  ;;  %vm7906_vm15 = vcmp.ge.f32.partialorder %v7778_v63, 0.0  ;;  %v8034_v51 = vmul.f32 0.2, %v7778_v63  ;;  %vm7904_vm0 = vcmp.ge.f32.partialorder %v7776_v29, 0.0 }
 0x265   : > { %v13930_v61 = vpop.f32.mrf.mxu1  ;;  %v13932_v15 = vpop.f32.mrf.mxu0  ;;  %v8032_v32 = vmul.f32 0.2, %v7776_v29  ;;  %v6642_v1 = vrot.slane %v6640_v26, 5  ;;  %v6648_v47 = vrot.slane %v6646_v21, 5  ;;  %v6652_v2 = vrot.slane %v6650_v0, 4 }
 0x266   : > { %14714 = vst [vmem:[#allocation124_spill] sm:$0xff] %v13932_v15  ;;  %10410 = vst [vmem:[%s13566_s6 + $0x50] sm:$0xff] %v10134_v4   ;;  %v8162_v49 = vsel %vm7906_vm15, %v7778_v63, %v8034_v51  ;;  %v6658_v11 = vrot.slane %v6656_v54, 5  ;;  %v6660_v52 = vshrl.u32 %v9689_v25, 16  ;;  %v5011_v33 = vadd.f32 %v13670_v14, %v14715_v12  ;;  %v14716_v51 = vld [vmem:[#allocation14_spill] sm:$0xff] }
 0x267   : > { %v13937_v20 = vpop.f32.mrf.mxu1  ;;  %v13939_v35 = vpop.f32.mrf.mxu0  ;;  %v13941_v8 = vsel %vm7904_vm0, %v7776_v29, %v8032_v32  ;;  %v6643_v30 = vor.u32 %v6642_v1, %v6639_v41  ;;  %v6653_v59 = vor.u32 %v6652_v2, %v6648_v47  ;;  %v6666_v15 = vshll.u32 %v9690_v55, 16 }
 0x268   : > { %v6662_v23 = vrot.slane %v6660_v52, 4  ;;  %v7644_v26 = vadd.f32 %v13701_v60, %v5011_v33  ;;  %v6670_v21 = vshrl.u32 %v9690_v55, 16  ;;  %v6676_v0 = vshll.u32 %v9691_v43, 16  ;;  %v14717_v43 = vld [vmem:[#allocation15_spill] sm:$0xff] }
 0x269   : > { %v13944_v63 = vpop.f32.mrf.mxu1  ;;  %v13946_v25 = vpop.f32.mrf.mxu0  ;;  %v6644_v54 = vrot.slane %v6643_v30, 4  ;;  %v6654_v14 = vrot.slane %v6653_v59, 4  ;;  %v6668_v4 = vrot.slane %v6666_v15, 5  ;;  %v5009_v12 = vadd.f32 %v13680_v13, %v14716_v51 }
 0x26a   : > { %v6663_v29 = vor.u32 %v6662_v23, %v6658_v11  ;;  %v7779_v41 = vadd.f32 %v13919_v31, %v7644_v26  ;;  %v6672_v32 = vrot.slane %v6670_v21, 4  ;;  %v6678_v1 = vrot.slane %v6676_v0, 5 }
 0x26b   : > { %v13951_v2 = vpop.f32.mrf.mxu1  ;;  %v13953_v60 = vpop.f32.mrf.mxu0  ;;  %v6649_v55 = vsel %vm11508_vm4, %v6644_v54, %v6648_v47  ;;  %v6659_v30 = vsel %vm11508_vm4, %v6654_v14, %v6658_v11  ;;  %v7642_v59 = vadd.f32 %v13711_v34, %v5009_v12  ;;  %v5014_v13 = vadd.f32 %v13690_v62, %v14717_v43  ;;  %v14718_v47 = vld [vmem:[#allocation16_spill] sm:$0xff]  ;;  %v14719_v14 = vld [vmem:[#allocation17_spill] sm:$0xff]  ;;  %v14720_v12 = vld [vmem:[#allocation18_spill] sm:$0xff] }
 0x26c   : > { %v6664_v23 = vrot.slane %v6663_v29, 4  ;;  %v9754_v15 = vcombine.low %v6649_v55, %v6659_v30  ;;  %vm7907_vm2 = vcmp.ge.f32.partialorder %v7779_v41, 0.0  ;;  %v8035_v52 = vmul.f32 0.2, %v7779_v41 }
 0x26d   : > { %v13962_v33 = vpop.f32.mrf.mxu0  ;;  %v6673_v26 = vor.u32 %v6672_v32, %v6668_v4  ;;  %v7777_v21 = vadd.f32 %v13919_v31, %v7642_v59  ;;  %v7647_v0 = vadd.f32 %v13724_v40, %v5014_v13  ;;  %v5012_v54 = vadd.f32 %v13703_v10, %v14718_v47  ;;  %v13968_v11 = vpop.f32.mrf.mxu1  ;;  %v14721_v13 = vld [vmem:[#allocation19_spill] sm:$0xff] }
 0x26e   : > { %11240 = vmatprep.mubr.msk.bf16.mxu1 %vm1992_vm1, %v9754_v15  ;;  %v8163_v62 = vsel %vm7907_vm2, %v7779_v41, %v8035_v52  ;;  %v6669_v34 = vsel %vm11508_vm4, %v6664_v23, %v6668_v4  ;;  %v5015_v51 = vadd.f32 %v13713_v45, %v14719_v14  ;;  %v5013_v29 = vadd.f32 %v13720_v22, %v14720_v12  ;;  %v14722_v15 = vld [vmem:[#allocation20_spill] sm:$0xff] }
 0x26f   : > { %v13977_v32 = vpop.f32.mrf.mxu0  ;;  %v10149_v40 = vpack.c.bf16 %v8163_v62, %v8162_v49  ;;  %v6674_v55 = vrot.slane %v6673_v26, 4  ;;  %vm7905_vm3 = vcmp.ge.f32.partialorder %v7777_v21, 0.0  ;;  %v8033_v10 = vmul.f32 0.2, %v7777_v21  ;;  %v13979_v30 = vpop.f32.mrf.mxu1 }
 0x270   : > { %v7782_v59 = vadd.f32 %v13919_v31, %v7647_v0  ;;  %v7645_v41 = vadd.f32 %v13732_v5, %v5012_v54  ;;  %v7648_v4 = vadd.f32 %v13740_v39, %v5015_v51  ;;  %v7646_v43 = vadd.f32 %v13747_v48, %v5013_v29  ;;  %v14723_v54 = vld [vmem:[#allocation21_spill] sm:$0xff] }
 0x271   : > { %v13985_v45 = vpop.f32.mrf.mxu0  ;;  %10413 = vst [vmem:[%s13566_s6 + $0x68] sm:$0xff] %v10149_v40   ;;  %v6679_v22 = vsel %vm11508_vm4, %v6674_v55, %v6678_v1  ;;  %v8161_v49 = vsel %vm7905_vm3, %v7777_v21, %v8033_v10  ;;  %v5018_v23 = vadd.f32 %v13728_v28, %v14721_v13  ;;  %v5016_v52 = vadd.f32 %v13735_v9, %v14722_v15  ;;  %v13994_v26 = vpop.f32.mrf.mxu1 }
 0x272   : > { %v9755_v5 = vcombine.low %v6669_v34, %v6679_v22  ;;  %v10144_v39 = vpack.c.bf16 %v8161_v49, %v13941_v8  ;;  %vm7910_vm5 = vcmp.ge.f32.partialorder %v7782_v59, 0.0  ;;  %v8038_v48 = vmul.f32 0.2, %v7782_v59  ;;  %v14724_v34 = vld [vmem:[#allocation22_spill] sm:$0xff] }
 0x273   : > { %v13997_v0 = vpop.f32.mrf.mxu0  ;;  %v7780_v36 = vadd.f32 %v13919_v31, %v7645_v41  ;;  %v7783_v1 = vadd.f32 %v13919_v31, %v7648_v4  ;;  %v7781_v21 = vadd.f32 %v13919_v31, %v7646_v43  ;;  %v7651_v28 = vadd.f32 %v13765_v50, %v5018_v23  ;;  %v14003_v47 = vpop.f32.mrf.mxu1 }
 0x274   : > { %11241 = vmatmul.mubr.msk.bf16.gmra.mxu1 %vm1992_vm1, %v9755_v5  ;;  %10412 = vst [vmem:[%s13566_s6 + $0x60] sm:$0xff] %v10144_v39   ;;  %v8166_v9 = vsel %vm7910_vm5, %v7782_v59, %v8038_v48  ;;  %v7649_v8 = vadd.f32 %v13774_v17, %v5016_v52  ;;  %v5019_v62 = vadd.f32 %v13744_v27, %v14723_v54  ;;  %v14725_v39 = vld [vmem:[#allocation23_spill] sm:$0xff]  ;;  %v14726_v48 = vld [vmem:[#allocation24_spill] sm:$0xff]  ;;  %v14728_v54 = vld [vmem:[#allocation25_spill] sm:$0xff] }
 0x275   : > { %v5017_v14 = vadd.f32 %v13753_v58, %v14724_v34  ;;  %v14012_v51 = vpop.f32.mrf.mxu0  ;;  %vm7908_vm4 = vcmp.ge.f32.partialorder %v7780_v36, 0.0  ;;  %v8036_v12 = vmul.f32 0.2, %v7780_v36  ;;  %vm7911_vm6 = vcmp.ge.f32.partialorder %v7783_v1, 0.0 }
 0x276   : > { %v8039_v50 = vmul.f32 0.2, %v7783_v1  ;;  %vm7909_vm7 = vcmp.ge.f32.partialorder %v7781_v21, 0.0  ;;  %v8037_v29 = vmul.f32 0.2, %v7781_v21  ;;  %v7786_v40 = vadd.f32 %v13919_v31, %v7651_v28 }
 0x277   : > { %v7784_v55 = vadd.f32 %v13919_v31, %v7649_v8  ;;  %v14016_v10 = vpop.f32.mrf.mxu1  ;;  %v14018_v17 = vpop.f32.mrf.mxu0  ;;  %v8164_v27 = vsel %vm7908_vm4, %v7780_v36, %v8036_v12  ;;  %v7652_v58 = vadd.f32 %v13779_v24, %v5019_v62  ;;  %v7650_v41 = vadd.f32 %v13789_v53, %v5017_v14  ;;  %v14727_v36 = vld [vmem:[#allocation2_spill] sm:$0xff]  ;;  %v14729_v62 = vld [vmem:[#allocation3_spill] sm:$0xff] }
 0x278   : > { %v8167_v59 = vsel %vm7911_vm6, %v7783_v1, %v8039_v50  ;;  %v8165_v43 = vsel %vm7909_vm7, %v7781_v21, %v8037_v29  ;;  %vm7914_vm1 = vcmp.ge.f32.partialorder %v7786_v40, 0.0  ;;  %v8042_v22 = vmul.f32 0.2, %v7786_v40 }
 0x279   : > { %v10159_v4 = vpack.c.bf16 %v8167_v59, %v8166_v9  ;;  %v14022_v49 = vpop.f32.mrf.mxu1  ;;  %v14024_v13 = vpop.f32.mrf.mxu0  ;;  %v10154_v23 = vpack.c.bf16 %v8165_v43, %v8164_v27  ;;  %vm7912_vm8 = vcmp.ge.f32.partialorder %v7784_v55, 0.0  ;;  %v8040_v15 = vmul.f32 0.2, %v7784_v55  ;;  %v14731_v59 = vld [vmem:[#allocation4_spill] sm:$0xff] }
 0x27a   : > { %v7787_v52 = vadd.f32 %v13919_v31, %v7652_v58  ;;  %v8170_v5 = vsel %vm7914_vm1, %v7786_v40, %v8042_v22  ;;  %v7785_v24 = vadd.f32 %v13919_v31, %v7650_v41  ;;  %v5022_v53 = vadd.f32 %v13767_v16, %v14725_v39  ;;  %v14732_v41 = vld [vmem:[#allocation27_spill] sm:$0xff] }
 0x27b   : > { %10415 = vst [vmem:[%s13566_s6 + $0x78] sm:$0xff] %v10159_v4   ;;  %v5020_v1 = vadd.f32 %v14727_v36, %v14726_v48  ;;  %v14033_v21 = vpop.f32.mrf.mxu1  ;;  %v14035_v28 = vpop.f32.mrf.mxu0  ;;  %10414 = vst [vmem:[%s13566_s6 + $0x70] sm:$0xff] %v10154_v23   ;;  %v8168_v9 = vsel %vm7912_vm8, %v7784_v55, %v8040_v15  ;;  %v5023_v34 = vadd.f32 %v14729_v62, %v14728_v54  ;;  %v14730_v55 = vld [vmem:[#allocation26_spill] sm:$0xff]  ;;  %v14734_v62 = vld [vmem:[#allocation28_spill] sm:$0xff] }
 0x27c   : > { %vm7915_vm9 = vcmp.ge.f32.partialorder %v7787_v52, 0.0  ;;  %v8043_v8 = vmul.f32 0.2, %v7787_v52  ;;  %vm7913_vm10 = vcmp.ge.f32.partialorder %v7785_v24, 0.0  ;;  %v8041_v14 = vmul.f32 0.2, %v7785_v24 }
 0x27d   : > { %v7655_v12 = vadd.f32 %v13802_v38, %v5022_v53  ;;  %v7653_v16 = vadd.f32 %v13809_v44, %v5020_v1  ;;  %v14042_v50 = vpop.f32.mrf.mxu1  ;;  %v14044_v29 = vpop.f32.mrf.mxu0  ;;  %v7656_v27 = vadd.f32 %v13818_v6, %v5023_v34  ;;  %v5021_v58 = vadd.f32 %v14731_v59, %v14730_v55  ;;  %v14733_v4 = vld [vmem:[#allocation118_spill] sm:$0xff]  ;;  %v14735_v34 = vld [vmem:[#allocation5_spill] sm:$0xff] }
 0x27e   : > { %v8171_v40 = vsel %vm7915_vm9, %v7787_v52, %v8043_v8  ;;  %v5026_v43 = vadd.f32 %v14733_v4, %v14732_v41  ;;  %v8169_v23 = vsel %vm7913_vm10, %v7785_v24, %v8041_v14  ;;  %v5024_v14 = vadd.f32 %v14735_v34, %v14734_v62 }
 0x27f   : > { %v10169_v22 = vpack.c.bf16 %v8171_v40, %v8170_v5  ;;  %v7790_v38 = vadd.f32 %v13919_v31, %v7655_v12  ;;  %v7788_v44 = vadd.f32 %v13919_v31, %v7653_v16  ;;  %v14053_v15 = vpop.f32.mrf.mxu0  ;;  %v10164_v39 = vpack.c.bf16 %v8169_v23, %v8168_v9  ;;  %v14058_v48 = vpop.f32.mrf.mxu1  ;;  %v14736_v12 = vld [vmem:[#allocation29_spill] sm:$0xff]  ;;  %v14737_v16 = vld [vmem:[#allocation119_spill] sm:$0xff] }
 0x280   : > { %v7791_v52 = vadd.f32 %v13919_v31, %v7656_v27  ;;  %v7654_v6 = vadd.f32 %v13829_v57, %v5021_v58  ;;  %v7659_v53 = vadd.f32 %v13842_v46, %v5026_v43  ;;  %v5027_v40 = vadd.f32 %v14737_v16, %v14736_v12 }
 0x281   : > { %10417 = vst [vmem:[%s13566_s6 + $0x88] sm:$0xff] %v10169_v22   ;;  %vm7918_vm11 = vcmp.ge.f32.partialorder %v7790_v38, 0.0  ;;  %v8046_v5 = vmul.f32 0.2, %v7790_v38  ;;  %vm7916_vm12 = vcmp.ge.f32.partialorder %v7788_v44, 0.0  ;;  %v14061_v36 = vpop.f32.mrf.mxu0  ;;  %10416 = vst [vmem:[%s13566_s6 + $0x80] sm:$0xff] %v10164_v39   ;;  %v14066_v54 = vpop.f32.mrf.mxu1  ;;  %v7657_v43 = vadd.f32 %v13851_v42, %v5024_v14 }
 0x282   : > { %v8044_v24 = vmul.f32 0.2, %v7788_v44  ;;  %vm7919_vm13 = vcmp.ge.f32.partialorder %v7791_v52, 0.0  ;;  %v8047_v1 = vmul.f32 0.2, %v7791_v52  ;;  %v7789_v9 = vadd.f32 %v13919_v31, %v7654_v6  ;;  %v14739_v6 = vld [vmem:[#allocation31_spill] sm:$0xff] }
 0x283   : > { %v7794_v8 = vadd.f32 %v13919_v31, %v7659_v53  ;;  %v8174_v57 = vsel %vm7918_vm11, %v7790_v38, %v8046_v5  ;;  %v14072_v27 = vpop.f32.mrf.mxu0  ;;  %v14074_v58 = vpop.f32.mrf.mxu1  ;;  %v7660_v22 = vadd.f32 %v13857_v18, %v5027_v40  ;;  %v14741_v5 = vld [vmem:[#allocation32_spill] sm:$0xff]  ;;  %v7792_v18 = vadd.f32 %v13919_v31, %v7657_v43  ;;  %v14744_v40 = vld [vmem:[#allocation33_spill] sm:$0xff] }
 0x284   : > { %v8172_v46 = vsel %vm7916_vm12, %v7788_v44, %v8044_v24  ;;  %v8175_v55 = vsel %vm7919_vm13, %v7791_v52, %v8047_v1  ;;  %vm7917_vm14 = vcmp.ge.f32.partialorder %v7789_v9, 0.0  ;;  %v8045_v59 = vmul.f32 0.2, %v7789_v9  ;;  %v14738_v44 = vld [vmem:[#allocation30_spill] sm:$0xff]  ;;  %v14742_v24 = vld [vmem:[#allocation7_spill] sm:$0xff] }
 0x285   : > { %vm7922_vm15 = vcmp.ge.f32.partialorder %v7794_v8, 0.0  ;;  %v10179_v41 = vpack.c.bf16 %v8175_v55, %v8174_v57  ;;  %v8050_v4 = vmul.f32 0.2, %v7794_v8  ;;  %v14078_v23 = vpop.f32.mrf.mxu0  ;;  %v5025_v39 = vadd.f32 %v13827_v7, %v14738_v44  ;;  %v14740_v52 = vld [vmem:[#allocation6_spill] sm:$0xff]  ;;  %v14086_v62 = vpop.f32.mrf.mxu1  ;;  %v14745_v55 = vld [vmem:[#allocation8_spill] sm:$0xff] }
 0x286   : > { %v8173_v38 = vsel %vm7917_vm14, %v7789_v9, %v8045_v59  ;;  %v5030_v53 = vadd.f32 %v14740_v52, %v14739_v6  ;;  %v5028_v1 = vadd.f32 %v14742_v24, %v14741_v5  ;;  %v7795_v34 = vadd.f32 %v13919_v31, %v7660_v22  ;;  %v14743_v9 = vld [vmem:[#allocation9_spill] sm:$0xff]  ;;  %v14747_v6 = vld [vmem:[#allocation120_spill] sm:$0xff] }
 0x287   : > { %10419 = vst [vmem:[%s13566_s6 + $0x98] sm:$0xff] %v10179_v41   ;;  %v10174_v57 = vpack.c.bf16 %v8173_v38, %v8172_v46  ;;  %v8178_v42 = vsel %vm7922_vm15, %v7794_v8, %v8050_v4  ;;  %v14091_v14 = vpop.f32.mrf.mxu0  ;;  %v7658_v12 = vadd.f32 %v14743_v9, %v5025_v39  ;;  %v5031_v59 = vadd.f32 %v14745_v55, %v14744_v40  ;;  %v14746_v39 = vld [vmem:[#allocation34_spill] sm:$0xff]  ;;  %v14749_v5 = vld [vmem:[#allocation121_spill] sm:$0xff] }
 0x288   : > { %v7663_v7 = vadd.f32 %v13883_v56, %v5030_v53  ;;  %v7661_v16 = vadd.f32 %v13893_v3, %v5028_v1  ;;  %vm7920_vm0 = vcmp.ge.f32.partialorder %v7792_v18, 0.0  ;;  %v8048_v41 = vmul.f32 0.2, %v7792_v18  ;;  %v14748_v53 = vld [vmem:[#allocation35_spill] sm:$0xff] }
 0x289   : > { %10418 = vst [vmem:[%s13566_s6 + $0x90] sm:$0xff] %v10174_v57   ;;  %vm7923_vm2 = vcmp.ge.f32.partialorder %v7795_v34, 0.0  ;;  %v8051_v8 = vmul.f32 0.2, %v7795_v34  ;;  %v14099_v46 = vpop.f32.mrf.mxu1  ;;  %v14101_v4 = vpop.f32.mrf.mxu0  ;;  %v7793_v43 = vadd.f32 %v13919_v31, %v7658_v12  ;;  %v7664_v3 = vadd.f32 %v13901_v37, %v5031_v59 }
 0x28a   : > { %v7798_v22 = vadd.f32 %v13919_v31, %v7663_v7  ;;  %v7796_v56 = vadd.f32 %v13919_v31, %v7661_v16  ;;  %v8176_v38 = vsel %vm7920_vm0, %v7792_v18, %v8048_v41  ;;  %v5029_v52 = vadd.f32 %v14747_v6, %v14746_v39  ;;  %v14752_v41 = vld [vmem:[#allocation122_spill] sm:$0xff] }
 0x28b   : > { %v8179_v44 = vsel %vm7923_vm2, %v7795_v34, %v8051_v8  ;;  %v5034_v24 = vadd.f32 %v14749_v5, %v14748_v53  ;;  %v14111_v1 = vpop.f32.mrf.mxu1  ;;  %v14113_v57 = vpop.f32.mrf.mxu0  ;;  %vm7921_vm3 = vcmp.ge.f32.partialorder %v7793_v43, 0.0  ;;  %v8049_v12 = vmul.f32 0.2, %v7793_v43 }
 0x28c   : > { %v10189_v9 = vpack.c.bf16 %v8179_v44, %v8178_v42  ;;  %vm7926_vm5 = vcmp.ge.f32.partialorder %v7798_v22, 0.0  ;;  %v8054_v7 = vmul.f32 0.2, %v7798_v22  ;;  %vm7924_vm4 = vcmp.ge.f32.partialorder %v7796_v56, 0.0  ;;  %v14751_v42 = vld [vmem:[#allocation36_spill] sm:$0xff] }
 0x28d   : > { %v8052_v37 = vmul.f32 0.2, %v7796_v56  ;;  %v7799_v18 = vadd.f32 %v13919_v31, %v7664_v3  ;;  %v14116_v34 = vpop.f32.mrf.mxu1  ;;  %v14118_v16 = vpop.f32.mrf.mxu0  ;;  %v8177_v40 = vsel %vm7921_vm3, %v7793_v43, %v8049_v12  ;;  %v7662_v55 = vadd.f32 %v13914_v19, %v5029_v52  ;;  %v14754_v52 = vld [vmem:[#allocation10_spill] sm:$0xff]  ;;  %v14758_v12 = vld [vmem:[#allocation12_spill] sm:$0xff] }
 0x28e   : > { %14750 = vst [vmem:[#allocation13_spill] sm:$0xff] %v14118_v16  ;;  %10421 = vst [vmem:[%s13566_s6 + $0xa8] sm:$0xff] %v10189_v9   ;;  %v7667_v59 = vadd.f32 %v13930_v61, %v5034_v24  ;;  %v5032_v8 = vadd.f32 %v14752_v41, %v14751_v42  ;;  %v10184_v44 = vpack.c.bf16 %v8177_v40, %v8176_v38  ;;  %v14753_v61 = vld [vmem:[#allocation37_spill] sm:$0xff]  ;;  %v14755_v9 = vld [vmem:[#allocation38_spill] sm:$0xff] }
 0x28f   : > { %v8182_v39 = vsel %vm7926_vm5, %v7798_v22, %v8054_v7  ;;  %v8180_v6 = vsel %vm7924_vm4, %v7796_v56, %v8052_v37  ;;  %vm7927_vm6 = vcmp.ge.f32.partialorder %v7799_v18, 0.0  ;;  %v14125_v53 = vpop.f32.mrf.mxu1  ;;  %v14127_v3 = vpop.f32.mrf.mxu0  ;;  %v8055_v5 = vmul.f32 0.2, %v7799_v18  ;;  %v14756_v38 = vld [vmem:[#allocation11_spill] sm:$0xff]  ;;  %v14759_v37 = vld [vmem:[#allocation40_spill] sm:$0xff] }
 0x290   : > { %v7797_v16 = vadd.f32 %v13919_v31, %v7662_v55  ;;  %v7802_v43 = vadd.f32 %v13919_v31, %v7667_v59  ;;  %v7665_v19 = vadd.f32 %v13937_v20, %v5032_v8  ;;  %10420 = vst [vmem:[%s13566_s6 + $0xa0] sm:$0xff] %v10184_v44   ;;  %v5035_v24 = vadd.f32 %v14754_v52, %v14753_v61  ;;  %v14757_v56 = vld [vmem:[#allocation39_spill] sm:$0xff] }
 0x291   : > { %v5033_v22 = vadd.f32 %v14756_v38, %v14755_v9  ;;  %v5038_v7 = vadd.f32 %v14758_v12, %v14757_v56  ;;  %v14760_v40 = vld [vmem:[#allocation123_spill] sm:$0xff]  ;;  %v14141_v41 = vpop.f32.mrf.mxu0  ;;  %v8183_v55 = vsel %vm7927_vm6, %v7799_v18, %v8055_v5  ;;  %v14143_v20 = vpop.f32.mrf.mxu1 }
 0x292   : > { %v5036_v42 = vadd.f32 %v14760_v40, %v14759_v37  ;;  %vm7925_vm7 = vcmp.ge.f32.partialorder %v7797_v16, 0.0  ;;  %v8053_v59 = vmul.f32 0.2, %v7797_v16  ;;  %vm7930_vm1 = vcmp.ge.f32.partialorder %v7802_v43, 0.0 }
 0x293   : > { %v10199_v8 = vpack.c.bf16 %v8183_v55, %v8182_v39  ;;  %v8058_v44 = vmul.f32 0.2, %v7802_v43  ;;  %v7800_v61 = vadd.f32 %v13919_v31, %v7665_v19  ;;  %v7668_v52 = vadd.f32 %v13944_v63, %v5035_v24  ;;  %v14147_v9 = vpop.f32.mrf.mxu0  ;;  %v14152_v5 = vpop.f32.mrf.mxu1  ;;  %v14766_v55 = vld [vmem:[#allocation43_spill] sm:$0xff] }
 0x294   : > { %14761 = vst [vmem:[#allocation14_spill] sm:$0xff] %v14147_v9  ;;  %v8181_v38 = vsel %vm7925_vm7, %v7797_v16, %v8053_v59  ;;  %v7666_v56 = vadd.f32 %v13951_v2, %v5033_v22  ;;  %v7671_v12 = vadd.f32 %v13968_v11, %v5038_v7  ;;  %v7669_v18 = vadd.f32 %v13979_v30, %v5036_v42  ;;  %v14763_v22 = vld [vmem:[#allocation41_spill] sm:$0xff]  ;;  %v14764_v7 = vld [vmem:[#allocation124_spill] sm:$0xff] }
 0x295   : > { %10423 = vst [vmem:[%s13566_s6 + $0xb8] sm:$0xff] %v10199_v8   ;;  %v10194_v37 = vpack.c.bf16 %v8181_v38, %v8180_v6  ;;  %v8186_v39 = vsel %vm7930_vm1, %v7802_v43, %v8058_v44  ;;  %vm7928_vm8 = vcmp.ge.f32.partialorder %v7800_v61, 0.0  ;;  %v8056_v40 = vmul.f32 0.2, %v7800_v61  ;;  %v14155_v19 = vpop.f32.mrf.mxu0  ;;  %v14161_v11 = vpop.f32.mrf.mxu1  ;;  %v14765_v43 = vld [vmem:[#allocation42_spill] sm:$0xff] }
 0x296   : > { %14762 = vst [vmem:[#allocation15_spill] sm:$0xff] %v14155_v19  ;;  %v7803_v63 = vadd.f32 %v13919_v31, %v7668_v52  ;;  %v7801_v16 = vadd.f32 %v13919_v31, %v7666_v56  ;;  %v7806_v24 = vadd.f32 %v13919_v31, %v7671_v12  ;;  %v7804_v2 = vadd.f32 %v13919_v31, %v7669_v18 }
 0x297   : > { %10422 = vst [vmem:[%s13566_s6 + $0xb0] sm:$0xff] %v10194_v37   ;;  %v8184_v30 = vsel %vm7928_vm8, %v7800_v61, %v8056_v40  ;;  %v5039_v6 = vadd.f32 %v14764_v7, %v14763_v22  ;;  %v5037_v42 = vadd.f32 %v13939_v35, %v14765_v43  ;;  %v5042_v59 = vadd.f32 %v13946_v25, %v14766_v55  ;;  %v14170_v8 = vpop.f32.mrf.mxu0  ;;  %v14172_v38 = vpop.f32.mrf.mxu1 }
 0x298   : > { %14767 = vst [vmem:[#allocation16_spill] sm:$0xff] %v14170_v8  ;;  %vm7931_vm9 = vcmp.ge.f32.partialorder %v7803_v63, 0.0  ;;  %v8059_v44 = vmul.f32 0.2, %v7803_v63  ;;  %vm7929_vm10 = vcmp.ge.f32.partialorder %v7801_v16, 0.0  ;;  %vm7934_vm11 = vcmp.ge.f32.partialorder %v7806_v24, 0.0 }
 0x299   : > { %v8057_v52 = vmul.f32 0.2, %v7801_v16  ;;  %v8062_v56 = vmul.f32 0.2, %v7806_v24  ;;  %vm7932_vm12 = vcmp.ge.f32.partialorder %v7804_v2, 0.0  ;;  %v14174_v12 = vpop.f32.mrf.mxu0  ;;  %v7672_v25 = vadd.f32 %v13994_v26, %v5039_v6  ;;  %v14770_v26 = vld [vmem:[#allocation45_spill] sm:$0xff] }
 0x29a   : > { %v8060_v61 = vmul.f32 0.2, %v7804_v2  ;;  %14768 = vst [vmem:[#allocation17_spill] sm:$0xff] %v14174_v12  ;;  %v8187_v35 = vsel %vm7931_vm9, %v7803_v63, %v8059_v44  ;;  %v7670_v37 = vadd.f32 %v14003_v47, %v5037_v42  ;;  %v7675_v12 = vadd.f32 %v14016_v10, %v5042_v59  ;;  %v14769_v63 = vld [vmem:[#allocation44_spill] sm:$0xff] }
 0x29b   : > { %v8185_v18 = vsel %vm7929_vm10, %v7801_v16, %v8057_v52  ;;  %v10209_v40 = vpack.c.bf16 %v8187_v35, %v8186_v39  ;;  %v8190_v7 = vsel %vm7934_vm11, %v7806_v24, %v8062_v56  ;;  %v14178_v55 = vpop.f32.mrf.mxu1  ;;  %v14180_v8 = vpop.f32.mrf.mxu0  ;;  %v7807_v19 = vadd.f32 %v13919_v31, %v7672_v25  ;;  %v14771_v39 = vld [vmem:[#allocation46_spill] sm:$0xff]  ;;  %v14773_v6 = vld [vmem:[#allocation48_spill] sm:$0xff] }
 0x29c   : > { %v10204_v22 = vpack.c.bf16 %v8185_v18, %v8184_v30  ;;  %v8188_v43 = vsel %vm7932_vm12, %v7804_v2, %v8060_v61  ;;  %v7805_v9 = vadd.f32 %v13919_v31, %v7670_v37  ;;  %v5040_v16 = vadd.f32 %v13953_v60, %v14769_v63  ;;  %v14772_v2 = vld [vmem:[#allocation47_spill] sm:$0xff] }
 0x29d   : > { %10425 = vst [vmem:[%s13566_s6 + $0xc8] sm:$0xff] %v10209_v40   ;;  %v5043_v47 = vadd.f32 %v13962_v33, %v14770_v26  ;;  %v5041_v24 = vadd.f32 %v13977_v32, %v14771_v39  ;;  %v5046_v30 = vadd.f32 %v13985_v45, %v14772_v2  ;;  %v5044_v42 = vadd.f32 %v13997_v0, %v14773_v6  ;;  %v14197_v44 = vpop.f32.mrf.mxu1  ;;  %v14199_v10 = vpop.f32.mrf.mxu0 }
 0x29e   : > { %10424 = vst [vmem:[%s13566_s6 + $0xc0] sm:$0xff] %v10204_v22   ;;  %vm7935_vm13 = vcmp.ge.f32.partialorder %v7807_v19, 0.0  ;;  %v8063_v60 = vmul.f32 0.2, %v7807_v19  ;;  %vm7933_vm14 = vcmp.ge.f32.partialorder %v7805_v9, 0.0  ;;  %v7810_v52 = vadd.f32 %v13919_v31, %v7675_v12 }
 0x29f   : > { %v8061_v59 = vmul.f32 0.2, %v7805_v9  ;;  %v7673_v33 = vadd.f32 %v14022_v49, %v5040_v16  ;;  %v7676_v32 = vadd.f32 %v14033_v21, %v5043_v47  ;;  %v7674_v56 = vadd.f32 %v14042_v50, %v5041_v24  ;;  %v14205_v45 = vpop.f32.mrf.mxu1  ;;  %v14207_v0 = vpop.f32.mrf.mxu0 }
 0x2a0   : > { %v8191_v61 = vsel %vm7935_vm13, %v7807_v19, %v8063_v60  ;;  %v7679_v18 = vadd.f32 %v14058_v48, %v5046_v30  ;;  %v7677_v25 = vadd.f32 %v14066_v54, %v5044_v42  ;;  %vm7938_vm15 = vcmp.ge.f32.partialorder %v7810_v52, 0.0  ;;  %v14774_v19 = vld [vmem:[#allocation49_spill] sm:$0xff] }
 0x2a1   : > { %v8189_v35 = vsel %vm7933_vm14, %v7805_v9, %v8061_v59  ;;  %v10219_v37 = vpack.c.bf16 %v8191_v61, %v8190_v7  ;;  %v8066_v49 = vmul.f32 0.2, %v7810_v52  ;;  %v14211_v40 = vpop.f32.mrf.mxu1  ;;  %v14213_v21 = vpop.f32.mrf.mxu0  ;;  %v7808_v50 = vadd.f32 %v13919_v31, %v7673_v33 }
 0x2a2   : > { %v10214_v12 = vpack.c.bf16 %v8189_v35, %v8188_v43  ;;  %v7811_v22 = vadd.f32 %v13919_v31, %v7676_v32  ;;  %v7809_v63 = vadd.f32 %v13919_v31, %v7674_v56  ;;  %v7814_v9 = vadd.f32 %v13919_v31, %v7679_v18  ;;  %v14775_v43 = vld [vmem:[#allocation50_spill] sm:$0xff] }
 0x2a3   : > { %10427 = vst [vmem:[%s13566_s6 + $0xd8] sm:$0xff] %v10219_v37   ;;  %v8194_v48 = vsel %vm7938_vm15, %v7810_v52, %v8066_v49  ;;  %v7812_v54 = vadd.f32 %v13919_v31, %v7677_v25  ;;  %v5047_v7 = vadd.f32 %v14012_v51, %v14774_v19  ;;  %v5045_v16 = vadd.f32 %v14018_v17, %v14775_v43  ;;  %v14226_v26 = vpop.f32.mrf.mxu0  ;;  %v14228_v24 = vpop.f32.mrf.mxu1  ;;  %v14776_v25 = vld [vmem:[#allocation51_spill] sm:$0xff]  ;;  %v14781_v43 = vld [vmem:[#allocation56_spill] sm:$0xff] }
 0x2a4   : > { %10426 = vst [vmem:[%s13566_s6 + $0xd0] sm:$0xff] %v10214_v12   ;;  %vm7936_vm0 = vcmp.ge.f32.partialorder %v7808_v50, 0.0  ;;  %v8064_v47 = vmul.f32 0.2, %v7808_v50  ;;  %vm7939_vm2 = vcmp.ge.f32.partialorder %v7811_v22, 0.0  ;;  %vm7937_vm3 = vcmp.ge.f32.partialorder %v7809_v63, 0.0 }
 0x2a5   : > { %v8067_v39 = vmul.f32 0.2, %v7811_v22  ;;  %v8065_v2 = vmul.f32 0.2, %v7809_v63  ;;  %vm7942_vm5 = vcmp.ge.f32.partialorder %v7814_v9, 0.0  ;;  %v14230_v6 = vpop.f32.mrf.mxu0  ;;  %vm7940_vm4 = vcmp.ge.f32.partialorder %v7812_v54, 0.0  ;;  %v14232_v17 = vpop.f32.mrf.mxu1 }
 0x2a6   : > { %v8070_v30 = vmul.f32 0.2, %v7814_v9  ;;  %v8192_v42 = vsel %vm7936_vm0, %v7808_v50, %v8064_v47  ;;  %v8068_v60 = vmul.f32 0.2, %v7812_v54  ;;  %v7680_v32 = vadd.f32 %v14074_v58, %v5047_v7  ;;  %v14777_v50 = vld [vmem:[#allocation52_spill] sm:$0xff]  ;;  %v14780_v19 = vld [vmem:[#allocation55_spill] sm:$0xff] }
 0x2a7   : > { %v8195_v51 = vsel %vm7939_vm2, %v7811_v22, %v8067_v39  ;;  %v8193_v52 = vsel %vm7937_vm3, %v7809_v63, %v8065_v2  ;;  %v14235_v56 = vpop.f32.mrf.mxu0  ;;  %v7678_v18 = vadd.f32 %v14086_v62, %v5045_v16  ;;  %v5050_v37 = vadd.f32 %v14024_v13, %v14776_v25  ;;  %v14240_v12 = vpop.f32.mrf.mxu1  ;;  %v14778_v63 = vld [vmem:[#allocation53_spill] sm:$0xff] }
 0x2a8   : > { %v10229_v59 = vpack.c.bf16 %v8195_v51, %v8194_v48  ;;  %v8198_v33 = vsel %vm7942_vm5, %v7814_v9, %v8070_v30  ;;  %v10224_v61 = vpack.c.bf16 %v8193_v52, %v8192_v42  ;;  %v8196_v35 = vsel %vm7940_vm4, %v7812_v54, %v8068_v60  ;;  %v14779_v9 = vld [vmem:[#allocation54_spill] sm:$0xff] }
 0x2a9   : > { %v7815_v49 = vadd.f32 %v13919_v31, %v7680_v32  ;;  %v5048_v22 = vadd.f32 %v14035_v28, %v14777_v50  ;;  %v5051_v58 = vadd.f32 %v14044_v29, %v14778_v63  ;;  %v5049_v48 = vadd.f32 %v14053_v15, %v14779_v9  ;;  %v14250_v54 = vpop.f32.mrf.mxu0  ;;  %v14259_v28 = vpop.f32.mrf.mxu1  ;;  %v14783_v63 = vld [vmem:[#allocation58_spill] sm:$0xff] }
 0x2aa   : > { %10429 = vst [vmem:[%s13566_s6 + $0xe8] sm:$0xff] %v10229_v59   ;;  %10428 = vst [vmem:[%s13566_s6 + $0xe0] sm:$0xff] %v10224_v61   ;;  %v7813_v62 = vadd.f32 %v13919_v31, %v7678_v18  ;;  %v7683_v13 = vadd.f32 %v14099_v46, %v5050_v37  ;;  %v5054_v7 = vadd.f32 %v14061_v36, %v14780_v19 }
 0x2ab   : > { %v5052_v16 = vadd.f32 %v14072_v27, %v14781_v43  ;;  %vm7943_vm6 = vcmp.ge.f32.partialorder %v7815_v49, 0.0  ;;  %v8071_v29 = vmul.f32 0.2, %v7815_v49  ;;  %v7681_v47 = vadd.f32 %v14111_v1, %v5048_v22  ;;  %v14263_v39 = vpop.f32.mrf.mxu0  ;;  %v14782_v22 = vld [vmem:[#allocation57_spill] sm:$0xff] }
 0x2ac   : > { %v7684_v15 = vadd.f32 %v14116_v34, %v5051_v58  ;;  %vm7941_vm7 = vcmp.ge.f32.partialorder %v7813_v62, 0.0  ;;  %v8069_v2 = vmul.f32 0.2, %v7813_v62  ;;  %v7818_v46 = vadd.f32 %v13919_v31, %v7683_v13 }
 0x2ad   : > { %v7682_v30 = vadd.f32 %v14125_v53, %v5049_v48  ;;  %v8199_v36 = vsel %vm7943_vm6, %v7815_v49, %v8071_v29  ;;  %v7816_v27 = vadd.f32 %v13919_v31, %v7681_v47  ;;  %v7687_v51 = vadd.f32 %v14143_v20, %v5054_v7  ;;  %v14270_v60 = vpop.f32.mrf.mxu1  ;;  %v14272_v1 = vpop.f32.mrf.mxu0  ;;  %v14784_v47 = vld [vmem:[#allocation59_spill] sm:$0xff] }
 0x2ae   : > { %v7819_v42 = vadd.f32 %v13919_v31, %v7684_v15  ;;  %v10239_v34 = vpack.c.bf16 %v8199_v36, %v8198_v33  ;;  %v8197_v59 = vsel %vm7941_vm7, %v7813_v62, %v8069_v2  ;;  %vm7946_vm1 = vcmp.ge.f32.partialorder %v7818_v46, 0.0  ;;  %v14785_v2 = vld [vmem:[#allocation60_spill] sm:$0xff] }
 0x2af   : > { %v8074_v52 = vmul.f32 0.2, %v7818_v46  ;;  %v10234_v32 = vpack.c.bf16 %v8197_v59, %v8196_v35  ;;  %vm7944_vm8 = vcmp.ge.f32.partialorder %v7816_v27, 0.0  ;;  %v8072_v53 = vmul.f32 0.2, %v7816_v27  ;;  %v14274_v61 = vpop.f32.mrf.mxu1  ;;  %v14276_v18 = vpop.f32.mrf.mxu0 }
 0x2b0   : > { %vm7947_vm9 = vcmp.ge.f32.partialorder %v7819_v42, 0.0  ;;  %10431 = vst [vmem:[%s13566_s6 + $0xf8] sm:$0xff] %v10239_v34   ;;  %v8075_v20 = vmul.f32 0.2, %v7819_v42  ;;  %v7817_v37 = vadd.f32 %v13919_v31, %v7682_v30  ;;  %v7822_v49 = vadd.f32 %v13919_v31, %v7687_v51 }
 0x2b1   : > { %v8202_v25 = vsel %vm7946_vm1, %v7818_v46, %v8074_v52  ;;  %10430 = vst [vmem:[%s13566_s6 + $0xf0] sm:$0xff] %v10234_v32   ;;  %v8200_v33 = vsel %vm7944_vm8, %v7816_v27, %v8072_v53  ;;  %v7685_v50 = vadd.f32 %v14152_v5, %v5052_v16  ;;  %v5055_v35 = vadd.f32 %v14078_v23, %v14782_v22  ;;  %v14287_v9 = vpop.f32.mrf.mxu1  ;;  %v14289_v48 = vpop.f32.mrf.mxu0  ;;  %v14787_v52 = vld [vmem:[#allocation13_spill] sm:$0xff]  ;;  %v14788_v53 = vld [vmem:[#allocation62_spill] sm:$0xff] }
 0x2b2   : > { %v5053_v58 = vadd.f32 %v14091_v14, %v14783_v63  ;;  %v8203_v62 = vsel %vm7947_vm9, %v7819_v42, %v8075_v20  ;;  %vm7945_vm10 = vcmp.ge.f32.partialorder %v7817_v37, 0.0  ;;  %v8073_v13 = vmul.f32 0.2, %v7817_v37  ;;  %v14789_v20 = vld [vmem:[#allocation63_spill] sm:$0xff] }
 0x2b3   : > { %vm7950_vm11 = vcmp.ge.f32.partialorder %v7822_v49, 0.0  ;;  %v10249_v19 = vpack.c.bf16 %v8203_v62, %v8202_v25  ;;  %v8078_v7 = vmul.f32 0.2, %v7822_v49  ;;  %v7820_v43 = vadd.f32 %v13919_v31, %v7685_v50  ;;  %v14293_v16 = vpop.f32.mrf.mxu1  ;;  %v14295_v23 = vpop.f32.mrf.mxu0  ;;  %v14790_v62 = vld [vmem:[#allocation64_spill] sm:$0xff] }
 0x2b4   : > { %v7688_v5 = vadd.f32 %v14161_v11, %v5055_v35  ;;  %v8201_v14 = vsel %vm7945_vm10, %v7817_v37, %v8073_v13  ;;  %v7686_v29 = vadd.f32 %v14172_v38, %v5053_v58  ;;  %v5058_v15 = vadd.f32 %v14101_v4, %v14784_v47  ;;  %v14791_v13 = vld [vmem:[#allocation14_spill] sm:$0xff] }
 0x2b5   : > { %v5056_v46 = vadd.f32 %v14113_v57, %v14785_v2  ;;  %10433 = vst [vmem:[%s13566_s6 + $0x108] sm:$0xff] %v10249_v19   ;;  %v10244_v30 = vpack.c.bf16 %v8201_v14, %v8200_v33  ;;  %v8206_v36 = vsel %vm7950_vm11, %v7822_v49, %v8078_v7  ;;  %vm7948_vm12 = vcmp.ge.f32.partialorder %v7820_v43, 0.0  ;;  %v14303_v11 = vpop.f32.mrf.mxu0  ;;  %v14309_v59 = vpop.f32.mrf.mxu1  ;;  %v14786_v57 = vld [vmem:[#allocation61_spill] sm:$0xff] }
 0x2b6   : > { %v8076_v27 = vmul.f32 0.2, %v7820_v43  ;;  %v7823_v42 = vadd.f32 %v13919_v31, %v7688_v5  ;;  %v7821_v51 = vadd.f32 %v13919_v31, %v7686_v29  ;;  %v7691_v34 = vadd.f32 %v14178_v55, %v5058_v15 }
 0x2b7   : > { %v7689_v38 = vadd.f32 %v14197_v44, %v5056_v46  ;;  %10432 = vst [vmem:[%s13566_s6 + $0x100] sm:$0xff] %v10244_v30   ;;  %v5059_v32 = vadd.f32 %v14787_v52, %v14786_v57  ;;  %v5057_v25 = vadd.f32 %v14127_v3, %v14788_v53  ;;  %v5062_v37 = vadd.f32 %v14141_v41, %v14789_v20  ;;  %v14318_v49 = vpop.f32.mrf.mxu0  ;;  %v14320_v44 = vpop.f32.mrf.mxu1  ;;  %v14792_v30 = vld [vmem:[#allocation65_spill] sm:$0xff]  ;;  %v14794_v53 = vld [vmem:[#allocation66_spill] sm:$0xff] }
 0x2b8   : > { %v8204_v4 = vsel %vm7948_vm12, %v7820_v43, %v8076_v27  ;;  %vm7951_vm13 = vcmp.ge.f32.partialorder %v7823_v42, 0.0  ;;  %v8079_v33 = vmul.f32 0.2, %v7823_v42  ;;  %vm7949_vm14 = vcmp.ge.f32.partialorder %v7821_v51, 0.0 }
 0x2b9   : > { %v8077_v55 = vmul.f32 0.2, %v7821_v51  ;;  %v7826_v50 = vadd.f32 %v13919_v31, %v7691_v34  ;;  %v7824_v22 = vadd.f32 %v13919_v31, %v7689_v38  ;;  %v7692_v35 = vadd.f32 %v14205_v45, %v5059_v32  ;;  %v14329_v7 = vpop.f32.mrf.mxu1  ;;  %v14331_v43 = vpop.f32.mrf.mxu0 }
 0x2ba   : > { %v7690_v63 = vadd.f32 %v14211_v40, %v5057_v25  ;;  %v8207_v3 = vsel %vm7951_vm13, %v7823_v42, %v8079_v33  ;;  %v7695_v58 = vadd.f32 %v14228_v24, %v5062_v37  ;;  %v5060_v19 = vadd.f32 %v14791_v13, %v14790_v62  ;;  %v14795_v25 = vld [vmem:[#allocation16_spill] sm:$0xff]  ;;  %v14796_v37 = vld [vmem:[#allocation67_spill] sm:$0xff]  ;;  %v14797_v33 = vld [vmem:[#allocation17_spill] sm:$0xff] }
 0x2bb   : > { %v8205_v41 = vsel %vm7949_vm14, %v7821_v51, %v8077_v55  ;;  %v10259_v5 = vpack.c.bf16 %v8207_v3, %v8206_v36  ;;  %vm7954_vm15 = vcmp.ge.f32.partialorder %v7826_v50, 0.0  ;;  %v8082_v29 = vmul.f32 0.2, %v7826_v50  ;;  %v14335_v15 = vpop.f32.mrf.mxu1  ;;  %v14793_v36 = vld [vmem:[#allocation15_spill] sm:$0xff]  ;;  %v14343_v34 = vpop.f32.mrf.mxu0 }
 0x2bc   : > { %v10254_v14 = vpack.c.bf16 %v8205_v41, %v8204_v4  ;;  %vm7952_vm0 = vcmp.ge.f32.partialorder %v7824_v22, 0.0  ;;  %v8080_v45 = vmul.f32 0.2, %v7824_v22  ;;  %v7827_v40 = vadd.f32 %v13919_v31, %v7692_v35 }
 0x2bd   : > { %v7825_v47 = vadd.f32 %v13919_v31, %v7690_v63  ;;  %10435 = vst [vmem:[%s13566_s6 + $0x118] sm:$0xff] %v10259_v5   ;;  %v8210_v24 = vsel %vm7954_vm15, %v7826_v50, %v8082_v29  ;;  %v7830_v2 = vadd.f32 %v13919_v31, %v7695_v58  ;;  %v7693_v46 = vadd.f32 %v14232_v17, %v5060_v19  ;;  %v14798_v19 = vld [vmem:[#allocation68_spill] sm:$0xff] }
 0x2be   : > { %10434 = vst [vmem:[%s13566_s6 + $0x110] sm:$0xff] %v10254_v14   ;;  %v5063_v27 = vadd.f32 %v14793_v36, %v14792_v30  ;;  %v8208_v42 = vsel %vm7952_vm0, %v7824_v22, %v8080_v45  ;;  %vm7955_vm2 = vcmp.ge.f32.partialorder %v7827_v40, 0.0  ;;  %v8083_v51 = vmul.f32 0.2, %v7827_v40  ;;  %v14799_v14 = vld [vmem:[#allocation69_spill] sm:$0xff]  ;;  %v14800_v45 = vld [vmem:[#allocation70_spill] sm:$0xff] }
 0x2bf   : > { %vm7953_vm3 = vcmp.ge.f32.partialorder %v7825_v47, 0.0  ;;  %v8081_v38 = vmul.f32 0.2, %v7825_v47  ;;  %vm7958_vm5 = vcmp.ge.f32.partialorder %v7830_v2, 0.0  ;;  %v8086_v4 = vmul.f32 0.2, %v7830_v2  ;;  %v14346_v52 = vpop.f32.mrf.mxu1 }
 0x2c0   : > { %v7828_v57 = vadd.f32 %v13919_v31, %v7693_v46  ;;  %v8211_v32 = vsel %vm7955_vm2, %v7827_v40, %v8083_v51  ;;  %v7696_v17 = vadd.f32 %v14240_v12, %v5063_v27  ;;  %v5061_v20 = vadd.f32 %v14795_v25, %v14794_v53  ;;  %v14357_v12 = vpop.f32.mrf.mxu0  ;;  %v14801_v27 = vld [vmem:[#allocation71_spill] sm:$0xff] }
 0x2c1   : > { %v5066_v55 = vadd.f32 %v14797_v33, %v14796_v37  ;;  %v10269_v50 = vpack.c.bf16 %v8211_v32, %v8210_v24  ;;  %v8209_v22 = vsel %vm7953_vm3, %v7825_v47, %v8081_v38  ;;  %v8214_v35 = vsel %vm7958_vm5, %v7830_v2, %v8086_v4  ;;  %v14353_v63 = vpop.f32.mrf.mxu1  ;;  %v14373_v24 = vld [vmem:[%s14566_s2] ss:$0 sm:$0xff] }
 0x2c2   : > { %vm7956_vm4 = vcmp.ge.f32.partialorder %v7828_v57, 0.0  ;;  %v10264_v3 = vpack.c.bf16 %v8209_v22, %v8208_v42  ;;  %v8084_v41 = vmul.f32 0.2, %v7828_v57  ;;  %v7831_v58 = vadd.f32 %v13919_v31, %v7696_v17  ;;  %v14382_v51 = vpop.f32.mrf.mxu0 }
 0x2c3   : > { %v7694_v62 = vadd.f32 %v14259_v28, %v5061_v20  ;;  %10437 = vst [vmem:[%s13566_s6 + $0x128] sm:$0xff] %v10269_v50   ;;  %v7699_v13 = vadd.f32 %v14270_v60, %v5066_v55  ;;  %v5064_v5 = vadd.f32 %v14180_v8, %v14798_v19  ;;  %v5067_v29 = vadd.f32 %v14199_v10, %v14799_v14  ;;  %v14367_v47 = vpop.f32.mrf.mxu1 }
 0x2c4   : > { %v5065_v40 = vadd.f32 %v14207_v0, %v14800_v45  ;;  %10436 = vst [vmem:[%s13566_s6 + $0x120] sm:$0xff] %v10264_v3   ;;  %v8212_v31 = vsel %vm7956_vm4, %v7828_v57, %v8084_v41  ;;  %vm7959_vm6 = vcmp.ge.f32.partialorder %v7831_v58, 0.0  ;;  %v8087_v28 = vmul.f32 0.2, %v7831_v58  ;;  %v14393_v55 = vpop.f32.mrf.mxu0  ;;  %v14803_v3 = vld [vmem:[#allocation73_spill] sm:$0xff] }
 0x2c5   : > { %v7829_v60 = vadd.f32 %v14373_v24, %v7694_v62  ;;  %v7834_v8 = vadd.f32 %v14373_v24, %v7699_v13  ;;  %v7697_v10 = vadd.f32 %v14274_v61, %v5064_v5  ;;  %v7700_v2 = vadd.f32 %v14287_v9, %v5067_v29  ;;  %v7461_v46 = vpop.f32.mrf.mxu1  ;;  %v14804_v13 = vld [vmem:[#allocation74_spill] sm:$0xff]  ;;  %v14805_v5 = vld [vmem:[#allocation75_spill] sm:$0xff] }
 0x2c6   : > { %v7698_v0 = vadd.f32 %v14293_v16, %v5065_v40  ;;  %v8215_v30 = vsel %vm7959_vm6, %v7831_v58, %v8087_v28  ;;  %v5070_v42 = vadd.f32 %v14213_v21, %v14801_v27  ;;  %v5071_v41 = vadd.f32 %v14230_v6, %v14803_v3 }
 0x2c7   : > { %vm7957_vm7 = vcmp.ge.f32.partialorder %v7829_v60, 0.0  ;;  %v8085_v36 = vmul.f32 0.2, %v7829_v60  ;;  %v10279_v38 = vpack.c.bf16 %v8215_v30, %v8214_v35  ;;  %vm7962_vm1 = vcmp.ge.f32.partialorder %v7834_v8, 0.0  ;;  %v14388_v17 = vpop.f32.mrf.mxu1 }
 0x2c8   : > { %v8090_v4 = vmul.f32 0.2, %v7834_v8  ;;  %v7832_v57 = vadd.f32 %v14373_v24, %v7697_v10  ;;  %v7835_v9 = vadd.f32 %v14373_v24, %v7700_v2  ;;  %v7833_v16 = vadd.f32 %v14373_v24, %v7698_v0  ;;  %v14806_v10 = vld [vmem:[#allocation76_spill] sm:$0xff]  ;;  %v14807_v0 = vld [vmem:[#allocation77_spill] sm:$0xff] }
 0x2c9   : > { %v8213_v61 = vsel %vm7957_vm7, %v7829_v60, %v8085_v36  ;;  %v7703_v32 = vadd.f32 %v14309_v59, %v5070_v42  ;;  %10439 = vst [vmem:[%s13566_s6 + $0x138] sm:$0xff] %v10279_v38   ;;  %v14391_v33 = vpop.f32.mrf.mxu1  ;;  %v14802_v59 = vld [vmem:[#allocation72_spill] sm:$0xff]  ;;  %v5069_v19 = vadd.f32 %v14235_v56, %v14804_v13  ;;  %v5074_v14 = vadd.f32 %v14250_v54, %v14805_v5  ;;  %v14413_v56 = vpop.f32.mrf.mxu0  ;;  %v14811_v5 = vld [vmem:[#allocation81_spill] sm:$0xff] }
 0x2ca   : > { %v10274_v53 = vpack.c.bf16 %v8213_v61, %v8212_v31  ;;  %v8218_v21 = vsel %vm7962_vm1, %v7834_v8, %v8090_v4  ;;  %vm7960_vm8 = vcmp.ge.f32.partialorder %v7832_v57, 0.0  ;;  %v8088_v25 = vmul.f32 0.2, %v7832_v57  ;;  %v14810_v13 = vld [vmem:[#allocation80_spill] sm:$0xff] }
 0x2cb   : > { %vm7963_vm9 = vcmp.ge.f32.partialorder %v7835_v9, 0.0  ;;  %v8091_v20 = vmul.f32 0.2, %v7835_v9  ;;  %vm7961_vm10 = vcmp.ge.f32.partialorder %v7833_v16, 0.0  ;;  %v8089_v37 = vmul.f32 0.2, %v7833_v16  ;;  %v14405_v29 = vpop.f32.mrf.mxu1 }
 0x2cc   : > { %10438 = vst [vmem:[%s13566_s6 + $0x130] sm:$0xff] %v10274_v53   ;;  %v8216_v50 = vsel %vm7960_vm8, %v7832_v57, %v8088_v25  ;;  %v7838_v22 = vadd.f32 %v14373_v24, %v7703_v32  ;;  %v5068_v35 = vadd.f32 %v14226_v26, %v14802_v59  ;;  %v7704_v6 = vadd.f32 %v14329_v7, %v5071_v41 }
 0x2cd   : > { %v8219_v58 = vsel %vm7963_vm9, %v7835_v9, %v8091_v20  ;;  %v8217_v62 = vsel %vm7961_vm10, %v7833_v16, %v8089_v37  ;;  %v7702_v28 = vadd.f32 %v14335_v15, %v5069_v19  ;;  %v7707_v60 = vadd.f32 %v14346_v52, %v5074_v14  ;;  %v14411_v8 = vpop.f32.mrf.mxu1  ;;  %v14431_v9 = vpop.f32.mrf.mxu0 }
 0x2ce   : > { %v10289_v45 = vpack.c.bf16 %v8219_v58, %v8218_v21  ;;  %v10284_v40 = vpack.c.bf16 %v8217_v62, %v8216_v50  ;;  %vm7966_vm11 = vcmp.ge.f32.partialorder %v7838_v22, 0.0  ;;  %v8094_v31 = vmul.f32 0.2, %v7838_v22 }
 0x2cf   : > { %v7701_v26 = vadd.f32 %v14320_v44, %v5068_v35  ;;  %v5072_v2 = vadd.f32 %v14263_v39, %v14806_v10  ;;  %v5075_v30 = vadd.f32 %v14272_v1, %v14807_v0  ;;  %v14808_v44 = vld [vmem:[#allocation78_spill] sm:$0xff]  ;;  %v7839_v52 = vadd.f32 %v14373_v24, %v7704_v6  ;;  %v14809_v39 = vld [vmem:[#allocation79_spill] sm:$0xff]  ;;  %v14438_v35 = vpop.f32.mrf.mxu0 }
 0x2d0   : > { %10441 = vst [vmem:[%s13566_s6 + $0x148] sm:$0xff] %v10289_v45   ;;  %10440 = vst [vmem:[%s13566_s6 + $0x140] sm:$0xff] %v10284_v40   ;;  %v8222_v54 = vsel %vm7966_vm11, %v7838_v22, %v8094_v31  ;;  %v5073_v7 = vadd.f32 %v14276_v18, %v14808_v44  ;;  %v7837_v36 = vadd.f32 %v14373_v24, %v7702_v28  ;;  %v14812_v45 = vld [vmem:[#allocation82_spill] sm:$0xff]  ;;  %v14813_v28 = vld [vmem:[#allocation83_spill] sm:$0xff] }
 0x2d1   : > { %v7836_v15 = vadd.f32 %v14373_v24, %v7701_v26  ;;  %v7842_v27 = vadd.f32 %v14373_v24, %v7707_v60  ;;  %v7705_v42 = vadd.f32 %v14353_v63, %v5072_v2  ;;  %v7708_v38 = vadd.f32 %v14367_v47, %v5075_v30  ;;  %v11214_v1 = vpop.f32.mrf.mxu1 }
 0x2d2   : > { %v7706_v4 = vadd.f32 %v7461_v46, %v5073_v7  ;;  %v5078_v57 = vadd.f32 %v14289_v48, %v14809_v39  ;;  %vm7967_vm13 = vcmp.ge.f32.partialorder %v7839_v52, 0.0  ;;  %v8095_v18 = vmul.f32 0.2, %v7839_v52  ;;  %v14814_v7 = vld [vmem:[#allocation84_spill] sm:$0xff] }
 0x2d3   : > { %vm7964_vm12 = vcmp.ge.f32.partialorder %v7836_v15, 0.0  ;;  %v8092_v61 = vmul.f32 0.2, %v7836_v15  ;;  %vm7965_vm14 = vcmp.ge.f32.partialorder %v7837_v36, 0.0  ;;  %v8093_v16 = vmul.f32 0.2, %v7837_v36  ;;  %v14433_v53 = vpop.f32.mrf.mxu1 }
 0x2d4   : > { %vm7970_vm15 = vcmp.ge.f32.partialorder %v7842_v27, 0.0  ;;  %v8098_v32 = vmul.f32 0.2, %v7842_v27  ;;  %v8223_v47 = vsel %vm7967_vm13, %v7839_v52, %v8095_v18  ;;  %v7840_v46 = vadd.f32 %v14373_v24, %v7705_v42  ;;  %v14815_v52 = vld [vmem:[#allocation85_spill] sm:$0xff] }
 0x2d5   : > { %v8220_v63 = vsel %vm7964_vm12, %v7836_v15, %v8092_v61  ;;  %v7843_v48 = vadd.f32 %v14373_v24, %v7708_v38  ;;  %v10299_v21 = vpack.c.bf16 %v8223_v47, %v8222_v54  ;;  %v8221_v25 = vsel %vm7965_vm14, %v7837_v36, %v8093_v16  ;;  %v11215_v50 = vpop.f32.mrf.mxu1 }
 0x2d6   : > { %v8226_v20 = vsel %vm7970_vm15, %v7842_v27, %v8098_v32  ;;  %v7841_v37 = vadd.f32 %v14373_v24, %v7706_v4  ;;  %v10294_v22 = vpack.c.bf16 %v8221_v25, %v8220_v63  ;;  %vm7968_vm0 = vcmp.ge.f32.partialorder %v7840_v46, 0.0 }
 0x2d7   : > { %v8096_v59 = vmul.f32 0.2, %v7840_v46  ;;  %vm7971_vm2 = vcmp.ge.f32.partialorder %v7843_v48, 0.0  ;;  %10443 = vst [vmem:[%s13566_s6 + $0x158] sm:$0xff] %v10299_v21   ;;  %v8099_v3 = vmul.f32 0.2, %v7843_v48  ;;  %v7711_v58 = vadd.f32 %v14388_v17, %v5078_v57  ;;  %v7493_v60 = vpop.f32.mrf.mxu1 }
 0x2d8   : > { %vm7969_vm3 = vcmp.ge.f32.partialorder %v7841_v37, 0.0  ;;  %v8097_v41 = vmul.f32 0.2, %v7841_v37  ;;  %10442 = vst [vmem:[%s13566_s6 + $0x150] sm:$0xff] %v10294_v22   ;;  %v5076_v19 = vadd.f32 %v14295_v23, %v14810_v13  ;;  %v5079_v14 = vadd.f32 %v14303_v11, %v14811_v5  ;;  %v14454_v11 = vpop.f32.mrf.mxu0 }
 0x2d9   : > { %v8224_v62 = vsel %vm7968_vm0, %v7840_v46, %v8096_v59  ;;  %v5077_v40 = vadd.f32 %v14318_v49, %v14812_v45  ;;  %v8227_v31 = vsel %vm7971_vm2, %v7843_v48, %v8099_v3  ;;  %v7846_v6 = vadd.f32 %v14373_v24, %v7711_v58 }
 0x2da   : > { %v8225_v26 = vsel %vm7969_vm3, %v7841_v37, %v8097_v41  ;;  %v5082_v17 = vadd.f32 %v14331_v43, %v14813_v28  ;;  %v10309_v54 = vpack.c.bf16 %v8227_v31, %v8226_v20  ;;  %v7709_v23 = vadd.f32 %v14391_v33, %v5076_v19  ;;  %v4889_v57 = vpop.f32.mrf.mxu0  ;;  %v14817_v37 = vld [vmem:[#allocation87_spill] sm:$0xff]  ;;  %v14819_v41 = vld [vmem:[#allocation89_spill] sm:$0xff] }
 0x2db   : > { %v10304_v10 = vpack.c.bf16 %v8225_v26, %v8224_v62  ;;  %v7712_v2 = vadd.f32 %v14405_v29, %v5079_v14  ;;  %vm7974_vm5 = vcmp.ge.f32.partialorder %v7846_v6, 0.0  ;;  %v8102_v0 = vmul.f32 0.2, %v7846_v6  ;;  %v14820_v62 = vld [vmem:[#allocation90_spill] sm:$0xff] }
 0x2dc   : > { %v7710_v49 = vadd.f32 %v14411_v8, %v5077_v40  ;;  %v7715_v30 = vadd.f32 %v11214_v1, %v5082_v17  ;;  %10445 = vst [vmem:[%s13566_s6 + $0x168] sm:$0xff] %v10309_v54   ;;  %v7844_v44 = vadd.f32 %v14373_v24, %v7709_v23  ;;  %v5080_v15 = vadd.f32 %v14343_v34, %v14814_v7  ;;  %v11218_v42 = vpop.f32.mrf.mxu1  ;;  %v14816_v8 = vld [vmem:[#allocation86_spill] sm:$0xff]  ;;  %v11093_v59 = vpop.f32.mrf.mxu0 }
 0x2dd   : > { %10444 = vst [vmem:[%s13566_s6 + $0x160] sm:$0xff] %v10304_v10   ;;  %v7847_v43 = vadd.f32 %v14373_v24, %v7712_v2  ;;  %v5083_v33 = vadd.f32 %v14357_v12, %v14815_v52  ;;  %v8230_v29 = vsel %vm7974_vm5, %v7846_v6, %v8102_v0  ;;  %v5081_v38 = vadd.f32 %v14382_v51, %v14816_v8  ;;  %v14821_v2 = vld [vmem:[#allocation91_spill] sm:$0xff]  ;;  %v14823_v8 = vld [vmem:[#allocation93_spill] sm:$0xff] }
 0x2de   : > { %v7845_v36 = vadd.f32 %v14373_v24, %v7710_v49  ;;  %v7850_v27 = vadd.f32 %v14373_v24, %v7715_v30  ;;  %vm7972_vm4 = vcmp.ge.f32.partialorder %v7844_v44, 0.0  ;;  %v8100_v4 = vmul.f32 0.2, %v7844_v44  ;;  %v7506_v12 = vpop.f32.mrf.mxu1 }
 0x2df   : > { %vm7975_vm6 = vcmp.ge.f32.partialorder %v7847_v43, 0.0  ;;  %v8103_v39 = vmul.f32 0.2, %v7847_v43  ;;  %v7713_v16 = vadd.f32 %v14433_v53, %v5080_v15  ;;  %v7716_v32 = vadd.f32 %v11215_v50, %v5083_v33  ;;  %v14818_v53 = vld [vmem:[#allocation88_spill] sm:$0xff] }
 0x2e0   : > { %vm7973_vm7 = vcmp.ge.f32.partialorder %v7845_v36, 0.0  ;;  %v8101_v1 = vmul.f32 0.2, %v7845_v36  ;;  %vm7978_vm1 = vcmp.ge.f32.partialorder %v7850_v27, 0.0  ;;  %v8106_v34 = vmul.f32 0.2, %v7850_v27  ;;  %v11219_v48 = vpop.f32.mrf.mxu1 }
 0x2e1   : > { %v8228_v61 = vsel %vm7972_vm4, %v7844_v44, %v8100_v4  ;;  %v8231_v18 = vsel %vm7975_vm6, %v7847_v43, %v8103_v39  ;;  %v7714_v46 = vadd.f32 %v7493_v60, %v5081_v38  ;;  %v7848_v25 = vadd.f32 %v14373_v24, %v7713_v16  ;;  %v14824_v16 = vld [vmem:[#allocation95_spill] sm:$0xff] }
 0x2e2   : > { %v10319_v63 = vpack.c.bf16 %v8231_v18, %v8230_v29  ;;  %v8229_v47 = vsel %vm7973_vm7, %v7845_v36, %v8101_v1  ;;  %v8234_v51 = vsel %vm7978_vm1, %v7850_v27, %v8106_v34  ;;  %v7851_v20 = vadd.f32 %v14373_v24, %v7716_v32  ;;  %v7509_v40 = vpop.f32.mrf.mxu1  ;;  %v14822_v29 = vld [vmem:[#allocation92_spill] sm:$0xff] }
 0x2e3   : > { %v10314_v21 = vpack.c.bf16 %v8229_v47, %v8228_v61  ;;  %v5086_v22 = vadd.f32 %v14393_v55, %v14817_v37  ;;  %v7849_v3 = vadd.f32 %v14373_v24, %v7714_v46  ;;  %v5084_v50 = vadd.f32 %v14413_v56, %v14818_v53 }
 0x2e4   : > { %10447 = vst [vmem:[%s13566_s6 + $0x178] sm:$0xff] %v10319_v63   ;;  %v5087_v58 = vadd.f32 %v14431_v9, %v14819_v41  ;;  %v5085_v13 = vadd.f32 %v14438_v35, %v14820_v62  ;;  %vm7976_vm8 = vcmp.ge.f32.partialorder %v7848_v25, 0.0  ;;  %v8104_v19 = vmul.f32 0.2, %v7848_v25  ;;  %v4892_v9 = vpop.f32.mrf.mxu0  ;;  %v14826_v62 = vld [vmem:[#allocation97_spill] sm:$0xff] }
 0x2e5   : > { %10446 = vst [vmem:[%s13566_s6 + $0x170] sm:$0xff] %v10314_v21   ;;  %vm7979_vm9 = vcmp.ge.f32.partialorder %v7851_v20, 0.0  ;;  %v8107_v5 = vmul.f32 0.2, %v7851_v20  ;;  %vm7977_vm10 = vcmp.ge.f32.partialorder %v7849_v3, 0.0  ;;  %v7719_v14 = vadd.f32 %v11218_v42, %v5086_v22 }
 0x2e6   : > { %v8105_v55 = vmul.f32 0.2, %v7849_v3  ;;  %v7717_v45 = vadd.f32 %v7506_v12, %v5084_v50  ;;  %v8232_v31 = vsel %vm7976_vm8, %v7848_v25, %v8104_v19  ;;  %v7720_v56 = vadd.f32 %v11219_v48, %v5087_v58  ;;  %v11096_v7 = vpop.f32.mrf.mxu0 }
 0x2e7   : > { %v8235_v26 = vsel %vm7979_vm9, %v7851_v20, %v8107_v5  ;;  %v7718_v6 = vadd.f32 %v7509_v40, %v5085_v13  ;;  %v7854_v35 = vadd.f32 %v14373_v24, %v7719_v14  ;;  %v5090_v0 = vadd.f32 %v14454_v11, %v14821_v2  ;;  %v14827_v40 = vld [vmem:[#allocation98_spill] sm:$0xff] }
 0x2e8   : > { %v10329_v28 = vpack.c.bf16 %v8235_v26, %v8234_v51  ;;  %v8233_v17 = vsel %vm7977_vm10, %v7849_v3, %v8105_v55  ;;  %v7852_v60 = vadd.f32 %v14373_v24, %v7717_v45  ;;  %v7855_v10 = vadd.f32 %v14373_v24, %v7720_v56  ;;  %v4905_v61 = vpop.f32.mrf.mxu0  ;;  %v14825_v3 = vld [vmem:[#allocation96_spill] sm:$0xff] }
 0x2e9   : > { %v10324_v54 = vpack.c.bf16 %v8233_v17, %v8232_v31  ;;  %v7853_v23 = vadd.f32 %v14373_v24, %v7718_v6  ;;  %vm7982_vm11 = vcmp.ge.f32.partialorder %v7854_v35, 0.0  ;;  %v8110_v49 = vmul.f32 0.2, %v7854_v35  ;;  %v14828_v17 = vld [vmem:[#allocation99_spill] sm:$0xff] }
 0x2ea   : > { %10449 = vst [vmem:[%s13566_s6 + $0x188] sm:$0xff] %v10329_v28   ;;  %vm7980_vm12 = vcmp.ge.f32.partialorder %v7852_v60, 0.0  ;;  %v8108_v30 = vmul.f32 0.2, %v7852_v60  ;;  %vm7983_vm13 = vcmp.ge.f32.partialorder %v7855_v10, 0.0  ;;  %v11222_v33 = vpop.f32.mrf.mxu1  ;;  %v5088_v36 = vadd.f32 %v4889_v57, %v14822_v29  ;;  %v11097_v48 = vpop.f32.mrf.mxu0 }
 0x2eb   : > { %10448 = vst [vmem:[%s13566_s6 + $0x180] sm:$0xff] %v10324_v54   ;;  %v8111_v44 = vmul.f32 0.2, %v7855_v10  ;;  %vm7981_vm14 = vcmp.ge.f32.partialorder %v7853_v23, 0.0  ;;  %v8109_v43 = vmul.f32 0.2, %v7853_v23  ;;  %v8238_v15 = vsel %vm7982_vm11, %v7854_v35, %v8110_v49 }
 0x2ec   : > { %v8236_v52 = vsel %vm7980_vm12, %v7852_v60, %v8108_v30  ;;  %v7723_v42 = vadd.f32 %v11222_v33, %v5090_v0  ;;  %v5091_v38 = vadd.f32 %v11093_v59, %v14823_v8  ;;  %v7522_v1 = vpop.f32.mrf.mxu1  ;;  %v5089_v32 = vadd.f32 %v4892_v9, %v14824_v16  ;;  %v4908_v50 = vpop.f32.mrf.mxu0 }
 0x2ed   : > { %v8239_v27 = vsel %vm7983_vm13, %v7855_v10, %v8111_v44  ;;  %v8237_v11 = vsel %vm7981_vm14, %v7853_v23, %v8109_v43  ;;  %v7721_v12 = vadd.f32 %v7522_v1, %v5088_v36  ;;  %v5094_v53 = vadd.f32 %v11096_v7, %v14825_v3 }
 0x2ee   : > { %v10339_v4 = vpack.c.bf16 %v8239_v27, %v8238_v15  ;;  %v10334_v39 = vpack.c.bf16 %v8237_v11, %v8236_v52  ;;  %v7858_v34 = vadd.f32 %v14373_v24, %v7723_v42  ;;  %v11223_v18 = vpop.f32.mrf.mxu1  ;;  %v5092_v13 = vadd.f32 %v4905_v61, %v14826_v62  ;;  %v11100_v26 = vpop.f32.mrf.mxu0  ;;  %v14829_v42 = vld [vmem:[#allocation101_spill] sm:$0xff]  ;;  %v14831_v61 = vld [vmem:[#allocation104_spill] sm:$0xff]  ;;  %v14833_v62 = vld [vmem:[#allocation106_spill] sm:$0xff] }
 0x2ef   : > { %v7724_v63 = vadd.f32 %v11223_v18, %v5091_v38  ;;  %v7856_v57 = vadd.f32 %v14373_v24, %v7721_v12  ;;  %v5095_v31 = vadd.f32 %v11097_v48, %v14827_v40  ;;  %v5093_v35 = vadd.f32 %v4908_v50, %v14828_v17  ;;  %v14836_v17 = vld [vmem:[#allocation100_spill] sm:$0xff] }
 0x2f0   : > { %10451 = vst [vmem:[%s13566_s6 + $0x198] sm:$0xff] %v10339_v4   ;;  %10450 = vst [vmem:[%s13566_s6 + $0x190] sm:$0xff] %v10334_v39   ;;  %v8114_v47 = vmul.f32 0.2, %v7858_v34  ;;  %v7525_v51 = vpop.f32.mrf.mxu1  ;;  %vm7986_vm15 = vcmp.ge.f32.partialorder %v7858_v34, 0.0  ;;  %v4921_v54 = vpop.f32.mrf.mxu0  ;;  %v5098_v8 = vadd.f32 %v11100_v26, %v14829_v42  ;;  %v14830_v4 = vld [vmem:[#allocation103_spill] sm:$0xff] }
 0x2f1   : > { %v7859_v46 = vadd.f32 %v14373_v24, %v7724_v63  ;;  %v7722_v21 = vadd.f32 %v7525_v51, %v5089_v32  ;;  %v8112_v20 = vmul.f32 0.2, %v7856_v57  ;;  %vm7984_vm2 = vcmp.ge.f32.partialorder %v7856_v57, 0.0 }
 0x2f2   : > { %v8242_v22 = vsel %vm7986_vm15, %v7858_v34, %v8114_v47  ;;  %v11101_v44 = vpop.f32.mrf.mxu0  ;;  %v5096_v39 = vadd.f32 %v4921_v54, %v14830_v4  ;;  %v14832_v47 = vld [vmem:[#allocation105_spill] sm:$0xff] }
 0x2f3   : > { %vm7987_vm0 = vcmp.ge.f32.partialorder %v7859_v46, 0.0  ;;  %v8115_v25 = vmul.f32 0.2, %v7859_v46  ;;  %v7857_v37 = vadd.f32 %v14373_v24, %v7722_v21  ;;  %v8240_v19 = vsel %vm7984_vm2, %v7856_v57, %v8112_v20 }
 0x2f4   : > { %v4924_v36 = vpop.f32.mrf.mxu0  ;;  %v5099_v18 = vadd.f32 %v11101_v44, %v14831_v61 }
 0x2f5   : > { %v8243_v59 = vsel %vm7987_vm0, %v7859_v46, %v8115_v25  ;;  %vm7985_vm3 = vcmp.ge.f32.partialorder %v7857_v37, 0.0  ;;  %v8113_v58 = vmul.f32 0.2, %v7857_v37  ;;  %v5097_v51 = vadd.f32 %v4924_v36, %v14832_v47 }
 0x2f6   : > { %v10349_v41 = vpack.c.bf16 %v8243_v59, %v8242_v22  ;;  %v11104_v34 = vpop.f32.mrf.mxu0 }
 0x2f7   : > { %v8241_v55 = vsel %vm7985_vm3, %v7857_v37, %v8113_v58 }
 0x2f8   : > { %10453 = vst [vmem:[%s13566_s6 + $0x1a8] sm:$0xff] %v10349_v41   ;;  %v11226_v5 = vpop.f32.mrf.mxu1  ;;  %v10344_v14 = vpack.c.bf16 %v8241_v55, %v8240_v19  ;;  %v4937_v46 = vpop.f32.mrf.mxu0 }
 0x2f9   : > { %v7727_v45 = vadd.f32 %v11226_v5, %v5094_v53 }
 0x2fa   : > { %v7538_v56 = vpop.f32.mrf.mxu1  ;;  %10452 = vst [vmem:[%s13566_s6 + $0x1a0] sm:$0xff] %v10344_v14   ;;  %v11105_v59 = vpop.f32.mrf.mxu0  ;;  %v14834_v14 = vld [vmem:[#allocation108_spill] sm:$0xff] }
 0x2fb   : > { %v7862_v6 = vadd.f32 %v14373_v24, %v7727_v45  ;;  %v7725_v9 = vadd.f32 %v7538_v56, %v5092_v13  ;;  %v5102_v13 = vadd.f32 %v11104_v34, %v14833_v62  ;;  %v5100_v45 = vadd.f32 %v4937_v46, %v14834_v14  ;;  %v14839_v34 = vld [vmem:[#allocation112_spill] sm:$0xff]  ;;  %v14842_v46 = vld [vmem:[#allocation102_spill] sm:$0xff] }
 0x2fc   : > { %v11227_v28 = vpop.f32.mrf.mxu1  ;;  %v4940_v55 = vpop.f32.mrf.mxu0 }
 0x2fd   : > { %v7728_v60 = vadd.f32 %v11227_v28, %v5095_v31  ;;  %v7860_v10 = vadd.f32 %v14373_v24, %v7725_v9  ;;  %v8118_v23 = vmul.f32 0.2, %v7862_v6  ;;  %vm7990_vm5 = vcmp.ge.f32.partialorder %v7862_v6, 0.0  ;;  %v14835_v9 = vld [vmem:[#allocation109_spill] sm:$0xff] }
 0x2fe   : > { %v7541_v2 = vpop.f32.mrf.mxu1  ;;  %v5103_v28 = vadd.f32 %v11105_v59, %v14835_v9 }
 0x2ff   : > { %v7863_v0 = vadd.f32 %v14373_v24, %v7728_v60  ;;  %v7726_v49 = vadd.f32 %v7541_v2, %v5093_v35  ;;  %v8116_v43 = vmul.f32 0.2, %v7860_v10  ;;  %v8246_v15 = vsel %vm7990_vm5, %v7862_v6, %v8118_v23  ;;  %v14837_v35 = vld [vmem:[#allocation94_spill] sm:$0xff] }
 0x300   : > { %vm7988_vm6 = vcmp.ge.f32.partialorder %v7860_v10, 0.0  ;;  %v3751_v60 = vadd.f32 %v14837_v35, %v14836_v17 }
 0x301   : > { %vm7991_vm4 = vcmp.ge.f32.partialorder %v7863_v0, 0.0  ;;  %v8119_v30 = vmul.f32 0.2, %v7863_v0  ;;  %v7861_v7 = vadd.f32 %v14373_v24, %v7726_v49  ;;  %v8244_v27 = vsel %vm7988_vm6, %v7860_v10, %v8116_v43  ;;  %v11108_v10 = vpop.f32.mrf.mxu0 }
 0x302   : > { %v5101_v49 = vadd.f32 %v4940_v55, %v3751_v60  ;;  %v14844_v60 = vld [vmem:[#allocation116_spill] sm:$0xff] }
 0x303   : > { %v8247_v52 = vsel %vm7991_vm4, %v7863_v0, %v8119_v30  ;;  %vm7989_vm7 = vcmp.ge.f32.partialorder %v7861_v7, 0.0  ;;  %v8117_v29 = vmul.f32 0.2, %v7861_v7  ;;  %v4953_v43 = vpop.f32.mrf.mxu0 }
 0x304   : > { %v10359_v33 = vpack.c.bf16 %v8247_v52, %v8246_v15 }
 0x305   : > { %v8245_v11 = vsel %vm7989_vm7, %v7861_v7, %v8117_v29 }
 0x306   : > { %10455 = vst [vmem:[%s13566_s6 + $0x1b8] sm:$0xff] %v10359_v33   ;;  %v10354_v38 = vpack.c.bf16 %v8245_v11, %v8244_v27  ;;  %v14838_v11 = vld [vmem:[#allocation111_spill] sm:$0xff] }
 0x307   : > { %v5106_v42 = vadd.f32 %v11108_v10, %v14838_v11 }
 0x308   : > { %10454 = vst [vmem:[%s13566_s6 + $0x1b0] sm:$0xff] %v10354_v38  }
 0x309   : > { %v11230_v1 = vpop.f32.mrf.mxu1 }
 0x30a   : > { %v7731_v12 = vadd.f32 %v11230_v1, %v5098_v8  ;;  %v11109_v8 = vpop.f32.mrf.mxu0 }
 0x30b   : > { %v7554_v16 = vpop.f32.mrf.mxu1 }
 0x30c   : > { %v7866_v32 = vadd.f32 %v14373_v24, %v7731_v12  ;;  %v7729_v63 = vadd.f32 %v7554_v16, %v5096_v39  ;;  %v5104_v12 = vadd.f32 %v4953_v43, %v14839_v34  ;;  %v4956_v47 = vpop.f32.mrf.mxu0 }
 0x30d   : > { %v11231_v57 = vpop.f32.mrf.mxu1 }
 0x30e   : > { %v7732_v48 = vadd.f32 %v11231_v57, %v5099_v18  ;;  %v7864_v21 = vadd.f32 %v14373_v24, %v7729_v63  ;;  %v8122_v25 = vmul.f32 0.2, %v7866_v32  ;;  %vm7994_vm1 = vcmp.ge.f32.partialorder %v7866_v32, 0.0  ;;  %v14840_v63 = vld [vmem:[#allocation114_spill] sm:$0xff] }
 0x30f   : > { %v7557_v20 = vpop.f32.mrf.mxu1  ;;  %v5107_v57 = vadd.f32 %v11109_v8, %v14840_v63 }
 0x310   : > { %v7867_v37 = vadd.f32 %v14373_v24, %v7732_v48  ;;  %v7730_v22 = vadd.f32 %v7557_v20, %v5097_v51  ;;  %v8120_v53 = vmul.f32 0.2, %v7864_v21  ;;  %v8250_v41 = vsel %vm7994_vm1, %v7866_v32, %v8122_v25  ;;  %v14841_v51 = vld [vmem:[#allocation107_spill] sm:$0xff] }
 0x311   : > { %vm7992_vm9 = vcmp.ge.f32.partialorder %v7864_v21, 0.0  ;;  %v3767_v48 = vadd.f32 %v14842_v46, %v14841_v51 }
 0x312   : > { %vm7995_vm8 = vcmp.ge.f32.partialorder %v7867_v37, 0.0  ;;  %v8123_v3 = vmul.f32 0.2, %v7867_v37  ;;  %v7865_v50 = vadd.f32 %v14373_v24, %v7730_v22  ;;  %v8248_v40 = vsel %vm7992_vm9, %v7864_v21, %v8120_v53  ;;  %v11112_v53 = vpop.f32.mrf.mxu0 }
 0x313   : > { %v5105_v59 = vadd.f32 %v4956_v47, %v3767_v48 }
 0x314   : > { %v8251_v58 = vsel %vm7995_vm8, %v7867_v37, %v8123_v3  ;;  %vm7993_vm10 = vcmp.ge.f32.partialorder %v7865_v50, 0.0  ;;  %v8121_v5 = vmul.f32 0.2, %v7865_v50 }
 0x315   : > { %v10369_v19 = vpack.c.bf16 %v8251_v58, %v8250_v41 }
 0x316   : > { %v8249_v26 = vsel %vm7993_vm10, %v7865_v50, %v8121_v5  ;;  %v4969_v5 = vpop.f32.mrf.mxu0 }
 0x317   : > { %10457 = vst [vmem:[%s13566_s6 + $0x1c8] sm:$0xff] %v10369_v19   ;;  %v11234_v31 = vpop.f32.mrf.mxu1  ;;  %v10364_v56 = vpack.c.bf16 %v8249_v26, %v8248_v40 }
 0x318   : > { %v7735_v6 = vadd.f32 %v11234_v31, %v5102_v13  ;;  %v11113_v9 = vpop.f32.mrf.mxu0 }
 0x319   : > { %v7570_v54 = vpop.f32.mrf.mxu1  ;;  %10456 = vst [vmem:[%s13566_s6 + $0x1c0] sm:$0xff] %v10364_v56   ;;  %v14843_v56 = vld [vmem:[#allocation115_spill] sm:$0xff] }
 0x31a   : > { %v7870_v23 = vadd.f32 %v14373_v24, %v7735_v6  ;;  %v7733_v2 = vadd.f32 %v7570_v54, %v5100_v45  ;;  %v5110_v6 = vadd.f32 %v11112_v53, %v14843_v56  ;;  %v5108_v54 = vadd.f32 %v4969_v5, %v14844_v60 }
 0x31b   : > { %v11235_v0 = vpop.f32.mrf.mxu1 }
 0x31c   : > { %v7736_v30 = vadd.f32 %v11235_v0, %v5103_v28  ;;  %v7868_v44 = vadd.f32 %v14373_v24, %v7733_v2  ;;  %v8126_v7 = vmul.f32 0.2, %v7870_v23  ;;  %vm7998_vm11 = vcmp.ge.f32.partialorder %v7870_v23, 0.0  ;;  %v14845_v2 = vld [vmem:[#allocation117_spill] sm:$0xff] }
 0x31d   : > { %v7573_v15 = vpop.f32.mrf.mxu1  ;;  %v5111_v0 = vadd.f32 %v11113_v9, %v14845_v2 }
 0x31e   : > { %v7871_v52 = vadd.f32 %v14373_v24, %v7736_v30  ;;  %v7734_v33 = vadd.f32 %v7573_v15, %v5101_v49  ;;  %v8124_v36 = vmul.f32 0.2, %v7868_v44  ;;  %v8254_v38 = vsel %vm7998_vm11, %v7870_v23, %v8126_v7  ;;  %v4972_v49 = vpop.f32.mrf.mxu0  ;;  %v14846_v30 = vld [vmem:[#allocation113_spill] sm:$0xff] }
 0x31f   : > { %vm7996_vm13 = vcmp.ge.f32.partialorder %v7868_v44, 0.0 }
 0x320   : > { %vm7999_vm12 = vcmp.ge.f32.partialorder %v7871_v52, 0.0  ;;  %v8127_v29 = vmul.f32 0.2, %v7871_v52  ;;  %v7869_v27 = vadd.f32 %v14373_v24, %v7734_v33  ;;  %v8252_v18 = vsel %vm7996_vm13, %v7868_v44, %v8124_v36  ;;  %v14847_v44 = vld [vmem:[#allocation110_spill] sm:$0xff] }
 0x321   : > { %v3783_v43 = vadd.f32 %v14847_v44, %v14846_v30 }
 0x322   : > { %v8255_v4 = vsel %vm7999_vm12, %v7871_v52, %v8127_v29  ;;  %vm7997_vm14 = vcmp.ge.f32.partialorder %v7869_v27, 0.0  ;;  %v8125_v1 = vmul.f32 0.2, %v7869_v27 }
 0x323   : > { %v10379_v39 = vpack.c.bf16 %v8255_v4, %v8254_v38  ;;  %v5109_v29 = vadd.f32 %v4972_v49, %v3783_v43 }
 0x324   : > { %v11238_v61 = vpop.f32.mrf.mxu1  ;;  %v8253_v16 = vsel %vm7997_vm14, %v7869_v27, %v8125_v1 }
 0x325   : > { %10459 = vst [vmem:[%s13566_s6 + $0x1d8] sm:$0xff] %v10379_v39   ;;  %v7739_v32 = vadd.f32 %v11238_v61, %v5106_v42  ;;  %v10374_v21 = vpack.c.bf16 %v8253_v16, %v8252_v18 }
 0x326   : > { %v7586_v25 = vpop.f32.mrf.mxu1 }
 0x327   : > { %v7874_v20 = vadd.f32 %v14373_v24, %v7739_v32  ;;  %v7737_v37 = vadd.f32 %v7586_v25, %v5104_v12  ;;  %10458 = vst [vmem:[%s13566_s6 + $0x1d0] sm:$0xff] %v10374_v21  }
 0x328   : > { %v11239_v22 = vpop.f32.mrf.mxu1 }
 0x329   : > { %v7740_v3 = vadd.f32 %v11239_v22, %v5107_v57  ;;  %v7872_v50 = vadd.f32 %v14373_v24, %v7737_v37  ;;  %v8130_v41 = vmul.f32 0.2, %v7874_v20  ;;  %vm8002_vm15 = vcmp.ge.f32.partialorder %v7874_v20, 0.0 }
 0x32a   : > { %v7589_v58 = vpop.f32.mrf.mxu1 }
 0x32b   : > { %v7875_v62 = vadd.f32 %v14373_v24, %v7740_v3  ;;  %v7738_v13 = vadd.f32 %v7589_v58, %v5105_v59  ;;  %v8128_v55 = vmul.f32 0.2, %v7872_v50  ;;  %v8258_v45 = vsel %vm8002_vm15, %v7874_v20, %v8130_v41 }
 0x32c   : > { %vm8000_vm2 = vcmp.ge.f32.partialorder %v7872_v50, 0.0 }
 0x32d   : > { %vm8003_vm0 = vcmp.ge.f32.partialorder %v7875_v62, 0.0  ;;  %v8131_v19 = vmul.f32 0.2, %v7875_v62  ;;  %v7873_v14 = vadd.f32 %v14373_v24, %v7738_v13  ;;  %v8256_v28 = vsel %vm8000_vm2, %v7872_v50, %v8128_v55 }
 0x32f   : > { %v8259_v40 = vsel %vm8003_vm0, %v7875_v62, %v8131_v19  ;;  %vm8001_vm3 = vcmp.ge.f32.partialorder %v7873_v14, 0.0  ;;  %v8129_v26 = vmul.f32 0.2, %v7873_v14 }
 0x330   : > { %v10389_v31 = vpack.c.bf16 %v8259_v40, %v8258_v45 }
 0x331   : > { %v8257_v17 = vsel %vm8001_vm3, %v7873_v14, %v8129_v26 }
 0x332   : > { %10461 = vst [vmem:[%s13566_s6 + $0x1e8] sm:$0xff] %v10389_v31   ;;  %v10384_v35 = vpack.c.bf16 %v8257_v17, %v8256_v28 }
 0x334   : > { %v11242_v10 = vpop.f32.mrf.mxu1  ;;  %10460 = vst [vmem:[%s13566_s6 + $0x1e0] sm:$0xff] %v10384_v35  }
 0x335   : > { %v7743_v23 = vadd.f32 %v11242_v10, %v5110_v6 }
 0x336   : > { %v7602_v7 = vpop.f32.mrf.mxu1 }
 0x337   : > { %v7878_v15 = vadd.f32 %v14373_v24, %v7743_v23  ;;  %v7741_v52 = vadd.f32 %v7602_v7, %v5108_v54 }
 0x338   : > { %v11243_v33 = vpop.f32.mrf.mxu1 }
 0x339   : > { %v7744_v36 = vadd.f32 %v11243_v33, %v5111_v0  ;;  %v7876_v27 = vadd.f32 %v14373_v24, %v7741_v52  ;;  %v8134_v11 = vmul.f32 0.2, %v7878_v15  ;;  %vm8006_vm5 = vcmp.ge.f32.partialorder %v7878_v15, 0.0 }
 0x33a   : > { %v7605_v42 = vpop.f32.mrf.mxu1 }
 0x33b   : > { %v7879_v8 = vadd.f32 %v14373_v24, %v7744_v36  ;;  %v7742_v38 = vadd.f32 %v7605_v42, %v5109_v29  ;;  %v8132_v39 = vmul.f32 0.2, %v7876_v27  ;;  %v8262_v34 = vsel %vm8006_vm5, %v7878_v15, %v8134_v11 }
 0x33c   : > { %vm8004_vm6 = vcmp.ge.f32.partialorder %v7876_v27, 0.0 }
 0x33d   : > { %vm8007_vm4 = vcmp.ge.f32.partialorder %v7879_v8, 0.0  ;;  %v8135_v4 = vmul.f32 0.2, %v7879_v8  ;;  %v7877_v1 = vadd.f32 %v14373_v24, %v7742_v38  ;;  %v8260_v16 = vsel %vm8004_vm6, %v7876_v27, %v8132_v39 }
 0x33f   : > { %v8263_v12 = vsel %vm8007_vm4, %v7879_v8, %v8135_v4  ;;  %vm8005_vm7 = vcmp.ge.f32.partialorder %v7877_v1, 0.0  ;;  %v8133_v18 = vmul.f32 0.2, %v7877_v1 }
 0x340   : > { %v10399_v61 = vpack.c.bf16 %v8263_v12, %v8262_v34 }
 0x341   : > { %v8261_v32 = vsel %vm8005_vm7, %v7877_v1, %v8133_v18 }
 0x342   : > { %10463 = vst [vmem:[%s13566_s6 + $0x1f8] sm:$0xff] %v10399_v61   ;;  %v10394_v63 = vpack.c.bf16 %v8261_v32, %v8260_v16 }
 0x344   : > { %10462 = vst [vmem:[%s13566_s6 + $0x1f0] sm:$0xff] %v10394_v63  }
 0x345 PF: > { %s13_s14 = sadd.s32 1, %s11427_s14   ;;  %s14848_s12 = smov %s11423_s13 }
 0x346   : > { %p10_p5 = scmp.ge.s32.totalorder %s13_s14, 4   ;;  %s14849_s13 = smov %s14851_s15 }
 0x348   :  { %12 = sbr.rel (!%p10_p5) target bundleno = 2 (0x2), region = 69 }

// kernel: _lambda_.6
= control target key start
LH: loop header
LB: loop body
LE: loop exit
PB: predicated region body
PF: predicated region fallthrough
CT: control target
= control target key end

     0   :  { %s3464_s12 = smov 0   ;;  %s3466_s13 = smov 0   ;;  %s3995_s0 = inlined_call_operand.vmem [shape: bf16[2,17,17,32], index: 0, kind: input, shape index: {}]   ;;  %s3996_s1 = inlined_call_operand.vmem [shape: bf16[128,128], index: 1, kind: input, shape index: {}]   ;;  %s3997_s2 = inlined_call_operand.vmem [shape: bf16[2,256,128], index: 2, kind: output, shape index: {0}]   ;;  %s3998_s3 = inlined_call_operand.vmem [shape: f32[2,2,128], index: 3, kind: output, shape index: {1}]  }
   0x1   :  { %s3468_s14 = smov 0  }
   0x2 LB: > { %s23_s15 = sadd.s32 1, %s3438_s13  ;;  %p2756_p0 = scmp.ge.s32.totalorder %s3442_s14, 1  ;;  %s3442_s14 = sphi %s3468_s14, %s14_s14   ;;  %s3438_s13 = sphi %s3466_s13, %s4002_s13   ;;  %s3434_s12 = sphi %s3464_s12, %s4001_s12  }
   0x3   : > { %p24_p1 = scmp.ge.s32.totalorder %s23_s15, 2  ;;  %p165_p2 = scmp.lt.s32.totalorder %s3442_s14, 3 }
   0x5   : > { %s4004_s15 = smov (%p24_p1, %s23_s15), 0  ;;  %p166_p3 = pnand %p2756_p0, %p165_p2 }
   0x6   : > { %p203_p4 = scmp.lt.s32.totalorder (!%p166_p3), %s3434_s12, 1 }
   0x7   : > { %169 = sbr.rel (%p166_p3) target bundleno = 385 (0x181), region = 28 }
   0xc   : > { %v3380_v0 = vld [vmem:[%s3996_s1 + $0x8] sm:$0xff]   ;;  %v3381_v1 = vld [vmem:[%s3996_s1 + $0x18] sm:$0xff]   ;;  %v3382_v2 = vld [vmem:[%s3996_s1] sm:$0xff]   ;;  %s4006_s12 = smov (!%p203_p4, %s3434_s12), 1  ;;  %vm280_vm0 = vsmask.f32 3328 }
   0xd   : > { %3247 = vmatprep.subr.bf16.mxu1 %v3380_v0  ;;  %3211 = vmatprep.subr.bf16.mxu0 %v3381_v1  ;;  %v3383_v3 = vld [vmem:[%s3996_s1 + $0x10] sm:$0xff]   ;;  %s3355_s24 = smul.u32 204, %s4006_s12  ;;  %vm281_vm1 = vsmask.f32 7440  ;;  %v3500_v4 = vld [vmem:[%s3996_s1 + $0x28] sm:$0xff]   ;;  %vm731_vm2 = vcmask 261120  }
   0xe   : > { %3248 = vmatpush3.bf16.msra.mxu1 %v3380_v0  ;;  %3212 = vmatpush3.bf16.msra.mxu0 %v3381_v1  ;;  %v3387_v5 = vld [vmem:[%s3996_s1 + $0x38] sm:$0xff]   ;;  %v3397_v33 = vld [vmem:[%s3996_s1 + $0x30] sm:$0xff]   ;;  %vm3524_vm3 = vmor %vm280_vm0, %vm281_vm1  ;;  %s3011_s9 = sshll.u32 %s4006_s12, 7  ;;  %s2760_s17 = sshll.u32 %s4006_s12, 1 }
   0xf   : > { %3249 = vmatprep.subr.bf16.mxu1 %v3382_v2  ;;  %3213 = vmatprep.subr.bf16.mxu0 %v3383_v3  ;;  %s3505_s29 = scalar_lea.vmem %s3995_s0, %s3355_s24  ;;  %s3926_s16 = scalar_lea.vmem %s3997_s2, %s3011_s9 }
  0x10   : > { %v228_v6 = vld [vmem:[%s3505_s29] sm:$0xf]  ;;  %v229_v7 = vld [vmem:[%s3505_s29 + $0x4] sm:$0xf]  ;;  %v230_v8 = vld [vmem:[%s3505_s29 + $0xc] sm:$0xf]  ;;  %s226_s20 = scalar_lea.vmem %s3998_s3, %s2760_s17 }
  0x11   : > { %v284_v9 = vshrl.u32 %v228_v6, 16  ;;  %v287_v10 = vshll.u32 %v228_v6, 16  ;;  %v293_v11 = vshll.u32 %v229_v7, 16  ;;  %v297_v12 = vshrl.u32 %v229_v7, 16  ;;  %v231_v13 = vld [vmem:[%s3505_s29 + $0x10] sm:$0xf] }
  0x12   : > { %3250 = vmatpush3.bf16.msra.mxu1 %v3382_v2  ;;  %3214 = vmatpush3.bf16.msra.mxu0 %v3383_v3  ;;  %v2795_v14 = vcombine.low %v228_v6, %v229_v7  ;;  %v308_v15 = vshrl.u32 %v230_v8, 16  ;;  %v311_v16 = vshll.u32 %v230_v8, 16  ;;  %v317_v17 = vshll.u32 %v231_v13, 16  ;;  %v264_v18 = vld [vmem:[%s3505_s29 + $0x8] sm:$0x1] }
  0x13   : > { %3319 = vmatprep.subr.bf16.mxu1 %v3387_v5  ;;  %3283 = vmatprep.subr.bf16.mxu0 %v3500_v4  ;;  %v286_v19 = vrot.slane %v284_v9, 4  ;;  %v289_v20 = vrot.slane %v287_v10, 5  ;;  %v295_v21 = vrot.slane %v293_v11, 5  ;;  %v299_v22 = vrot.slane %v297_v12, 4  ;;  %v265_v23 = vld [vmem:[%s3505_s29 + $0x14] sm:$0x1] }
  0x14   : > { %3251 = vmatprep.mubr.msk.bf16.mxu1 %vm731_vm2, %v2795_v14  ;;  %v310_v24 = vrot.slane %v308_v15, 4  ;;  %v313_v25 = vrot.slane %v311_v16, 5  ;;  %v319_v26 = vrot.slane %v317_v17, 5  ;;  %v321_v27 = vshrl.u32 %v231_v13, 16  ;;  %v232_v28 = vld [vmem:[%s3505_s29 + $0x18] sm:$0xf] }
  0x15   : > { %v2796_v29 = vcombine.low %v230_v8, %v231_v13  ;;  %v290_v30 = vor.u32 %v289_v20, %v286_v19  ;;  %v300_v31 = vor.u32 %v299_v22, %v295_v21  ;;  %v303_v32 = vshll.u32 %v264_v18, 16  ;;  %v233_v38 = vld [vmem:[%s3505_s29 + $0x1c] sm:$0xf]  ;;  %v234_v48 = vld [vmem:[%s3505_s29 + $0x24] sm:$0xf] }
  0x16   : > { %v323_v34 = vrot.slane %v321_v27, 4  ;;  %v314_v36 = vor.u32 %v313_v25, %v310_v24  ;;  %v327_v37 = vshll.u32 %v265_v23, 16  ;;  %v332_v39 = vshrl.u32 %v232_v28, 16  ;;  %v235_v53 = vld [vmem:[%s3505_s29 + $0x28] sm:$0xf]  ;;  %v3396_v10 = vld [vmem:[%s3996_s1 + $0x20] sm:$0xff]  }
  0x17   : > { %3252 = vmatmul.mubr.msk.bf16.vlgmr.msra.gmra.mxu1 %vm731_vm2, %v2796_v29  ;;  %v291_v40 = vrot.slane %v290_v30, 4  ;;  %v301_v41 = vrot.slane %v300_v31, 4  ;;  %v305_v42 = vrot.slane %v303_v32, 5  ;;  %v335_v43 = vshll.u32 %v232_v28, 16  ;;  %v266_v58 = vld [vmem:[%s3505_s29 + $0x20] sm:$0x1] }
  0x18   : > { %v315_v44 = vrot.slane %v314_v36, 4  ;;  %v324_v45 = vor.u32 %v323_v34, %v319_v26  ;;  %v329_v46 = vrot.slane %v327_v37, 5  ;;  %3320 = vmatpush3.bf16.msra.mxu1 %v3387_v5  ;;  %v334_v47 = vrot.slane %v332_v39, 4  ;;  %v267_v63 = vld [vmem:[%s3505_s29 + $0x2c] sm:$0x1] }
  0x19   : > { %v296_v49 = vsel %vm3524_vm3, %v291_v40, %v295_v21  ;;  %v306_v50 = vsel %vm3524_vm3, %v301_v41, %v305_v42  ;;  %v337_v51 = vrot.slane %v335_v43, 5  ;;  %v341_v52 = vshll.u32 %v233_v38, 16  ;;  %3321 = vmatprep.subr.bf16.mxu1 %v3397_v33  ;;  %v236_v5 = vld [vmem:[%s3505_s29 + $0x30] sm:$0xf]  ;;  %v237_v18 = vld [vmem:[%s3505_s29 + $0x34] sm:$0xf] }
  0x1a   : > { %v2761_v54 = vcombine.low %v296_v49, %v306_v50  ;;  %v320_v55 = vsel %vm3524_vm3, %v315_v44, %v319_v26  ;;  %v325_v56 = vrot.slane %v324_v45, 4  ;;  %v345_v57 = vshrl.u32 %v233_v38, 16  ;;  %v269_v39 = vld [vmem:[%s3505_s29 + $0x44] sm:$0x1]  ;;  %v240_v44 = vld [vmem:[%s3505_s29 + $0x48] sm:$0xf] }
  0x1b   : > { %v343_v59 = vrot.slane %v341_v52, 5  ;;  %v2797_v60 = vcombine.low %v232_v28, %v233_v38  ;;  %v356_v61 = vshrl.u32 %v234_v48, 16  ;;  %v359_v62 = vshll.u32 %v234_v48, 16  ;;  %v238_v28 = vld [vmem:[%s3505_s29 + $0x3c] sm:$0xf] }
  0x1c   : > { %3215 = vmatprep.mubr.msk.bf16.mxu0 %vm731_vm2, %v2761_v54  ;;  %v330_v0 = vsel %vm3524_vm3, %v325_v56, %v329_v46  ;;  %v347_v1 = vrot.slane %v345_v57, 4  ;;  %v365_v2 = vshll.u32 %v235_v53, 16  ;;  %v369_v3 = vshrl.u32 %v235_v53, 16  ;;  %3322 = vmatpush3.bf16.msra.mxu1 %v3397_v33  ;;  %v268_v38 = vld [vmem:[%s3505_s29 + $0x38] sm:$0x1] }
  0x1d   : > { %v2762_v6 = vcombine.low %v320_v55, %v330_v0  ;;  %3255 = vmatprep.mubr.msk.bf16.mxu1 %vm731_vm2, %v2797_v60  ;;  %v358_v7 = vrot.slane %v356_v61, 4  ;;  %v361_v8 = vrot.slane %v359_v62, 5  ;;  %v2798_v9 = vcombine.low %v234_v48, %v235_v53  ;;  %v241_v60 = vld [vmem:[%s3505_s29 + $0x4c] sm:$0xf] }
  0x1e   : > { %v367_v11 = vrot.slane %v365_v2, 5  ;;  %v371_v12 = vrot.slane %v369_v3, 4  ;;  %v338_v13 = vor.u32 %v337_v51, %v334_v47  ;;  %v348_v14 = vor.u32 %v347_v1, %v343_v59 }
  0x1f   : > { %3216 = vmatmul.mubr.msk.bf16.vlgmr.msra.gmra.mxu0 %vm731_vm2, %v2762_v6  ;;  %3256 = vmatmul.mubr.msk.bf16.gmra.mxu1 %vm731_vm2, %v2798_v9  ;;  %v351_v15 = vshll.u32 %v266_v58, 16  ;;  %v362_v16 = vor.u32 %v361_v8, %v358_v7  ;;  %v375_v17 = vshll.u32 %v267_v63, 16  ;;  %v380_v19 = vshrl.u32 %v236_v5, 16  ;;  %v242_v7 = vld [vmem:[%s3505_s29 + $0x54] sm:$0xf] }
  0x20   : > { %3284 = vmatpush3.bf16.msra.mxu0 %v3500_v4  ;;  %v339_v20 = vrot.slane %v338_v13, 4  ;;  %v349_v21 = vrot.slane %v348_v14, 4  ;;  %v372_v22 = vor.u32 %v371_v12, %v367_v11  ;;  %v383_v23 = vshll.u32 %v236_v5, 16  ;;  %v239_v4 = vld [vmem:[%s3505_s29 + $0x40] sm:$0xf] }
  0x21   : > { %v353_v24 = vrot.slane %v351_v15, 5  ;;  %v363_v25 = vrot.slane %v362_v16, 4  ;;  %v377_v26 = vrot.slane %v375_v17, 5  ;;  %v382_v27 = vrot.slane %v380_v19, 4  ;;  %3285 = vmatprep.subr.bf16.mxu0 %v3396_v10  ;;  %v243_v12 = vld [vmem:[%s3505_s29 + $0x58] sm:$0xf] }
  0x22   : > { %v344_v29 = vsel %vm3524_vm3, %v339_v20, %v343_v59  ;;  %v373_v30 = vrot.slane %v372_v22, 4  ;;  %v385_v31 = vrot.slane %v383_v23, 5  ;;  %v389_v32 = vshll.u32 %v237_v18, 16  ;;  %v270_v17 = vld [vmem:[%s3505_s29 + $0x50] sm:$0x1] }
  0x23   : > { %v354_v33 = vsel %vm3524_vm3, %v349_v21, %v353_v24  ;;  %v368_v34 = vsel %vm3524_vm3, %v363_v25, %v367_v11  ;;  %v393_v36 = vshrl.u32 %v237_v18, 16  ;;  %v2799_v37 = vcombine.low %v236_v5, %v237_v18  ;;  %v271_v22 = vld [vmem:[%s3505_s29 + $0x5c] sm:$0x1] }
  0x24   : > { %v2763_v40 = vcombine.low %v344_v29, %v354_v33  ;;  %v378_v41 = vsel %vm3524_vm3, %v373_v30, %v377_v26  ;;  %v391_v42 = vrot.slane %v389_v32, 5  ;;  %v404_v43 = vshrl.u32 %v238_v28, 16  ;;  %3286 = vmatpush3.bf16.msra.mxu0 %v3396_v10 }
  0x25   : > { %v2764_v45 = vcombine.low %v368_v34, %v378_v41  ;;  %v395_v46 = vrot.slane %v393_v36, 4  ;;  %3259 = vmatprep.mubr.msk.bf16.mxu1 %vm731_vm2, %v2799_v37  ;;  %v407_v47 = vshll.u32 %v238_v28, 16  ;;  %v413_v48 = vshll.u32 %v239_v4, 16 }
  0x26   : > { %3219 = vmatprep.mubr.msk.bf16.mxu0 %vm731_vm2, %v2763_v40  ;;  %v406_v49 = vrot.slane %v404_v43, 4  ;;  %v417_v50 = vshrl.u32 %v239_v4, 16  ;;  %v2800_v51 = vcombine.low %v238_v28, %v239_v4  ;;  %v386_v52 = vor.u32 %v385_v31, %v382_v27  ;;  %v244_v27 = vld [vmem:[%s3505_s29 + $0x60] sm:$0xf] }
  0x27   : > { %3220 = vmatmul.mubr.msk.bf16.gmra.mxu0 %vm731_vm2, %v2764_v45  ;;  %v409_v53 = vrot.slane %v407_v47, 5  ;;  %v415_v54 = vrot.slane %v413_v48, 5  ;;  %v396_v55 = vor.u32 %v395_v46, %v391_v42  ;;  %v399_v56 = vshll.u32 %v268_v38, 16 }
  0x28   : > { %v419_v57 = vrot.slane %v417_v50, 4  ;;  %3260 = vmatmul.mubr.msk.bf16.gmra.mxu1 %vm731_vm2, %v2800_v51  ;;  %v387_v58 = vrot.slane %v386_v52, 4  ;;  %v423_v59 = vshll.u32 %v269_v39, 16  ;;  %v428_v61 = vshrl.u32 %v240_v44, 16  ;;  %v245_v39 = vld [vmem:[%s3505_s29 + $0x64] sm:$0xf] }
  0x29   : > { %v397_v62 = vrot.slane %v396_v55, 4  ;;  %v401_v63 = vrot.slane %v399_v56, 5  ;;  %v410_v0 = vor.u32 %v409_v53, %v406_v49  ;;  %v431_v1 = vshll.u32 %v240_v44, 16  ;;  %v246_v49 = vld [vmem:[%s3505_s29 + $0x6c] sm:$0xf] }
  0x2a   : > { %v392_v2 = vsel %vm3524_vm3, %v387_v58, %v391_v42  ;;  %v420_v3 = vor.u32 %v419_v57, %v415_v54  ;;  %v425_v5 = vrot.slane %v423_v59, 5  ;;  %v430_v6 = vrot.slane %v428_v61, 4 }
  0x2b   : > { %v402_v8 = vsel %vm3524_vm3, %v397_v62, %v401_v63  ;;  %v411_v9 = vrot.slane %v410_v0, 4  ;;  %v433_v10 = vrot.slane %v431_v1, 5  ;;  %v437_v11 = vshll.u32 %v241_v60, 16  ;;  %v272_v63 = vld [vmem:[%s3505_s29 + $0x68] sm:$0x1] }
  0x2c   : > { %v2765_v13 = vcombine.low %v392_v2, %v402_v8  ;;  %v421_v14 = vrot.slane %v420_v3, 4  ;;  %v441_v15 = vshrl.u32 %v241_v60, 16  ;;  %v2801_v16 = vcombine.low %v240_v44, %v241_v60  ;;  %v273_v0 = vld [vmem:[%s3505_s29 + $0x74] sm:$0x1] }
  0x2d   : > { %v416_v18 = vsel %vm3524_vm3, %v411_v9, %v415_v54  ;;  %v439_v19 = vrot.slane %v437_v11, 5  ;;  %v452_v20 = vshrl.u32 %v242_v7, 16  ;;  %v455_v21 = vshll.u32 %v242_v7, 16  ;;  %v247_v54 = vld [vmem:[%s3505_s29 + $0x70] sm:$0xf] }
  0x2e   : > { %3223 = vmatprep.mubr.msk.bf16.mxu0 %vm731_vm2, %v2765_v13  ;;  %v426_v23 = vsel %vm3524_vm3, %v421_v14, %v425_v5  ;;  %v443_v24 = vrot.slane %v441_v15, 4  ;;  %3263 = vmatprep.mubr.msk.bf16.mxu1 %vm731_vm2, %v2801_v16  ;;  %v461_v25 = vshll.u32 %v243_v12, 16  ;;  %v465_v26 = vshrl.u32 %v243_v12, 16  ;;  %v249_v11 = vld [vmem:[%s3505_s29 + $0x7c] sm:$0xf] }
  0x2f   : > { %v2766_v28 = vcombine.low %v416_v18, %v426_v23  ;;  %v454_v29 = vrot.slane %v452_v20, 4  ;;  %v457_v30 = vrot.slane %v455_v21, 5  ;;  %v2802_v31 = vcombine.low %v242_v7, %v243_v12 }
  0x30   : > { %v463_v32 = vrot.slane %v461_v25, 5  ;;  %v467_v4 = vrot.slane %v465_v26, 4  ;;  %v434_v33 = vor.u32 %v433_v10, %v430_v6  ;;  %v444_v34 = vor.u32 %v443_v24, %v439_v19  ;;  %v248_v6 = vld [vmem:[%s3505_s29 + $0x78] sm:$0xf] }
  0x31   : > { %3224 = vmatmul.mubr.msk.bf16.gmra.mxu0 %vm731_vm2, %v2766_v28  ;;  %3264 = vmatmul.mubr.msk.bf16.gmra.mxu1 %vm731_vm2, %v2802_v31  ;;  %v447_v36 = vshll.u32 %v270_v17, 16  ;;  %v458_v37 = vor.u32 %v457_v30, %v454_v29  ;;  %v471_v38 = vshll.u32 %v271_v22, 16  ;;  %v476_v40 = vshrl.u32 %v244_v27, 16  ;;  %v250_v28 = vld [vmem:[%s3505_s29 + $0x84] sm:$0xf] }
  0x32   : > { %v435_v41 = vrot.slane %v434_v33, 4  ;;  %v445_v42 = vrot.slane %v444_v34, 4  ;;  %v468_v43 = vor.u32 %v467_v4, %v463_v32  ;;  %v479_v44 = vshll.u32 %v244_v27, 16  ;;  %v251_v4 = vld [vmem:[%s3505_s29 + $0x88] sm:$0xf] }
  0x33   : > { %v449_v45 = vrot.slane %v447_v36, 5  ;;  %v459_v46 = vrot.slane %v458_v37, 4  ;;  %v473_v47 = vrot.slane %v471_v38, 5  ;;  %v478_v48 = vrot.slane %v476_v40, 4  ;;  %v274_v38 = vld [vmem:[%s3505_s29 + $0x80] sm:$0x1] }
  0x34   : > { %v440_v50 = vsel %vm3524_vm3, %v435_v41, %v439_v19  ;;  %v469_v51 = vrot.slane %v468_v43, 4  ;;  %v481_v52 = vrot.slane %v479_v44, 5  ;;  %v485_v53 = vshll.u32 %v245_v39, 16  ;;  %v275_v43 = vld [vmem:[%s3505_s29 + $0x8c] sm:$0x1] }
  0x35   : > { %v450_v55 = vsel %vm3524_vm3, %v445_v42, %v449_v45  ;;  %v464_v56 = vsel %vm3524_vm3, %v459_v46, %v463_v32  ;;  %v489_v57 = vshrl.u32 %v245_v39, 16  ;;  %v2803_v58 = vcombine.low %v244_v27, %v245_v39 }
  0x36   : > { %v2767_v59 = vcombine.low %v440_v50, %v450_v55  ;;  %v474_v60 = vsel %vm3524_vm3, %v469_v51, %v473_v47  ;;  %v487_v61 = vrot.slane %v485_v53, 5  ;;  %v500_v62 = vshrl.u32 %v246_v49, 16 }
  0x37   : > { %v2768_v1 = vcombine.low %v464_v56, %v474_v60  ;;  %v491_v2 = vrot.slane %v489_v57, 4  ;;  %3267 = vmatprep.mubr.msk.bf16.mxu1 %vm731_vm2, %v2803_v58  ;;  %v503_v3 = vshll.u32 %v246_v49, 16  ;;  %v509_v5 = vshll.u32 %v247_v54, 16  ;;  %v253_v60 = vld [vmem:[%s3505_s29 + $0x94] sm:$0xf] }
  0x38   : > { %3227 = vmatprep.mubr.msk.bf16.mxu0 %vm731_vm2, %v2767_v59  ;;  %v502_v7 = vrot.slane %v500_v62, 4  ;;  %v513_v8 = vshrl.u32 %v247_v54, 16  ;;  %v2804_v9 = vcombine.low %v246_v49, %v247_v54  ;;  %v482_v10 = vor.u32 %v481_v52, %v478_v48  ;;  %v252_v48 = vld [vmem:[%s3505_s29 + $0x90] sm:$0xf] }
  0x39   : > { %3228 = vmatmul.mubr.msk.bf16.gmra.mxu0 %vm731_vm2, %v2768_v1  ;;  %v505_v12 = vrot.slane %v503_v3, 5  ;;  %v511_v13 = vrot.slane %v509_v5, 5  ;;  %v492_v14 = vor.u32 %v491_v2, %v487_v61  ;;  %v495_v15 = vshll.u32 %v272_v63, 16  ;;  %v254_v2 = vld [vmem:[%s3505_s29 + $0x9c] sm:$0xf] }
  0x3a   : > { %v515_v16 = vrot.slane %v513_v8, 4  ;;  %3268 = vmatmul.mubr.msk.bf16.gmra.mxu1 %vm731_vm2, %v2804_v9  ;;  %v483_v17 = vrot.slane %v482_v10, 4  ;;  %v519_v18 = vshll.u32 %v273_v0, 16  ;;  %v524_v19 = vshrl.u32 %v248_v6, 16  ;;  %v255_v8 = vld [vmem:[%s3505_s29 + $0xa0] sm:$0xf] }
  0x3b   : > { %v493_v20 = vrot.slane %v492_v14, 4  ;;  %v497_v21 = vrot.slane %v495_v15, 5  ;;  %v506_v22 = vor.u32 %v505_v12, %v502_v7  ;;  %v527_v23 = vshll.u32 %v248_v6, 16 }
  0x3c   : > { %v488_v24 = vsel %vm3524_vm3, %v483_v17, %v487_v61  ;;  %v516_v25 = vor.u32 %v515_v16, %v511_v13  ;;  %v521_v26 = vrot.slane %v519_v18, 5  ;;  %v526_v27 = vrot.slane %v524_v19, 4  ;;  %v277_v18 = vld [vmem:[%s3505_s29 + $0xa4] sm:$0x1]  ;;  %v256_v19 = vld [vmem:[%s3505_s29 + $0xa8] sm:$0xf] }
  0x3d   : > { %v498_v29 = vsel %vm3524_vm3, %v493_v20, %v497_v21  ;;  %v507_v30 = vrot.slane %v506_v22, 4  ;;  %v529_v31 = vrot.slane %v527_v23, 5  ;;  %v533_v32 = vshll.u32 %v249_v11, 16 }
  0x3e   : > { %v2769_v33 = vcombine.low %v488_v24, %v498_v29  ;;  %v517_v34 = vrot.slane %v516_v25, 4  ;;  %v537_v36 = vshrl.u32 %v249_v11, 16  ;;  %v2805_v37 = vcombine.low %v248_v6, %v249_v11 }
  0x3f   : > { %v512_v39 = vsel %vm3524_vm3, %v507_v30, %v511_v13  ;;  %v535_v40 = vrot.slane %v533_v32, 5  ;;  %v548_v41 = vshrl.u32 %v250_v28, 16  ;;  %v551_v42 = vshll.u32 %v250_v28, 16  ;;  %v276_v13 = vld [vmem:[%s3505_s29 + $0x98] sm:$0x1] }
  0x40   : > { %3231 = vmatprep.mubr.msk.bf16.mxu0 %vm731_vm2, %v2769_v33  ;;  %v522_v44 = vsel %vm3524_vm3, %v517_v34, %v521_v26  ;;  %v539_v45 = vrot.slane %v537_v36, 4  ;;  %3271 = vmatprep.mubr.msk.bf16.mxu1 %vm731_vm2, %v2805_v37  ;;  %v557_v46 = vshll.u32 %v251_v4, 16  ;;  %v561_v47 = vshrl.u32 %v251_v4, 16 }
  0x41   : > { %v2770_v49 = vcombine.low %v512_v39, %v522_v44  ;;  %v550_v50 = vrot.slane %v548_v41, 4  ;;  %v553_v51 = vrot.slane %v551_v42, 5  ;;  %v2806_v52 = vcombine.low %v250_v28, %v251_v4  ;;  %v257_v39 = vld [vmem:[%s3505_s29 + $0xac] sm:$0xf] }
  0x42   : > { %v559_v53 = vrot.slane %v557_v46, 5  ;;  %v563_v54 = vrot.slane %v561_v47, 4  ;;  %v530_v55 = vor.u32 %v529_v31, %v526_v27  ;;  %v540_v56 = vor.u32 %v539_v45, %v535_v40 }
  0x43   : > { %3232 = vmatmul.mubr.msk.bf16.gmra.mxu0 %vm731_vm2, %v2770_v49  ;;  %3272 = vmatmul.mubr.msk.bf16.gmra.mxu1 %vm731_vm2, %v2806_v52  ;;  %v543_v57 = vshll.u32 %v274_v38, 16  ;;  %v554_v58 = vor.u32 %v553_v51, %v550_v50  ;;  %v567_v59 = vshll.u32 %v275_v43, 16  ;;  %v572_v61 = vshrl.u32 %v252_v48, 16  ;;  %v258_v49 = vld [vmem:[%s3505_s29 + $0xb4] sm:$0xf] }
  0x44   : > { %v531_v62 = vrot.slane %v530_v55, 4  ;;  %v541_v63 = vrot.slane %v540_v56, 4  ;;  %v564_v0 = vor.u32 %v563_v54, %v559_v53  ;;  %v575_v1 = vshll.u32 %v252_v48, 16  ;;  %v259_v50 = vld [vmem:[%s3505_s29 + $0xb8] sm:$0xf] }
  0x45   : > { %v545_v3 = vrot.slane %v543_v57, 5  ;;  %v555_v5 = vrot.slane %v554_v58, 4  ;;  %v569_v6 = vrot.slane %v567_v59, 5  ;;  %v574_v7 = vrot.slane %v572_v61, 4  ;;  %v278_v59 = vld [vmem:[%s3505_s29 + $0xb0] sm:$0x1] }
  0x46   : > { %v536_v9 = vsel %vm3524_vm3, %v531_v62, %v535_v40  ;;  %v565_v10 = vrot.slane %v564_v0, 4  ;;  %v577_v11 = vrot.slane %v575_v1, 5  ;;  %v581_v12 = vshll.u32 %v253_v60, 16 }
  0x47   : > { %v546_v14 = vsel %vm3524_vm3, %v541_v63, %v545_v3  ;;  %v560_v15 = vsel %vm3524_vm3, %v555_v5, %v559_v53  ;;  %v585_v16 = vshrl.u32 %v253_v60, 16  ;;  %v2807_v17 = vcombine.low %v252_v48, %v253_v60  ;;  %v279_v60 = vld [vmem:[%s3505_s29 + $0xbc] sm:$0x1] }
  0x48   : > { %v2771_v20 = vcombine.low %v536_v9, %v546_v14  ;;  %v570_v21 = vsel %vm3524_vm3, %v565_v10, %v569_v6  ;;  %v583_v22 = vrot.slane %v581_v12, 5  ;;  %v596_v23 = vshrl.u32 %v254_v2, 16  ;;  %v2895_v6 = vld [vmem:[%s3505_s29 + $0xc] sm:$0xf] }
  0x49   : > { %v2772_v24 = vcombine.low %v560_v15, %v570_v21  ;;  %v587_v25 = vrot.slane %v585_v16, 4  ;;  %3275 = vmatprep.mubr.msk.bf16.mxu1 %vm731_vm2, %v2807_v17  ;;  %v599_v26 = vshll.u32 %v254_v2, 16  ;;  %v605_v27 = vshll.u32 %v255_v8, 16  ;;  %v2896_v15 = vld [vmem:[%s3505_s29 + $0x10] sm:$0xf] }
  0x4a   : > { %3235 = vmatprep.mubr.msk.bf16.mxu0 %vm731_vm2, %v2771_v20  ;;  %v598_v28 = vrot.slane %v596_v23, 4  ;;  %v609_v29 = vshrl.u32 %v255_v8, 16  ;;  %v2808_v30 = vcombine.low %v254_v2, %v255_v8  ;;  %v578_v31 = vor.u32 %v577_v11, %v574_v7 }
  0x4b   : > { %3236 = vmatmul.mubr.msk.bf16.gmra.mxu0 %vm731_vm2, %v2772_v24  ;;  %v601_v32 = vrot.slane %v599_v26, 5  ;;  %v607_v4 = vrot.slane %v605_v27, 5  ;;  %v588_v33 = vor.u32 %v587_v25, %v583_v22  ;;  %v591_v34 = vshll.u32 %v276_v13, 16  ;;  %v2898_v25 = vld [vmem:[%s3505_s29 + $0x18] sm:$0xf] }
  0x4c   : > { %v611_v36 = vrot.slane %v609_v29, 4  ;;  %3276 = vmatmul.mubr.msk.bf16.gmra.mxu1 %vm731_vm2, %v2808_v30  ;;  %v579_v37 = vrot.slane %v578_v31, 4  ;;  %v615_v38 = vshll.u32 %v277_v18, 16  ;;  %v620_v40 = vshrl.u32 %v256_v19, 16 }
  0x4d   : > { %v589_v41 = vrot.slane %v588_v33, 4  ;;  %v593_v42 = vrot.slane %v591_v34, 5  ;;  %v602_v43 = vor.u32 %v601_v32, %v598_v28  ;;  %v623_v44 = vshll.u32 %v256_v19, 16 }
  0x4e   : > { %v584_v45 = vsel %vm3524_vm3, %v579_v37, %v583_v22  ;;  %v612_v46 = vor.u32 %v611_v36, %v607_v4  ;;  %v617_v47 = vrot.slane %v615_v38, 5  ;;  %v622_v48 = vrot.slane %v620_v40, 4  ;;  %v2899_v38 = vld [vmem:[%s3505_s29 + $0x1c] sm:$0xf] }
  0x4f   : > { %v594_v51 = vsel %vm3524_vm3, %v589_v41, %v593_v42  ;;  %v603_v52 = vrot.slane %v602_v43, 4  ;;  %v625_v53 = vrot.slane %v623_v44, 5  ;;  %v629_v54 = vshll.u32 %v257_v39, 16  ;;  %v2900_v43 = vld [vmem:[%s3505_s29 + $0x20] sm:$0x1]  ;;  %v3404_v44 = vld [vmem:[%s3505_s29 + $0xc] sm:$0xff]  }
  0x50   : > { %v2773_v55 = vcombine.low %v584_v45, %v594_v51  ;;  %v613_v56 = vrot.slane %v612_v46, 4  ;;  %v633_v57 = vshrl.u32 %v257_v39, 16  ;;  %v2809_v58 = vcombine.low %v256_v19, %v257_v39  ;;  %v2897_v19 = vld [vmem:[%s3505_s29 + $0x14] sm:$0x1]  ;;  %v2901_v45 = vld [vmem:[%s3505_s29 + $0x24] sm:$0xf] }
  0x51   : > { %v608_v61 = vsel %vm3524_vm3, %v603_v52, %v607_v4  ;;  %v631_v62 = vrot.slane %v629_v54, 5  ;;  %v644_v63 = vshrl.u32 %v258_v49, 16  ;;  %v647_v0 = vshll.u32 %v258_v49, 16 }
  0x52   : > { %3239 = vmatprep.mubr.msk.bf16.mxu0 %vm731_vm2, %v2773_v55  ;;  %v618_v1 = vsel %vm3524_vm3, %v613_v56, %v617_v47  ;;  %v635_v2 = vrot.slane %v633_v57, 4  ;;  %3279 = vmatprep.mubr.msk.bf16.mxu1 %vm731_vm2, %v2809_v58  ;;  %v653_v3 = vshll.u32 %v259_v50, 16  ;;  %v657_v5 = vshrl.u32 %v259_v50, 16  ;;  %v2903_v55 = vld [vmem:[%s3505_s29 + $0x2c] sm:$0x1] }
  0x53   : > { %v2774_v7 = vcombine.low %v608_v61, %v618_v1  ;;  %v646_v8 = vrot.slane %v644_v63, 4  ;;  %v649_v9 = vrot.slane %v647_v0, 5  ;;  %v2810_v10 = vcombine.low %v258_v49, %v259_v50  ;;  %v2902_v50 = vld [vmem:[%s3505_s29 + $0x28] sm:$0xf] }
  0x54   : > { %v655_v11 = vrot.slane %v653_v3, 5  ;;  %v659_v12 = vrot.slane %v657_v5, 4  ;;  %v626_v13 = vor.u32 %v625_v53, %v622_v48  ;;  %v636_v14 = vor.u32 %v635_v2, %v631_v62 }
  0x55   : > { %3240 = vmatmul.mubr.msk.bf16.gmra.mxu0 %vm731_vm2, %v2774_v7  ;;  %3280 = vmatmul.mubr.msk.bf16.gmra.mxu1 %vm731_vm2, %v2810_v10  ;;  %v639_v16 = vshll.u32 %v278_v59, 16  ;;  %v650_v17 = vor.u32 %v649_v9, %v646_v8  ;;  %v663_v18 = vshll.u32 %v279_v60, 16  ;;  %v1661_v20 = vshrl.u32 %v2895_v6, 16  ;;  %v2904_v60 = vld [vmem:[%s3505_s29 + $0x30] sm:$0xf] }
  0x56   : > { %v627_v21 = vrot.slane %v626_v13, 4  ;;  %v637_v22 = vrot.slane %v636_v14, 4  ;;  %v660_v23 = vor.u32 %v659_v12, %v655_v11  ;;  %v1664_v24 = vshll.u32 %v2895_v6, 16  ;;  %v2905_v14 = vld [vmem:[%s3505_s29 + $0x34] sm:$0xf] }
  0x57   : > { %v641_v26 = vrot.slane %v639_v16, 5  ;;  %v651_v27 = vrot.slane %v650_v17, 4  ;;  %v665_v28 = vrot.slane %v663_v18, 5  ;;  %v1663_v29 = vrot.slane %v1661_v20, 4  ;;  %v2906_v20 = vld [vmem:[%s3505_s29 + $0x38] sm:$0x1] }
  0x58   : > { %v632_v30 = vsel %vm3524_vm3, %v627_v21, %v631_v62  ;;  %v661_v31 = vrot.slane %v660_v23, 4  ;;  %v1666_v32 = vrot.slane %v1664_v24, 5  ;;  %v1670_v4 = vshll.u32 %v2896_v15, 16  ;;  %v3406_v21 = vld [vmem:[%s3505_s29 + $0x24] sm:$0xff]  }
  0x59   : > { %v642_v33 = vsel %vm3524_vm3, %v637_v22, %v641_v26  ;;  %v656_v34 = vsel %vm3524_vm3, %v651_v27, %v655_v11  ;;  %v1674_v36 = vshrl.u32 %v2896_v15, 16  ;;  %v1680_v37 = vshll.u32 %v2897_v19, 16  ;;  %v3405_v11 = vld [vmem:[%s3505_s29 + $0x18] sm:$0xff]  }
  0x5a   : > { %v2775_v39 = vcombine.low %v632_v30, %v642_v33  ;;  %v666_v40 = vsel %vm3524_vm3, %v661_v31, %v665_v28  ;;  %v1667_v41 = vor.u32 %v1666_v32, %v1663_v29  ;;  %v1672_v42 = vrot.slane %v1670_v4, 5  ;;  %v2907_v26 = vld [vmem:[%s3505_s29 + $0x3c] sm:$0xf]  ;;  %v2908_v31 = vld [vmem:[%s3505_s29 + $0x40] sm:$0xf] }
  0x5b   : > { %v2776_v46 = vcombine.low %v656_v34, %v666_v40  ;;  %v1676_v47 = vrot.slane %v1674_v36, 4  ;;  %v1682_v48 = vrot.slane %v1680_v37, 5  ;;  %v1685_v49 = vshrl.u32 %v2898_v25, 16  ;;  %v2909_v36 = vld [vmem:[%s3505_s29 + $0x44] sm:$0x1] }
  0x5c   : > { %3243 = vmatprep.mubr.msk.bf16.mxu0 %vm731_vm2, %v2775_v39  ;;  %v1668_v51 = vrot.slane %v1667_v41, 4  ;;  %v1688_v52 = vshll.u32 %v2898_v25, 16  ;;  %v1694_v53 = vshll.u32 %v2899_v38, 16  ;;  %v1698_v54 = vshrl.u32 %v2899_v38, 16  ;;  %v2910_v41 = vld [vmem:[%s3505_s29 + $0x48] sm:$0xf] }
  0x5d   : > { %3244 = vmatmul.mubr.msk.bf16.gmra.mxu0 %vm731_vm2, %v2776_v46  ;;  %v1677_v56 = vor.u32 %v1676_v47, %v1672_v42  ;;  %v1687_v57 = vrot.slane %v1685_v49, 4  ;;  %v1704_v58 = vshll.u32 %v2900_v43, 16  ;;  %v1709_v59 = vshrl.u32 %v2901_v45, 16 }
  0x5e   : > { %v1673_v61 = vsel %vm3524_vm3, %v1668_v51, %v1672_v42  ;;  %v1690_v62 = vrot.slane %v1688_v52, 5  ;;  %v1696_v63 = vrot.slane %v1694_v53, 5  ;;  %v1700_v0 = vrot.slane %v1698_v54, 4  ;;  %3287 = vmatprep.mubr.msk.bf16.mxu0 %vm731_vm2, %v3404_v44  ;;  %v3407_v52 = vld [vmem:[%s3505_s29 + $0x30] sm:$0xff]  }
  0x5f   : > { %v1678_v1 = vrot.slane %v1677_v56, 4  ;;  %v1706_v2 = vrot.slane %v1704_v58, 5  ;;  %v1711_v3 = vrot.slane %v1709_v59, 4  ;;  %v1712_v5 = vshll.u32 %v2901_v45, 16 }
  0x60   : > { %v1691_v6 = vor.u32 %v1690_v62, %v1687_v57  ;;  %v1701_v7 = vor.u32 %v1700_v0, %v1696_v63  ;;  %v1718_v8 = vshll.u32 %v2902_v50, 16  ;;  %v1722_v9 = vshrl.u32 %v2902_v50, 16  ;;  %v2912_v0 = vld [vmem:[%s3505_s29 + $0x50] sm:$0x1] }
  0x61   : > { %v1683_v10 = vsel %vm3524_vm3, %v1678_v1, %v1682_v48  ;;  %v1714_v12 = vrot.slane %v1712_v5, 5  ;;  %v1728_v13 = vshll.u32 %v2903_v55, 16  ;;  %v1733_v15 = vshrl.u32 %v2904_v60, 16  ;;  %v2911_v55 = vld [vmem:[%s3505_s29 + $0x4c] sm:$0xf] }
  0x62   : > { %v2943_v16 = vcombine.low %v1673_v61, %v1683_v10  ;;  %v1692_v17 = vrot.slane %v1691_v6, 4  ;;  %v1702_v18 = vrot.slane %v1701_v7, 4  ;;  %v1720_v19 = vrot.slane %v1718_v8, 5  ;;  %v2913_v7 = vld [vmem:[%s3505_s29 + $0x54] sm:$0xf] }
  0x63   : > { %v1715_v22 = vor.u32 %v1714_v12, %v1711_v3  ;;  %v1724_v23 = vrot.slane %v1722_v9, 4  ;;  %v1730_v24 = vrot.slane %v1728_v13, 5  ;;  %v1735_v25 = vrot.slane %v1733_v15, 4  ;;  %v2914_v12 = vld [vmem:[%s3505_s29 + $0x58] sm:$0xf] }
  0x64   : > { %3323 = vmatprep.mubr.msk.bf16.mxu1 %vm731_vm2, %v2943_v16  ;;  %v1697_v27 = vsel %vm3524_vm3, %v1692_v17, %v1696_v63  ;;  %v1707_v28 = vsel %vm3524_vm3, %v1702_v18, %v1706_v2  ;;  %v1736_v29 = vshll.u32 %v2904_v60, 16  ;;  %v1742_v30 = vshll.u32 %v2905_v14, 16  ;;  %v3408_v60 = vld [vmem:[%s3505_s29 + $0x3c] sm:$0xff]  }
  0x65   : > { %v2944_v32 = vcombine.low %v1697_v27, %v1707_v28  ;;  %3288 = vmatmul.mubr.msk.bf16.vlgmr.msra.gmra.mxu0 %vm731_vm2, %v3405_v11  ;;  %v1716_v4 = vrot.slane %v1715_v22, 4  ;;  %v1725_v33 = vor.u32 %v1724_v23, %v1720_v19  ;;  %v1746_v34 = vshrl.u32 %v2905_v14, 16  ;;  %v2915_v17 = vld [vmem:[%s3505_s29 + $0x5c] sm:$0x1]  ;;  %v2916_v18 = vld [vmem:[%s3505_s29 + $0x60] sm:$0xf] }
  0x66   : > { %v1738_v37 = vrot.slane %v1736_v29, 5  ;;  %v1744_v38 = vrot.slane %v1742_v30, 5  ;;  %v1752_v39 = vshll.u32 %v2906_v20, 16  ;;  %3291 = vmatprep.mubr.msk.bf16.mxu0 %vm731_vm2, %v3406_v21  ;;  %v1757_v40 = vshrl.u32 %v2907_v26, 16  ;;  %v3409_v29 = vld [vmem:[%s3505_s29 + $0x48] sm:$0xff]  }
  0x67   : > { %3324 = vmatmul.mubr.msk.bf16.vlgmr.msra.gmra.mxu1 %vm731_vm2, %v2944_v32  ;;  %v1721_v42 = vsel %vm3524_vm3, %v1716_v4, %v1720_v19  ;;  %v1726_v43 = vrot.slane %v1725_v33, 4  ;;  %v1748_v44 = vrot.slane %v1746_v34, 4  ;;  %v1760_v45 = vshll.u32 %v2907_v26, 16 }
  0x68   : > { %v1739_v46 = vor.u32 %v1738_v37, %v1735_v25  ;;  %v1754_v47 = vrot.slane %v1752_v39, 5  ;;  %v1759_v48 = vrot.slane %v1757_v40, 4  ;;  %v1766_v49 = vshll.u32 %v2908_v31, 16  ;;  %v3410_v37 = vld [vmem:[%s3505_s29 + $0x54] sm:$0xff]  }
  0x69   : > { %v1731_v50 = vsel %vm3524_vm3, %v1726_v43, %v1730_v24  ;;  %v1749_v51 = vor.u32 %v1748_v44, %v1744_v38  ;;  %v1762_v53 = vrot.slane %v1760_v45, 5  ;;  %v1770_v54 = vshrl.u32 %v2908_v31, 16  ;;  %v2918_v45 = vld [vmem:[%s3505_s29 + $0x68] sm:$0x1] }
  0x6a   : > { %v2945_v56 = vcombine.low %v1721_v42, %v1731_v50  ;;  %v1740_v57 = vrot.slane %v1739_v46, 4  ;;  %v1768_v58 = vrot.slane %v1766_v49, 5  ;;  %v1776_v59 = vshll.u32 %v2909_v36, 16  ;;  %v2917_v36 = vld [vmem:[%s3505_s29 + $0x64] sm:$0xf] }
  0x6b   : > { %v1750_v61 = vrot.slane %v1749_v51, 4  ;;  %v1763_v62 = vor.u32 %v1762_v53, %v1759_v48  ;;  %v1772_v63 = vrot.slane %v1770_v54, 4  ;;  %v1781_v1 = vshrl.u32 %v2910_v41, 16  ;;  %v2919_v51 = vld [vmem:[%s3505_s29 + $0x6c] sm:$0xf] }
  0x6c   : > { %3327 = vmatprep.mubr.msk.bf16.mxu1 %vm731_vm2, %v2945_v56  ;;  %v1745_v2 = vsel %vm3524_vm3, %v1740_v57, %v1744_v38  ;;  %v1778_v3 = vrot.slane %v1776_v59, 5  ;;  %v1784_v5 = vshll.u32 %v2910_v41, 16  ;;  %v1790_v6 = vshll.u32 %v2911_v55, 16  ;;  %v2920_v56 = vld [vmem:[%s3505_s29 + $0x70] sm:$0xf] }
  0x6d   : > { %v1755_v8 = vsel %vm3524_vm3, %v1750_v61, %v1754_v47  ;;  %3292 = vmatmul.mubr.msk.bf16.gmra.mxu0 %vm731_vm2, %v3407_v52  ;;  %v1764_v9 = vrot.slane %v1763_v62, 4  ;;  %v1773_v10 = vor.u32 %v1772_v63, %v1768_v58  ;;  %v1783_v11 = vrot.slane %v1781_v1, 4 }
  0x6e   : > { %v2946_v13 = vcombine.low %v1745_v2, %v1755_v8  ;;  %v1786_v14 = vrot.slane %v1784_v5, 5  ;;  %v1792_v15 = vrot.slane %v1790_v6, 5  ;;  %v1794_v16 = vshrl.u32 %v2911_v55, 16  ;;  %3295 = vmatprep.mubr.msk.bf16.mxu0 %vm731_vm2, %v3408_v60  ;;  %v3411_v5 = vld [vmem:[%s3505_s29 + $0x60] sm:$0xff]   ;;  %v2922_v8 = vld [vmem:[%s3505_s29 + $0x78] sm:$0xf] }
  0x6f   : > { %v1769_v19 = vsel %vm3524_vm3, %v1764_v9, %v1768_v58  ;;  %v1774_v20 = vrot.slane %v1773_v10, 4  ;;  %v1800_v21 = vshll.u32 %v2912_v0, 16  ;;  %v1805_v22 = vshrl.u32 %v2913_v7, 16  ;;  %v2921_v0 = vld [vmem:[%s3505_s29 + $0x74] sm:$0x1] }
  0x70   : > { %3328 = vmatmul.mubr.msk.bf16.gmra.mxu1 %vm731_vm2, %v2946_v13  ;;  %v1787_v23 = vor.u32 %v1786_v14, %v1783_v11  ;;  %v1796_v24 = vrot.slane %v1794_v16, 4  ;;  %v1808_v25 = vshll.u32 %v2913_v7, 16  ;;  %v1814_v26 = vshll.u32 %v2914_v12, 16  ;;  %v2923_v13 = vld [vmem:[%s3505_s29 + $0x7c] sm:$0xf]  ;;  %v3412_v14 = vld [vmem:[%s3505_s29 + $0x6c] sm:$0xff]  }
  0x71   : > { %v1779_v27 = vsel %vm3524_vm3, %v1774_v20, %v1778_v3  ;;  %v1802_v28 = vrot.slane %v1800_v21, 5  ;;  %v1807_v30 = vrot.slane %v1805_v22, 4  ;;  %v1818_v31 = vshrl.u32 %v2914_v12, 16  ;;  %v2924_v21 = vld [vmem:[%s3505_s29 + $0x80] sm:$0x1] }
  0x72   : > { %v2947_v32 = vcombine.low %v1769_v19, %v1779_v27  ;;  %v1788_v4 = vrot.slane %v1787_v23, 4  ;;  %v1797_v33 = vor.u32 %v1796_v24, %v1792_v15  ;;  %v1810_v34 = vrot.slane %v1808_v25, 5 }
  0x73   : > { %v1816_v38 = vrot.slane %v1814_v26, 5  ;;  %v1820_v39 = vrot.slane %v1818_v31, 4  ;;  %v1824_v40 = vshll.u32 %v2915_v17, 16  ;;  %v1829_v41 = vshrl.u32 %v2916_v18, 16 }
  0x74   : > { %3331 = vmatprep.mubr.msk.bf16.mxu1 %vm731_vm2, %v2947_v32  ;;  %v1793_v42 = vsel %vm3524_vm3, %v1788_v4, %v1792_v15  ;;  %v1798_v43 = vrot.slane %v1797_v33, 4  ;;  %v1811_v44 = vor.u32 %v1810_v34, %v1807_v30  ;;  %v1832_v46 = vshll.u32 %v2916_v18, 16  ;;  %v2926_v4 = vld [vmem:[%s3505_s29 + $0x88] sm:$0xf] }
  0x75   : > { %3296 = vmatmul.mubr.msk.bf16.gmra.mxu0 %vm731_vm2, %v3409_v29  ;;  %v1821_v47 = vor.u32 %v1820_v39, %v1816_v38  ;;  %v1826_v48 = vrot.slane %v1824_v40, 5  ;;  %v1831_v49 = vrot.slane %v1829_v41, 4  ;;  %v1838_v50 = vshll.u32 %v2917_v36, 16 }
  0x76   : > { %v1803_v52 = vsel %vm3524_vm3, %v1798_v43, %v1802_v28  ;;  %v1812_v53 = vrot.slane %v1811_v44, 4  ;;  %v1834_v54 = vrot.slane %v1832_v46, 5  ;;  %v1842_v55 = vshrl.u32 %v2917_v36, 16  ;;  %3299 = vmatprep.mubr.msk.bf16.mxu0 %vm731_vm2, %v3410_v37  ;;  %v2925_v28 = vld [vmem:[%s3505_s29 + $0x84] sm:$0xf]  ;;  %v3413_v44 = vld [vmem:[%s3505_s29 + $0x78] sm:$0xff]  }
  0x77   : > { %v2948_v57 = vcombine.low %v1793_v42, %v1803_v52  ;;  %v1822_v58 = vrot.slane %v1821_v47, 4  ;;  %v1840_v59 = vrot.slane %v1838_v50, 5  ;;  %v1848_v60 = vshll.u32 %v2918_v45, 16  ;;  %v2927_v45 = vld [vmem:[%s3505_s29 + $0x8c] sm:$0x1] }
  0x78   : > { %v1817_v61 = vsel %vm3524_vm3, %v1812_v53, %v1816_v38  ;;  %v1835_v62 = vor.u32 %v1834_v54, %v1831_v49  ;;  %v1844_v63 = vrot.slane %v1842_v55, 4  ;;  %v1853_v1 = vshrl.u32 %v2919_v51, 16  ;;  %v2928_v52 = vld [vmem:[%s3505_s29 + $0x90] sm:$0xf]  ;;  %v3414_v53 = vld [vmem:[%s3505_s29 + $0x84] sm:$0xff]  }
  0x79   : > { %3332 = vmatmul.mubr.msk.bf16.gmra.mxu1 %vm731_vm2, %v2948_v57  ;;  %v1827_v2 = vsel %vm3524_vm3, %v1822_v58, %v1826_v48  ;;  %v1850_v3 = vrot.slane %v1848_v60, 5  ;;  %v1856_v6 = vshll.u32 %v2919_v51, 16  ;;  %v1862_v7 = vshll.u32 %v2920_v56, 16  ;;  %v2929_v58 = vld [vmem:[%s3505_s29 + $0x94] sm:$0xf] }
  0x7a   : > { %v2949_v9 = vcombine.low %v1817_v61, %v1827_v2  ;;  %v1836_v10 = vrot.slane %v1835_v62, 4  ;;  %v1845_v11 = vor.u32 %v1844_v63, %v1840_v59  ;;  %v1855_v12 = vrot.slane %v1853_v1, 4  ;;  %v2930_v1 = vld [vmem:[%s3505_s29 + $0x98] sm:$0x1] }
  0x7b   : > { %v1858_v15 = vrot.slane %v1856_v6, 5  ;;  %v1864_v16 = vrot.slane %v1862_v7, 5  ;;  %v1866_v17 = vshrl.u32 %v2920_v56, 16  ;;  %v1872_v18 = vshll.u32 %v2921_v0, 16 }
  0x7c   : > { %3335 = vmatprep.mubr.msk.bf16.mxu1 %vm731_vm2, %v2949_v9  ;;  %v1841_v19 = vsel %vm3524_vm3, %v1836_v10, %v1840_v59  ;;  %v1846_v20 = vrot.slane %v1845_v11, 4  ;;  %v1877_v22 = vshrl.u32 %v2922_v8, 16  ;;  %v1880_v23 = vshll.u32 %v2922_v8, 16  ;;  %v2931_v9 = vld [vmem:[%s3505_s29 + $0x9c] sm:$0xf] }
  0x7d   : > { %3300 = vmatmul.mubr.msk.bf16.gmra.mxu0 %vm731_vm2, %v3411_v5  ;;  %v1859_v24 = vor.u32 %v1858_v15, %v1855_v12  ;;  %v1868_v25 = vrot.slane %v1866_v17, 4  ;;  %v1874_v26 = vrot.slane %v1872_v18, 5  ;;  %v1886_v27 = vshll.u32 %v2923_v13, 16 }
  0x7e   : > { %v1851_v29 = vsel %vm3524_vm3, %v1846_v20, %v1850_v3  ;;  %v1879_v30 = vrot.slane %v1877_v22, 4  ;;  %v1882_v31 = vrot.slane %v1880_v23, 5  ;;  %v1890_v32 = vshrl.u32 %v2923_v13, 16  ;;  %3303 = vmatprep.mubr.msk.bf16.mxu0 %vm731_vm2, %v3412_v14  ;;  %v2932_v14 = vld [vmem:[%s3505_s29 + $0xa0] sm:$0xf] }
  0x7f   : > { %v2950_v33 = vcombine.low %v1841_v19, %v1851_v29  ;;  %v1860_v34 = vrot.slane %v1859_v24, 4  ;;  %v1869_v36 = vor.u32 %v1868_v25, %v1864_v16  ;;  %v1888_v37 = vrot.slane %v1886_v27, 5  ;;  %v3416_v24 = vld [vmem:[%s3505_s29 + $0x9c] sm:$0xff]  }
  0x80   : > { %v1883_v38 = vor.u32 %v1882_v31, %v1879_v30  ;;  %v1892_v39 = vrot.slane %v1890_v32, 4  ;;  %v1896_v40 = vshll.u32 %v2924_v21, 16  ;;  %v1901_v41 = vshrl.u32 %v2925_v28, 16  ;;  %v3415_v21 = vld [vmem:[%s3505_s29 + $0x90] sm:$0xff]   ;;  %v2934_v30 = vld [vmem:[%s3505_s29 + $0xa8] sm:$0xf] }
  0x81   : > { %3336 = vmatmul.mubr.msk.bf16.gmra.mxu1 %vm731_vm2, %v2950_v33  ;;  %v1865_v42 = vsel %vm3524_vm3, %v1860_v34, %v1864_v16  ;;  %v1870_v43 = vrot.slane %v1869_v36, 4  ;;  %v1904_v46 = vshll.u32 %v2925_v28, 16  ;;  %v1910_v47 = vshll.u32 %v2926_v4, 16  ;;  %v2933_v28 = vld [vmem:[%s3505_s29 + $0xa4] sm:$0x1] }
  0x82   : > { %v1884_v48 = vrot.slane %v1883_v38, 4  ;;  %v1893_v49 = vor.u32 %v1892_v39, %v1888_v37  ;;  %v1898_v50 = vrot.slane %v1896_v40, 5  ;;  %v1903_v51 = vrot.slane %v1901_v41, 4  ;;  %v2935_v34 = vld [vmem:[%s3505_s29 + $0xac] sm:$0xf] }
  0x83   : > { %v1875_v54 = vsel %vm3524_vm3, %v1870_v43, %v1874_v26  ;;  %v1906_v55 = vrot.slane %v1904_v46, 5  ;;  %v1912_v56 = vrot.slane %v1910_v47, 5  ;;  %v1914_v57 = vshrl.u32 %v2926_v4, 16  ;;  %v2936_v46 = vld [vmem:[%s3505_s29 + $0xb0] sm:$0x1] }
  0x84   : > { %v2951_v59 = vcombine.low %v1865_v42, %v1875_v54  ;;  %v1889_v60 = vsel %vm3524_vm3, %v1884_v48, %v1888_v37  ;;  %v1894_v61 = vrot.slane %v1893_v49, 4  ;;  %v1920_v62 = vshll.u32 %v2927_v45, 16  ;;  %v2937_v49 = vld [vmem:[%s3505_s29 + $0xb4] sm:$0xf]  ;;  %v2938_v54 = vld [vmem:[%s3505_s29 + $0xb8] sm:$0xf] }
  0x85   : > { %3304 = vmatmul.mubr.msk.bf16.gmra.mxu0 %vm731_vm2, %v3413_v44  ;;  %v1907_v63 = vor.u32 %v1906_v55, %v1903_v51  ;;  %v1916_v0 = vrot.slane %v1914_v57, 4  ;;  %v1925_v2 = vshrl.u32 %v2928_v52, 16  ;;  %v1928_v3 = vshll.u32 %v2928_v52, 16 }
  0x86   : > { %3339 = vmatprep.mubr.msk.bf16.mxu1 %vm731_vm2, %v2951_v59  ;;  %v1899_v5 = vsel %vm3524_vm3, %v1894_v61, %v1898_v50  ;;  %v1922_v6 = vrot.slane %v1920_v62, 5  ;;  %v1934_v7 = vshll.u32 %v2929_v58, 16  ;;  %v1938_v8 = vshrl.u32 %v2929_v58, 16  ;;  %3307 = vmatprep.mubr.msk.bf16.mxu0 %vm731_vm2, %v3414_v53  ;;  %v3417_v62 = vld [vmem:[%s3505_s29 + $0xa8] sm:$0xff]  }
  0x87   : > { %v2952_v10 = vcombine.low %v1889_v60, %v1899_v5  ;;  %v1908_v11 = vrot.slane %v1907_v63, 4  ;;  %v1917_v12 = vor.u32 %v1916_v0, %v1912_v56  ;;  %v1927_v13 = vrot.slane %v1925_v2, 4  ;;  %v2939_v63 = vld [vmem:[%s3505_s29 + $0xbc] sm:$0x1] }
  0x88   : > { %v1930_v15 = vrot.slane %v1928_v3, 5  ;;  %v1936_v16 = vrot.slane %v1934_v7, 5  ;;  %v1940_v17 = vrot.slane %v1938_v8, 4  ;;  %v1944_v18 = vshll.u32 %v2930_v1, 16  ;;  %v3418_v7 = vld [vmem:[%s3505_s29 + $0xb4] sm:$0xff]  }
  0x89   : > { %3340 = vmatmul.mubr.msk.bf16.gmra.mxu1 %vm731_vm2, %v2952_v10  ;;  %v1913_v19 = vsel %vm3524_vm3, %v1908_v11, %v1912_v56  ;;  %v1918_v20 = vrot.slane %v1917_v12, 4  ;;  %v1949_v22 = vshrl.u32 %v2931_v9, 16  ;;  %v1952_v23 = vshll.u32 %v2931_v9, 16 }
  0x8a   : > { %v1931_v25 = vor.u32 %v1930_v15, %v1927_v13  ;;  %v1941_v26 = vor.u32 %v1940_v17, %v1936_v16  ;;  %v1946_v27 = vrot.slane %v1944_v18, 5  ;;  %v1958_v29 = vshll.u32 %v2932_v14, 16 }
  0x8b   : > { %v1923_v31 = vsel %vm3524_vm3, %v1918_v20, %v1922_v6  ;;  %v1951_v32 = vrot.slane %v1949_v22, 4  ;;  %v1954_v4 = vrot.slane %v1952_v23, 5  ;;  %v1962_v33 = vshrl.u32 %v2932_v14, 16  ;;  %v2940_v6 = vld [vmem:[%s3505_s29 + $0xc0] sm:$0xf] }
  0x8c   : > { %v2953_v36 = vcombine.low %v1913_v19, %v1923_v31  ;;  %v1932_v37 = vrot.slane %v1931_v25, 4  ;;  %v1942_v38 = vrot.slane %v1941_v26, 4  ;;  %v1960_v39 = vrot.slane %v1958_v29, 5 }
  0x8d   : > { %3308 = vmatmul.mubr.msk.bf16.gmra.mxu0 %vm731_vm2, %v3415_v21  ;;  %v1955_v40 = vor.u32 %v1954_v4, %v1951_v32  ;;  %v1964_v41 = vrot.slane %v1962_v33, 4  ;;  %v1968_v42 = vshll.u32 %v2933_v28, 16  ;;  %v1973_v43 = vshrl.u32 %v2934_v30, 16 }
  0x8e   : > { %3343 = vmatprep.mubr.msk.bf16.mxu1 %vm731_vm2, %v2953_v36  ;;  %v1937_v44 = vsel %vm3524_vm3, %v1932_v37, %v1936_v16  ;;  %v1947_v45 = vsel %vm3524_vm3, %v1942_v38, %v1946_v27  ;;  %v1976_v47 = vshll.u32 %v2934_v30, 16  ;;  %v1982_v48 = vshll.u32 %v2935_v34, 16  ;;  %3311 = vmatprep.mubr.msk.bf16.mxu0 %vm731_vm2, %v3416_v24  ;;  %v2941_v16 = vld [vmem:[%s3505_s29 + $0xc4] sm:$0xf]  ;;  %v2942_v24 = vld [vmem:[%s3505_s29 + $0xc8] sm:$0x1] }
  0x8f   : > { %v2954_v50 = vcombine.low %v1937_v44, %v1947_v45  ;;  %v1956_v51 = vrot.slane %v1955_v40, 4  ;;  %v1965_v52 = vor.u32 %v1964_v41, %v1960_v39  ;;  %v1970_v53 = vrot.slane %v1968_v42, 5  ;;  %v3419_v38 = vld [vmem:[%s3505_s29 + $0xc0] sm:$0xff]  }
  0x90   : > { %v1975_v55 = vrot.slane %v1973_v43, 4  ;;  %v1978_v56 = vrot.slane %v1976_v47, 5  ;;  %v1984_v57 = vrot.slane %v1982_v48, 5  ;;  %v1986_v58 = vshrl.u32 %v2935_v34, 16 }
  0x91   : > { %3344 = vmatmul.mubr.msk.bf16.gmra.mxu1 %vm731_vm2, %v2954_v50  ;;  %v1961_v59 = vsel %vm3524_vm3, %v1956_v51, %v1960_v39  ;;  %v1966_v60 = vrot.slane %v1965_v52, 4  ;;  %v1992_v61 = vshll.u32 %v2936_v46, 16  ;;  %v1997_v0 = vshrl.u32 %v2937_v49, 16 }
  0x92   : > { %v1979_v1 = vor.u32 %v1978_v56, %v1975_v55  ;;  %v1988_v2 = vrot.slane %v1986_v58, 4  ;;  %v2000_v3 = vshll.u32 %v2937_v49, 16  ;;  %v2006_v5 = vshll.u32 %v2938_v54, 16 }
  0x93   : > { %v1971_v8 = vsel %vm3524_vm3, %v1966_v60, %v1970_v53  ;;  %v1994_v9 = vrot.slane %v1992_v61, 5  ;;  %v1999_v10 = vrot.slane %v1997_v0, 4  ;;  %v2010_v11 = vshrl.u32 %v2938_v54, 16 }
  0x94   : > { %v2955_v12 = vcombine.low %v1961_v59, %v1971_v8  ;;  %v1980_v13 = vrot.slane %v1979_v1, 4  ;;  %v1989_v14 = vor.u32 %v1988_v2, %v1984_v57  ;;  %v2002_v15 = vrot.slane %v2000_v3, 5 }
  0x95   : > { %3312 = vmatmul.mubr.msk.bf16.gmra.mxu0 %vm731_vm2, %v3417_v62  ;;  %v2008_v17 = vrot.slane %v2006_v5, 5  ;;  %v2012_v18 = vrot.slane %v2010_v11, 4  ;;  %v2016_v19 = vshll.u32 %v2939_v63, 16  ;;  %v2021_v20 = vshrl.u32 %v2940_v6, 16 }
  0x96   : > { %3347 = vmatprep.mubr.msk.bf16.mxu1 %vm731_vm2, %v2955_v12  ;;  %v1985_v21 = vsel %vm3524_vm3, %v1980_v13, %v1984_v57  ;;  %v1990_v22 = vrot.slane %v1989_v14, 4  ;;  %v2003_v23 = vor.u32 %v2002_v15, %v1999_v10  ;;  %v2024_v25 = vshll.u32 %v2940_v6, 16  ;;  %3315 = vmatprep.mubr.msk.bf16.mxu0 %vm731_vm2, %v3418_v7 }
  0x97   : > { %v2013_v26 = vor.u32 %v2012_v18, %v2008_v17  ;;  %v2018_v27 = vrot.slane %v2016_v19, 5  ;;  %v2023_v28 = vrot.slane %v2021_v20, 4  ;;  %v2030_v29 = vshll.u32 %v2941_v16, 16 }
  0x98   : > { %v1995_v30 = vsel %vm3524_vm3, %v1990_v22, %v1994_v9  ;;  %v2004_v31 = vrot.slane %v2003_v23, 4  ;;  %v2026_v32 = vrot.slane %v2024_v25, 5  ;;  %v2034_v4 = vshrl.u32 %v2941_v16, 16 }
  0x99   : > { %v2956_v33 = vcombine.low %v1985_v21, %v1995_v30  ;;  %v2014_v34 = vrot.slane %v2013_v26, 4  ;;  %v2032_v36 = vrot.slane %v2030_v29, 5  ;;  %v2040_v37 = vshll.u32 %v2942_v24, 16 }
  0x9a   : > { %v2009_v39 = vsel %vm3524_vm3, %v2004_v31, %v2008_v17  ;;  %v2027_v40 = vor.u32 %v2026_v32, %v2023_v28  ;;  %v2036_v41 = vrot.slane %v2034_v4, 4 }
  0x9b   : > { %3348 = vmatmul.mubr.msk.bf16.gmra.mxu1 %vm731_vm2, %v2956_v33  ;;  %v2019_v42 = vsel %vm3524_vm3, %v2014_v34, %v2018_v27  ;;  %v2042_v46 = vrot.slane %v2040_v37, 5 }
  0x9c   : > { %v2957_v43 = vcombine.low %v2009_v39, %v2019_v42  ;;  %v2028_v44 = vrot.slane %v2027_v40, 4  ;;  %v2037_v45 = vor.u32 %v2036_v41, %v2032_v36 }
  0x9d   : > { %3316 = vmatmul.mubr.msk.bf16.gmra.mxu0 %vm731_vm2, %v3419_v38 }
  0x9e   : > { %3351 = vmatprep.mubr.msk.bf16.mxu1 %vm731_vm2, %v2957_v43  ;;  %v2033_v47 = vsel %vm3524_vm3, %v2028_v44, %v2032_v36  ;;  %v2038_v48 = vrot.slane %v2037_v45, 4 }
  0xa0   : > { %v2043_v49 = vsel %vm3524_vm3, %v2038_v48, %v2042_v46 }
  0xa1   : > { %v2958_v50 = vcombine.low %v2033_v47, %v2043_v49 }
  0xa3   : > { %3352 = vmatmul.mubr.msk.bf16.gmra.mxu1 %vm731_vm2, %v2958_v50 }
  0xd7   : > { %v3253_v51 = vpop.f32.mrf.mxu1 }
  0xd9   : > { %v1115_v52 = vpop.f32.mrf.mxu1 }
  0xdb   : > { %v3828_v53 = vpop.f32.mrf.mxu1 }
  0xdd   : > { %v3830_v54 = vpop.f32.mrf.mxu1 }
  0xdf   : > { %v3217_v55 = vpop.f32.mrf.mxu0  ;;  %v3257_v56 = vpop.f32.mrf.mxu1 }
  0xe0   : > { %v3832_v57 = vadd.f32 %v3253_v51, %v3217_v55 }
  0xe1   : > { %v814_v58 = vpop.f32.mrf.mxu0  ;;  %v1131_v59 = vpop.f32.mrf.mxu1 }
  0xe2   : > { %v3834_v60 = vadd.f32 %v1115_v52, %v814_v58 }
  0xe3   : > { %v3836_v61 = vpop.f32.mrf.mxu0  ;;  %v3838_v35 = vpop.f32.mrf.mxu1 }
  0xe5   : > { %v3840_v62 = vpop.f32.mrf.mxu0  ;;  %v3842_v63 = vpop.f32.mrf.mxu1 }
  0xe7   : > { %v3221_v0 = vpop.f32.mrf.mxu0 }
  0xe8   : > { %v3844_v1 = vadd.f32 %v3257_v56, %v3221_v0  ;;  %v3261_v2 = vpop.f32.mrf.mxu1 }
  0xe9   : > { %v830_v3 = vpop.f32.mrf.mxu0 }
  0xea   : > { %v3846_v5 = vadd.f32 %v1131_v59, %v830_v3  ;;  %v1147_v6 = vpop.f32.mrf.mxu1 }
  0xeb   : > { %v3848_v7 = vpop.f32.mrf.mxu0 }
  0xec   : > { %v3850_v8 = vpop.f32.mrf.mxu1 }
  0xed   : > { %v3852_v9 = vpop.f32.mrf.mxu0 }
  0xee   : > { %v3854_v10 = vpop.f32.mrf.mxu1 }
  0xf1   : > { %v3225_v11 = vpop.f32.mrf.mxu0  ;;  %v3265_v12 = vpop.f32.mrf.mxu1 }
  0xf2   : > { %v3856_v13 = vadd.f32 %v3261_v2, %v3225_v11 }
  0xf3   : > { %v846_v14 = vpop.f32.mrf.mxu0  ;;  %v1163_v15 = vpop.f32.mrf.mxu1 }
  0xf4   : > { %v3858_v16 = vadd.f32 %v1147_v6, %v846_v14 }
  0xf5   : > { %v3860_v17 = vpop.f32.mrf.mxu0  ;;  %v3862_v18 = vpop.f32.mrf.mxu1 }
  0xf7   : > { %v3864_v19 = vpop.f32.mrf.mxu0  ;;  %v3866_v20 = vpop.f32.mrf.mxu1 }
  0xf9   : > { %v3229_v21 = vpop.f32.mrf.mxu0 }
  0xfa   : > { %v3868_v22 = vadd.f32 %v3265_v12, %v3229_v21  ;;  %v3269_v23 = vpop.f32.mrf.mxu1 }
  0xfb   : > { %v862_v24 = vpop.f32.mrf.mxu0 }
  0xfc   : > { %v3870_v25 = vadd.f32 %v1163_v15, %v862_v24  ;;  %v1179_v26 = vpop.f32.mrf.mxu1 }
  0xfd   : > { %v3872_v27 = vpop.f32.mrf.mxu0 }
  0xfe   : > { %v3874_v28 = vpop.f32.mrf.mxu1 }
  0xff   : > { %v3876_v29 = vpop.f32.mrf.mxu0 }
 0x100   : > { %v3878_v30 = vpop.f32.mrf.mxu1 }
 0x103   : > { %v3233_v31 = vpop.f32.mrf.mxu0  ;;  %v3273_v32 = vpop.f32.mrf.mxu1 }
 0x104   : > { %v3880_v4 = vadd.f32 %v3269_v23, %v3233_v31 }
 0x105   : > { %v878_v33 = vpop.f32.mrf.mxu0  ;;  %v1195_v34 = vpop.f32.mrf.mxu1 }
 0x106   : > { %v3882_v36 = vadd.f32 %v1179_v26, %v878_v33 }
 0x107   : > { %v3884_v37 = vpop.f32.mrf.mxu0  ;;  %v3886_v38 = vpop.f32.mrf.mxu1 }
 0x109   : > { %v3888_v39 = vpop.f32.mrf.mxu0  ;;  %v3890_v40 = vpop.f32.mrf.mxu1 }
 0x10b   : > { %v3237_v41 = vpop.f32.mrf.mxu0 }
 0x10c   : > { %v3892_v42 = vadd.f32 %v3273_v32, %v3237_v41  ;;  %v3277_v43 = vpop.f32.mrf.mxu1 }
 0x10d   : > { %v894_v44 = vpop.f32.mrf.mxu0 }
 0x10e   : > { %v3894_v45 = vadd.f32 %v1195_v34, %v894_v44  ;;  %v1211_v46 = vpop.f32.mrf.mxu1 }
 0x10f   : > { %v3896_v47 = vpop.f32.mrf.mxu0 }
 0x110   : > { %v3278_v48 = vpop.f32.mrf.mxu1 }
 0x111   : > { %v3898_v49 = vpop.f32.mrf.mxu0 }
 0x112   : > { %v1214_v50 = vpop.f32.mrf.mxu1 }
 0x115   : > { %v3241_v51 = vpop.f32.mrf.mxu0  ;;  %v3281_v56 = vpop.f32.mrf.mxu1 }
 0x116   : > { %v3900_v52 = vadd.f32 %v3277_v43, %v3241_v51  ;;  %v1127_v43 = vadd.f32 %v3828_v53, %v3836_v61  ;;  %v1119_v51 = vadd.f32 %v3830_v54, %v3840_v62  ;;  %v1143_v54 = vadd.f32 %v3838_v35, %v3848_v7 }
 0x117   : > { %v910_v55 = vpop.f32.mrf.mxu0  ;;  %v1227_v3 = vpop.f32.mrf.mxu1 }
 0x118   : > { %v3902_v58 = vadd.f32 %v1211_v46, %v910_v55 }
 0x119   : > { %v3242_v59 = vpop.f32.mrf.mxu0  ;;  %v3282_v14 = vpop.f32.mrf.mxu1 }
 0x11a   : > { %v3904_v0 = vadd.f32 %v3278_v48, %v3242_v59 }
 0x11b   : > { %v913_v2 = vpop.f32.mrf.mxu0  ;;  %v1230_v26 = vpop.f32.mrf.mxu1 }
 0x11c   : > { %v3906_v6 = vadd.f32 %v1214_v50, %v913_v2 }
 0x11d   : > { %v3245_v11 = vpop.f32.mrf.mxu0 }
 0x11e   : > { %v3908_v12 = vadd.f32 %v3281_v56, %v3245_v11 }
 0x11f   : > { %v926_v15 = vpop.f32.mrf.mxu0 }
 0x120   : > { %v3910_v21 = vadd.f32 %v1227_v3, %v926_v15 }
 0x121   : > { %v3246_v23 = vpop.f32.mrf.mxu0 }
 0x122   : > { %v3912_v24 = vadd.f32 %v3282_v14, %v3246_v23 }
 0x123   : > { %v929_v31 = vpop.f32.mrf.mxu0 }
 0x124   : > { %v3914_v32 = vadd.f32 %v1230_v26, %v929_v31 }
 0x125   : > { %v3289_v33 = vpop.f32.mrf.mxu0 }
 0x126   : > { %v1582_v44 = vadd.f32 %v3289_v33, %v3832_v57 }
 0x127   : > { %v3325_v34 = vpop.f32.mrf.mxu1  ;;  %v1453_v41 = vpop.f32.mrf.mxu0 }
 0x128   : > { %v1580_v46 = vadd.f32 %v1453_v41, %v3834_v60  ;;  %v2319_v3 = vadd.f32 %v3325_v34, %v1582_v44  ;;  %v1135_v41 = vadd.f32 %v3842_v63, %v3852_v9 }
 0x129   : > { %v2190_v48 = vpop.f32.mrf.mxu1  ;;  %v3290_v50 = vpop.f32.mrf.mxu0 }
 0x12a   : > { %v1583_v55 = vadd.f32 %v3290_v50, %v1127_v43  ;;  %v2317_v59 = vadd.f32 %v2190_v48, %v1580_v46  ;;  %v2549_v46 = vmul.f32 %v2319_v3, %v2319_v3 }
 0x12b   : > { %v3326_v56 = vpop.f32.mrf.mxu1  ;;  %v1456_v2 = vpop.f32.mrf.mxu0 }
 0x12c   : > { %v2320_v11 = vadd.f32 %v3326_v56, %v1583_v55  ;;  %v1581_v14 = vadd.f32 %v1456_v2, %v1119_v51  ;;  %v2547_v61 = vmul.f32 %v2317_v59, %v2317_v59 }
 0x12d   : > { %v2193_v15 = vpop.f32.mrf.mxu1  ;;  %v3293_v53 = vpop.f32.mrf.mxu0 }
 0x12e   : > { %v3052_v57 = vpack.c.bf16 %v2320_v11, %v2319_v3  ;;  %v2318_v60 = vadd.f32 %v2193_v15, %v1581_v14  ;;  %v1586_v43 = vadd.f32 %v3293_v53, %v3844_v1  ;;  %v2550_v56 = vmul.f32 %v2320_v11, %v2320_v11 }
 0x12f   : > { %v1469_v62 = vpop.f32.mrf.mxu0 }
 0x130   : > { %3124 = vst [vmem:[%s3926_s16 + $0x8] sm:$0xff] %v3052_v57   ;;  %v3329_v23 = vpop.f32.mrf.mxu1  ;;  %v3047_v26 = vpack.c.bf16 %v2318_v60, %v2317_v59  ;;  %v2509_v31 = vadd.f32 %v2318_v60, %v2317_v59  ;;  %v2548_v33 = vmul.f32 %v2318_v60, %v2318_v60  ;;  %v1584_v34 = vadd.f32 %v1469_v62, %v3846_v5 }
 0x131   : > { %v3294_v44 = vpop.f32.mrf.mxu0  ;;  %v2323_v15 = vadd.f32 %v3329_v23, %v1586_v43  ;;  %v1151_v43 = vadd.f32 %v3854_v10, %v3864_v19 }
 0x132   : > { %3048 = vst [vmem:[%s3926_s16] sm:$0xff] %v3047_v26   ;;  %v2510_v48 = vadd.f32 %v2509_v31, %v2319_v3  ;;  %v2579_v50 = vadd.f32 %v2548_v33, %v2547_v61  ;;  %v2206_v35 = vpop.f32.mrf.mxu1  ;;  %v1587_v7 = vadd.f32 %v3294_v44, %v1143_v54  ;;  %v1159_v54 = vadd.f32 %v3850_v8, %v3860_v17 }
 0x133   : > { %v2321_v51 = vadd.f32 %v2206_v35, %v1584_v34  ;;  %v1472_v55 = vpop.f32.mrf.mxu0 }
 0x134   : > { %v2580_v2 = vadd.f32 %v2579_v50, %v2549_v46  ;;  %v3330_v59 = vpop.f32.mrf.mxu1  ;;  %v2511_v14 = vadd.f32 %v2510_v48, %v2320_v11  ;;  %v1585_v5 = vadd.f32 %v1472_v55, %v1135_v41  ;;  %v2553_v48 = vmul.f32 %v2323_v15, %v2323_v15 }
 0x135   : > { %v2324_v57 = vadd.f32 %v3330_v59, %v1587_v7  ;;  %v3297_v63 = vpop.f32.mrf.mxu0  ;;  %v2551_v1 = vmul.f32 %v2321_v51, %v2321_v51 }
 0x136   : > { %v2512_v9 = vadd.f32 %v2511_v14, %v2321_v51  ;;  %v2581_v53 = vadd.f32 %v2580_v2, %v2550_v56  ;;  %v2209_v60 = vpop.f32.mrf.mxu1  ;;  %v1590_v44 = vadd.f32 %v3297_v63, %v3856_v13 }
 0x137   : > { %v3062_v62 = vpack.c.bf16 %v2324_v57, %v2323_v15  ;;  %v2322_v3 = vadd.f32 %v2209_v60, %v1585_v5  ;;  %v1485_v61 = vpop.f32.mrf.mxu0  ;;  %v2554_v55 = vmul.f32 %v2324_v57, %v2324_v57  ;;  %v1175_v60 = vadd.f32 %v3862_v18, %v3872_v27 }
 0x138   : > { %v2582_v26 = vadd.f32 %v2581_v53, %v2551_v1  ;;  %v1588_v31 = vadd.f32 %v1485_v61, %v3858_v16 }
 0x139   : > { %3126 = vst [vmem:[%s3926_s16 + $0x18] sm:$0xff] %v3062_v62   ;;  %v3333_v11 = vpop.f32.mrf.mxu1  ;;  %v3057_v33 = vpack.c.bf16 %v2322_v3, %v2321_v51  ;;  %v2513_v23 = vadd.f32 %v2512_v9, %v2322_v3  ;;  %v2552_v34 = vmul.f32 %v2322_v3, %v2322_v3  ;;  %v3298_v41 = vpop.f32.mrf.mxu0 }
 0x13a   : > { %v1591_v46 = vadd.f32 %v3298_v41, %v1159_v54  ;;  %v2327_v14 = vadd.f32 %v3333_v11, %v1590_v44  ;;  %v1167_v11 = vadd.f32 %v3866_v20, %v3876_v29  ;;  %v1191_v20 = vadd.f32 %v3874_v28, %v3884_v37 }
 0x13b   : > { %3125 = vst [vmem:[%s3926_s16 + $0x10] sm:$0xff] %v3057_v33   ;;  %v2514_v50 = vadd.f32 %v2513_v23, %v2323_v15  ;;  %v2583_v35 = vadd.f32 %v2582_v26, %v2552_v34  ;;  %v2222_v8 = vpop.f32.mrf.mxu1  ;;  %v1488_v17 = vpop.f32.mrf.mxu0 }
 0x13c   : > { %v2325_v7 = vadd.f32 %v2222_v8, %v1588_v31  ;;  %v1589_v16 = vadd.f32 %v1488_v17, %v1151_v43  ;;  %v2557_v41 = vmul.f32 %v2327_v14, %v2327_v14 }
 0x13d   : > { %v2584_v56 = vadd.f32 %v2583_v35, %v2553_v48  ;;  %v3334_v51 = vpop.f32.mrf.mxu1  ;;  %v2515_v2 = vadd.f32 %v2514_v50, %v2324_v57  ;;  %v3301_v59 = vpop.f32.mrf.mxu0 }
 0x13e   : > { %v2328_v5 = vadd.f32 %v3334_v51, %v1591_v46  ;;  %v2555_v19 = vmul.f32 %v2325_v7, %v2325_v7  ;;  %v1594_v31 = vadd.f32 %v3301_v59, %v3868_v22 }
 0x13f   : > { %v2516_v10 = vadd.f32 %v2515_v2, %v2325_v7  ;;  %v2585_v13 = vadd.f32 %v2584_v56, %v2554_v55  ;;  %v2225_v63 = vpop.f32.mrf.mxu1  ;;  %v1501_v9 = vpop.f32.mrf.mxu0 }
 0x140   : > { %v3072_v1 = vpack.c.bf16 %v2328_v5, %v2327_v14  ;;  %v2326_v15 = vadd.f32 %v2225_v63, %v1589_v16  ;;  %v1592_v53 = vadd.f32 %v1501_v9, %v3870_v25  ;;  %v2558_v27 = vmul.f32 %v2328_v5, %v2328_v5 }
 0x141   : > { %v2586_v62 = vadd.f32 %v2585_v13, %v2555_v19  ;;  %v3337_v3 = vpop.f32.mrf.mxu1  ;;  %v3302_v57 = vpop.f32.mrf.mxu0 }
 0x142   : > { %3128 = vst [vmem:[%s3926_s16 + $0x28] sm:$0xff] %v3072_v1   ;;  %v3067_v61 = vpack.c.bf16 %v2326_v15, %v2325_v7  ;;  %v2517_v54 = vadd.f32 %v2516_v10, %v2326_v15  ;;  %v2556_v26 = vmul.f32 %v2326_v15, %v2326_v15  ;;  %v1595_v23 = vadd.f32 %v3302_v57, %v1175_v60 }
 0x143   : > { %v2238_v33 = vpop.f32.mrf.mxu1  ;;  %v1504_v34 = vpop.f32.mrf.mxu0  ;;  %v2331_v35 = vadd.f32 %v3337_v3, %v1594_v31  ;;  %v1183_v10 = vadd.f32 %v3878_v30, %v3888_v39 }
 0x144   : > { %3127 = vst [vmem:[%s3926_s16 + $0x20] sm:$0xff] %v3067_v61   ;;  %v2518_v25 = vadd.f32 %v2517_v54, %v2327_v14  ;;  %v2587_v43 = vadd.f32 %v2586_v62, %v2556_v26  ;;  %v2329_v18 = vadd.f32 %v2238_v33, %v1592_v53  ;;  %v1593_v46 = vadd.f32 %v1504_v34, %v1167_v11 }
 0x145   : > { %v3338_v44 = vpop.f32.mrf.mxu1  ;;  %v3305_v48 = vpop.f32.mrf.mxu0  ;;  %v2561_v53 = vmul.f32 %v2331_v35, %v2331_v35  ;;  %v1207_v11 = vadd.f32 %v3886_v38, %v3896_v47  ;;  %v1199_v33 = vadd.f32 %v3890_v40, %v3898_v49 }
 0x146   : > { %v2588_v50 = vadd.f32 %v2587_v43, %v2557_v41  ;;  %v2519_v8 = vadd.f32 %v2518_v25, %v2328_v5  ;;  %v2332_v22 = vadd.f32 %v3338_v44, %v1595_v23  ;;  %v2559_v16 = vmul.f32 %v2329_v18, %v2329_v18 }
 0x147   : > { %v2241_v29 = vpop.f32.mrf.mxu1  ;;  %v1517_v17 = vpop.f32.mrf.mxu0  ;;  %v1598_v19 = vadd.f32 %v3305_v48, %v3880_v4 }
 0x148   : > { %v2520_v7 = vadd.f32 %v2519_v8, %v2329_v18  ;;  %v2589_v55 = vadd.f32 %v2588_v50, %v2558_v27  ;;  %v3082_v56 = vpack.c.bf16 %v2332_v22, %v2331_v35  ;;  %v2330_v2 = vadd.f32 %v2241_v29, %v1593_v46 }
 0x149   : > { %v3341_v51 = vpop.f32.mrf.mxu1  ;;  %v1596_v59 = vadd.f32 %v1517_v17, %v3882_v36  ;;  %v3306_v14 = vpop.f32.mrf.mxu0  ;;  %v2562_v39 = vmul.f32 %v2332_v22, %v2332_v22 }
 0x14a   : > { %v2590_v5 = vadd.f32 %v2589_v55, %v2559_v16  ;;  %3130 = vst [vmem:[%s3926_s16 + $0x38] sm:$0xff] %v3082_v56   ;;  %v1599_v28 = vadd.f32 %v3306_v14, %v1191_v20  ;;  %v3077_v37 = vpack.c.bf16 %v2330_v2, %v2329_v18  ;;  %v2521_v13 = vadd.f32 %v2520_v7, %v2330_v2 }
 0x14b   : > { %v2560_v63 = vmul.f32 %v2330_v2, %v2330_v2  ;;  %v2254_v9 = vpop.f32.mrf.mxu1  ;;  %v1520_v1 = vpop.f32.mrf.mxu0  ;;  %v2335_v61 = vadd.f32 %v3341_v51, %v1598_v19 }
 0x14c   : > { %v1597_v15 = vadd.f32 %v1520_v1, %v1183_v10  ;;  %3129 = vst [vmem:[%s3926_s16 + $0x30] sm:$0xff] %v3077_v37   ;;  %v2522_v60 = vadd.f32 %v2521_v13, %v2331_v35  ;;  %v2333_v3 = vadd.f32 %v2254_v9, %v1596_v59 }
 0x14d   : > { %v2591_v62 = vadd.f32 %v2590_v5, %v2560_v63  ;;  %v3342_v36 = vpop.f32.mrf.mxu1  ;;  %v3309_v57 = vpop.f32.mrf.mxu0 }
 0x14e   : > { %v2336_v30 = vadd.f32 %v3342_v36, %v1599_v28  ;;  %v2523_v4 = vadd.f32 %v2522_v60, %v2332_v22  ;;  %v2563_v25 = vmul.f32 %v2333_v3, %v2333_v3  ;;  %v1602_v50 = vadd.f32 %v3309_v57, %v3892_v42 }
 0x14f   : > { %v2592_v54 = vadd.f32 %v2591_v62, %v2561_v53  ;;  %v2257_v26 = vpop.f32.mrf.mxu1  ;;  %v1533_v31 = vpop.f32.mrf.mxu0  ;;  %v2565_v22 = vmul.f32 %v2335_v61, %v2335_v61 }
 0x150   : > { %v3092_v23 = vpack.c.bf16 %v2336_v30, %v2335_v61  ;;  %v2334_v34 = vadd.f32 %v2257_v26, %v1597_v15  ;;  %v2524_v41 = vadd.f32 %v2523_v4, %v2333_v3  ;;  %v1600_v27 = vadd.f32 %v1533_v31, %v3894_v45 }
 0x151   : > { %v2593_v43 = vadd.f32 %v2592_v54, %v2562_v39  ;;  %v3345_v18 = vpop.f32.mrf.mxu1  ;;  %v3310_v44 = vpop.f32.mrf.mxu0  ;;  %v2566_v56 = vmul.f32 %v2336_v30, %v2336_v30 }
 0x152   : > { %3132 = vst [vmem:[%s3926_s16 + $0x48] sm:$0xff] %v3092_v23   ;;  %v3087_v46 = vpack.c.bf16 %v2334_v34, %v2333_v3  ;;  %v2564_v48 = vmul.f32 %v2334_v34, %v2334_v34  ;;  %v1603_v35 = vadd.f32 %v3310_v44, %v1207_v11  ;;  %v2525_v47 = vadd.f32 %v2524_v41, %v2334_v34 }
 0x153   : > { %v2594_v38 = vadd.f32 %v2593_v43, %v2563_v25  ;;  %v2270_v8 = vpop.f32.mrf.mxu1  ;;  %v1536_v40 = vpop.f32.mrf.mxu0  ;;  %v2339_v16 = vadd.f32 %v3345_v18, %v1602_v50 }
 0x154   : > { %3131 = vst [vmem:[%s3926_s16 + $0x40] sm:$0xff] %v3087_v46   ;;  %v1601_v49 = vadd.f32 %v1536_v40, %v1199_v33  ;;  %v2526_v20 = vadd.f32 %v2525_v47, %v2335_v61  ;;  %v2337_v7 = vadd.f32 %v2270_v8, %v1600_v27 }
 0x155   : > { %v2595_v29 = vadd.f32 %v2594_v38, %v2564_v48  ;;  %v3346_v17 = vpop.f32.mrf.mxu1  ;;  %v3313_v45 = vpop.f32.mrf.mxu0  ;;  %v2569_v3 = vmul.f32 %v2339_v16, %v2339_v16 }
 0x156   : > { %v2340_v55 = vadd.f32 %v3346_v17, %v1603_v35  ;;  %v2527_v2 = vadd.f32 %v2526_v20, %v2336_v30  ;;  %v2567_v19 = vmul.f32 %v2337_v7, %v2337_v7  ;;  %v1606_v62 = vadd.f32 %v3313_v45, %v3900_v52 }
 0x157   : > { %v2596_v51 = vadd.f32 %v2595_v29, %v2565_v22  ;;  %v2273_v42 = vpop.f32.mrf.mxu1  ;;  %v1549_v59 = vpop.f32.mrf.mxu0 }
 0x158   : > { %v3102_v14 = vpack.c.bf16 %v2340_v55, %v2339_v16  ;;  %v2338_v10 = vadd.f32 %v2273_v42, %v1601_v49  ;;  %v2528_v5 = vadd.f32 %v2527_v2, %v2337_v7  ;;  %v1604_v9 = vadd.f32 %v1549_v59, %v3902_v58 }
 0x159   : > { %v2597_v28 = vadd.f32 %v2596_v51, %v2566_v56  ;;  %v3314_v37 = vpop.f32.mrf.mxu0  ;;  %v2570_v26 = vmul.f32 %v2340_v55, %v2340_v55 }
 0x15a   : > { %3134 = vst [vmem:[%s3926_s16 + $0x58] sm:$0xff] %v3102_v14   ;;  %v3097_v13 = vpack.c.bf16 %v2338_v10, %v2337_v7  ;;  %v2568_v63 = vmul.f32 %v2338_v10, %v2338_v10  ;;  %v2529_v53 = vadd.f32 %v2528_v5, %v2338_v10  ;;  %v1607_v36 = vadd.f32 %v3314_v37, %v3904_v0 }
 0x15b   : > { %v2598_v1 = vadd.f32 %v2597_v28, %v2567_v19  ;;  %v3349_v15 = vpop.f32.mrf.mxu1  ;;  %v1552_v60 = vpop.f32.mrf.mxu0 }
 0x15c   : > { %3133 = vst [vmem:[%s3926_s16 + $0x50] sm:$0xff] %v3097_v13   ;;  %v2530_v57 = vadd.f32 %v2529_v53, %v2339_v16  ;;  %v1605_v4 = vadd.f32 %v1552_v60, %v3906_v6  ;;  %v2343_v23 = vadd.f32 %v3349_v15, %v1606_v62 }
 0x15d   : > { %v2599_v61 = vadd.f32 %v2598_v1, %v2568_v63  ;;  %v2286_v30 = vpop.f32.mrf.mxu1  ;;  %v3317_v39 = vpop.f32.mrf.mxu0 }
 0x15e   : > { %v2341_v54 = vadd.f32 %v2286_v30, %v1604_v9  ;;  %v2531_v11 = vadd.f32 %v2530_v57, %v2340_v55  ;;  %v1610_v48 = vadd.f32 %v3317_v39, %v3908_v12  ;;  %v2573_v49 = vmul.f32 %v2343_v23, %v2343_v23 }
 0x15f   : > { %v2600_v31 = vadd.f32 %v2599_v61, %v2569_v3  ;;  %v3350_v58 = vpop.f32.mrf.mxu1  ;;  %v1565_v33 = vpop.f32.mrf.mxu0 }
 0x160   : > { %v2344_v34 = vadd.f32 %v3350_v58, %v1607_v36  ;;  %v2532_v41 = vadd.f32 %v2531_v11, %v2341_v54  ;;  %v2571_v52 = vmul.f32 %v2341_v54, %v2341_v54  ;;  %v1608_v44 = vadd.f32 %v1565_v33, %v3910_v21 }
 0x161   : > { %v2601_v25 = vadd.f32 %v2600_v31, %v2570_v26  ;;  %v2289_v0 = vpop.f32.mrf.mxu1  ;;  %v3318_v43 = vpop.f32.mrf.mxu0 }
 0x162   : > { %v3112_v18 = vpack.c.bf16 %v2344_v34, %v2343_v23  ;;  %v2342_v27 = vadd.f32 %v2289_v0, %v1605_v4  ;;  %v1611_v47 = vadd.f32 %v3318_v43, %v3912_v24  ;;  %v2574_v17 = vmul.f32 %v2344_v34, %v2344_v34 }
 0x163   : > { %v2602_v46 = vadd.f32 %v2601_v25, %v2571_v52  ;;  %v3353_v6 = vpop.f32.mrf.mxu1  ;;  %v1568_v8 = vpop.f32.mrf.mxu0 }
 0x164   : > { %3136 = vst [vmem:[%s3926_s16 + $0x68] sm:$0xff] %v3112_v18   ;;  %v3107_v50 = vpack.c.bf16 %v2342_v27, %v2341_v54  ;;  %v2533_v35 = vadd.f32 %v2532_v41, %v2342_v27  ;;  %v2572_v38 = vmul.f32 %v2342_v27, %v2342_v27  ;;  %v1609_v7 = vadd.f32 %v1568_v8, %v3914_v32 }
 0x165   : > { %v2302_v40 = vpop.f32.mrf.mxu1  ;;  %v2347_v12 = vadd.f32 %v3353_v6, %v1610_v48 }
 0x166   : > { %3135 = vst [vmem:[%s3926_s16 + $0x60] sm:$0xff] %v3107_v50   ;;  %v2534_v22 = vadd.f32 %v2533_v35, %v2343_v23  ;;  %v2603_v20 = vadd.f32 %v2602_v46, %v2572_v38  ;;  %v2345_v29 = vadd.f32 %v2302_v40, %v1608_v44 }
 0x167   : > { %v3354_v21 = vpop.f32.mrf.mxu1  ;;  %v2577_v28 = vmul.f32 %v2347_v12, %v2347_v12 }
 0x168   : > { %v2604_v45 = vadd.f32 %v2603_v20, %v2573_v49  ;;  %v2535_v16 = vadd.f32 %v2534_v22, %v2344_v34  ;;  %v2348_v55 = vadd.f32 %v3354_v21, %v1611_v47  ;;  %v2575_v51 = vmul.f32 %v2345_v29, %v2345_v29 }
 0x169   : > { %v2305_v2 = vpop.f32.mrf.mxu1 }
 0x16a   : > { %v2536_v56 = vadd.f32 %v2535_v16, %v2345_v29  ;;  %v2605_v24 = vadd.f32 %v2604_v45, %v2574_v17  ;;  %v3122_v42 = vpack.c.bf16 %v2348_v55, %v2347_v12  ;;  %v2346_v59 = vadd.f32 %v2305_v2, %v1609_v7 }
 0x16b   : > { %v2578_v13 = vmul.f32 %v2348_v55, %v2348_v55 }
 0x16c   : > { %v2606_v14 = vadd.f32 %v2605_v24, %v2575_v51  ;;  %3138 = vst [vmem:[%s3926_s16 + $0x78] sm:$0xff] %v3122_v42   ;;  %v3117_v10 = vpack.c.bf16 %v2346_v59, %v2345_v29  ;;  %v2537_v5 = vadd.f32 %v2536_v56, %v2346_v59  ;;  %v2576_v19 = vmul.f32 %v2346_v59, %v2346_v59 }
 0x16e   : > { %3137 = vst [vmem:[%s3926_s16 + $0x70] sm:$0xff] %v3117_v10   ;;  %v2538_v32 = vadd.f32 %v2537_v5, %v2347_v12  ;;  %v2607_v37 = vadd.f32 %v2606_v14, %v2576_v19 }
 0x170   : > { %v2539_v63 = vadd.f32 %v2538_v32, %v2348_v55  ;;  %v2608_v9 = vadd.f32 %v2607_v37, %v2577_v28 }
 0x172   : > { %v2540_v1 = vrot.slane %v2539_v63, 4  ;;  %v2609_v15 = vadd.f32 %v2608_v9, %v2578_v13 }
 0x174   : > { %v2541_v53 = vadd.f32 %v2540_v1, %v2539_v63  ;;  %v2610_v60 = vrot.slane %v2609_v15, 4 }
 0x176   : > { %v2542_v62 = vrot.slane %v2541_v53, 2  ;;  %v2611_v36 = vadd.f32 %v2610_v60, %v2609_v15 }
 0x178   : > { %v2543_v3 = vadd.f32 %v2542_v62, %v2541_v53  ;;  %v2612_v57 = vrot.slane %v2611_v36, 2 }
 0x17a   : > { %v2544_v61 = vrot.slane %v2543_v3, 1  ;;  %v2613_v30 = vadd.f32 %v2612_v57, %v2611_v36 }
 0x17c   : > { %v2545_v39 = vadd.f32 %v2544_v61, %v2543_v3  ;;  %v2614_v54 = vrot.slane %v2613_v30, 1 }
 0x17e   : > { %2546 = vst [vmem:[%s226_s20] sm:$0x1] %v2545_v39  ;;  %v2615_v4 = vadd.f32 %v2614_v54, %v2613_v30 }
 0x180   : > { %2616 = vst [vmem:[%s226_s20 + $0x1] sm:$0x1] %v2615_v4 }
 0x181 PF: > { %s14_s14 = sadd.s32 1, %s3442_s14   ;;  %s4001_s12 = smov %s3438_s13 }
 0x182   : > { %p11_p5 = scmp.ge.s32.totalorder %s14_s14, 4   ;;  %s4002_s13 = smov %s4004_s15 }
 0x184   :  { %13 = sbr.rel (!%p11_p5) target bundleno = 2 (0x2), region = 74 }

// kernel: _lambda_.7
= control target key start
LH: loop header
LB: loop body
LE: loop exit
PB: predicated region body
PF: predicated region fallthrough
CT: control target
= control target key end

     0   :  { %s1536_s12 = smov 0   ;;  %s1538_s13 = smov 0   ;;  %s1727_s0 = inlined_call_operand.vmem [shape: bf16[2,9,9,64], index: 0, kind: input, shape index: {}]   ;;  %s1728_s1 = inlined_call_operand.vmem [shape: bf16[256,128], index: 1, kind: input, shape index: {}]   ;;  %s1729_s2 = inlined_call_operand.vmem [shape: bf16[2,64,128], index: 2, kind: output, shape index: {0}]   ;;  %s1730_s3 = inlined_call_operand.vmem [shape: f32[2,2,128], index: 3, kind: output, shape index: {1}]  }
   0x1   :  { %s1540_s14 = smov 0  }
   0x2 LB: > { %s23_s15 = sadd.s32 1, %s1510_s13  ;;  %p1228_p0 = scmp.ge.s32.totalorder %s1514_s14, 1  ;;  %s1514_s14 = sphi %s1540_s14, %s14_s14   ;;  %s1510_s13 = sphi %s1538_s13, %s1734_s13   ;;  %s1506_s12 = sphi %s1536_s12, %s1733_s12  }
   0x3   : > { %p24_p1 = scmp.ge.s32.totalorder %s23_s15, 2  ;;  %p165_p2 = scmp.lt.s32.totalorder %s1514_s14, 3 }
   0x5   : > { %s1736_s15 = smov (%p24_p1, %s23_s15), 0  ;;  %p166_p3 = pnand %p1228_p0, %p165_p2 }
   0x6   : > { %p203_p4 = scmp.lt.s32.totalorder (!%p166_p3), %s1506_s12, 1 }
   0x7   : > { %169 = sbr.rel (%p166_p3) target bundleno = 284 (0x11c), region = 28 }
   0xc   : > { %v1468_v0 = vld [vmem:[%s1728_s1 + $0x38] sm:$0xff]   ;;  %v1470_v2 = vld [vmem:[%s1728_s1 + $0x30] sm:$0xff]   ;;  %s1738_s12 = smov (!%p203_p4, %s1506_s12), 1  ;;  %v1472_v4 = vld [vmem:[%s1728_s1 + $0x28] sm:$0xff]   ;;  %vm411_vm0 = vcmask 523264  }
   0xd   : > { %v1469_v1 = vld [vmem:[%s1728_s1 + $0x18] sm:$0xff]   ;;  %1379 = vmatprep.subr.bf16.mxu0 %v1468_v0  ;;  %v1471_v3 = vld [vmem:[%s1728_s1 + $0x10] sm:$0xff]   ;;  %s1443_s26 = smul.u32 72, %s1738_s12  ;;  %v1473_v5 = vld [vmem:[%s1728_s1 + $0x8] sm:$0xff]   ;;  %vm252_vm1 = vsmask.f32 3328 }
   0xe   : > { %1395 = vmatprep.subr.bf16.mxu1 %v1469_v1  ;;  %1380 = vmatpush3.bf16.msra.mxu0 %v1468_v0  ;;  %v1474_v6 = vld [vmem:[%s1728_s1 + $0x20] sm:$0xff]   ;;  %vm253_vm2 = vsmask.f32 7440  ;;  %v1593_v18 = vld [vmem:[%s1728_s1 + $0x58] sm:$0xff]   ;;  %v1481_v53 = vld [vmem:[%s1728_s1 + $0x70] sm:$0xff]   ;;  %s1315_s29 = sshll.u32 %s1738_s12, 5 }
   0xf   : > { %1396 = vmatpush3.bf16.msra.mxu1 %v1469_v1  ;;  %1381 = vmatprep.subr.bf16.mxu0 %v1470_v2  ;;  %s1581_s6 = scalar_lea.vmem %s1727_s0, %s1443_s26  ;;  %v1475_v7 = vld [vmem:[%s1728_s1] sm:$0xff]   ;;  %vm1600_vm3 = vmor %vm252_vm1, %vm253_vm2  ;;  %v1479_v38 = vld [vmem:[%s1728_s1 + $0x78] sm:$0xff]   ;;  %s1708_s5 = scalar_lea.vmem %s1729_s2, %s1315_s29 }
  0x10   : > { %1397 = vmatprep.subr.bf16.mxu1 %v1471_v3  ;;  %v228_v8 = vld [vmem:[%s1581_s6] sm:$0xf]  ;;  %v229_v9 = vld [vmem:[%s1581_s6 + $0x8] sm:$0xf]  ;;  %v244_v10 = vld [vmem:[%s1581_s6 + $0x4] sm:$0x1] }
  0x11   : > { %v256_v11 = vshrl.u32 %v228_v8, 16  ;;  %v259_v12 = vshll.u32 %v228_v8, 16  ;;  %v270_v13 = vshrl.u32 %v229_v9, 16  ;;  %v273_v14 = vshll.u32 %v229_v9, 16  ;;  %v245_v15 = vld [vmem:[%s1581_s6 + $0xc] sm:$0x1] }
  0x12   : > { %1382 = vmatpush3.bf16.msra.mxu0 %v1470_v2  ;;  %v1245_v16 = vcombine.low %v228_v8, %v229_v9  ;;  %v265_v17 = vshll.u32 %v244_v10, 16  ;;  %v230_v23 = vld [vmem:[%s1581_s6 + $0x10] sm:$0xf]  ;;  %v279_v25 = vshll.u32 %v245_v15, 16  ;;  %v231_v26 = vld [vmem:[%s1581_s6 + $0x18] sm:$0xf] }
  0x13   : > { %1398 = vmatpush3.bf16.msra.mxu1 %v1471_v3  ;;  %1383 = vmatprep.subr.bf16.mxu0 %v1472_v4  ;;  %v258_v19 = vrot.slane %v256_v11, 4  ;;  %v261_v20 = vrot.slane %v259_v12, 5  ;;  %v272_v21 = vrot.slane %v270_v13, 4  ;;  %v275_v22 = vrot.slane %v273_v14, 5  ;;  %v246_v43 = vld [vmem:[%s1581_s6 + $0x14] sm:$0x1] }
  0x14   : > { %1399 = vmatprep.subr.bf16.mxu1 %v1473_v5  ;;  %v267_v24 = vrot.slane %v265_v17, 5  ;;  %v284_v27 = vshrl.u32 %v230_v23, 16  ;;  %v287_v28 = vshll.u32 %v230_v23, 16  ;;  %1403 = vmatprep.mubr.msk.bf16.mxu1 %vm411_vm0, %v1245_v16  ;;  %v298_v31 = vshrl.u32 %v231_v26, 16  ;;  %v247_v44 = vld [vmem:[%s1581_s6 + $0x1c] sm:$0x1] }
  0x15   : > { %v262_v29 = vor.u32 %v261_v20, %v258_v19  ;;  %v276_v30 = vor.u32 %v275_v22, %v272_v21  ;;  %v301_v32 = vshll.u32 %v231_v26, 16  ;;  %v281_v34 = vrot.slane %v279_v25, 5  ;;  %v232_v56 = vld [vmem:[%s1581_s6 + $0x20] sm:$0xf]  ;;  %v233_v57 = vld [vmem:[%s1581_s6 + $0x28] sm:$0xf] }
  0x16   : > { %1384 = vmatpush3.bf16.msra.mxu0 %v1472_v4  ;;  %v286_v35 = vrot.slane %v284_v27, 4  ;;  %v289_v36 = vrot.slane %v287_v28, 5  ;;  %v1246_v37 = vcombine.low %v230_v23, %v231_v26  ;;  %v300_v41 = vrot.slane %v298_v31, 4  ;;  %v248_v62 = vld [vmem:[%s1581_s6 + $0x24] sm:$0x1]  ;;  %v1485_v10 = vld [vmem:[%s1728_s1 + $0x68] sm:$0xff]  }
  0x17   : > { %1400 = vmatpush3.bf16.msra.mxu1 %v1473_v5  ;;  %1385 = vmatprep.subr.bf16.mxu0 %v1474_v6  ;;  %v263_v39 = vrot.slane %v262_v29, 4  ;;  %v277_v40 = vrot.slane %v276_v30, 4  ;;  %v303_v42 = vrot.slane %v301_v32, 5  ;;  %v293_v48 = vshll.u32 %v246_v43, 16  ;;  %v249_v2 = vld [vmem:[%s1581_s6 + $0x2c] sm:$0x1] }
  0x18   : > { %1401 = vmatprep.subr.bf16.mxu1 %v1475_v7  ;;  %v290_v45 = vor.u32 %v289_v36, %v286_v35  ;;  %v307_v52 = vshll.u32 %v247_v44, 16  ;;  %v312_v59 = vshrl.u32 %v232_v56, 16  ;;  %v315_v60 = vshll.u32 %v232_v56, 16  ;;  %v234_v4 = vld [vmem:[%s1581_s6 + $0x30] sm:$0xf]  ;;  %v1487_v21 = vld [vmem:[%s1728_s1 + $0x60] sm:$0xff]  }
  0x19   : > { %v268_v46 = vsel %vm1600_vm3, %v263_v39, %v267_v24  ;;  %v282_v47 = vsel %vm1600_vm3, %v277_v40, %v281_v34  ;;  %v304_v49 = vor.u32 %v303_v42, %v300_v41  ;;  %v295_v54 = vrot.slane %v293_v48, 5  ;;  %v235_v9 = vld [vmem:[%s1581_s6 + $0x38] sm:$0xf]  ;;  %v1480_v12 = vld [vmem:[%s1728_s1 + $0x50] sm:$0xff]   ;;  %v1484_v34 = vld [vmem:[%s1728_s1 + $0x48] sm:$0xff]  }
  0x1a   : > { %1386 = vmatpush3.bf16.msra.mxu0 %v1474_v6  ;;  %v1233_v50 = vcombine.low %v268_v46, %v282_v47  ;;  %v291_v51 = vrot.slane %v290_v45, 4  ;;  %v309_v58 = vrot.slane %v307_v52, 5  ;;  %v326_v61 = vshrl.u32 %v233_v57, 16  ;;  %v250_v30 = vld [vmem:[%s1581_s6 + $0x34] sm:$0x1]  ;;  %v1486_v42 = vld [vmem:[%s1728_s1 + $0x40] sm:$0xff]  }
  0x1b   : > { %1402 = vmatpush3.bf16.msra.mxu1 %v1475_v7  ;;  %1411 = vmatprep.subr.bf16.mxu0 %v1593_v18  ;;  %v305_v55 = vrot.slane %v304_v49, 4  ;;  %v329_v0 = vshll.u32 %v233_v57, 16  ;;  %v1247_v1 = vcombine.low %v232_v56, %v233_v57  ;;  %v321_v3 = vshll.u32 %v248_v62, 16  ;;  %v251_v35 = vld [vmem:[%s1581_s6 + $0x3c] sm:$0x1] }
  0x1c   : > { %1427 = vmatprep.subr.bf16.mxu1 %v1479_v38  ;;  %1387 = vmatprep.mubr.msk.bf16.mxu0 %vm411_vm0, %v1233_v50  ;;  %v296_v63 = vsel %vm1600_vm3, %v291_v51, %v295_v54  ;;  %v314_v6 = vrot.slane %v312_v59, 4  ;;  %v317_v7 = vrot.slane %v315_v60, 5  ;;  %v328_v8 = vrot.slane %v326_v61, 4  ;;  %v1277_v46 = vld [vmem:[%s1581_s6 + $0x8] sm:$0xf] }
  0x1d   : > { %v310_v5 = vsel %vm1600_vm3, %v305_v55, %v309_v58  ;;  %v331_v13 = vrot.slane %v329_v0, 5  ;;  %v323_v14 = vrot.slane %v321_v3, 5  ;;  %v335_v15 = vshll.u32 %v249_v2, 16  ;;  %v1278_v47 = vld [vmem:[%s1581_s6 + $0xc] sm:$0x1] }
  0x1e   : > { %1404 = vmatmul.mubr.msk.bf16.vlgmr.msra.gmra.mxu1 %vm411_vm0, %v1246_v37  ;;  %v1234_v11 = vcombine.low %v296_v63, %v310_v5  ;;  %v318_v16 = vor.u32 %v317_v7, %v314_v6  ;;  %v340_v17 = vshrl.u32 %v234_v4, 16  ;;  %v343_v19 = vshll.u32 %v234_v4, 16  ;;  %v1279_v49 = vld [vmem:[%s1581_s6 + $0x10] sm:$0xf]  ;;  %v1280_v50 = vld [vmem:[%s1581_s6 + $0x14] sm:$0x1] }
  0x1f   : > { %1428 = vmatpush3.bf16.msra.mxu1 %v1479_v38  ;;  %1407 = vmatprep.mubr.msk.bf16.mxu1 %vm411_vm0, %v1247_v1  ;;  %v354_v20 = vshrl.u32 %v235_v9, 16  ;;  %v332_v22 = vor.u32 %v331_v13, %v328_v8  ;;  %v337_v23 = vrot.slane %v335_v15, 5  ;;  %v357_v24 = vshll.u32 %v235_v9, 16  ;;  %v1488_v0 = vld [vmem:[%s1581_s6 + $0x8] ss:$8 sps:$4 sm:$0xff]  }
  0x20   : > { %1429 = vmatprep.subr.bf16.mxu1 %v1481_v53  ;;  %1388 = vmatmul.mubr.msk.bf16.vlgmr.msra.gmra.mxu0 %vm411_vm0, %v1234_v11  ;;  %v1248_v25 = vcombine.low %v234_v4, %v235_v9  ;;  %v319_v26 = vrot.slane %v318_v16, 4  ;;  %v342_v27 = vrot.slane %v340_v17, 4  ;;  %v345_v28 = vrot.slane %v343_v19, 5  ;;  %v1281_v3 = vld [vmem:[%s1581_s6 + $0x18] sm:$0xf] }
  0x21   : > { %1412 = vmatpush3.bf16.msra.mxu0 %v1593_v18  ;;  %v356_v29 = vrot.slane %v354_v20, 4  ;;  %v333_v31 = vrot.slane %v332_v22, 4  ;;  %v359_v32 = vrot.slane %v357_v24, 5  ;;  %v349_v36 = vshll.u32 %v250_v30, 16  ;;  %v1282_v4 = vld [vmem:[%s1581_s6 + $0x1c] sm:$0x1] }
  0x22   : > { %1413 = vmatprep.subr.bf16.mxu0 %v1480_v12  ;;  %v324_v18 = vsel %vm1600_vm3, %v319_v26, %v323_v14  ;;  %v346_v37 = vor.u32 %v345_v28, %v342_v27  ;;  %v363_v38 = vshll.u32 %v251_v35, 16  ;;  %v773_v51 = vshrl.u32 %v1277_v46, 16  ;;  %v1283_v6 = vld [vmem:[%s1581_s6 + $0x20] sm:$0xf]  ;;  %v1284_v7 = vld [vmem:[%s1581_s6 + $0x24] sm:$0x1] }
  0x23   : > { %1430 = vmatpush3.bf16.msra.mxu1 %v1481_v53  ;;  %v338_v39 = vsel %vm1600_vm3, %v333_v31, %v337_v23  ;;  %v351_v40 = vrot.slane %v349_v36, 5  ;;  %v360_v41 = vor.u32 %v359_v32, %v356_v29  ;;  %v776_v53 = vshll.u32 %v1277_v46, 16  ;;  %v1489_v22 = vld [vmem:[%s1581_s6 + $0x18] ss:$8 sps:$4 sm:$0xff]   ;;  %v1285_v27 = vld [vmem:[%s1581_s6 + $0x28] sm:$0xf] }
  0x24   : > { %1431 = vmatprep.subr.bf16.mxu1 %v1485_v10  ;;  %v1235_v43 = vcombine.low %v324_v18, %v338_v39  ;;  %v347_v44 = vrot.slane %v346_v37, 4  ;;  %v365_v45 = vrot.slane %v363_v38, 5  ;;  %v782_v54 = vshll.u32 %v1278_v47, 16  ;;  %v1286_v28 = vld [vmem:[%s1581_s6 + $0x2c] sm:$0x1] }
  0x25   : > { %1414 = vmatpush3.bf16.msra.mxu0 %v1480_v12  ;;  %v361_v48 = vrot.slane %v360_v41, 4  ;;  %v787_v55 = vshrl.u32 %v1279_v49, 16  ;;  %v775_v57 = vrot.slane %v773_v51, 4  ;;  %v790_v58 = vshll.u32 %v1279_v49, 16  ;;  %v1287_v31 = vld [vmem:[%s1581_s6 + $0x30] sm:$0xf] }
  0x26   : > { %1408 = vmatmul.mubr.msk.bf16.gmra.mxu1 %vm411_vm0, %v1248_v25  ;;  %1415 = vmatprep.subr.bf16.mxu0 %v1484_v34  ;;  %v352_v52 = vsel %vm1600_vm3, %v347_v44, %v351_v40  ;;  %v796_v59 = vshll.u32 %v1280_v50, 16  ;;  %v778_v61 = vrot.slane %v776_v53, 5  ;;  %v784_v62 = vrot.slane %v782_v54, 5  ;;  %v1288_v32 = vld [vmem:[%s1581_s6 + $0x34] sm:$0x1] }
  0x27   : > { %1432 = vmatpush3.bf16.msra.mxu1 %v1485_v10  ;;  %1391 = vmatprep.mubr.msk.bf16.mxu0 %vm411_vm0, %v1235_v43  ;;  %v366_v56 = vsel %vm1600_vm3, %v361_v48, %v365_v45  ;;  %v789_v63 = vrot.slane %v787_v55, 4  ;;  %v792_v1 = vrot.slane %v790_v58, 5  ;;  %v801_v8 = vshrl.u32 %v1281_v3, 16  ;;  %v1490_v46 = vld [vmem:[%s1581_s6 + $0x28] ss:$8 sps:$4 sm:$0xff]  }
  0x28   : > { %1433 = vmatprep.subr.bf16.mxu1 %v1487_v21  ;;  %v1236_v60 = vcombine.low %v352_v52, %v366_v56  ;;  %v798_v2 = vrot.slane %v796_v59, 5  ;;  %v779_v5 = vor.u32 %v778_v61, %v775_v57  ;;  %v804_v9 = vshll.u32 %v1281_v3, 16  ;;  %v1289_v51 = vld [vmem:[%s1581_s6 + $0x38] sm:$0xf]  ;;  %v1290_v52 = vld [vmem:[%s1581_s6 + $0x3c] sm:$0x1] }
  0x29   : > { %1416 = vmatpush3.bf16.msra.mxu0 %v1484_v34  ;;  %v793_v10 = vor.u32 %v792_v1, %v789_v63  ;;  %v810_v11 = vshll.u32 %v1282_v4, 16  ;;  %v815_v12 = vshrl.u32 %v1283_v6, 16  ;;  %v818_v13 = vshll.u32 %v1283_v6, 16  ;;  %v1291_v55 = vld [vmem:[%s1581_s6 + $0x40] sm:$0xf] }
  0x2a   : > { %1417 = vmatprep.subr.bf16.mxu0 %v1486_v42  ;;  %1392 = vmatmul.mubr.msk.bf16.gmra.mxu0 %vm411_vm0, %v1236_v60  ;;  %v780_v14 = vrot.slane %v779_v5, 4  ;;  %v803_v15 = vrot.slane %v801_v8, 4  ;;  %v806_v16 = vrot.slane %v804_v9, 5  ;;  %v824_v17 = vshll.u32 %v1284_v7, 16  ;;  %v1292_v56 = vld [vmem:[%s1581_s6 + $0x44] sm:$0x1] }
  0x2b   : > { %1434 = vmatpush3.bf16.msra.mxu1 %v1487_v21  ;;  %1419 = vmatprep.mubr.msk.bf16.mxu0 %vm411_vm0, %v1488_v0  ;;  %v794_v19 = vrot.slane %v793_v10, 4  ;;  %v817_v20 = vrot.slane %v815_v12, 4  ;;  %v820_v21 = vrot.slane %v818_v13, 5  ;;  %v812_v25 = vrot.slane %v810_v11, 5  ;;  %v1491_v5 = vld [vmem:[%s1581_s6 + $0x38] ss:$8 sps:$4 sm:$0xff]  }
  0x2c   : > { %v785_v23 = vsel %vm1600_vm3, %v780_v14, %v784_v62  ;;  %v807_v24 = vor.u32 %v806_v16, %v803_v15  ;;  %v826_v26 = vrot.slane %v824_v17, 5  ;;  %v829_v34 = vshrl.u32 %v1285_v27, 16  ;;  %s1232_s6 = sshll.u32 %s1738_s12, 1 }
  0x2d   : > { %1418 = vmatpush3.bf16.msra.mxu0 %v1486_v42  ;;  %v799_v29 = vsel %vm1600_vm3, %v794_v19, %v798_v2  ;;  %v821_v30 = vor.u32 %v820_v21, %v817_v20  ;;  %v832_v35 = vshll.u32 %v1285_v27, 16  ;;  %v838_v37 = vshll.u32 %v1286_v28, 16  ;;  %s226_s9 = scalar_lea.vmem %s1730_s3, %s1232_s6 }
  0x2e   : > { %v1293_v36 = vcombine.low %v785_v23, %v799_v29  ;;  %v808_v18 = vrot.slane %v807_v24, 4  ;;  %v843_v38 = vshrl.u32 %v1287_v31, 16  ;;  %v831_v40 = vrot.slane %v829_v34, 4 }
  0x2f   : > { %v822_v39 = vrot.slane %v821_v30, 4  ;;  %v834_v41 = vrot.slane %v832_v35, 5  ;;  %v846_v42 = vshll.u32 %v1287_v31, 16  ;;  %v852_v45 = vshll.u32 %v1288_v32, 16 }
  0x30   : > { %1435 = vmatprep.mubr.msk.bf16.mxu1 %vm411_vm0, %v1293_v36  ;;  %v813_v43 = vsel %vm1600_vm3, %v808_v18, %v812_v25  ;;  %v845_v44 = vrot.slane %v843_v38, 4  ;;  %v840_v49 = vrot.slane %v838_v37, 5  ;;  %v857_v57 = vshrl.u32 %v1289_v51, 16 }
  0x31   : > { %v827_v47 = vsel %vm1600_vm3, %v822_v39, %v826_v26  ;;  %v835_v48 = vor.u32 %v834_v41, %v831_v40  ;;  %v848_v50 = vrot.slane %v846_v42, 5  ;;  %v854_v54 = vrot.slane %v852_v45, 5 }
  0x32   : > { %1420 = vmatmul.mubr.msk.bf16.vlgmr.msra.gmra.mxu0 %vm411_vm0, %v1489_v22  ;;  %v1294_v53 = vcombine.low %v813_v43, %v827_v47  ;;  %v860_v60 = vshll.u32 %v1289_v51, 16  ;;  %v866_v61 = vshll.u32 %v1290_v52, 16  ;;  %v859_v62 = vrot.slane %v857_v57, 4 }
  0x33   : > { %1423 = vmatprep.mubr.msk.bf16.mxu0 %vm411_vm0, %v1490_v46  ;;  %v836_v58 = vrot.slane %v835_v48, 4  ;;  %v849_v59 = vor.u32 %v848_v50, %v845_v44  ;;  %v871_v63 = vshrl.u32 %v1291_v55, 16  ;;  %v874_v0 = vshll.u32 %v1291_v55, 16 }
  0x34   : > { %1436 = vmatmul.mubr.msk.bf16.vlgmr.msra.gmra.mxu1 %vm411_vm0, %v1294_v53  ;;  %v880_v1 = vshll.u32 %v1292_v56, 16  ;;  %v862_v4 = vrot.slane %v860_v60, 5  ;;  %v868_v10 = vrot.slane %v866_v61, 5 }
  0x35   : > { %v841_v2 = vsel %vm1600_vm3, %v836_v58, %v840_v49  ;;  %v850_v3 = vrot.slane %v849_v59, 4  ;;  %v873_v6 = vrot.slane %v871_v63, 4  ;;  %v876_v7 = vrot.slane %v874_v0, 5 }
  0x36   : > { %v863_v9 = vor.u32 %v862_v4, %v859_v62  ;;  %v882_v13 = vrot.slane %v880_v1, 5 }
  0x37   : > { %v855_v8 = vsel %vm1600_vm3, %v850_v3, %v854_v54  ;;  %v877_v12 = vor.u32 %v876_v7, %v873_v6 }
  0x38   : > { %v1295_v11 = vcombine.low %v841_v2, %v855_v8  ;;  %v864_v14 = vrot.slane %v863_v9, 4 }
  0x39   : > { %v878_v15 = vrot.slane %v877_v12, 4 }
  0x3a   : > { %1424 = vmatmul.mubr.msk.bf16.gmra.mxu0 %vm411_vm0, %v1491_v5  ;;  %1439 = vmatprep.mubr.msk.bf16.mxu1 %vm411_vm0, %v1295_v11  ;;  %v869_v16 = vsel %vm1600_vm3, %v864_v14, %v868_v10 }
  0x3b   : > { %v883_v17 = vsel %vm1600_vm3, %v878_v15, %v882_v13 }
  0x3c   : > { %v1296_v19 = vcombine.low %v869_v16, %v883_v17 }
  0x3e   : > { %1440 = vmatmul.mubr.msk.bf16.gmra.mxu1 %vm411_vm0, %v1296_v19 }
  0xde   : > { %v1405_v20 = vpop.f32.mrf.mxu1 }
  0xe0   : > { %v579_v21 = vpop.f32.mrf.mxu1  ;;  %v1389_v23 = vpop.f32.mrf.mxu0 }
  0xe1   : > { %v588_v37 = vadd.f32 %v1405_v20, %v1389_v23 }
  0xe2   : > { %v1406_v22 = vpop.f32.mrf.mxu1  ;;  %v458_v24 = vpop.f32.mrf.mxu0 }
  0xe3   : > { %v580_v38 = vadd.f32 %v579_v21, %v458_v24 }
  0xe4   : > { %v582_v25 = vpop.f32.mrf.mxu1  ;;  %v1390_v26 = vpop.f32.mrf.mxu0 }
  0xe5   : > { %v591_v39 = vadd.f32 %v1406_v22, %v1390_v26 }
  0xe6   : > { %v461_v27 = vpop.f32.mrf.mxu0  ;;  %v1409_v28 = vpop.f32.mrf.mxu1 }
  0xe7   : > { %v583_v42 = vadd.f32 %v582_v25, %v461_v27 }
  0xe8   : > { %v595_v30 = vpop.f32.mrf.mxu1 }
  0xea   : > { %v1393_v29 = vpop.f32.mrf.mxu0  ;;  %v1410_v32 = vpop.f32.mrf.mxu1 }
  0xeb   : > { %v604_v0 = vadd.f32 %v1409_v28, %v1393_v29 }
  0xec   : > { %v474_v31 = vpop.f32.mrf.mxu0  ;;  %v598_v35 = vpop.f32.mrf.mxu1 }
  0xed   : > { %v596_v58 = vadd.f32 %v595_v30, %v474_v31 }
  0xee   : > { %v1394_v34 = vpop.f32.mrf.mxu0 }
  0xef   : > { %v607_v1 = vadd.f32 %v1410_v32, %v1394_v34 }
  0xf0   : > { %v477_v33 = vpop.f32.mrf.mxu0 }
  0xf1   : > { %v599_v8 = vadd.f32 %v598_v35, %v477_v33 }
  0xf2   : > { %v1421_v36 = vpop.f32.mrf.mxu0 }
  0xf3   : > { %v750_v43 = vadd.f32 %v1421_v36, %v588_v37 }
  0xf4   : > { %v717_v18 = vpop.f32.mrf.mxu0  ;;  %v1437_v40 = vpop.f32.mrf.mxu1 }
  0xf5   : > { %v748_v44 = vadd.f32 %v717_v18, %v580_v38  ;;  %v1007_v51 = vadd.f32 %v1437_v40, %v750_v43 }
  0xf6   : > { %v1422_v41 = vpop.f32.mrf.mxu0  ;;  %v974_v46 = vpop.f32.mrf.mxu1 }
  0xf7   : > { %v751_v45 = vadd.f32 %v1422_v41, %v591_v39  ;;  %v1005_v52 = vadd.f32 %v974_v46, %v748_v44  ;;  %v1069_v3 = vmul.f32 %v1007_v51, %v1007_v51 }
  0xf8   : > { %v720_v47 = vpop.f32.mrf.mxu0  ;;  %v1438_v49 = vpop.f32.mrf.mxu1 }
  0xf9   : > { %v749_v48 = vadd.f32 %v720_v47, %v583_v42  ;;  %v1008_v53 = vadd.f32 %v1438_v49, %v751_v45  ;;  %v1067_v60 = vmul.f32 %v1005_v52, %v1005_v52 }
  0xfa   : > { %v1425_v50 = vpop.f32.mrf.mxu0  ;;  %v977_v54 = vpop.f32.mrf.mxu1 }
  0xfb   : > { %v1332_v56 = vpack.c.bf16 %v1008_v53, %v1007_v51  ;;  %v1006_v57 = vadd.f32 %v977_v54, %v749_v48  ;;  %v754_v9 = vadd.f32 %v1425_v50, %v604_v0  ;;  %v1070_v11 = vmul.f32 %v1008_v53, %v1008_v53 }
  0xfc   : > { %v733_v55 = vpop.f32.mrf.mxu0 }
  0xfd   : > { %1344 = vst [vmem:[%s1708_s5 + $0x8] sm:$0xff] %v1332_v56   ;;  %v1327_v61 = vpack.c.bf16 %v1006_v57, %v1005_v52  ;;  %v1053_v62 = vadd.f32 %v1006_v57, %v1005_v52  ;;  %v1068_v63 = vmul.f32 %v1006_v57, %v1006_v57  ;;  %v752_v2 = vadd.f32 %v733_v55, %v596_v58 }
  0xfe   : > { %v1426_v59 = vpop.f32.mrf.mxu0  ;;  %v1441_v6 = vpop.f32.mrf.mxu1 }
  0xff   : > { %1328 = vst [vmem:[%s1708_s5] sm:$0xff] %v1327_v61   ;;  %v1054_v4 = vadd.f32 %v1053_v62, %v1007_v51  ;;  %v1075_v5 = vadd.f32 %v1068_v63, %v1067_v60  ;;  %v755_v10 = vadd.f32 %v1426_v59, %v607_v1  ;;  %v1011_v20 = vadd.f32 %v1441_v6, %v754_v9 }
 0x100   : > { %v736_v7 = vpop.f32.mrf.mxu0  ;;  %v990_v13 = vpop.f32.mrf.mxu1 }
 0x101   : > { %v1076_v12 = vadd.f32 %v1075_v5, %v1069_v3  ;;  %v1055_v14 = vadd.f32 %v1054_v4, %v1008_v53  ;;  %v1009_v15 = vadd.f32 %v990_v13, %v752_v2  ;;  %v753_v16 = vadd.f32 %v736_v7, %v599_v8 }
 0x102   : > { %v1442_v19 = vpop.f32.mrf.mxu1  ;;  %v1073_v31 = vmul.f32 %v1011_v20, %v1011_v20 }
 0x103   : > { %v1077_v17 = vadd.f32 %v1076_v12, %v1070_v11  ;;  %v1056_v21 = vadd.f32 %v1055_v14, %v1009_v15  ;;  %v1071_v22 = vmul.f32 %v1009_v15, %v1009_v15  ;;  %v1012_v23 = vadd.f32 %v1442_v19, %v755_v10 }
 0x104   : > { %v993_v24 = vpop.f32.mrf.mxu1 }
 0x105   : > { %v1078_v25 = vadd.f32 %v1077_v17, %v1071_v22  ;;  %v1342_v26 = vpack.c.bf16 %v1012_v23, %v1011_v20  ;;  %v1010_v27 = vadd.f32 %v993_v24, %v753_v16  ;;  %v1074_v33 = vmul.f32 %v1012_v23, %v1012_v23 }
 0x107   : > { %1346 = vst [vmem:[%s1708_s5 + $0x18] sm:$0xff] %v1342_v26   ;;  %v1337_v28 = vpack.c.bf16 %v1010_v27, %v1009_v15  ;;  %v1057_v29 = vadd.f32 %v1056_v21, %v1010_v27  ;;  %v1072_v30 = vmul.f32 %v1010_v27, %v1010_v27 }
 0x109   : > { %1345 = vst [vmem:[%s1708_s5 + $0x10] sm:$0xff] %v1337_v28   ;;  %v1058_v32 = vadd.f32 %v1057_v29, %v1011_v20  ;;  %v1079_v34 = vadd.f32 %v1078_v25, %v1072_v30 }
 0x10b   : > { %v1059_v35 = vadd.f32 %v1058_v32, %v1012_v23  ;;  %v1080_v36 = vadd.f32 %v1079_v34, %v1073_v31 }
 0x10d   : > { %v1060_v18 = vrot.slane %v1059_v35, 4  ;;  %v1081_v37 = vadd.f32 %v1080_v36, %v1074_v33 }
 0x10f   : > { %v1061_v38 = vadd.f32 %v1060_v18, %v1059_v35  ;;  %v1082_v39 = vrot.slane %v1081_v37, 4 }
 0x111   : > { %v1062_v40 = vrot.slane %v1061_v38, 2  ;;  %v1083_v41 = vadd.f32 %v1082_v39, %v1081_v37 }
 0x113   : > { %v1063_v42 = vadd.f32 %v1062_v40, %v1061_v38  ;;  %v1084_v43 = vrot.slane %v1083_v41, 2 }
 0x115   : > { %v1064_v44 = vrot.slane %v1063_v42, 1  ;;  %v1085_v45 = vadd.f32 %v1084_v43, %v1083_v41 }
 0x117   : > { %v1065_v46 = vadd.f32 %v1064_v44, %v1063_v42  ;;  %v1086_v47 = vrot.slane %v1085_v45, 1 }
 0x119   : > { %1066 = vst [vmem:[%s226_s9] sm:$0x1] %v1065_v46  ;;  %v1087_v48 = vadd.f32 %v1086_v47, %v1085_v45 }
 0x11b   : > { %1088 = vst [vmem:[%s226_s9 + $0x1] sm:$0x1] %v1087_v48 }
 0x11c PF: > { %s14_s14 = sadd.s32 1, %s1514_s14   ;;  %s1733_s12 = smov %s1510_s13 }
 0x11d   : > { %p11_p5 = scmp.ge.s32.totalorder %s14_s14, 4   ;;  %s1734_s13 = smov %s1736_s15 }
 0x11f   :  { %13 = sbr.rel (!%p11_p5) target bundleno = 2 (0x2), region = 74 }

// kernel: _lambda_.8
= control target key start
LH: loop header
LB: loop body
LE: loop exit
PB: predicated region body
PF: predicated region fallthrough
CT: control target
= control target key end

     0   :  { %s1403_s12 = smov 0   ;;  %s1405_s13 = smov 0   ;;  %s1637_s0 = inlined_call_operand.vmem [shape: bf16[2,5,5,128], index: 0, kind: input, shape index: {}]   ;;  %s1638_s1 = inlined_call_operand.vmem [shape: bf16[512,128], index: 1, kind: input, shape index: {}]   ;;  %s1639_s2 = inlined_call_operand.vmem [shape: bf16[2,16,128], index: 2, kind: output, shape index: {0}]   ;;  %s1640_s3 = inlined_call_operand.vmem [shape: f32[2,2,128], index: 3, kind: output, shape index: {1}]  }
   0x1   :  { %s1407_s14 = smov 0  }
   0x2 LB: > { %s23_s15 = sadd.s32 1, %s1374_s13  ;;  %p1107_p0 = scmp.ge.s32.totalorder %s1378_s14, 1  ;;  %s1378_s14 = sphi %s1407_s14, %s14_s14   ;;  %s1374_s13 = sphi %s1405_s13, %s1648_s13   ;;  %s1370_s12 = sphi %s1403_s12, %s1647_s12  }
   0x3   : > { %p24_p1 = scmp.ge.s32.totalorder %s23_s15, 2  ;;  %p165_p2 = scmp.lt.s32.totalorder %s1378_s14, 3 }
   0x5   : > { %s1650_s15 = smov (%p24_p1, %s23_s15), 0  ;;  %p166_p3 = pnand %p1107_p0, %p165_p2 }
   0x6   : > { %p203_p4 = scmp.lt.s32.totalorder (!%p166_p3), %s1370_s12, 1 }
   0x7   : > { %169 = sbr.rel (%p166_p3) target bundleno = 295 (0x127), region = 28 }
   0xc   : > { %v1316_v0 = vld [vmem:[%s1638_s1 + $0x78] sm:$0xff]   ;;  %v1380_v1 = vmov 0.0   ;;  %v1318_v3 = vld [vmem:[%s1638_s1 + $0x70] sm:$0xff]   ;;  %vm1381_vm0 = vmmov 0   ;;  %s1652_s12 = smov (!%p203_p4, %s1370_s12), 1  ;;  %v1320_v5 = vld [vmem:[%s1638_s1 + $0x68] sm:$0xff]   ;;  %v372_v21 = vlaneseq }
   0xd   : > { %1208 = vmatprep.subr.bf16.mxu0 %v1380_v1  ;;  %1228 = vmatprep.subr.bf16.mxu1 %v1380_v1  ;;  %v1317_v2 = vld [vmem:[%s1638_s1 + $0x38] sm:$0xff]   ;;  %v1319_v4 = vld [vmem:[%s1638_s1 + $0x30] sm:$0xff]   ;;  %v1321_v6 = vld [vmem:[%s1638_s1 + $0x28] sm:$0xff]   ;;  %s1288_s28 = smul.u32 20, %s1652_s12  ;;  %vm288_vm1 = vsmask.f32 1280 }
   0xe   : > { %1209 = vmatpush3.bf16.msra.mxu0 %v1316_v0  ;;  %1224 = vmatprep.mubr.msk.bf16.mxu0 %vm1381_vm0, %v1380_v1  ;;  %v1322_v7 = vld [vmem:[%s1638_s1 + $0x60] sm:$0xff]   ;;  %v1324_v9 = vld [vmem:[%s1638_s1 + $0x58] sm:$0xff]   ;;  %v1326_v11 = vld [vmem:[%s1638_s1 + $0x50] sm:$0xff]   ;;  %vm289_vm2 = vsmask.f32 3336  ;;  %v373_v53 = vshrl.u32 %v372_v21, 7 }
   0xf   : > { %1229 = vmatpush3.bf16.msra.mxu1 %v1317_v2  ;;  %1210 = vmatprep.subr.bf16.mxu0 %v1380_v1  ;;  %v1323_v8 = vld [vmem:[%s1638_s1 + $0x20] sm:$0xff]   ;;  %s1463_s8 = scalar_lea.vmem %s1637_s0, %s1288_s28  ;;  %v1325_v10 = vld [vmem:[%s1638_s1 + $0x18] sm:$0xff]   ;;  %v1327_v13 = vld [vmem:[%s1638_s1 + $0x10] sm:$0xff]   ;;  %vm291_vm3 = vsmask.f32 5392  ;;  %s1164_s16 = sshll.u32 %s1652_s12, 3 }
  0x10   : > { %1230 = vmatprep.subr.bf16.mxu1 %v1380_v1  ;;  %1244 = vmatprep.mubr.msk.bf16.mxu1 %vm1381_vm0, %v1380_v1  ;;  %v1112_v12 = vld.sshfl [vmem:[%s1463_s8] sm:$0x13 pattern:$0x76325410]  ;;  %vm1484_vm4 = vmor %vm288_vm1, %vm289_vm2  ;;  %vm293_vm5 = vsmask.f32 7448  ;;  %s219_s19 = scalar_lea.vmem %s1639_s2, %s1164_s16 }
  0x11   : > { %v1113_v14 = vld.sshfl [vmem:[%s1463_s8 + $0x4] sm:$0x13 pattern:$0x76325410]  ;;  %v263_v15 = vcombine.high %v1112_v12, %v1112_v12  ;;  %v1328_v22 = vld [vmem:[%s1638_s1 + $0x48] sm:$0xff]   ;;  %v296_v24 = vshrl.u32 %v1112_v12, 16  ;;  %vm1498_vm6 = vmor %vm1484_vm4, %vm291_vm3 }
  0x12   : > { %1211 = vmatpush3.bf16.msra.mxu0 %v1318_v3  ;;  %v1114_v16 = vld.sshfl [vmem:[%s1463_s8 + $0x8] sm:$0x13 pattern:$0x76325410]  ;;  %v271_v17 = vcombine.high %v1113_v14, %v1113_v14  ;;  %v299_v25 = vshll.u32 %v1112_v12, 16  ;;  %v310_v28 = vshrl.u32 %v1113_v14, 16  ;;  %vm1507_vm7 = vmor %vm1498_vm6, %vm293_vm5 }
  0x13   : > { %1231 = vmatpush3.bf16.msra.mxu1 %v1319_v4  ;;  %1212 = vmatprep.subr.bf16.mxu0 %v1380_v1  ;;  %v1115_v18 = vld.sshfl [vmem:[%s1463_s8 + $0xc] sm:$0x13 pattern:$0x76325410]  ;;  %v279_v19 = vcombine.high %v1114_v16, %v1114_v16  ;;  %v305_v26 = vshll.u32 %v263_v15, 16  ;;  %v313_v29 = vshll.u32 %v1113_v14, 16 }
  0x14   : > { %1232 = vmatprep.subr.bf16.mxu1 %v1380_v1  ;;  %v287_v23 = vcombine.high %v1115_v18, %v1115_v18  ;;  %v1329_v27 = vld [vmem:[%s1638_s1 + $0x8] sm:$0xff]   ;;  %v319_v30 = vshll.u32 %v271_v17, 16  ;;  %v324_v31 = vshrl.u32 %v1114_v16, 16  ;;  %v298_v33 = vrot.slane %v296_v24, 6  ;;  %v1330_v49 = vld [vmem:[%s1638_s1 + $0x40] sm:$0xff]   ;;  %v1335_v12 = vld [vmem:[%s1638_s1 + $0xf8] sm:$0xff]  }
  0x15   : > { %v301_v34 = vrot.slane %v299_v25, 7  ;;  %v307_v35 = vrot.slane %v305_v26, 7  ;;  %v327_v36 = vshll.u32 %v1114_v16, 16  ;;  %v312_v37 = vrot.slane %v310_v28, 6  ;;  %v1331_v54 = vld [vmem:[%s1638_s1] sm:$0xff]   ;;  %v1334_v15 = vld [vmem:[%s1638_s1 + $0xb8] sm:$0xff]  }
  0x16   : > { %1213 = vmatpush3.bf16.msra.mxu0 %v1320_v5  ;;  %v315_v38 = vrot.slane %v313_v29, 7  ;;  %v321_v39 = vrot.slane %v319_v30, 7  ;;  %v326_v40 = vrot.slane %v324_v31, 6  ;;  %v333_v43 = vshll.u32 %v279_v19, 16  ;;  %v1337_v17 = vld [vmem:[%s1638_s1 + $0xf0] sm:$0xff]   ;;  %v1339_v19 = vld [vmem:[%s1638_s1 + $0xe8] sm:$0xff]  }
  0x17   : > { %1233 = vmatpush3.bf16.msra.mxu1 %v1321_v6  ;;  %1214 = vmatprep.subr.bf16.mxu0 %v1380_v1  ;;  %v302_v41 = vor.u32 %v301_v34, %v298_v33  ;;  %v329_v42 = vrot.slane %v327_v36, 7  ;;  %v338_v44 = vshrl.u32 %v1115_v18, 16  ;;  %v341_v47 = vshll.u32 %v1115_v18, 16  ;;  %v1336_v18 = vld [vmem:[%s1638_s1 + $0xb0] sm:$0xff]   ;;  %v1338_v21 = vld [vmem:[%s1638_s1 + $0xa8] sm:$0xff]   ;;  %v1341_v24 = vld [vmem:[%s1638_s1 + $0xe0] sm:$0xff]  }
  0x18   : > { %1234 = vmatprep.subr.bf16.mxu1 %v1380_v1  ;;  %v316_v46 = vor.u32 %v315_v38, %v312_v37  ;;  %v347_v48 = vshll.u32 %v287_v23, 16  ;;  %v335_v56 = vrot.slane %v333_v43, 7  ;;  %v1382_v58 = vmov 1983009808   ;;  %v1340_v29 = vld [vmem:[%s1638_s1 + $0xa0] sm:$0xff]   ;;  %v1343_v30 = vld [vmem:[%s1638_s1 + $0xd8] sm:$0xff]  }
  0x19   : > { %v303_v50 = vrot.slane %v302_v41, 2  ;;  %v330_v51 = vor.u32 %v329_v42, %v326_v40  ;;  %v340_v52 = vrot.slane %v338_v44, 6  ;;  %v343_v57 = vrot.slane %v341_v47, 7  ;;  %v1342_v34 = vld [vmem:[%s1638_s1 + $0x98] sm:$0xff]   ;;  %v1344_v37 = vld [vmem:[%s1638_s1 + $0x90] sm:$0xff]   ;;  %v1347_v40 = vld [vmem:[%s1638_s1 + $0xc8] sm:$0xff]  }
  0x1a   : > { %1215 = vmatpush3.bf16.msra.mxu0 %v1322_v7  ;;  %v317_v55 = vrot.slane %v316_v46, 2  ;;  %v370_v59 = vunpack.c.l.s4 %v1382_v58  ;;  %v1352_v60 = vld.sshfl [vmem:[%s1463_s8] sm:$0xf pattern:$0x76325410]  ;;  %v349_v0 = vrot.slane %v347_v48, 7 }
  0x1b   : > { %1235 = vmatpush3.bf16.msra.mxu1 %v1323_v8  ;;  %1216 = vmatprep.subr.bf16.mxu0 %v1380_v1  ;;  %v1353_v61 = vld.sshfl [vmem:[%s1463_s8 + $0x8] sm:$0xf pattern:$0x76325410]  ;;  %v308_v62 = vsel %vm1507_vm7, %v303_v50, %v307_v35  ;;  %v331_v63 = vrot.slane %v330_v51, 2  ;;  %v344_v3 = vor.u32 %v343_v57, %v340_v52  ;;  %v1345_v35 = vld [vmem:[%s1638_s1 + $0xd0] sm:$0xff]  }
  0x1c   : > { %1236 = vmatprep.subr.bf16.mxu1 %v1380_v1  ;;  %v1525_v2 = vsel %vm1507_vm7, %v317_v55, %v321_v39  ;;  %v371_v4 = vunpack.c.0.s8 %v370_v59  ;;  %v1151_v20 = vld.sshfl [vmem:[%s1463_s8 + $0x10] sm:$0x13 pattern:$0x76325410]  ;;  %v1346_v43 = vld [vmem:[%s1638_s1 + $0x88] sm:$0xff]   ;;  %v1349_v46 = vld [vmem:[%s1638_s1 + $0xc0] sm:$0xff]  }
  0x1d   : > { %v367_v5 = vcombine.low %v308_v62, %v1525_v2  ;;  %v1530_v6 = vsel %vm1507_vm7, %v331_v63, %v335_v56  ;;  %v345_v7 = vrot.slane %v344_v3, 2  ;;  %v802_v23 = vshrl.u32 %v1151_v20, 16  ;;  %v1354_v41 = vld.sshfl [vmem:[%s1463_s8 + $0x4] sm:$0xf pattern:$0x76325410] }
  0x1e   : > { %1217 = vmatpush3.bf16.msra.mxu0 %v1324_v9  ;;  %v1532_v8 = vsub.s32 %v371_v4, %v373_v53  ;;  %v805_v25 = vshll.u32 %v1151_v20, 16  ;;  %v831_v38 = vcombine.low %v1525_v2, %v1530_v6  ;;  %v1355_v42 = vld.sshfl [vmem:[%s1463_s8 + $0xc] sm:$0xf pattern:$0x76325410]  ;;  %v1348_v47 = vld [vmem:[%s1638_s1 + $0x80] sm:$0xff]  }
  0x1f   : > { %1237 = vmatpush3.bf16.msra.mxu1 %v1325_v10  ;;  %1218 = vmatprep.subr.bf16.mxu0 %v1380_v1  ;;  %v1538_v9 = vsel %vm1507_vm7, %v345_v7, %v349_v0  ;;  %v804_v26 = vrot.slane %v802_v23, 6  ;;  %s1111_s20 = sshll.u32 %s1652_s12, 1 }
  0x20   : > { %1238 = vmatprep.subr.bf16.mxu1 %v1380_v1  ;;  %v368_v10 = vcombine.low %v1530_v6, %v1538_v9  ;;  %v807_v28 = vrot.slane %v805_v25, 7  ;;  %v839_v44 = vrot.slane %v831_v38, %v1532_v8  ;;  %s226_s23 = scalar_lea.vmem %s1640_s3, %s1111_s20 }
  0x22   : > { %1219 = vmatpush3.bf16.msra.mxu0 %v1326_v11  ;;  %v375_v11 = vrot.slane %v367_v5, %v1532_v8  ;;  %v382_v14 = vrot.slane %v368_v10, %v1532_v8  ;;  %v808_v31 = vor.u32 %v807_v28, %v804_v26 }
  0x23   : > { %1239 = vmatpush3.bf16.msra.mxu1 %v1327_v13  ;;  %1220 = vmatprep.subr.bf16.mxu0 %v1380_v1  ;;  %v494_v13 = vcombine.low %v1352_v60, %v1353_v61 }
  0x24   : > { %1240 = vmatprep.subr.bf16.mxu1 %v1380_v1  ;;  %v383_v16 = vcombine.low %v375_v11, %v382_v14  ;;  %v809_v33 = vrot.slane %v808_v31, 2 }
  0x26   : > { %1221 = vmatpush3.bf16.msra.mxu0 %v1328_v22  ;;  %v758_v22 = vcombine.high %v1151_v20, %v1151_v20 }
  0x27   : > { %1241 = vmatpush3.bf16.msra.mxu1 %v1329_v27  ;;  %1222 = vmatprep.subr.bf16.mxu0 %v1380_v1 }
  0x28   : > { %1242 = vmatprep.subr.bf16.mxu1 %v1380_v1  ;;  %v811_v27 = vshll.u32 %v758_v22, 16 }
  0x2a   : > { %1223 = vmatpush3.bf16.msra.mxu0 %v1330_v49  ;;  %v813_v32 = vrot.slane %v811_v27, 7  ;;  %v626_v49 = vcombine.low %v1354_v41, %v1355_v42 }
  0x2b   : > { %1243 = vmatpush3.bf16.msra.mxu1 %v1331_v54  ;;  %1248 = vmatprep.subr.bf16.mxu0 %v1380_v1 }
  0x2c   : > { %1268 = vmatprep.subr.bf16.mxu1 %v1380_v1  ;;  %v814_v36 = vsel %vm1507_vm7, %v809_v33, %v813_v32 }
  0x2d   : > { %1225 = vmatmul.mubr.bf16.vlgmr.msra.gmra.mxu0 %v383_v16  ;;  %v832_v39 = vcombine.low %v1538_v9, %v814_v36 }
  0x2e   : > { %1245 = vmatmul.mubr.bf16.vlgmr.msra.gmra.mxu1 %v494_v13  ;;  %1249 = vmatpush3.bf16.msra.mxu0 %v1334_v15 }
  0x2f   : > { %1269 = vmatpush3.bf16.msra.mxu1 %v1335_v12  ;;  %1284 = vmatprep.mubr.msk.bf16.mxu1 %vm1381_vm0, %v1380_v1  ;;  %v846_v45 = vrot.slane %v832_v39, %v1532_v8 }
  0x30   : > { %1270 = vmatprep.subr.bf16.mxu1 %v1380_v1  ;;  %1264 = vmatprep.mubr.msk.bf16.mxu0 %vm1381_vm0, %v1380_v1 }
  0x31   : > { %1250 = vmatprep.subr.bf16.mxu0 %v1380_v1  ;;  %v847_v48 = vcombine.low %v839_v44, %v846_v45 }
  0x32   : > { %1251 = vmatpush3.bf16.msra.mxu0 %v1336_v18 }
  0x33   : > { %1271 = vmatpush3.bf16.msra.mxu1 %v1337_v17  ;;  %1252 = vmatprep.subr.bf16.mxu0 %v1380_v1 }
  0x34   : > { %1272 = vmatprep.subr.bf16.mxu1 %v1380_v1 }
  0x36   : > { %1253 = vmatpush3.bf16.msra.mxu0 %v1338_v21 }
  0x37   : > { %1273 = vmatpush3.bf16.msra.mxu1 %v1339_v19  ;;  %1254 = vmatprep.subr.bf16.mxu0 %v1380_v1 }
  0x38   : > { %1274 = vmatprep.subr.bf16.mxu1 %v1380_v1 }
  0x3a   : > { %1255 = vmatpush3.bf16.msra.mxu0 %v1340_v29 }
  0x3b   : > { %1275 = vmatpush3.bf16.msra.mxu1 %v1341_v24  ;;  %1256 = vmatprep.subr.bf16.mxu0 %v1380_v1 }
  0x3c   : > { %1276 = vmatprep.subr.bf16.mxu1 %v1380_v1 }
  0x3e   : > { %1257 = vmatpush3.bf16.msra.mxu0 %v1342_v34 }
  0x3f   : > { %1277 = vmatpush3.bf16.msra.mxu1 %v1343_v30  ;;  %1258 = vmatprep.subr.bf16.mxu0 %v1380_v1 }
  0x40   : > { %1278 = vmatprep.subr.bf16.mxu1 %v1380_v1 }
  0x42   : > { %1259 = vmatpush3.bf16.msra.mxu0 %v1344_v37 }
  0x43   : > { %1279 = vmatpush3.bf16.msra.mxu1 %v1345_v35  ;;  %1260 = vmatprep.subr.bf16.mxu0 %v1380_v1 }
  0x44   : > { %1280 = vmatprep.subr.bf16.mxu1 %v1380_v1 }
  0x46   : > { %1261 = vmatpush3.bf16.msra.mxu0 %v1346_v43 }
  0x47   : > { %1281 = vmatpush3.bf16.msra.mxu1 %v1347_v40  ;;  %1262 = vmatprep.subr.bf16.mxu0 %v1380_v1 }
  0x48   : > { %1282 = vmatprep.subr.bf16.mxu1 %v1380_v1 }
  0x4a   : > { %1263 = vmatpush3.bf16.msra.mxu0 %v1348_v47 }
  0x4b   : > { %1283 = vmatpush3.bf16.msra.mxu1 %v1349_v46 }
  0x4d   : > { %1265 = vmatmul.mubr.bf16.vlgmr.msra.gmra.mxu0 %v626_v49 }
  0x4e   : > { %1285 = vmatmul.mubr.bf16.vlgmr.msra.gmra.mxu1 %v847_v48 }
  0xed   : > { %v467_v52 = vpop.f32.mrf.mxu0 }
  0xee   : > { %v578_v50 = vpop.f32.mrf.mxu1 }
  0xef   : > { %v1226_v54 = vpop.f32.mrf.mxu0  ;;  %v579_v59 = vadd.f32 %v578_v50, %v467_v52 }
  0xf0   : > { %v1246_v51 = vpop.f32.mrf.mxu1 }
  0xf1   : > { %v470_v56 = vpop.f32.mrf.mxu0 }
  0xf2   : > { %v581_v53 = vpop.f32.mrf.mxu1 }
  0xf3   : > { %v1227_v57 = vpop.f32.mrf.mxu0  ;;  %v582_v0 = vadd.f32 %v581_v53, %v470_v56 }
  0xf4   : > { %v1247_v55 = vpop.f32.mrf.mxu1 }
 0x10d   : > { %v710_v61 = vpop.f32.mrf.mxu0 }
 0x10e   : > { %v931_v58 = vpop.f32.mrf.mxu1  ;;  %v717_v62 = vadd.f32 %v710_v61, %v579_v59 }
 0x10f   : > { %v1266_v63 = vpop.f32.mrf.mxu0 }
 0x110   : > { %v1286_v60 = vpop.f32.mrf.mxu1  ;;  %v938_v4 = vadd.f32 %v931_v58, %v717_v62 }
 0x111   : > { %v713_v3 = vpop.f32.mrf.mxu0 }
 0x112   : > { %v934_v1 = vpop.f32.mrf.mxu1  ;;  %v718_v5 = vadd.f32 %v713_v3, %v582_v0  ;;  %v958_v8 = vmul.f32 %v938_v4, %v938_v4 }
 0x113   : > { %v1267_v6 = vpop.f32.mrf.mxu0 }
 0x114   : > { %v1287_v2 = vpop.f32.mrf.mxu1  ;;  %v939_v7 = vadd.f32 %v934_v1, %v718_v5 }
 0x116   : > { %v1170_v9 = vpack.c.bf16 %v939_v7, %v938_v4  ;;  %v950_v10 = vadd.f32 %v939_v7, %v938_v4  ;;  %v959_v11 = vmul.f32 %v939_v7, %v939_v7 }
 0x118   : > { %1171 = vst [vmem:[%s219_s19] sm:$0xff] %v1170_v9   ;;  %v951_v12 = vrot.slane %v950_v10, 4  ;;  %v960_v13 = vadd.f32 %v959_v11, %v958_v8 }
 0x11a   : > { %v952_v14 = vadd.f32 %v951_v12, %v950_v10  ;;  %v961_v15 = vrot.slane %v960_v13, 4 }
 0x11c   : > { %v953_v16 = vrot.slane %v952_v14, 2  ;;  %v962_v17 = vadd.f32 %v961_v15, %v960_v13 }
 0x11e   : > { %v954_v18 = vadd.f32 %v953_v16, %v952_v14  ;;  %v963_v19 = vrot.slane %v962_v17, 2 }
 0x120   : > { %v955_v20 = vrot.slane %v954_v18, 1  ;;  %v964_v21 = vadd.f32 %v963_v19, %v962_v17 }
 0x122   : > { %v956_v22 = vadd.f32 %v955_v20, %v954_v18  ;;  %v965_v23 = vrot.slane %v964_v21, 1 }
 0x124   : > { %957 = vst [vmem:[%s226_s23] sm:$0x1] %v956_v22  ;;  %v966_v24 = vadd.f32 %v965_v23, %v964_v21 }
 0x126   : > { %967 = vst [vmem:[%s226_s23 + $0x1] sm:$0x1] %v966_v24 }
 0x127 PF: > { %s14_s14 = sadd.s32 1, %s1378_s14   ;;  %s1647_s12 = smov %s1374_s13 }
 0x128   : > { %p11_p5 = scmp.ge.s32.totalorder %s14_s14, 4   ;;  %s1648_s13 = smov %s1650_s15 }
 0x12a   :  { %13 = sbr.rel (!%p11_p5) target bundleno = 2 (0x2), region = 74 }

// kernel: _lambda_.9
= control target key start
LH: loop header
LB: loop body
LE: loop exit
PB: predicated region body
PF: predicated region fallthrough
CT: control target
= control target key end

     0   :  { %v988_v22 = vmov 1966171168   ;;  %v156_v24 = vlaneseq  ;;  %s1223_s1 = inlined_call_operand.vmem [shape: bf16[1024,128], index: 1, kind: input, shape index: {}]   ;;  %s1224_s0 = inlined_call_operand.vmem [shape: bf16[2,1024], index: 0, kind: input, shape index: {}]   ;;  %s1225_s2 = inlined_call_operand.vmem [shape: f32[1,128], index: 2, kind: input, shape index: {}]   ;;  %s1226_s3 = inlined_call_operand.vmem [shape: f32[2,128], index: 3, kind: output, shape index: {}]  }
   0x1   :  { %v919_v0 = vld [vmem:[%s1223_s1 + $0x78] sm:$0xff]   ;;  %v923_v4 = vld [vmem:[%s1223_s1 + $0x70] sm:$0xff]   ;;  %v927_v8 = vld [vmem:[%s1223_s1 + $0x68] sm:$0xff]   ;;  %v154_v23 = vunpack.c.l.s4 %v988_v22 }
   0x2   :  { %v920_v1 = vld [vmem:[%s1223_s1 + $0xf8] sm:$0xff]   ;;  %830 = vmatprep.subr.bf16.mxu0 %v919_v0  ;;  %v924_v5 = vld [vmem:[%s1223_s1 + $0xf0] sm:$0xff]   ;;  %v928_v9 = vld [vmem:[%s1223_s1 + $0xe8] sm:$0xff]   ;;  %v157_v30 = vshrl.u32 %v156_v24, 7 }
   0x3   :  { %v921_v2 = vld [vmem:[%s1223_s1 + $0x38] sm:$0xff]   ;;  %852 = vmatprep.subr.bf16.mxu1 %v920_v1  ;;  %v925_v6 = vld [vmem:[%s1223_s1 + $0x30] sm:$0xff]   ;;  %v929_v10 = vld [vmem:[%s1223_s1 + $0x28] sm:$0xff]   ;;  %v155_v29 = vunpack.c.0.s8 %v154_v23 }
   0x4   :  { %v922_v3 = vld [vmem:[%s1223_s1 + $0xb8] sm:$0xff]   ;;  %831 = vmatpush3.bf16.msra.mxu0 %v921_v2  ;;  %v926_v7 = vld [vmem:[%s1223_s1 + $0xb0] sm:$0xff]   ;;  %v930_v11 = vld [vmem:[%s1223_s1 + $0xa8] sm:$0xff]  }
   0x5   :  { %853 = vmatpush3.bf16.msra.mxu1 %v922_v3  ;;  %832 = vmatprep.subr.bf16.mxu0 %v923_v4  ;;  %v931_v12 = vld [vmem:[%s1223_s1 + $0x60] sm:$0xff]   ;;  %v935_v16 = vld [vmem:[%s1223_s1 + $0x58] sm:$0xff]   ;;  %v939_v20 = vld [vmem:[%s1223_s1 + $0x50] sm:$0xff]   ;;  %v1099_v35 = vsub.s32 %v155_v29, %v157_v30 }
   0x6   :  { %854 = vmatprep.subr.bf16.mxu1 %v924_v5  ;;  %v932_v13 = vld [vmem:[%s1223_s1 + $0xe0] sm:$0xff]   ;;  %v936_v17 = vld [vmem:[%s1223_s1 + $0xd8] sm:$0xff]   ;;  %v940_v21 = vld [vmem:[%s1223_s1 + $0xd0] sm:$0xff]  }
   0x7   :  { %v933_v14 = vld [vmem:[%s1223_s1 + $0x20] sm:$0xff]   ;;  %v937_v18 = vld [vmem:[%s1223_s1 + $0x18] sm:$0xff]   ;;  %v941_v25 = vld [vmem:[%s1223_s1 + $0x10] sm:$0xff]  }
   0x8   :  { %833 = vmatpush3.bf16.msra.mxu0 %v925_v6  ;;  %v934_v15 = vld [vmem:[%s1223_s1 + $0xa0] sm:$0xff]   ;;  %v938_v19 = vld [vmem:[%s1223_s1 + $0x98] sm:$0xff]   ;;  %v942_v26 = vld [vmem:[%s1223_s1 + $0x90] sm:$0xff]  }
   0x9   :  { %855 = vmatpush3.bf16.msra.mxu1 %v926_v7  ;;  %834 = vmatprep.subr.bf16.mxu0 %v927_v8  ;;  %v943_v27 = vld [vmem:[%s1223_s1 + $0x48] sm:$0xff]   ;;  %v947_v33 = vld [vmem:[%s1223_s1 + $0x40] sm:$0xff]   ;;  %v952_v41 = vld [vmem:[%s1223_s1 + $0x178] sm:$0xff]  }
   0xa   :  { %856 = vmatprep.subr.bf16.mxu1 %v928_v9  ;;  %v944_v28 = vld [vmem:[%s1223_s1 + $0xc8] sm:$0xff]   ;;  %v948_v34 = vld [vmem:[%s1223_s1 + $0xc0] sm:$0xff]   ;;  %v953_v42 = vld [vmem:[%s1223_s1 + $0x1f8] sm:$0xff]  }
   0xb   :  { %v945_v31 = vld [vmem:[%s1223_s1 + $0x8] sm:$0xff]   ;;  %v949_v36 = vld [vmem:[%s1223_s1] sm:$0xff]   ;;  %v954_v47 = vld [vmem:[%s1223_s1 + $0x138] sm:$0xff]  }
   0xc   :  { %835 = vmatpush3.bf16.msra.mxu0 %v929_v10  ;;  %v946_v32 = vld [vmem:[%s1223_s1 + $0x88] sm:$0xff]   ;;  %v950_v37 = vld [vmem:[%s1223_s1 + $0x80] sm:$0xff]   ;;  %v956_v50 = vld [vmem:[%s1223_s1 + $0x170] sm:$0xff]  }
   0xd   :  { %857 = vmatpush3.bf16.msra.mxu1 %v930_v11  ;;  %836 = vmatprep.subr.bf16.mxu0 %v931_v12  ;;  %v15_v38 = vld [vmem:[%s1224_s0] sm:$0xff]  ;;  %v955_v52 = vld [vmem:[%s1223_s1 + $0x1b8] sm:$0xff]   ;;  %v957_v54 = vld [vmem:[%s1223_s1 + $0x1f0] sm:$0xff]  }
   0xe   :  { %858 = vmatprep.subr.bf16.mxu1 %v932_v13  ;;  %v152_v39 = vcombine.high %v15_v38, %v15_v38  ;;  %v159_v40 = vrot.slane %v15_v38, %v1099_v35  ;;  %v958_v55 = vld [vmem:[%s1223_s1 + $0x130] sm:$0xff]   ;;  %v960_v57 = vld [vmem:[%s1223_s1 + $0x168] sm:$0xff]   ;;  %v964_v61 = vld [vmem:[%s1223_s1 + $0x160] sm:$0xff]  }
   0xf   :  { %v959_v58 = vld [vmem:[%s1223_s1 + $0x1b0] sm:$0xff]   ;;  %v961_v59 = vld [vmem:[%s1223_s1 + $0x1e8] sm:$0xff]   ;;  %v965_v63 = vld [vmem:[%s1223_s1 + $0x1e0] sm:$0xff]  }
  0x10   :  { %837 = vmatpush3.bf16.msra.mxu0 %v933_v14  ;;  %v167_v43 = vcombine.high %v159_v40, %v159_v40  ;;  %v175_v44 = vrot.slane %v159_v40, %v1099_v35  ;;  %v1119_v45 = vrot.slane %v152_v39, %v1099_v35  ;;  %v962_v60 = vld [vmem:[%s1223_s1 + $0x128] sm:$0xff]   ;;  %v966_v0 = vld [vmem:[%s1223_s1 + $0x120] sm:$0xff]   ;;  %v968_v1 = vld [vmem:[%s1223_s1 + $0x158] sm:$0xff]  }
  0x11   :  { %859 = vmatpush3.bf16.msra.mxu1 %v934_v15  ;;  %838 = vmatprep.subr.bf16.mxu0 %v935_v16  ;;  %v963_v62 = vld [vmem:[%s1223_s1 + $0x1a8] sm:$0xff]   ;;  %v967_v2 = vld [vmem:[%s1223_s1 + $0x1a0] sm:$0xff]   ;;  %v969_v3 = vld [vmem:[%s1223_s1 + $0x1d8] sm:$0xff]  }
  0x12   :  { %860 = vmatprep.subr.bf16.mxu1 %v936_v17  ;;  %v189_v46 = vrot.slane %v167_v43, %v1099_v35  ;;  %v168_v48 = vcombine.high %v1119_v45, %v1119_v45  ;;  %v197_v49 = vcombine.high %v175_v44, %v175_v44  ;;  %v970_v4 = vld [vmem:[%s1223_s1 + $0x118] sm:$0xff]   ;;  %v972_v5 = vld [vmem:[%s1223_s1 + $0x150] sm:$0xff]   ;;  %v976_v9 = vld [vmem:[%s1223_s1 + $0x148] sm:$0xff]   ;;  %v182_v17 = vrot.slane %v1119_v45, %v1099_v35 }
  0x13   :  { %v971_v6 = vld [vmem:[%s1223_s1 + $0x198] sm:$0xff]   ;;  %v973_v7 = vld [vmem:[%s1223_s1 + $0x1d0] sm:$0xff]   ;;  %v977_v11 = vld [vmem:[%s1223_s1 + $0x1c8] sm:$0xff]  }
  0x14   :  { %839 = vmatpush3.bf16.msra.mxu0 %v937_v18  ;;  %625 = vmatprep.mubr.bf16.mxu0 %v189_v46  ;;  %v199_v51 = vcombine.high %v189_v46, %v189_v46  ;;  %v196_v53 = vrot.slane %v168_v48, %v1099_v35  ;;  %v974_v8 = vld [vmem:[%s1223_s1 + $0x110] sm:$0xff]   ;;  %v978_v12 = vld [vmem:[%s1223_s1 + $0x108] sm:$0xff]   ;;  %v980_v13 = vld [vmem:[%s1223_s1 + $0x140] sm:$0xff]  }
  0x15   :  { %861 = vmatpush3.bf16.msra.mxu1 %v938_v19  ;;  %840 = vmatprep.subr.bf16.mxu0 %v939_v20  ;;  %v975_v10 = vld [vmem:[%s1223_s1 + $0x190] sm:$0xff]   ;;  %v979_v14 = vld [vmem:[%s1223_s1 + $0x188] sm:$0xff]   ;;  %v981_v15 = vld [vmem:[%s1223_s1 + $0x1c0] sm:$0xff]   ;;  %v198_v19 = vcombine.high %v182_v17, %v182_v17 }
  0x16   :  { %862 = vmatprep.subr.bf16.mxu1 %v940_v21  ;;  %665 = vmatprep.mubr.bf16.mxu1 %v199_v51  ;;  %v200_v56 = vcombine.high %v196_v53, %v196_v53  ;;  %v982_v16 = vld [vmem:[%s1223_s1 + $0x100] sm:$0xff]  }
  0x17   :  { %v983_v18 = vld [vmem:[%s1223_s1 + $0x180] sm:$0xff]  }
  0x18   :  { %841 = vmatpush3.bf16.msra.mxu0 %v941_v25  ;;  %v764_v29 = vld [vmem:[%s1225_s2] ss:$0 sm:$0xff] }
  0x19   :  { %863 = vmatpush3.bf16.msra.mxu1 %v942_v26  ;;  %842 = vmatprep.subr.bf16.mxu0 %v943_v27 }
  0x1a   :  { %864 = vmatprep.subr.bf16.mxu1 %v944_v28 }
  0x1c   :  { %843 = vmatpush3.bf16.msra.mxu0 %v945_v31 }
  0x1d   :  { %865 = vmatpush3.bf16.msra.mxu1 %v946_v32  ;;  %844 = vmatprep.subr.bf16.mxu0 %v947_v33 }
  0x1e   :  { %866 = vmatprep.subr.bf16.mxu1 %v948_v34 }
  0x20   :  { %845 = vmatpush3.bf16.msra.mxu0 %v949_v36 }
  0x21   :  { %867 = vmatpush3.bf16.msra.mxu1 %v950_v37  ;;  %874 = vmatprep.subr.bf16.mxu0 %v952_v41 }
  0x22   :  { %896 = vmatprep.subr.bf16.mxu1 %v953_v42 }
  0x23   :  { %626 = vmatmul.mubr.bf16.vlgmr.msra.gmra.mxu0 %v175_v44 }
  0x24   :  { %875 = vmatpush3.bf16.msra.mxu0 %v954_v47  ;;  %666 = vmatmul.mubr.bf16.vlgmr.msra.gmra.mxu1 %v197_v49 }
  0x25   :  { %876 = vmatprep.subr.bf16.mxu0 %v956_v50  ;;  %897 = vmatpush3.bf16.msra.mxu1 %v955_v52 }
  0x26   :  { %705 = vmatprep.mubr.bf16.mxu0 %v196_v53  ;;  %898 = vmatprep.subr.bf16.mxu1 %v957_v54 }
  0x27   :  { %745 = vmatprep.mubr.bf16.mxu1 %v200_v56 }
  0x28   :  { %877 = vmatpush3.bf16.msra.mxu0 %v958_v55 }
  0x29   :  { %878 = vmatprep.subr.bf16.mxu0 %v960_v57  ;;  %899 = vmatpush3.bf16.msra.mxu1 %v959_v58 }
  0x2a   :  { %900 = vmatprep.subr.bf16.mxu1 %v961_v59 }
  0x2c   :  { %879 = vmatpush3.bf16.msra.mxu0 %v962_v60 }
  0x2d   :  { %880 = vmatprep.subr.bf16.mxu0 %v964_v61  ;;  %901 = vmatpush3.bf16.msra.mxu1 %v963_v62 }
  0x2e   :  { %902 = vmatprep.subr.bf16.mxu1 %v965_v63 }
  0x30   :  { %881 = vmatpush3.bf16.msra.mxu0 %v966_v0 }
  0x31   :  { %882 = vmatprep.subr.bf16.mxu0 %v968_v1  ;;  %903 = vmatpush3.bf16.msra.mxu1 %v967_v2 }
  0x32   :  { %904 = vmatprep.subr.bf16.mxu1 %v969_v3 }
  0x34   :  { %883 = vmatpush3.bf16.msra.mxu0 %v970_v4 }
  0x35   :  { %884 = vmatprep.subr.bf16.mxu0 %v972_v5  ;;  %905 = vmatpush3.bf16.msra.mxu1 %v971_v6 }
  0x36   :  { %906 = vmatprep.subr.bf16.mxu1 %v973_v7 }
  0x38   :  { %885 = vmatpush3.bf16.msra.mxu0 %v974_v8 }
  0x39   :  { %886 = vmatprep.subr.bf16.mxu0 %v976_v9  ;;  %907 = vmatpush3.bf16.msra.mxu1 %v975_v10 }
  0x3a   :  { %908 = vmatprep.subr.bf16.mxu1 %v977_v11 }
  0x3c   :  { %887 = vmatpush3.bf16.msra.mxu0 %v978_v12 }
  0x3d   :  { %888 = vmatprep.subr.bf16.mxu0 %v980_v13  ;;  %909 = vmatpush3.bf16.msra.mxu1 %v979_v14 }
  0x3e   :  { %910 = vmatprep.subr.bf16.mxu1 %v981_v15 }
  0x40   :  { %889 = vmatpush3.bf16.msra.mxu0 %v982_v16 }
  0x41   :  { %911 = vmatpush3.bf16.msra.mxu1 %v983_v18 }
  0x43   :  { %706 = vmatmul.mubr.bf16.vlgmr.msra.gmra.mxu0 %v182_v17 }
  0x44   :  { %746 = vmatmul.mubr.bf16.vlgmr.msra.gmra.mxu1 %v198_v19 }
  0xe3   :  { %v846_v20 = vpop.f32.mrf.mxu0 }
  0xe4   :  { %v868_v21 = vpop.f32.mrf.mxu1 }
  0xe5   :  { %v847_v22 = vpop.f32.mrf.mxu0 }
  0xe6   :  { %v869_v23 = vpop.f32.mrf.mxu1  ;;  %v848_v28 = vadd.f32 %v847_v22, %v846_v20 }
  0xe7   :  { %v849_v24 = vpop.f32.mrf.mxu0  ;;  %v870_v31 = vadd.f32 %v869_v23, %v868_v21 }
  0xe8   :  { %v871_v25 = vpop.f32.mrf.mxu1  ;;  %v628_v30 = vadd.f32 %v848_v28, %v764_v29 }
  0xe9   :  { %v850_v26 = vpop.f32.mrf.mxu0 }
  0xea   :  { %v872_v27 = vpop.f32.mrf.mxu1  ;;  %v668_v35 = vadd.f32 %v870_v31, %v628_v30 }
 0x103   :  { %v890_v32 = vpop.f32.mrf.mxu0 }
 0x104   :  { %v912_v33 = vpop.f32.mrf.mxu1 }
 0x105   :  { %v891_v34 = vpop.f32.mrf.mxu0 }
 0x106   :  { %v892_v36 = vadd.f32 %v891_v34, %v890_v32  ;;  %v913_v37 = vpop.f32.mrf.mxu1 }
 0x107   :  { %v893_v38 = vpop.f32.mrf.mxu0  ;;  %v914_v40 = vadd.f32 %v913_v37, %v912_v33 }
 0x108   :  { %v708_v39 = vadd.f32 %v892_v36, %v668_v35  ;;  %v915_v41 = vpop.f32.mrf.mxu1 }
 0x109   :  { %v894_v42 = vpop.f32.mrf.mxu0 }
 0x10a   :  { %v748_v43 = vadd.f32 %v914_v40, %v708_v39  ;;  %v916_v44 = vpop.f32.mrf.mxu1 }
 0x10c   :  { %v829_v45 = vmul.f32 -1.442695, %v748_v43 }
 0x10e   :  { %984 = vpow2.f32 %v829_v45 }
 0x11b   :  { %v985_v46 = vpop.eup %984 }
 0x11c   :  { %v756_v47 = vadd.f32 1.0, %v985_v46 }
 0x11e   :  { %986 = vrcp.f32 %v756_v47 }
 0x12b   :  { %v987_v48 = vpop.eup %986 }
 0x12c   :  { %759 = vst [vmem:[%s1226_s3] sm:$0x3] %v987_v48 }

</bundles_post_ra>
